<compile_context>
chip_gen: v7x
topology: tpu7x:2x2x1
jax: 0.10.0
libtpu: 0.0.40
codegen_flags: <defaults>
</compile_context>

<pallas_src>
import math

import jax
import jax.numpy as jnp
from jax.experimental import pallas as pl
from jax.experimental.pallas import tpu as pltpu

# ---------------- static problem sizes (dictated by the module) ----------------
B = 2                 # batch
C_IN = 512            # conv in channels
C_OUT = 1024          # conv out channels
KH = KW = 3           # conv kernel
H_IN, W_IN = 3, 5     # input spatial -> conv output is (1, 3)
W_OUT = 3             # conv output width (height collapses to 1)
K = C_IN * KH * KW    # im2col contraction dim = 4608
TK = 1536             # K tile (4608 / 1536 = 3 grid steps)
M_PAD = 8             # B*W_OUT = 6 rows, zero-padded to a full sublane group

NB_PREV = 2
ADD_DIM = (NB_PREV + 1) * 4 + NB_PREV * 9   # 30
ADD_HID = 128
EMB_SUP = C_OUT * 1 * W_OUT                 # 3072
EMB_IN = EMB_SUP + ADD_HID                  # 3200
EMB_OUT = 512


# ---------------- fused kernel: conv(matmul) + InstanceNorm + LeakyReLU + head ----------------
def embedder_kernel(p_ref, cw_ref, cb_ref,
                    xa_ref, wa_ref, ba_ref,
                    w1s_ref, w1a_ref, b1_ref, noise_ref,
                    o_ref, acc_ref):
    k = pl.program_id(0)

    @pl.when(k == 0)
    def _init():
        acc_ref[...] = jnp.zeros_like(acc_ref)

    # One MXU push per K step: (M_PAD, TK) bf16 @ (TK, C_OUT) bf16 -> f32 accumulate.
    acc_ref[...] += jnp.dot(p_ref[...], cw_ref[...],
                            preferred_element_type=jnp.float32)

    @pl.when(k == pl.num_programs(0) - 1)
    def _finalize():
        # ---- conv epilogue: bias + InstanceNorm2d + leaky_relu(0.2) ----
        y = acc_ref[...] + cb_ref[...]                     # (M_PAD, C_OUT)
        y3 = y[:B * W_OUT].reshape(B, W_OUT, C_OUT)        # drop padded rows
        # InstanceNorm2d: per (b, c) over the 1x3 spatial extent, biased variance.
        mean = jnp.mean(y3, axis=1, keepdims=True)
        var = jnp.mean(jnp.square(y3 - mean), axis=1, keepdims=True)
        yn = (y3 - mean) * jax.lax.rsqrt(var + 1e-5)
        a = jnp.where(yn >= 0, yn, 0.2 * yn).astype(jnp.bfloat16)   # (B, W_OUT, C_OUT)

        # ---- fc_add(30 -> 128) + leaky_relu(0.2) ----
        h = jnp.dot(xa_ref[...], wa_ref[...],
                    preferred_element_type=jnp.float32) + ba_ref[...]
        h = jnp.where(h >= 0, h, 0.2 * h).astype(jnp.bfloat16)

        # ---- fc1 on cat([x_sup, h], 1): split matmul, channel-major flatten folded
        #      into the (W_OUT, C_OUT, EMB_OUT) weight layout at init time. ----
        acc2 = jnp.dot(h, w1a_ref[...], preferred_element_type=jnp.float32)
        for w in range(W_OUT):
            acc2 = acc2 + jnp.dot(a[:, w, :], w1s_ref[w],
                                  preferred_element_type=jnp.float32)
        out = jnp.maximum(acc2 + b1_ref[...], 0.0)          # relu
        o_ref[...] = out + noise_ref[...]                   # add_white_noise(std=0.005)


def embedder_fused(patches, conv_w, conv_b, x_add, wa, ba, w1_sup, w1_add, b1, noise):
    n_k = K // TK
    return pl.pallas_call(
        embedder_kernel,
        out_shape=jax.ShapeDtypeStruct((B, EMB_OUT), jnp.float32),
        grid=(n_k,),
        in_specs=[
            pl.BlockSpec((M_PAD, TK), lambda k: (0, k)),            # im2col patches (bf16)
            pl.BlockSpec((TK, C_OUT), lambda k: (k, 0)),            # conv weight tile (bf16)
            pl.BlockSpec((1, C_OUT), lambda k: (0, 0)),             # conv bias (f32)
            pl.BlockSpec((B, ADD_DIM), lambda k: (0, 0)),           # x_add (bf16)
            pl.BlockSpec((ADD_DIM, ADD_HID), lambda k: (0, 0)),     # fc_add weight (bf16)
            pl.BlockSpec((1, ADD_HID), lambda k: (0, 0)),           # fc_add bias (f32)
            pl.BlockSpec((W_OUT, C_OUT, EMB_OUT), lambda k: (0, 0, 0)),  # fc1 sup weight (bf16)
            pl.BlockSpec((ADD_HID, EMB_OUT), lambda k: (0, 0)),     # fc1 add weight (bf16)
            pl.BlockSpec((1, EMB_OUT), lambda k: (0, 0)),           # fc1 bias (f32)
            pl.BlockSpec((B, EMB_OUT), lambda k: (0, 0)),           # precomputed noise (f32)
        ],
        out_specs=pl.BlockSpec((B, EMB_OUT), lambda k: (0, 0)),
        scratch_shapes=[pltpu.VMEM((M_PAD, C_OUT), jnp.float32)],
        compiler_params=pltpu.CompilerParams(dimension_semantics=("arbitrary",)),
    )(patches, conv_w, conv_b, x_add, wa, ba, w1_sup, w1_add, b1, noise)


# ---------------- parameter init (deterministic, matches init_weights() recipe) ----------------
def init_params(seed=42):
    k1, k2, k3, k4, k5, k6 = jax.random.split(jax.random.PRNGKey(seed), 6)
    # Conv: N(0, sqrt(2 / (kh*kw*out_ch)))
    conv_w = jax.random.normal(k1, (C_OUT, C_IN, KH, KW), jnp.float32) * math.sqrt(
        2.0 / (KH * KW * C_OUT))
    conv_b = (jax.random.uniform(k2, (1, C_OUT), jnp.float32, -1.0, 1.0)
              / math.sqrt(C_IN * KH * KW))
    # Linears: N(0, 0.02) weights, PyTorch-default-style uniform biases.
    wa = jax.random.normal(k3, (ADD_DIM, ADD_HID), jnp.float32) * 0.02
    ba = jax.random.uniform(k4, (1, ADD_HID), jnp.float32, -1.0, 1.0) / math.sqrt(ADD_DIM)
    w1 = jax.random.normal(k5, (EMB_IN, EMB_OUT), jnp.float32) * 0.02
    b1 = jax.random.uniform(k6, (1, EMB_OUT), jnp.float32, -1.0, 1.0) / math.sqrt(EMB_IN)

    # Fold the channel-major `.view(-1, 1024*3)` flatten into the fc1 weight layout:
    # w1[c*W_OUT + w, :]  ->  w1_sup[w, c, :]
    w1_sup = w1[:EMB_SUP].reshape(C_OUT, W_OUT, EMB_OUT).transpose(1, 0, 2)

    return {
        # im2col conv weight: (C_OUT, C_IN*KH*KW)^T -> (K, C_OUT), stored bf16.
        "conv_w_mat": conv_w.reshape(C_OUT, K).T.astype(jnp.bfloat16),
        "conv_b": conv_b,
        "wa": wa.astype(jnp.bfloat16), "ba": ba,
        "w1_sup": w1_sup.astype(jnp.bfloat16),
        "w1_add": w1[EMB_SUP:].astype(jnp.bfloat16),
        "b1": b1,
    }


# ---------------- forward (im2col + noise in plain JAX, everything else in one kernel) ----------------
def embedder_forward(params, embeddings_supervised, speeds, is_reverse,
                     steering_wheel, steering_wheel_raw, multiactions_vecs,
                     noise_key):
    x = embeddings_supervised.astype(jnp.float32)            # (B, 512, 3, 5) NCHW
    # im2col: patches[b*W_OUT + w, :] = x[b, :, :, w:w+3] flattened in (c, kh, kw) order.
    patches = jnp.stack([x[:, :, :, w:w + KW] for w in range(W_OUT)], axis=1)
    patches = patches.reshape(B * W_OUT, K).astype(jnp.bfloat16)
    patches = jnp.pad(patches, ((0, M_PAD - B * W_OUT), (0, 0)))  # pad M to 8 sublanes

    x_add = jnp.concatenate(
        [speeds, is_reverse, steering_wheel, steering_wheel_raw, multiactions_vecs],
        axis=1).astype(jnp.bfloat16)                          # (B, 30)

    # final add_white_noise(std=0.005, training=True): deterministic JAX gaussian.
    # TODO(synk): PyTorch RNG stream is not reproducible; noise is a JAX-generated stand-in.
    noise = 0.005 * jax.random.normal(noise_key, (B, EMB_OUT), jnp.float32)

    return embedder_fused(patches, params["conv_w_mat"], params["conv_b"],
                          x_add, params["wa"], params["ba"],
                          params["w1_sup"], params["w1_add"], params["b1"], noise)


if __name__ == "__main__":
    params = init_params(seed=42)

    key = jax.random.PRNGKey(0)
    k_emb, k_sp, k_rev, k_sw, k_swr, k_ma, k_noise = jax.random.split(key, 7)
    embeddings_supervised = jax.random.normal(k_emb, (B, C_IN, H_IN, W_IN), jnp.float32)
    speeds = jax.random.normal(k_sp, (B, NB_PREV + 1), jnp.float32)
    is_reverse = jax.random.bernoulli(k_rev, 0.5, (B, NB_PREV + 1)).astype(jnp.float32)
    steering_wheel = jax.random.normal(k_sw, (B, NB_PREV + 1), jnp.float32)
    steering_wheel_raw = jax.random.normal(k_swr, (B, NB_PREV + 1), jnp.float32)
    multiactions_vecs = jax.random.bernoulli(k_ma, 0.5, (B, NB_PREV * 9)).astype(jnp.float32)

    out = embedder_forward(params, embeddings_supervised, speeds, is_reverse,
                           steering_wheel, steering_wheel_raw, multiactions_vecs,
                           k_noise)
    out = jax.block_until_ready(out)
    assert out.shape == (B, EMB_OUT) and out.dtype == jnp.float32
    assert bool(jnp.all(jnp.isfinite(out)))
    print("KERNEL_OK")
</pallas_src>

<mosaic_0001>
module attributes {stable_mosaic.version = 11 : i64} {
  func.func @embedder_kernel(%arg0: i32, %arg1: memref<8x1536xbf16, #tpu.memory_space<vmem>>, %arg2: memref<1536x1024xbf16, #tpu.memory_space<vmem>>, %arg3: memref<1x1024xf32, #tpu.memory_space<vmem>>, %arg4: memref<2x30xbf16, #tpu.memory_space<vmem>>, %arg5: memref<30x128xbf16, #tpu.memory_space<vmem>>, %arg6: memref<1x128xf32, #tpu.memory_space<vmem>>, %arg7: memref<3x1024x512xbf16, #tpu.memory_space<vmem>>, %arg8: memref<128x512xbf16, #tpu.memory_space<vmem>>, %arg9: memref<1x512xf32, #tpu.memory_space<vmem>>, %arg10: memref<2x512xf32, #tpu.memory_space<vmem>>, %arg11: memref<2x512xf32, #tpu.memory_space<vmem>>, %arg12: memref<8x1024xf32, #tpu.memory_space<vmem>>) attributes {dimension_semantics = [#tpu.dimension_semantics<arbitrary>], iteration_bounds = array<i64: 3>, scalar_prefetch = 0 : i64, scratch_operands = 1 : i64, tpu.core_type = #tpu.core_type<tc>, window_params = [{transform_indices = @transform_0, window_bounds = array<i64: 8, 1536>}, {transform_indices = @transform_1, window_bounds = array<i64: 1536, 1024>}, {pipeline_mode = #tpu.pipeline_mode<synchronous>, transform_indices = @transform_2, window_bounds = array<i64: 1, 1024>}, {pipeline_mode = #tpu.pipeline_mode<synchronous>, transform_indices = @transform_3, window_bounds = array<i64: 2, 30>}, {pipeline_mode = #tpu.pipeline_mode<synchronous>, transform_indices = @transform_4, window_bounds = array<i64: 30, 128>}, {pipeline_mode = #tpu.pipeline_mode<synchronous>, transform_indices = @transform_5, window_bounds = array<i64: 1, 128>}, {pipeline_mode = #tpu.pipeline_mode<synchronous>, transform_indices = @transform_6, window_bounds = array<i64: 3, 1024, 512>}, {pipeline_mode = #tpu.pipeline_mode<synchronous>, transform_indices = @transform_7, window_bounds = array<i64: 128, 512>}, {pipeline_mode = #tpu.pipeline_mode<synchronous>, transform_indices = @transform_8, window_bounds = array<i64: 1, 512>}, {pipeline_mode = #tpu.pipeline_mode<synchronous>, transform_indices = @transform_9, window_bounds = array<i64: 2, 512>}, {pipeline_mode = #tpu.pipeline_mode<synchronous>, transform_indices = @transform_10, window_bounds = array<i64: 2, 512>}]} {
    %c0_i32 = arith.constant 0 : i32
    %0 = arith.cmpi eq, %arg0, %c0_i32 : i32
    %1 = arith.extui %0 : i1 to i32
    %c0_i32_0 = arith.constant 0 : i32
    %2 = arith.cmpi ne, %1, %c0_i32_0 : i32
    scf.if %2 {
      %cst_9 = arith.constant 0.000000e+00 : f32
      %12 = vector.broadcast %cst_9 : f32 to vector<8x1024xf32>
      %c0_10 = arith.constant 0 : index
      %c0_11 = arith.constant 0 : index
      %13 = vector.load %arg12[%c0_10, %c0_11] : memref<8x1024xf32, #tpu.memory_space<vmem>>, vector<8x1024xf32>
      tpu.vector_store %arg12[%c0_10, %c0_11], %12 {strides = array<i32>} : memref<8x1024xf32, #tpu.memory_space<vmem>>, vector<8x1024xf32>,
    } else {
    }
    %c0 = arith.constant 0 : index
    %c0_1 = arith.constant 0 : index
    %3 = vector.load %arg12[%c0, %c0_1] : memref<8x1024xf32, #tpu.memory_space<vmem>>, vector<8x1024xf32>
    %c0_2 = arith.constant 0 : index
    %c0_3 = arith.constant 0 : index
    %4 = vector.load %arg1[%c0_2, %c0_3] : memref<8x1536xbf16, #tpu.memory_space<vmem>>, vector<8x1536xbf16>
    %c0_4 = arith.constant 0 : index
    %c0_5 = arith.constant 0 : index
    %5 = vector.load %arg2[%c0_4, %c0_5] : memref<1536x1024xbf16, #tpu.memory_space<vmem>>, vector<1536x1024xbf16>
    %cst = arith.constant dense<0.000000e+00> : vector<8x1024xf32>
    %6 = tpu.matmul %4, %5, %cst {dimension_numbers = #tpu.dot_dimension_numbers<[1], [0], [0], [1], [0, 0, 1, 1], [], []>} : vector<8x1536xbf16>, vector<1536x1024xbf16>, vector<8x1024xf32> -> vector<8x1024xf32>
    %7 = arith.addf %3, %6 : vector<8x1024xf32>
    %c0_6 = arith.constant 0 : index
    %c0_7 = arith.constant 0 : index
    %8 = vector.load %arg12[%c0_6, %c0_7] : memref<8x1024xf32, #tpu.memory_space<vmem>>, vector<8x1024xf32>
    tpu.vector_store %arg12[%c0_6, %c0_7], %7 {strides = array<i32>} : memref<8x1024xf32, #tpu.memory_space<vmem>>, vector<8x1024xf32>,
    %c2_i32 = arith.constant 2 : i32
    %9 = arith.cmpi eq, %arg0, %c2_i32 : i32
    %10 = arith.extui %9 : i1 to i32
    %c0_i32_8 = arith.constant 0 : i32
    %11 = arith.cmpi ne, %10, %c0_i32_8 : i32
    scf.if %11 {
      %c0_9 = arith.constant 0 : index
      %c0_10 = arith.constant 0 : index
      %12 = vector.load %arg12[%c0_9, %c0_10] : memref<8x1024xf32, #tpu.memory_space<vmem>>, vector<8x1024xf32>
      %c0_11 = arith.constant 0 : index
      %c0_12 = arith.constant 0 : index
      %13 = vector.load %arg3[%c0_11, %c0_12] : memref<1x1024xf32, #tpu.memory_space<vmem>>, vector<1x1024xf32>
      %14 = vector.broadcast %13 : vector<1x1024xf32> to vector<8x1024xf32>
      %15 = arith.addf %12, %14 : vector<8x1024xf32>
      %16 = vector.extract_strided_slice %15 {offsets = [0, 0], sizes = [6, 1024], strides = [1, 1]} : vector<8x1024xf32> to vector<6x1024xf32>
      %17 = vector.shape_cast %16 : vector<6x1024xf32> to vector<2x3x1024xf32>
      %cst_13 = arith.constant dense<0.000000e+00> : vector<2x1024xf32>
      %18 = vector.multi_reduction <add>, %17, %cst_13 [1] : vector<2x3x1024xf32> to vector<2x1024xf32>
      %19 = vector.shape_cast %18 : vector<2x1024xf32> to vector<2x1x1024xf32>
      %cst_14 = arith.constant 3.000000e+00 : f32
      %20 = vector.broadcast %cst_14 : f32 to vector<2x1x1024xf32>
      %21 = arith.divf %19, %20 : vector<2x1x1024xf32>
      %22 = vector.broadcast %21 : vector<2x1x1024xf32> to vector<2x3x1024xf32>
      %23 = arith.subf %17, %22 : vector<2x3x1024xf32>
      %24 = arith.mulf %23, %23 : vector<2x3x1024xf32>
      %cst_15 = arith.constant dense<0.000000e+00> : vector<2x1024xf32>
      %25 = vector.multi_reduction <add>, %24, %cst_15 [1] : vector<2x3x1024xf32> to vector<2x1024xf32>
      %26 = vector.shape_cast %25 : vector<2x1024xf32> to vector<2x1x1024xf32>
      %cst_16 = arith.constant 3.000000e+00 : f32
      %27 = vector.broadcast %cst_16 : f32 to vector<2x1x1024xf32>
      %28 = arith.divf %26, %27 : vector<2x1x1024xf32>
      %29 = vector.broadcast %21 : vector<2x1x1024xf32> to vector<2x3x1024xf32>
      %30 = arith.subf %17, %29 : vector<2x3x1024xf32>
      %cst_17 = arith.constant 9.99999974E-6 : f32
      %31 = vector.broadcast %cst_17 : f32 to vector<2x1x1024xf32>
      %32 = arith.addf %28, %31 : vector<2x1x1024xf32>
      %33 = math.rsqrt %32 : vector<2x1x1024xf32>
      %34 = vector.broadcast %33 : vector<2x1x1024xf32> to vector<2x3x1024xf32>
      %35 = arith.mulf %30, %34 : vector<2x3x1024xf32>
      %cst_18 = arith.constant 0.000000e+00 : f32
      %36 = vector.broadcast %cst_18 : f32 to vector<2x3x1024xf32>
      %37 = arith.cmpf oge, %35, %36 : vector<2x3x1024xf32>
      %cst_19 = arith.constant 2.000000e-01 : f32
      %38 = vector.broadcast %cst_19 : f32 to vector<2x3x1024xf32>
      %39 = arith.mulf %38, %35 : vector<2x3x1024xf32>
      %40 = arith.select %37, %35, %39 : vector<2x3x1024xi1>, vector<2x3x1024xf32>
      %41 = arith.truncf %40 : vector<2x3x1024xf32> to vector<2x3x1024xbf16>
      %c0_20 = arith.constant 0 : index
      %c0_21 = arith.constant 0 : index
      %42 = vector.load %arg4[%c0_20, %c0_21] : memref<2x30xbf16, #tpu.memory_space<vmem>>, vector<2x30xbf16>
      %c0_22 = arith.constant 0 : index
      %c0_23 = arith.constant 0 : index
      %43 = vector.load %arg5[%c0_22, %c0_23] : memref<30x128xbf16, #tpu.memory_space<vmem>>, vector<30x128xbf16>
      %cst_24 = arith.constant dense<0.000000e+00> : vector<2x128xf32>
      %44 = tpu.matmul %42, %43, %cst_24 {dimension_numbers = #tpu.dot_dimension_numbers<[1], [0], [0], [1], [0, 0, 1, 1], [], []>} : vector<2x30xbf16>, vector<30x128xbf16>, vector<2x128xf32> -> vector<2x128xf32>
      %c0_25 = arith.constant 0 : index
      %c0_26 = arith.constant 0 : index
      %45 = vector.load %arg6[%c0_25, %c0_26] : memref<1x128xf32, #tpu.memory_space<vmem>>, vector<1x128xf32>
      %46 = vector.broadcast %45 : vector<1x128xf32> to vector<2x128xf32>
      %47 = arith.addf %44, %46 : vector<2x128xf32>
      %cst_27 = arith.constant 0.000000e+00 : f32
      %48 = vector.broadcast %cst_27 : f32 to vector<2x128xf32>
      %49 = arith.cmpf oge, %47, %48 : vector<2x128xf32>
      %cst_28 = arith.constant 2.000000e-01 : f32
      %50 = vector.broadcast %cst_28 : f32 to vector<2x128xf32>
      %51 = arith.mulf %50, %47 : vector<2x128xf32>
      %52 = arith.select %49, %47, %51 : vector<2x128xi1>, vector<2x128xf32>
      %53 = arith.truncf %52 : vector<2x128xf32> to vector<2x128xbf16>
      %c0_29 = arith.constant 0 : index
      %c0_30 = arith.constant 0 : index
      %54 = vector.load %arg8[%c0_29, %c0_30] : memref<128x512xbf16, #tpu.memory_space<vmem>>, vector<128x512xbf16>
      %cst_31 = arith.constant dense<0.000000e+00> : vector<2x512xf32>
      %55 = tpu.matmul %53, %54, %cst_31 {dimension_numbers = #tpu.dot_dimension_numbers<[1], [0], [0], [1], [0, 0, 1, 1], [], []>} : vector<2x128xbf16>, vector<128x512xbf16>, vector<2x512xf32> -> vector<2x512xf32>
      %56 = vector.extract_strided_slice %41 {offsets = [0, 0, 0], sizes = [2, 1, 1024], strides = [1, 1, 1]} : vector<2x3x1024xbf16> to vector<2x1x1024xbf16>
      %57 = vector.shape_cast %56 : vector<2x1x1024xbf16> to vector<2x1024xbf16>
      %c0_32 = arith.constant 0 : index
      %c0_33 = arith.constant 0 : index
      %c0_34 = arith.constant 0 : index
      %58 = vector.load %arg7[%c0_32, %c0_33, %c0_34] : memref<3x1024x512xbf16, #tpu.memory_space<vmem>>, vector<1x1024x512xbf16>
      %59 = vector.shape_cast %58 : vector<1x1024x512xbf16> to vector<1024x512xbf16>
      %cst_35 = arith.constant dense<0.000000e+00> : vector<2x512xf32>
      %60 = tpu.matmul %57, %59, %cst_35 {dimension_numbers = #tpu.dot_dimension_numbers<[1], [0], [0], [1], [0, 0, 1, 1], [], []>} : vector<2x1024xbf16>, vector<1024x512xbf16>, vector<2x512xf32> -> vector<2x512xf32>
      %61 = arith.addf %55, %60 : vector<2x512xf32>
      %62 = vector.extract_strided_slice %41 {offsets = [0, 1, 0], sizes = [2, 1, 1024], strides = [1, 1, 1]} : vector<2x3x1024xbf16> to vector<2x1x1024xbf16>
      %63 = vector.shape_cast %62 : vector<2x1x1024xbf16> to vector<2x1024xbf16>
      %c1 = arith.constant 1 : index
      %c0_36 = arith.constant 0 : index
      %c0_37 = arith.constant 0 : index
      %64 = vector.load %arg7[%c1, %c0_36, %c0_37] : memref<3x1024x512xbf16, #tpu.memory_space<vmem>>, vector<1x1024x512xbf16>
      %65 = vector.shape_cast %64 : vector<1x1024x512xbf16> to vector<1024x512xbf16>
      %cst_38 = arith.constant dense<0.000000e+00> : vector<2x512xf32>
      %66 = tpu.matmul %63, %65, %cst_38 {dimension_numbers = #tpu.dot_dimension_numbers<[1], [0], [0], [1], [0, 0, 1, 1], [], []>} : vector<2x1024xbf16>, vector<1024x512xbf16>, vector<2x512xf32> -> vector<2x512xf32>
      %67 = arith.addf %61, %66 : vector<2x512xf32>
      %68 = vector.extract_strided_slice %41 {offsets = [0, 2, 0], sizes = [2, 1, 1024], strides = [1, 1, 1]} : vector<2x3x1024xbf16> to vector<2x1x1024xbf16>
      %69 = vector.shape_cast %68 : vector<2x1x1024xbf16> to vector<2x1024xbf16>
      %c2 = arith.constant 2 : index
      %c0_39 = arith.constant 0 : index
      %c0_40 = arith.constant 0 : index
      %70 = vector.load %arg7[%c2, %c0_39, %c0_40] : memref<3x1024x512xbf16, #tpu.memory_space<vmem>>, vector<1x1024x512xbf16>
      %71 = vector.shape_cast %70 : vector<1x1024x512xbf16> to vector<1024x512xbf16>
      %cst_41 = arith.constant dense<0.000000e+00> : vector<2x512xf32>
      %72 = tpu.matmul %69, %71, %cst_41 {dimension_numbers = #tpu.dot_dimension_numbers<[1], [0], [0], [1], [0, 0, 1, 1], [], []>} : vector<2x1024xbf16>, vector<1024x512xbf16>, vector<2x512xf32> -> vector<2x512xf32>
      %73 = arith.addf %67, %72 : vector<2x512xf32>
      %c0_42 = arith.constant 0 : index
      %c0_43 = arith.constant 0 : index
      %74 = vector.load %arg9[%c0_42, %c0_43] : memref<1x512xf32, #tpu.memory_space<vmem>>, vector<1x512xf32>
      %75 = vector.broadcast %74 : vector<1x512xf32> to vector<2x512xf32>
      %76 = arith.addf %73, %75 : vector<2x512xf32>
      %cst_44 = arith.constant 0.000000e+00 : f32
      %77 = vector.broadcast %cst_44 : f32 to vector<2x512xf32>
      %78 = arith.maximumf %76, %77 : vector<2x512xf32>
      %c0_45 = arith.constant 0 : index
      %c0_46 = arith.constant 0 : index
      %79 = vector.load %arg10[%c0_45, %c0_46] : memref<2x512xf32, #tpu.memory_space<vmem>>, vector<2x512xf32>
      %80 = arith.addf %78, %79 : vector<2x512xf32>
      %c0_47 = arith.constant 0 : index
      %c0_48 = arith.constant 0 : index
      %81 = vector.load %arg11[%c0_47, %c0_48] : memref<2x512xf32, #tpu.memory_space<vmem>>, vector<2x512xf32>
      tpu.vector_store %arg11[%c0_47, %c0_48], %80 {strides = array<i32>} : memref<2x512xf32, #tpu.memory_space<vmem>>, vector<2x512xf32>,
    } else {
    }
    return
  }
  func.func @transform_0(%arg0: i32) -> (i32, i32) {
    %c0_i32 = arith.constant 0 : i32
    %c0_i32_0 = arith.constant 0 : i32
    return %c0_i32, %arg0 : i32, i32
  }
  func.func @transform_1(%arg0: i32) -> (i32, i32) {
    %c0_i32 = arith.constant 0 : i32
    %c0_i32_0 = arith.constant 0 : i32
    return %arg0, %c0_i32 : i32, i32
  }
  func.func @transform_2(%arg0: i32) -> (i32, i32) {
    %c0_i32 = arith.constant 0 : i32
    %c0_i32_0 = arith.constant 0 : i32
    %c0_i32_1 = arith.constant 0 : i32
    return %c0_i32, %c0_i32_0 : i32, i32
  }
  func.func @transform_3(%arg0: i32) -> (i32, i32) {
    %c0_i32 = arith.constant 0 : i32
    %c0_i32_0 = arith.constant 0 : i32
    %c0_i32_1 = arith.constant 0 : i32
    return %c0_i32, %c0_i32_0 : i32, i32
  }
  func.func @transform_4(%arg0: i32) -> (i32, i32) {
    %c0_i32 = arith.constant 0 : i32
    %c0_i32_0 = arith.constant 0 : i32
    %c0_i32_1 = arith.constant 0 : i32
    return %c0_i32, %c0_i32_0 : i32, i32
  }
  func.func @transform_5(%arg0: i32) -> (i32, i32) {
    %c0_i32 = arith.constant 0 : i32
    %c0_i32_0 = arith.constant 0 : i32
    %c0_i32_1 = arith.constant 0 : i32
    return %c0_i32, %c0_i32_0 : i32, i32
  }
  func.func @transform_6(%arg0: i32) -> (i32, i32, i32) {
    %c0_i32 = arith.constant 0 : i32
    %c0_i32_0 = arith.constant 0 : i32
    %c0_i32_1 = arith.constant 0 : i32
    %c0_i32_2 = arith.constant 0 : i32
    return %c0_i32, %c0_i32_0, %c0_i32_1 : i32, i32, i32
  }
  func.func @transform_7(%arg0: i32) -> (i32, i32) {
    %c0_i32 = arith.constant 0 : i32
    %c0_i32_0 = arith.constant 0 : i32
    %c0_i32_1 = arith.constant 0 : i32
    return %c0_i32, %c0_i32_0 : i32, i32
  }
  func.func @transform_8(%arg0: i32) -> (i32, i32) {
    %c0_i32 = arith.constant 0 : i32
    %c0_i32_0 = arith.constant 0 : i32
    %c0_i32_1 = arith.constant 0 : i32
    return %c0_i32, %c0_i32_0 : i32, i32
  }
  func.func @transform_9(%arg0: i32) -> (i32, i32) {
    %c0_i32 = arith.constant 0 : i32
    %c0_i32_0 = arith.constant 0 : i32
    %c0_i32_1 = arith.constant 0 : i32
    return %c0_i32, %c0_i32_0 : i32, i32
  }
  func.func @transform_10(%arg0: i32) -> (i32, i32) {
    %c0_i32 = arith.constant 0 : i32
    %c0_i32_0 = arith.constant 0 : i32
    %c0_i32_1 = arith.constant 0 : i32
    return %c0_i32, %c0_i32_0 : i32, i32
  }
}

</mosaic_0001>

<bundles_post_ra>
// kernel: tpu_custom_call.1
= control target key start
LH: loop header
LB: loop body
LE: loop exit
PB: predicated region body
PF: predicated region fallthrough
CT: control target
= control target key end

     0   :  { %s19188_s0 = inlined_call_operand.hbm [shape: bf16[8,4608], index: 0, kind: input, shape index: {}]   ;;  %s19189_s1 = inlined_call_operand.hbm [shape: bf16[4608,1024], index: 1, kind: input, shape index: {}]   ;;  %s19190_s2 = inlined_call_operand.hbm [shape: f32[1,1024], index: 2, kind: input, shape index: {}]   ;;  %s19191_s3 = inlined_call_operand.hbm [shape: bf16[2,30], index: 3, kind: input, shape index: {}]   ;;  %s19192_s4 = inlined_call_operand.hbm [shape: bf16[30,128], index: 4, kind: input, shape index: {}]   ;;  %s19193_s5 = inlined_call_operand.hbm [shape: f32[1,128], index: 5, kind: input, shape index: {}]   ;;  %s19194_s6 = inlined_call_operand.hbm [shape: bf16[3,1024,512], index: 6, kind: input, shape index: {}]   ;;  %s19195_s7 = inlined_call_operand.hbm [shape: bf16[128,512], index: 7, kind: input, shape index: {}]   ;;  %s19196_s8 = inlined_call_operand.hbm [shape: f32[1,512], index: 8, kind: input, shape index: {}]   ;;  %s19197_s9 = inlined_call_operand.hbm [shape: f32[2,512], index: 9, kind: input, shape index: {}]   ;;  %s19198_s10 = inlined_call_operand.hbm [shape: f32[2,512], index: 10, kind: output, shape index: {}]  }
   0x1   :  { %19203 = sst [smem:[#allocation29_spill]] %s19190_s2 }
   0x2   :  { %19204 = sst [smem:[#allocation30_spill]] %s19191_s3 }
   0x3   :  { %19205 = sst [smem:[#allocation31_spill]] %s19193_s5 }
   0x4   :  { %19206 = sst [smem:[#allocation32_spill]] %s19195_s7 }
   0x5   :  { %15 = vsyncpa [#allocation4], 0 }
   0x6   :  { %17 = vsyncpa [#allocation4 + $0x1], 0 }
   0x7   :  { %18 = vsyncpa [#allocation7], 0 }
   0x8   :  { %20 = vsyncpa [#allocation7 + $0x1], 0 }
   0x9   :  { %21 = vsyncpa [#allocation10], 0 }
   0xa   :  { %22 = vsyncpa [#allocation13], 0 }
   0xb   :  { %23 = vsyncpa [#allocation16], 0 }
   0xc   :  { %24 = vsyncpa [#allocation19], 0 }
   0xd   :  { %25 = vsyncpa [#allocation5], 0  ;;  %s17321_s13 = smov 0   ;;  %s17323_s14 = smov 0  }
   0xe   :  { %s17325_s15 = smov 0   ;;  %s17327_s16 = smov 0  }
   0xf LB: > { %s17243_s17 = smov [#allocation8]   ;;  %s17342_s19 = sadd.s32 4294967295, %s17241_s16   ;;  %s17241_s16 = sphi %s17327_s16, %s19234_s16   ;;  %s17237_s15 = sphi %s17325_s15, %s19233_s15   ;;  %s17233_s14 = sphi %s17323_s14, %s19232_s14   ;;  %s17229_s13 = sphi %s17321_s13, %s19231_s13  }
  0x10   : > { %s290_s18 = sshll.u32 %s17243_s17, 4  ;;  %p13841_p0 = scmp.ge.s32.totalorder %s17241_s16, 1  ;;  %s291_s18 = int_to_ptr.vmem [resolvable:$true] %s290_s18 }
  0x11   : > { %p19199_p1 = scmp.eq.s32.totalorder %s17342_s19, 0  ;;  %p277_p2 = scmp.lt.s32.totalorder %s17241_s16, 4 }
  0x12   : > { %s17244_s21 = smov [#allocation9]   ;;  %s17245_s23 = smov [#allocation12]  }
  0x13   : > { %p17348_p4 = pnand %p13841_p0, %p277_p2  ;;  %s301_s22 = sshll.u32 %s17244_s21, 4  ;;  %s17354_s22 = int_to_ptr.vmem [resolvable:$true] %s301_s22 }
  0x14   : > { %s325_s24 = sshll.u32 %s17245_s23, 4  ;;  %s19209_s2 = sld [smem:[#allocation29_spill]]  ;;  %s17362_s24 = int_to_ptr.vmem [resolvable:$true] %s325_s24 }
  0x15   : > { %s19207_s20 = scalar_select %p17348_p4, 1, 0 }
  0x16   : > { %p15518_p5 = pneg %p17348_p4 }
  0x18   : > { %p17358_p6 = pnand %p15518_p5, %p19199_p1 }
  0x1a   : > { %s16869_s28 = scalar_lea.hbm %s19209_s2, 128  ;;  %p17372_p8 = pneg %p17358_p6 }
  0x1b   : > { %p16870_p7 = scmp.ne.s32.totalorder %s19209_s2, %s16869_s28  ;;  %p16876_p11 = scmp.lt.u32.totalorder %s16869_s28, %s19209_s2 }
  0x1d   : > { %p16872_p9 = pnand %p17372_p8, %p16870_p7 }
  0x1f   : > { %p16873_p10 = pneg %p16872_p9 }
  0x21   : > { %p16878_p12 = pnand %p16876_p11, %p16873_p10 }
  0x23   : > { %16881 = shalt.err (!%p16878_p12)
}
  0x24   : > { %s16882_s21 = scalar_lea.vmem %s291_s18, 128  ;;  %p16890_p5 = scmp.lt.s32.totalorder %s291_s18, %s291_s18 }
  0x25   : > { %p16883_p13 = scmp.ne.s32.totalorder %s291_s18, %s16882_s21  ;;  %p16891_p3 = scmp.lt.s32.totalorder %s16882_s21, %s16882_s21 }
  0x27   : > { %p16885_p0 = pnand %p16883_p13, %p17372_p8  ;;  %p16892_p1 = por %p16891_p3, %p16890_p5 }
  0x29   : > { %p16886_p2 = pneg %p16885_p0 }
  0x2b   : > { %p16893_p4 = pnand %p16892_p1, %p16886_p2 }
  0x2d   : > { %16896 = shalt.err (!%p16893_p4)
}
  0x2e   : > { %15521 = dma.hbm_to_vmem [thread:$0]  (!%p17358_p6), %s19209_s2, 128, %s291_s18, [#allocation7]  }
  0x2f   : > { %s19211_s3 = sld [smem:[#allocation30_spill]] }
  0x35   : > { %s16897_s29 = scalar_lea.hbm %s19211_s3, 16 }
  0x36   : > { %p16898_p7 = scmp.ne.s32.totalorder %s19211_s3, %s16897_s29  ;;  %p16904_p1 = scmp.lt.u32.totalorder %s16897_s29, %s19211_s3 }
  0x38   : > { %p16900_p9 = pnand %p16898_p7, %p17372_p8 }
  0x3a   : > { %p16901_p3 = pneg %p16900_p9 }
  0x3c   : > { %p16906_p4 = pnand %p16904_p1, %p16901_p3 }
  0x3e   : > { %16909 = shalt.err (!%p16906_p4)
}
  0x3f   : > { %s16910_s18 = scalar_lea.vmem %s17354_s22, 16  ;;  %s16917_s23 = scalar_lea.vmem %s17354_s22, 32 }
  0x40   : > { %p16911_p10 = scmp.ne.s32.totalorder %s17354_s22, %s16910_s18  ;;  %p16918_p13 = scmp.lt.s32.totalorder %s17354_s22, %s17354_s22 }
  0x41   : > { %p16919_p0 = scmp.lt.s32.totalorder %s16917_s23, %s16910_s18 }
  0x42   : > { %p16913_p11 = pnand %p16911_p10, %p17372_p8 }
  0x43   : > { %p16920_p2 = por %p16919_p0, %p16918_p13 }
  0x44   : > { %p16914_p12 = pneg %p16913_p11 }
  0x46   : > { %p16921_p5 = pnand %p16920_p2, %p16914_p12 }
  0x48   : > { %16924 = shalt.err (!%p16921_p5)
}
  0x49   : > { %15524 = dma.hbm_to_vmem [thread:$0]  (!%p17358_p6), %s19211_s3, 16, %s17354_s22, [#allocation10]  }
  0x4a   : > { %s19212_s5 = sld [smem:[#allocation31_spill]] }
  0x50   : > { %s16925_s30 = scalar_lea.hbm %s19212_s5, 16 }
  0x51   : > { %p16926_p7 = scmp.ne.s32.totalorder %s19212_s5, %s16925_s30  ;;  %p16932_p1 = scmp.lt.u32.totalorder %s16925_s30, %s19212_s5 }
  0x53   : > { %p16928_p9 = pnand %p16926_p7, %p17372_p8 }
  0x55   : > { %p16929_p3 = pneg %p16928_p9 }
  0x57   : > { %p16934_p4 = pnand %p16932_p1, %p16929_p3 }
  0x59   : > { %16937 = shalt.err (!%p16934_p4)
}
  0x5a   : > { %s16938_s22 = scalar_lea.vmem %s17362_s24, 16  ;;  %s16945_s23 = scalar_lea.vmem %s17362_s24, 32 }
  0x5b   : > { %p16939_p10 = scmp.ne.s32.totalorder %s17362_s24, %s16938_s22  ;;  %p16946_p13 = scmp.lt.s32.totalorder %s17362_s24, %s17362_s24 }
  0x5c   : > { %p16947_p0 = scmp.lt.s32.totalorder %s16945_s23, %s16938_s22 }
  0x5d   : > { %p16941_p11 = pnand %p16939_p10, %p17372_p8 }
  0x5e   : > { %p16948_p2 = por %p16947_p0, %p16946_p13 }
  0x5f   : > { %p16942_p12 = pneg %p16941_p11 }
  0x61   : > { %p16949_p5 = pnand %p16948_p2, %p16942_p12 }
  0x63   : > { %16952 = shalt.err (!%p16949_p5)
}
  0x64   : > { %15530 = dma.hbm_to_vmem [thread:$0]  (!%p17358_p6), %s19212_s5, 16, %s17362_s24, [#allocation13]  }
  0x65   : > { %s17246_s28 = smov [#allocation15]   ;;  %s17247_s30 = smov [#allocation11]  }
  0x66   : > { %s348_s29 = sshll.u32 %s17246_s28, 4  ;;  %s311_s12 = sshll.u32 %s17247_s30, 4  ;;  %s349_s29 = int_to_ptr.vmem [resolvable:$true] %s348_s29  ;;  %s312_s12 = int_to_ptr.vmem [resolvable:$true] %s311_s12 }
  0x67   : > { %s19213_s7 = sld [smem:[#allocation32_spill]] }
  0x6d   : > { %s16953_s18 = scalar_lea.hbm %s19213_s7, 4096 }
  0x6e   : > { %p16954_p7 = scmp.ne.s32.totalorder %s19213_s7, %s16953_s18  ;;  %p16960_p1 = scmp.lt.u32.totalorder %s16953_s18, %s19213_s7 }
  0x70   : > { %p16956_p9 = pnand %p16954_p7, %p17372_p8 }
  0x72   : > { %p16957_p3 = pneg %p16956_p9 }
  0x74   : > { %p16962_p4 = pnand %p16960_p1, %p16957_p3 }
  0x76   : > { %16965 = shalt.err (!%p16962_p4)
}
  0x77   : > { %s16966_s24 = scalar_lea.vmem %s349_s29, 4096  ;;  %p16974_p13 = scmp.lt.s32.totalorder %s349_s29, %s349_s29 }
  0x78   : > { %p16967_p10 = scmp.ne.s32.totalorder %s349_s29, %s16966_s24  ;;  %p16975_p0 = scmp.lt.s32.totalorder %s16966_s24, %s16966_s24 }
  0x7a   : > { %p16969_p11 = pnand %p16967_p10, %p17372_p8  ;;  %p16976_p2 = por %p16975_p0, %p16974_p13 }
  0x7c   : > { %p16970_p12 = pneg %p16969_p11 }
  0x7e   : > { %p16977_p5 = pnand %p16976_p2, %p16970_p12 }
  0x80   : > { %16980 = shalt.err (!%p16977_p5)
}
  0x81   : > { %s19201_s27 = smov 256   ;;  %s19202_s28 = smov 16  }
  0x82   : > { %15536 = dma.hbm_to_vmem [thread:$0]  (!%p17358_p6), %s19213_s7, 4096, %s349_s29, [#allocation16], %s19201_s27, %s19201_s27, %s19202_s28  }
  0x83   : > { %s16981_s18 = scalar_lea.hbm %s19192_s4, 256 }
  0x84   : > { %p16982_p7 = scmp.ne.s32.totalorder %s19192_s4, %s16981_s18  ;;  %p16988_p1 = scmp.lt.u32.totalorder %s16981_s18, %s19192_s4 }
  0x86   : > { %p16984_p9 = pnand %p16982_p7, %p17372_p8 }
  0x88   : > { %p16985_p3 = pneg %p16984_p9 }
  0x8a   : > { %p16990_p4 = pnand %p16988_p1, %p16985_p3 }
  0x8c   : > { %16993 = shalt.err (!%p16990_p4)
}
  0x8d   : > { %s16994_s2 = scalar_lea.vmem %s312_s12, 256  ;;  %p17002_p13 = scmp.lt.s32.totalorder %s312_s12, %s312_s12 }
  0x8e   : > { %p16995_p10 = scmp.ne.s32.totalorder %s312_s12, %s16994_s2  ;;  %p17003_p0 = scmp.lt.s32.totalorder %s16994_s2, %s16994_s2 }
  0x90   : > { %p16997_p11 = pnand %p16995_p10, %p17372_p8  ;;  %p17004_p2 = por %p17003_p0, %p17002_p13 }
  0x92   : > { %p16998_p12 = pneg %p16997_p11 }
  0x94   : > { %p17005_p5 = pnand %p17004_p2, %p16998_p12 }
  0x96   : > { %17008 = shalt.err (!%p17005_p5)
}
  0x97   : > { %s17250_s29 = smov 64   ;;  %s17251_s30 = smov 4  }
  0x98   : > { %15527 = dma.hbm_to_vmem [thread:$0]  (!%p17358_p6), %s19192_s4, 256, %s312_s12, [#allocation10], %s17250_s29, %s17250_s29, %s17251_s30  }
  0x99   : > { %s17252_s18 = smov [#allocation14]   ;;  %s17253_s23 = smov [#allocation17]  }
  0x9a   : > { %s335_s22 = sshll.u32 %s17252_s18, 4  ;;  %s362_s26 = sshll.u32 %s17253_s23, 4  ;;  %s336_s22 = int_to_ptr.vmem [resolvable:$true] %s335_s22  ;;  %s363_s26 = int_to_ptr.vmem [resolvable:$true] %s362_s26 }
  0x9b   : > { %s17009_s2 = scalar_lea.hbm %s19194_s6, 98304 }
  0x9c   : > { %p17010_p7 = scmp.ne.s32.totalorder %s19194_s6, %s17009_s2  ;;  %p17016_p1 = scmp.lt.u32.totalorder %s17009_s2, %s19194_s6 }
  0x9e   : > { %p17012_p9 = pnand %p17010_p7, %p17372_p8 }
  0xa0   : > { %p17013_p3 = pneg %p17012_p9 }
  0xa2   : > { %p17018_p4 = pnand %p17016_p1, %p17013_p3 }
  0xa4   : > { %17021 = shalt.err (!%p17018_p4)
}
  0xa5   : > { %s17022_s12 = scalar_lea.vmem %s336_s22, 98304  ;;  %p17030_p13 = scmp.lt.s32.totalorder %s336_s22, %s336_s22 }
  0xa6   : > { %p17023_p10 = scmp.ne.s32.totalorder %s336_s22, %s17022_s12  ;;  %p17031_p0 = scmp.lt.s32.totalorder %s17022_s12, %s17022_s12 }
  0xa8   : > { %p17025_p11 = pnand %p17023_p10, %p17372_p8  ;;  %p17032_p2 = por %p17031_p0, %p17030_p13 }
  0xaa   : > { %p17026_p12 = pneg %p17025_p11 }
  0xac   : > { %p17033_p5 = pnand %p17032_p2, %p17026_p12 }
  0xae   : > { %17036 = shalt.err (!%p17033_p5)
}
  0xaf   : > { %s19214_s3 = smov 16   ;;  %s19215_s27 = smov 256  }
  0xb0   : > { %15533 = dma.hbm_to_vmem [thread:$0]  (!%p17358_p6), %s19194_s6, 98304, %s336_s22, [#allocation13], %s19215_s27, %s19215_s27, %s19214_s3  }
  0xb1   : > { %s17037_s30 = scalar_lea.hbm %s19196_s8, 64 }
  0xb2   : > { %p17038_p7 = scmp.ne.s32.totalorder %s19196_s8, %s17037_s30  ;;  %p17044_p1 = scmp.lt.u32.totalorder %s17037_s30, %s19196_s8 }
  0xb4   : > { %p17040_p9 = pnand %p17038_p7, %p17372_p8 }
  0xb6   : > { %p17041_p3 = pneg %p17040_p9 }
  0xb8   : > { %p17046_p4 = pnand %p17044_p1, %p17041_p3 }
  0xba   : > { %17049 = shalt.err (!%p17046_p4)
}
  0xbb   : > { %s17050_s24 = scalar_lea.vmem %s363_s26, 64  ;;  %p17058_p13 = scmp.lt.s32.totalorder %s363_s26, %s363_s26 }
  0xbc   : > { %p17051_p10 = scmp.ne.s32.totalorder %s363_s26, %s17050_s24  ;;  %p17059_p0 = scmp.lt.s32.totalorder %s17050_s24, %s17050_s24 }
  0xbe   : > { %p17053_p11 = pnand %p17051_p10, %p17372_p8  ;;  %p17060_p2 = por %p17059_p0, %p17058_p13 }
  0xc0   : > { %p17054_p12 = pneg %p17053_p11 }
  0xc2   : > { %p17061_p5 = pnand %p17060_p2, %p17054_p12 }
  0xc4   : > { %17064 = shalt.err (!%p17061_p5)
}
  0xc5   : > { %15539 = dma.hbm_to_vmem [thread:$0]  (!%p17358_p6), %s19196_s8, 64, %s363_s26, [#allocation16]  }
  0xc6   : > { %s17254_s12 = smov [#allocation18]   ;;  %s17065_s7 = scalar_lea.hbm %s19197_s9, 128 }
  0xc7   : > { %s373_s3 = sshll.u32 %s17254_s12, 4  ;;  %p17066_p7 = scmp.ne.s32.totalorder %s19197_s9, %s17065_s7  ;;  %s374_s3 = int_to_ptr.vmem [resolvable:$true] %s373_s3 }
  0xc8   : > { %p17072_p1 = scmp.lt.u32.totalorder %s17065_s7, %s19197_s9 }
  0xc9   : > { %p17068_p9 = pnand %p17066_p7, %p17372_p8 }
  0xcb   : > { %p17069_p3 = pneg %p17068_p9 }
  0xcd   : > { %p17074_p4 = pnand %p17072_p1, %p17069_p3 }
  0xcf   : > { %17077 = shalt.err (!%p17074_p4)
}
  0xd0   : > { %s17078_s26 = scalar_lea.vmem %s374_s3, 128  ;;  %p17086_p13 = scmp.lt.s32.totalorder %s374_s3, %s374_s3 }
  0xd1   : > { %p17079_p10 = scmp.ne.s32.totalorder %s374_s3, %s17078_s26  ;;  %p17087_p0 = scmp.lt.s32.totalorder %s17078_s26, %s17078_s26 }
  0xd3   : > { %p17081_p11 = pnand %p17079_p10, %p17372_p8  ;;  %p17088_p2 = por %p17087_p0, %p17086_p13 }
  0xd5   : > { %p17082_p12 = pneg %p17081_p11 }
  0xd7   : > { %p17089_p5 = pnand %p17088_p2, %p17082_p12 }
  0xd9   : > { %17092 = shalt.err (!%p17089_p5)
}
  0xda   : > { %15542 = dma.hbm_to_vmem [thread:$0]  (!%p17358_p6), %s19197_s9, 128, %s374_s3, [#allocation19]  }
  0xdb   : > { %s17533_s11 = sadd.s32 1, %s17241_s16   ;;  %s38_s25 = sadd.s32 1, %s17237_s15 }
  0xdc   : > { %s35_s23 = ssub.s32 %s17241_s16, %s17533_s11  ;;  %p45_p8 = scmp.ne.s32.totalorder %s17237_s15, %s17233_s14 }
  0xdd   : > { %p36_p7 = scmp.eq.s32.totalorder %s35_s23, 0  ;;  %p46_p9 = scmp.eq.s32.totalorder %s17241_s16, 0 }
  0xde   : > { %p51_p3 = scmp.ne.s32.totalorder %s17233_s14, %s17229_s13  ;;  %p15558_p1 = scmp.lt.s32.totalorder %s17241_s16, 3 }
  0xdf   : > { %s17545_s24 = scalar_select %p36_p7, %s17237_s15, %s38_s25  }
  0xe0   : > { %p47_p4 = por %p46_p9, %p45_p8  ;;  %p19216_p10 = scmp.eq.s32.totalorder %s17342_s19, 0 }
  0xe1   : > { %s17554_s2 = sand.u32 1, %s17237_s15   ;;  %s15459_s12 = smul.u32 768, %s17241_s16 }
  0xe2   : > { %p17549_p11 = por %p19216_p10, %p51_p3  ;;  %s15474_s3 = smul.u32 48, %s17554_s2 }
  0xe3   : > { %s17561_s13 = scalar_lea.hbm %s19188_s0, %s15459_s12  ;;  %p17563_p6 = pnand %p15558_p1, %p47_p4 }
  0xe4   : > { %s15475_s28 = smul.u32 6144, %s17554_s2  ;;  %s388_s29 = scalar_lea.vmem [#allocation3], %s15474_s3 }
  0xe5   : > { %s396_s30 = sshll.u32 %s388_s29, 4  ;;  %s385_s17 = scalar_lea.sflag [#allocation4], %s17554_s2  ;;  %s17568_s30 = int_to_ptr.vmem [resolvable:$true] %s396_s30 }
  0xe6   : > { %s17093_s26 = scalar_lea.hbm %s17561_s13, 768  ;;  %p17095_p13 = pneg %p17563_p6 }
  0xe7   : > { %p17094_p12 = scmp.ne.s32.totalorder %s17561_s13, %s17093_s26  ;;  %s17098_s25 = scalar_lea.hbm %s19188_s0, 2304 }
  0xe8   : > { %p17099_p5 = scmp.lt.u32.totalorder %s17561_s13, %s19188_s0  ;;  %p17100_p8 = scmp.lt.u32.totalorder %s17098_s25, %s17093_s26 }
  0xe9   : > { %p17096_p0 = pnand %p17095_p13, %p17094_p12  ;;  %p17102_p9 = scmp.lt.u32.totalorder %s17093_s26, %s17561_s13 }
  0xea   : > { %p17101_p7 = por %p17100_p8, %p17099_p5 }
  0xeb   : > { %p17097_p2 = pneg %p17096_p0 }
  0xec   : > { %p17103_p3 = por %p17102_p9, %p17101_p7 }
  0xee   : > { %p17104_p1 = pnand %p17103_p3, %p17097_p2 }
  0xf0   : > { %17107 = shalt.err (!%p17104_p1)
}
  0xf1   : > { %s17108_s3 = scalar_lea.vmem %s17568_s30, 768  ;;  %s17255_s27 = smov [#allocation3]  }
  0xf2   : > { %p17109_p4 = scmp.ne.s32.totalorder %s17568_s30, %s17108_s3  ;;  %s17113_s5 = sshll.u32 %s17255_s27, 4  ;;  %s17114_s5 = int_to_ptr.vmem [resolvable:$false] %s17113_s5 }
  0xf3   : > { %s17115_s29 = scalar_lea.vmem %s17114_s5, 1536  ;;  %p17116_p0 = scmp.lt.s32.totalorder %s17568_s30, %s17114_s5 }
  0xf4   : > { %p17111_p10 = pnand %p17109_p4, %p17095_p13  ;;  %p17117_p5 = scmp.lt.s32.totalorder %s17115_s29, %s17108_s3 }
  0xf6   : > { %p17112_p12 = pneg %p17111_p10  ;;  %p17118_p8 = por %p17117_p5, %p17116_p0 }
  0xf8   : > { %p17119_p7 = pnand %p17118_p8, %p17112_p12 }
  0xfa   : > { %17122 = shalt.err (!%p17119_p7)
}
  0xfb   : > { %15546 = dma.hbm_to_vmem [thread:$0]  (!%p17563_p6), %s17561_s13, 768, %s17568_s30, %s385_s17  }
  0xfc   : > { %s407_s26 = scalar_lea.vmem [#allocation6], %s15475_s28  ;;  %s403_s18 = sand.u32 1, %s17241_s16  }
  0xfd   : > { %s415_s21 = sshll.u32 %s407_s26, 4  ;;  %s15462_s25 = smul.u32 98304, %s17241_s16  ;;  %s17599_s21 = int_to_ptr.vmem [resolvable:$true] %s415_s21 }
  0xfe   : > { %s17607_s27 = scalar_lea.sflag [#allocation7], %s403_s18  ;;  %s17128_s16 = scalar_lea.hbm %s19189_s1, 294912 }
  0xff   : > { %s17605_s3 = scalar_lea.hbm %s19189_s1, %s15462_s25 }
 0x100   : > { %s17123_s5 = scalar_lea.hbm %s17605_s3, 98304  ;;  %p17129_p1 = scmp.lt.u32.totalorder %s17605_s3, %s19189_s1 }
 0x101   : > { %p17124_p2 = scmp.ne.s32.totalorder %s17605_s3, %s17123_s5  ;;  %p17130_p4 = scmp.lt.u32.totalorder %s17128_s16, %s17123_s5 }
 0x102   : > { %p17132_p12 = scmp.lt.u32.totalorder %s17123_s5, %s17605_s3 }
 0x103   : > { %p17126_p9 = pnand %p17124_p2, %p17095_p13  ;;  %p17131_p10 = por %p17130_p4, %p17129_p1 }
 0x105   : > { %p17127_p3 = pneg %p17126_p9  ;;  %p17133_p0 = por %p17132_p12, %p17131_p10 }
 0x107   : > { %p17134_p5 = pnand %p17133_p0, %p17127_p3 }
 0x109   : > { %17137 = shalt.err (!%p17134_p5)
}
 0x10a   : > { %s17138_s17 = scalar_lea.vmem %s17599_s21, 98304  ;;  %s17256_s29 = smov [#allocation6]  }
 0x10b   : > { %p17139_p8 = scmp.ne.s32.totalorder %s17599_s21, %s17138_s17  ;;  %s17143_s26 = sshll.u32 %s17256_s29, 4  ;;  %s17144_s26 = int_to_ptr.vmem [resolvable:$false] %s17143_s26 }
 0x10c   : > { %s17145_s18 = scalar_lea.vmem %s17144_s26, 196608  ;;  %p17146_p9 = scmp.lt.s32.totalorder %s17599_s21, %s17144_s26 }
 0x10d   : > { %p17141_p7 = pnand %p17139_p8, %p17095_p13  ;;  %p17147_p1 = scmp.lt.s32.totalorder %s17145_s18, %s17138_s17 }
 0x10f   : > { %p17142_p2 = pneg %p17141_p7  ;;  %p17148_p4 = por %p17147_p1, %p17146_p9 }
 0x111   : > { %p17149_p10 = pnand %p17148_p4, %p17142_p2 }
 0x113   : > { %17152 = shalt.err (!%p17149_p10)
}
 0x114   : > { %s17257_s25 = smov 512   ;;  %s17258_s23 = smov 32  }
 0x115   : > { %15549 = dma.hbm_to_vmem [thread:$0]  (!%p17563_p6), %s17605_s3, 98304, %s17599_s21, %s17607_s27, %s17257_s25, %s17257_s25, %s17258_s23  }
 0x116   : > { %p19219_p13 = scmp.ne.s32.totalorder %s19207_s20, 0 }
 0x117   : > { %s429_s12 = sand.u32 (!%p19219_p13), 1, %s17233_s14  }
 0x118   : > { %427 = sbr.rel (%p19219_p13) target bundleno = 2481 (0x9b1), region = 60  ;;  %s430_s2 = scalar_lea.sflag (!%p19219_p13), [#allocation4], %s429_s12 }
 0x119   : > { %s15476_s5 = smul.u32 (!%p19219_p13), 48, %s429_s12 }
 0x11b   : > { %s17636_s13 = scalar_lea.vmem (!%p19219_p13), [#allocation3], %s15476_s5 }
 0x11f   : > { %17196 = dma.done.wait (%p17549_p11), %s430_s2, 768  }
 0x120   : > { %17198 = vsyncadd (%p17549_p11), %s430_s2, 4294966528  ;;  %s438_s16 = sand.u32 1, %s17342_s19   ;;  %s15477_s7 = smul.u32 6144, %s429_s12 }
 0x121   : > { %s439_s21 = scalar_lea.sflag [#allocation7], %s438_s16 }
 0x122   : > { %s17643_s3 = scalar_lea.vmem [#allocation6], %s15477_s7 }
 0x123   : > { %17200 = dma.done.wait (%p17549_p11), %s439_s21, 98304  }
 0x124   : > { %17202 = vsyncadd (%p17549_p11), %s439_s21, 4294868992  ;;  %p19220_p6 = scmp.eq.s32.totalorder %s17342_s19, 0 }
 0x126   : > { %17204 = dma.done.wait (%p19220_p6), [#allocation7], 128   ;;  %p19221_p3 = pmov %p19220_p6 }
 0x128   : > { %17206 = vsyncadd (%p19221_p3), [#allocation7], 4294967168  ;;  %p19222_p12 = pmov %p19221_p3 }
 0x129   : > { %p19223_p0 = pmov %p19221_p3 }
 0x12a   : > { %17208 = dma.done.wait (%p19222_p12), [#allocation10], 272  }
 0x12b   : > { %17210 = vsyncadd (%p19223_p0), [#allocation10], 4294967024  ;;  %p19224_p5 = pmov %p19223_p0 }
 0x12c   : > { %p19225_p8 = pmov %p19223_p0 }
 0x12d   : > { %17212 = dma.done.wait (%p19224_p5), [#allocation13], 98320  }
 0x12e   : > { %17214 = vsyncadd (%p19225_p8), [#allocation13], 4294868976  ;;  %p19226_p11 = pmov %p19223_p0 }
 0x12f   : > { %p19227_p7 = pmov %p19223_p0 }
 0x130   : > { %17216 = dma.done.wait (%p19226_p11), [#allocation16], 4160  }
 0x131   : > { %17218 = vsyncadd (%p19227_p7), [#allocation16], 4294963136  ;;  %p19228_p2 = pmov %p19223_p0 }
 0x132   : > { %p19229_p9 = pmov %p19223_p0 }
 0x133   : > { %17220 = dma.done.wait (%p19228_p2), [#allocation19], 128  }
 0x134   : > { %17222 = vsyncadd (%p19229_p9), [#allocation19], 4294967168  ;;  %p19230_p1 = scmp.ne.s32.totalorder %s17342_s19, 0 }
 0x135   : > { %v17259_v0 = vmov (!%p19230_p1), 0.0  }
 0x136   : > { %517 = sbr.rel (%p19230_p1) target bundleno = 317 (0x13d), region = 104  ;;  %518 = vst [vmem:[#allocation2] sm:$0xff] (!%p19230_p1), %v17259_v0  ;;  %519 = vst [vmem:[#allocation2 + $0x8] sm:$0xff] (!%p19230_p1), %v17259_v0 }
 0x137   : > { %520 = vst [vmem:[#allocation2 + $0x10] sm:$0xff] (!%p19230_p1), %v17259_v0  ;;  %521 = vst [vmem:[#allocation2 + $0x18] sm:$0xff] (!%p19230_p1), %v17259_v0 }
 0x138   : > { %522 = vst [vmem:[#allocation2 + $0x20] sm:$0xff] (!%p19230_p1), %v17259_v0  ;;  %523 = vst [vmem:[#allocation2 + $0x28] sm:$0xff] (!%p19230_p1), %v17259_v0 }
 0x139   : > { %524 = vst [vmem:[#allocation2 + $0x30] sm:$0xff] (!%p19230_p1), %v17259_v0  ;;  %525 = vst [vmem:[#allocation2 + $0x38] sm:$0xff] (!%p19230_p1), %v17259_v0 }
 0x13d PF: > { %v540_v1 = vld [vmem:[%s17643_s3] sm:$0xff]  ;;  %v17703_v55 = vld [vmem:[%s17636_s13 + $0x8] sm:$0xff]  ;;  %p14644_p4 = scmp.ne.s32.totalorder %s17342_s19, 2 }
 0x13e   : > { %v544_v2 = vld [vmem:[%s17643_s3 + $0x20] sm:$0xff]  ;;  %v17713_v60 = vcombine.high %v17703_v55, %v17703_v55  ;;  %vm7543_vm0 = vcmask (!%p14644_p4), 1046528   ;;  %vm17261_vm1 = vmmov (!%p14644_p4), 0   ;;  %vm7539_vm2 = vcmask (!%p14644_p4), 244736  }
 0x13f   : > { %v668_v3 = vld [vmem:[%s17643_s3 + $0x400] sm:$0xff]  ;;  %v13877_v4 = vcombine.high %v540_v1, %v544_v2  ;;  %v13876_v6 = vcombine.low %v540_v1, %v544_v2  ;;  %vm6550_vm3 = vcmask (!%p14644_p4), 1042432   ;;  %vm7912_vm10 = vcmask (!%p14644_p4), 1041409  }
 0x140   : > { %v672_v5 = vld [vmem:[%s17643_s3 + $0x420] sm:$0xff]  ;;  %5263 = vmatprep.mubr.bf16.mxu1 %v17713_v60 }
 0x141   : > { %v548_v7 = vld [vmem:[%s17643_s3 + $0x40] sm:$0xff]  ;;  %v14005_v9 = vcombine.high %v668_v3, %v672_v5  ;;  %v14004_v10 = vcombine.low %v668_v3, %v672_v5  ;;  %5190 = vmatprep.subr.bf16.mxu0 %v13877_v4 }
 0x142   : > { %v552_v8 = vld [vmem:[%s17643_s3 + $0x60] sm:$0xff]  ;;  %5191 = vmatpush1.bf16.msra.mxu0 %v13876_v6 }
 0x143   : > { %v13885_v11 = vcombine.high %v548_v7, %v552_v8  ;;  %v676_v12 = vld [vmem:[%s17643_s3 + $0x440] sm:$0xff]  ;;  %5231 = vmatprep.subr.bf16.mxu1 %v14005_v9  ;;  %v13884_v19 = vcombine.low %v548_v7, %v552_v8 }
 0x144   : > { %v680_v13 = vld [vmem:[%s17643_s3 + $0x460] sm:$0xff]  ;;  %5232 = vmatpush1.bf16.msra.mxu1 %v14004_v10 }
 0x145   : > { %v556_v14 = vld [vmem:[%s17643_s3 + $0x80] sm:$0xff]  ;;  %v14013_v15 = vcombine.high %v676_v12, %v680_v13  ;;  %5192 = vmatprep.subr.bf16.mxu0 %v13885_v11  ;;  %v14012_v20 = vcombine.low %v676_v12, %v680_v13 }
 0x146   : > { %v560_v16 = vld [vmem:[%s17643_s3 + $0xa0] sm:$0xff]  ;;  %5193 = vmatpush1.bf16.msra.mxu0 %v13884_v19 }
 0x147   : > { %v684_v17 = vld [vmem:[%s17643_s3 + $0x480] sm:$0xff]  ;;  %v13893_v21 = vcombine.high %v556_v14, %v560_v16  ;;  %5233 = vmatprep.subr.bf16.mxu1 %v14013_v15  ;;  %v13892_v27 = vcombine.low %v556_v14, %v560_v16 }
 0x148   : > { %v688_v18 = vld [vmem:[%s17643_s3 + $0x4a0] sm:$0xff]  ;;  %5234 = vmatpush1.bf16.msra.mxu1 %v14012_v20 }
 0x149   : > { %v14021_v22 = vcombine.high %v684_v17, %v688_v18  ;;  %v564_v23 = vld [vmem:[%s17643_s3 + $0xc0] sm:$0xff]  ;;  %5194 = vmatprep.subr.bf16.mxu0 %v13893_v21  ;;  %v14020_v28 = vcombine.low %v684_v17, %v688_v18 }
 0x14a   : > { %v568_v24 = vld [vmem:[%s17643_s3 + $0xe0] sm:$0xff]  ;;  %5195 = vmatpush1.bf16.msra.mxu0 %v13892_v27 }
 0x14b   : > { %v692_v25 = vld [vmem:[%s17643_s3 + $0x4c0] sm:$0xff]  ;;  %v13901_v29 = vcombine.high %v564_v23, %v568_v24  ;;  %5235 = vmatprep.subr.bf16.mxu1 %v14021_v22  ;;  %v13900_v35 = vcombine.low %v564_v23, %v568_v24 }
 0x14c   : > { %v696_v26 = vld [vmem:[%s17643_s3 + $0x4e0] sm:$0xff]  ;;  %5236 = vmatpush1.bf16.msra.mxu1 %v14020_v28 }
 0x14d   : > { %v14029_v30 = vcombine.high %v692_v25, %v696_v26  ;;  %v572_v31 = vld [vmem:[%s17643_s3 + $0x100] sm:$0xff]  ;;  %5196 = vmatprep.subr.bf16.mxu0 %v13901_v29  ;;  %v14028_v36 = vcombine.low %v692_v25, %v696_v26 }
 0x14e   : > { %v576_v32 = vld [vmem:[%s17643_s3 + $0x120] sm:$0xff]  ;;  %5197 = vmatpush1.bf16.msra.mxu0 %v13900_v35 }
 0x14f   : > { %v700_v33 = vld [vmem:[%s17643_s3 + $0x500] sm:$0xff]  ;;  %v13909_v37 = vcombine.high %v572_v31, %v576_v32  ;;  %5237 = vmatprep.subr.bf16.mxu1 %v14029_v30  ;;  %v13908_v43 = vcombine.low %v572_v31, %v576_v32 }
 0x150   : > { %v704_v34 = vld [vmem:[%s17643_s3 + $0x520] sm:$0xff]  ;;  %5238 = vmatpush1.bf16.msra.mxu1 %v14028_v36 }
 0x151   : > { %v14037_v38 = vcombine.high %v700_v33, %v704_v34  ;;  %v580_v39 = vld [vmem:[%s17643_s3 + $0x140] sm:$0xff]  ;;  %5198 = vmatprep.subr.bf16.mxu0 %v13909_v37  ;;  %v14036_v44 = vcombine.low %v700_v33, %v704_v34 }
 0x152   : > { %v584_v40 = vld [vmem:[%s17643_s3 + $0x160] sm:$0xff]  ;;  %5199 = vmatpush1.bf16.msra.mxu0 %v13908_v43 }
 0x153   : > { %v708_v41 = vld [vmem:[%s17643_s3 + $0x540] sm:$0xff]  ;;  %v13917_v45 = vcombine.high %v580_v39, %v584_v40  ;;  %5239 = vmatprep.subr.bf16.mxu1 %v14037_v38  ;;  %v13916_v51 = vcombine.low %v580_v39, %v584_v40 }
 0x154   : > { %v712_v42 = vld [vmem:[%s17643_s3 + $0x560] sm:$0xff]  ;;  %5240 = vmatpush1.bf16.msra.mxu1 %v14036_v44 }
 0x155   : > { %v14045_v46 = vcombine.high %v708_v41, %v712_v42  ;;  %v588_v47 = vld [vmem:[%s17643_s3 + $0x180] sm:$0xff]  ;;  %5200 = vmatprep.subr.bf16.mxu0 %v13917_v45  ;;  %v14044_v52 = vcombine.low %v708_v41, %v712_v42 }
 0x156   : > { %v592_v48 = vld [vmem:[%s17643_s3 + $0x1a0] sm:$0xff]  ;;  %5201 = vmatpush1.bf16.msra.mxu0 %v13916_v51 }
 0x157   : > { %v716_v49 = vld [vmem:[%s17643_s3 + $0x580] sm:$0xff]  ;;  %v13925_v53 = vcombine.high %v588_v47, %v592_v48  ;;  %5241 = vmatprep.subr.bf16.mxu1 %v14045_v46  ;;  %v13924_v63 = vcombine.low %v588_v47, %v592_v48 }
 0x158   : > { %v720_v50 = vld [vmem:[%s17643_s3 + $0x5a0] sm:$0xff]  ;;  %5242 = vmatpush1.bf16.msra.mxu1 %v14044_v52 }
 0x159   : > { %v17700_v54 = vld [vmem:[%s17636_s13] sm:$0xff]  ;;  %v14053_v56 = vcombine.high %v716_v49, %v720_v50  ;;  %5202 = vmatprep.subr.bf16.mxu0 %v13925_v53  ;;  %v14052_v0 = vcombine.low %v716_v49, %v720_v50 }
 0x15a   : > { %v596_v57 = vld [vmem:[%s17643_s3 + $0x1c0] sm:$0xff]  ;;  %v17709_v59 = vcombine.high %v17700_v54, %v17700_v54  ;;  %5203 = vmatpush1.bf16.msra.mxu0 %v13924_v63 }
 0x15b   : > { %v600_v58 = vld [vmem:[%s17643_s3 + $0x1e0] sm:$0xff]  ;;  %5243 = vmatprep.subr.bf16.mxu1 %v14053_v56 }
 0x15c   : > { %v724_v61 = vld [vmem:[%s17643_s3 + $0x5c0] sm:$0xff]  ;;  %5222 = vmatprep.mubr.bf16.mxu0 %v17709_v59  ;;  %v13933_v1 = vcombine.high %v596_v57, %v600_v58  ;;  %v13932_v7 = vcombine.low %v596_v57, %v600_v58  ;;  %5244 = vmatpush1.bf16.msra.mxu1 %v14052_v0 }
 0x15d   : > { %v728_v62 = vld [vmem:[%s17643_s3 + $0x5e0] sm:$0xff] }
 0x15e   : > { %v14061_v2 = vcombine.high %v724_v61, %v728_v62  ;;  %v604_v3 = vld [vmem:[%s17643_s3 + $0x200] sm:$0xff]  ;;  %5204 = vmatprep.subr.bf16.mxu0 %v13933_v1  ;;  %v14060_v8 = vcombine.low %v724_v61, %v728_v62 }
 0x15f   : > { %v608_v4 = vld [vmem:[%s17643_s3 + $0x220] sm:$0xff]  ;;  %5205 = vmatpush1.bf16.msra.mxu0 %v13932_v7 }
 0x160   : > { %v732_v5 = vld [vmem:[%s17643_s3 + $0x600] sm:$0xff]  ;;  %v13941_v9 = vcombine.high %v604_v3, %v608_v4  ;;  %5245 = vmatprep.subr.bf16.mxu1 %v14061_v2  ;;  %v13940_v15 = vcombine.low %v604_v3, %v608_v4 }
 0x161   : > { %v736_v6 = vld [vmem:[%s17643_s3 + $0x620] sm:$0xff]  ;;  %5246 = vmatpush1.bf16.msra.mxu1 %v14060_v8 }
 0x162   : > { %v14069_v10 = vcombine.high %v732_v5, %v736_v6  ;;  %v612_v11 = vld [vmem:[%s17643_s3 + $0x240] sm:$0xff]  ;;  %5206 = vmatprep.subr.bf16.mxu0 %v13941_v9  ;;  %v14068_v16 = vcombine.low %v732_v5, %v736_v6 }
 0x163   : > { %v616_v12 = vld [vmem:[%s17643_s3 + $0x260] sm:$0xff]  ;;  %5207 = vmatpush1.bf16.msra.mxu0 %v13940_v15 }
 0x164   : > { %v740_v13 = vld [vmem:[%s17643_s3 + $0x640] sm:$0xff]  ;;  %v13949_v17 = vcombine.high %v612_v11, %v616_v12  ;;  %5247 = vmatprep.subr.bf16.mxu1 %v14069_v10  ;;  %v13948_v23 = vcombine.low %v612_v11, %v616_v12 }
 0x165   : > { %v744_v14 = vld [vmem:[%s17643_s3 + $0x660] sm:$0xff]  ;;  %5248 = vmatpush1.bf16.msra.mxu1 %v14068_v16 }
 0x166   : > { %v14077_v18 = vcombine.high %v740_v13, %v744_v14  ;;  %v620_v19 = vld [vmem:[%s17643_s3 + $0x280] sm:$0xff]  ;;  %5208 = vmatprep.subr.bf16.mxu0 %v13949_v17  ;;  %v14076_v24 = vcombine.low %v740_v13, %v744_v14  ;;  %v17759_v17 = vcombine.low %v17700_v54, %v17700_v54 }
 0x167   : > { %v624_v20 = vld [vmem:[%s17643_s3 + $0x2a0] sm:$0xff]  ;;  %5209 = vmatpush1.bf16.msra.mxu0 %v13948_v23  ;;  %v17771_v23 = vld [vmem:[%s17636_s13 + $0x18] sm:$0xff] }
 0x168   : > { %v748_v21 = vld [vmem:[%s17643_s3 + $0x680] sm:$0xff]  ;;  %v13957_v25 = vcombine.high %v620_v19, %v624_v20  ;;  %5249 = vmatprep.subr.bf16.mxu1 %v14077_v18  ;;  %v13956_v31 = vcombine.low %v620_v19, %v624_v20 }
 0x169   : > { %v752_v22 = vld [vmem:[%s17643_s3 + $0x6a0] sm:$0xff]  ;;  %5250 = vmatpush1.bf16.msra.mxu1 %v14076_v24 }
 0x16a   : > { %v14085_v26 = vcombine.high %v748_v21, %v752_v22  ;;  %v628_v27 = vld [vmem:[%s17643_s3 + $0x2c0] sm:$0xff]  ;;  %5210 = vmatprep.subr.bf16.mxu0 %v13957_v25  ;;  %v14084_v32 = vcombine.low %v748_v21, %v752_v22  ;;  %v17768_v21 = vcombine.low %v17703_v55, %v17703_v55 }
 0x16b   : > { %v632_v28 = vld [vmem:[%s17643_s3 + $0x2e0] sm:$0xff]  ;;  %5211 = vmatpush1.bf16.msra.mxu0 %v13956_v31 }
 0x16c   : > { %v756_v29 = vld [vmem:[%s17643_s3 + $0x6c0] sm:$0xff]  ;;  %v13965_v33 = vcombine.high %v628_v27, %v632_v28  ;;  %5251 = vmatprep.subr.bf16.mxu1 %v14085_v26  ;;  %v13964_v39 = vcombine.low %v628_v27, %v632_v28 }
 0x16d   : > { %v760_v30 = vld [vmem:[%s17643_s3 + $0x6e0] sm:$0xff]  ;;  %5252 = vmatpush1.bf16.msra.mxu1 %v14084_v32 }
 0x16e   : > { %v14093_v34 = vcombine.high %v756_v29, %v760_v30  ;;  %v636_v35 = vld [vmem:[%s17643_s3 + $0x300] sm:$0xff]  ;;  %5212 = vmatprep.subr.bf16.mxu0 %v13965_v33  ;;  %v14092_v40 = vcombine.low %v756_v29, %v760_v30  ;;  %v17784_v30 = vcombine.high %v17771_v23, %v17771_v23 }
 0x16f   : > { %v640_v36 = vld [vmem:[%s17643_s3 + $0x320] sm:$0xff]  ;;  %5213 = vmatpush1.bf16.msra.mxu0 %v13964_v39 }
 0x170   : > { %v764_v37 = vld [vmem:[%s17643_s3 + $0x700] sm:$0xff]  ;;  %v13973_v41 = vcombine.high %v636_v35, %v640_v36  ;;  %5253 = vmatprep.subr.bf16.mxu1 %v14093_v34  ;;  %v13972_v47 = vcombine.low %v636_v35, %v640_v36 }
 0x171   : > { %v768_v38 = vld [vmem:[%s17643_s3 + $0x720] sm:$0xff]  ;;  %5254 = vmatpush1.bf16.msra.mxu1 %v14092_v40 }
 0x172   : > { %v14101_v42 = vcombine.high %v764_v37, %v768_v38  ;;  %v644_v43 = vld [vmem:[%s17643_s3 + $0x340] sm:$0xff]  ;;  %5214 = vmatprep.subr.bf16.mxu0 %v13973_v41  ;;  %v14100_v48 = vcombine.low %v764_v37, %v768_v38 }
 0x173   : > { %v648_v44 = vld [vmem:[%s17643_s3 + $0x360] sm:$0xff]  ;;  %5215 = vmatpush1.bf16.msra.mxu0 %v13972_v47 }
 0x174   : > { %v772_v45 = vld [vmem:[%s17643_s3 + $0x740] sm:$0xff]  ;;  %v13981_v49 = vcombine.high %v644_v43, %v648_v44  ;;  %5255 = vmatprep.subr.bf16.mxu1 %v14101_v42  ;;  %v13980_v57 = vcombine.low %v644_v43, %v648_v44 }
 0x175   : > { %v776_v46 = vld [vmem:[%s17643_s3 + $0x760] sm:$0xff]  ;;  %5256 = vmatpush1.bf16.msra.mxu1 %v14100_v48 }
 0x176   : > { %v14109_v50 = vcombine.high %v772_v45, %v776_v46  ;;  %v652_v51 = vld [vmem:[%s17643_s3 + $0x380] sm:$0xff]  ;;  %5216 = vmatprep.subr.bf16.mxu0 %v13981_v49  ;;  %v14108_v58 = vcombine.low %v772_v45, %v776_v46 }
 0x177   : > { %v656_v52 = vld [vmem:[%s17643_s3 + $0x3a0] sm:$0xff]  ;;  %5217 = vmatpush1.bf16.msra.mxu0 %v13980_v57 }
 0x178   : > { %v780_v53 = vld [vmem:[%s17643_s3 + $0x780] sm:$0xff]  ;;  %v13989_v61 = vcombine.high %v652_v51, %v656_v52  ;;  %5257 = vmatprep.subr.bf16.mxu1 %v14109_v50  ;;  %v13988_v3 = vcombine.low %v652_v51, %v656_v52 }
 0x179   : > { %v784_v56 = vld [vmem:[%s17643_s3 + $0x7a0] sm:$0xff]  ;;  %5258 = vmatpush1.bf16.msra.mxu1 %v14108_v58 }
 0x17a   : > { %v14117_v62 = vcombine.high %v780_v53, %v784_v56  ;;  %v660_v63 = vld [vmem:[%s17643_s3 + $0x3c0] sm:$0xff]  ;;  %5218 = vmatprep.subr.bf16.mxu0 %v13989_v61  ;;  %v14116_v4 = vcombine.low %v780_v53, %v784_v56 }
 0x17b   : > { %v664_v0 = vld [vmem:[%s17643_s3 + $0x3e0] sm:$0xff]  ;;  %5219 = vmatpush1.bf16.msra.mxu0 %v13988_v3 }
 0x17c   : > { %v788_v1 = vld [vmem:[%s17643_s3 + $0x7c0] sm:$0xff]  ;;  %v13997_v5 = vcombine.high %v660_v63, %v664_v0  ;;  %5259 = vmatprep.subr.bf16.mxu1 %v14117_v62  ;;  %v13996_v11 = vcombine.low %v660_v63, %v664_v0 }
 0x17d   : > { %v792_v2 = vld [vmem:[%s17643_s3 + $0x7e0] sm:$0xff]  ;;  %5260 = vmatpush1.bf16.msra.mxu1 %v14116_v4 }
 0x17e   : > { %v14125_v6 = vcombine.high %v788_v1, %v792_v2  ;;  %v796_v7 = vld [vmem:[%s17643_s3 + $0x800] sm:$0xff]  ;;  %5220 = vmatprep.subr.bf16.mxu0 %v13997_v5  ;;  %v14124_v12 = vcombine.low %v788_v1, %v792_v2 }
 0x17f   : > { %v800_v8 = vld [vmem:[%s17643_s3 + $0x820] sm:$0xff]  ;;  %5221 = vmatpush1.bf16.msra.mxu0 %v13996_v11 }
 0x180   : > { %v924_v9 = vld [vmem:[%s17643_s3 + $0xc00] sm:$0xff]  ;;  %v14133_v13 = vcombine.high %v796_v7, %v800_v8  ;;  %5261 = vmatprep.subr.bf16.mxu1 %v14125_v6  ;;  %v14132_v22 = vcombine.low %v796_v7, %v800_v8 }
 0x181   : > { %v928_v10 = vld [vmem:[%s17643_s3 + $0xc20] sm:$0xff]  ;;  %5262 = vmatpush1.bf16.msra.mxu1 %v14124_v12 }
 0x182   : > { %v14261_v14 = vcombine.high %v924_v9, %v928_v10  ;;  %v804_v15 = vld [vmem:[%s17643_s3 + $0x840] sm:$0xff]  ;;  %5272 = vmatprep.subr.bf16.mxu0 %v14133_v13  ;;  %v14260_v24 = vcombine.low %v924_v9, %v928_v10  ;;  %5223 = vmatmul.mubr.bf16.vlgmr.msra.gmra.mrb[0].mxu0 %v17759_v17 }
 0x183   : > { %v808_v16 = vld [vmem:[%s17643_s3 + $0x860] sm:$0xff]  ;;  %5273 = vmatpush1.bf16.msra.mxu0 %v14132_v22 }
 0x184   : > { %v932_v18 = vld [vmem:[%s17643_s3 + $0xc40] sm:$0xff]  ;;  %v14141_v25 = vcombine.high %v804_v15, %v808_v16  ;;  %5313 = vmatprep.subr.bf16.mxu1 %v14261_v14  ;;  %5264 = vmatmul.mubr.bf16.vlgmr.msra.gmra.mrb[0].mxu1 %v17768_v21  ;;  %v14140_v31 = vcombine.low %v804_v15, %v808_v16 }
 0x185   : > { %v936_v19 = vld [vmem:[%s17643_s3 + $0xc60] sm:$0xff]  ;;  %5314 = vmatpush1.bf16.msra.mxu1 %v14260_v24  ;;  %5345 = vmatprep.mubr.bf16.mxu1 %v17784_v30 }
 0x186   : > { %v17764_v20 = vld [vmem:[%s17636_s13 + $0x10] sm:$0xff]  ;;  %v14269_v54 = vcombine.high %v932_v18, %v936_v19  ;;  %5274 = vmatprep.subr.bf16.mxu0 %v14141_v25  ;;  %v14268_v32 = vcombine.low %v932_v18, %v936_v19 }
 0x187   : > { %v812_v26 = vld [vmem:[%s17643_s3 + $0x880] sm:$0xff]  ;;  %v17777_v28 = vcombine.high %v17764_v20, %v17764_v20  ;;  %5275 = vmatpush1.bf16.msra.mxu0 %v14140_v31 }
 0x188   : > { %v816_v27 = vld [vmem:[%s17643_s3 + $0x8a0] sm:$0xff]  ;;  %5315 = vmatprep.subr.bf16.mxu1 %v14269_v54 }
 0x189   : > { %v940_v55 = vld [vmem:[%s17643_s3 + $0xc80] sm:$0xff]  ;;  %v14149_v33 = vcombine.high %v812_v26, %v816_v27  ;;  %5304 = vmatprep.mubr.bf16.mxu0 %v17777_v28  ;;  %v14148_v39 = vcombine.low %v812_v26, %v816_v27  ;;  %5316 = vmatpush1.bf16.msra.mxu1 %v14268_v32 }
 0x18a   : > { %v944_v29 = vld [vmem:[%s17643_s3 + $0xca0] sm:$0xff] }
 0x18b   : > { %v14277_v34 = vcombine.high %v940_v55, %v944_v29  ;;  %v820_v35 = vld [vmem:[%s17643_s3 + $0x8c0] sm:$0xff]  ;;  %5276 = vmatprep.subr.bf16.mxu0 %v14149_v33  ;;  %v14276_v40 = vcombine.low %v940_v55, %v944_v29 }
 0x18c   : > { %v824_v36 = vld [vmem:[%s17643_s3 + $0x8e0] sm:$0xff]  ;;  %5277 = vmatpush1.bf16.msra.mxu0 %v14148_v39 }
 0x18d   : > { %v948_v37 = vld [vmem:[%s17643_s3 + $0xcc0] sm:$0xff]  ;;  %v14157_v41 = vcombine.high %v820_v35, %v824_v36  ;;  %5317 = vmatprep.subr.bf16.mxu1 %v14277_v34  ;;  %v14156_v47 = vcombine.low %v820_v35, %v824_v36 }
 0x18e   : > { %v952_v38 = vld [vmem:[%s17643_s3 + $0xce0] sm:$0xff]  ;;  %5318 = vmatpush1.bf16.msra.mxu1 %v14276_v40 }
 0x18f   : > { %v14285_v42 = vcombine.high %v948_v37, %v952_v38  ;;  %v828_v43 = vld [vmem:[%s17643_s3 + $0x900] sm:$0xff]  ;;  %5278 = vmatprep.subr.bf16.mxu0 %v14157_v41  ;;  %v14284_v48 = vcombine.low %v948_v37, %v952_v38 }
 0x190   : > { %v832_v44 = vld [vmem:[%s17643_s3 + $0x920] sm:$0xff]  ;;  %5279 = vmatpush1.bf16.msra.mxu0 %v14156_v47 }
 0x191   : > { %v956_v45 = vld [vmem:[%s17643_s3 + $0xd00] sm:$0xff]  ;;  %v14165_v49 = vcombine.high %v828_v43, %v832_v44  ;;  %5319 = vmatprep.subr.bf16.mxu1 %v14285_v42  ;;  %v14164_v57 = vcombine.low %v828_v43, %v832_v44 }
 0x192   : > { %v960_v46 = vld [vmem:[%s17643_s3 + $0xd20] sm:$0xff]  ;;  %5320 = vmatpush1.bf16.msra.mxu1 %v14284_v48 }
 0x193   : > { %v14293_v50 = vcombine.high %v956_v45, %v960_v46  ;;  %v836_v51 = vld [vmem:[%s17643_s3 + $0x940] sm:$0xff]  ;;  %5280 = vmatprep.subr.bf16.mxu0 %v14165_v49  ;;  %v14292_v58 = vcombine.low %v956_v45, %v960_v46 }
 0x194   : > { %v840_v52 = vld [vmem:[%s17643_s3 + $0x960] sm:$0xff]  ;;  %5281 = vmatpush1.bf16.msra.mxu0 %v14164_v57 }
 0x195   : > { %v964_v53 = vld [vmem:[%s17643_s3 + $0xd40] sm:$0xff]  ;;  %v14173_v61 = vcombine.high %v836_v51, %v840_v52  ;;  %5321 = vmatprep.subr.bf16.mxu1 %v14293_v50  ;;  %v14172_v3 = vcombine.low %v836_v51, %v840_v52 }
 0x196   : > { %v968_v56 = vld [vmem:[%s17643_s3 + $0xd60] sm:$0xff]  ;;  %5322 = vmatpush1.bf16.msra.mxu1 %v14292_v58 }
 0x197   : > { %v14301_v62 = vcombine.high %v964_v53, %v968_v56  ;;  %v844_v63 = vld [vmem:[%s17643_s3 + $0x980] sm:$0xff]  ;;  %5282 = vmatprep.subr.bf16.mxu0 %v14173_v61  ;;  %v14300_v4 = vcombine.low %v964_v53, %v968_v56 }
 0x198   : > { %v848_v0 = vld [vmem:[%s17643_s3 + $0x9a0] sm:$0xff]  ;;  %5283 = vmatpush1.bf16.msra.mxu0 %v14172_v3 }
 0x199   : > { %v972_v1 = vld [vmem:[%s17643_s3 + $0xd80] sm:$0xff]  ;;  %v14181_v5 = vcombine.high %v844_v63, %v848_v0  ;;  %5323 = vmatprep.subr.bf16.mxu1 %v14301_v62  ;;  %v14180_v11 = vcombine.low %v844_v63, %v848_v0 }
 0x19a   : > { %v976_v2 = vld [vmem:[%s17643_s3 + $0xda0] sm:$0xff]  ;;  %5324 = vmatpush1.bf16.msra.mxu1 %v14300_v4 }
 0x19b   : > { %v14309_v6 = vcombine.high %v972_v1, %v976_v2  ;;  %v852_v7 = vld [vmem:[%s17643_s3 + $0x9c0] sm:$0xff]  ;;  %5284 = vmatprep.subr.bf16.mxu0 %v14181_v5  ;;  %v14308_v12 = vcombine.low %v972_v1, %v976_v2 }
 0x19c   : > { %v856_v8 = vld [vmem:[%s17643_s3 + $0x9e0] sm:$0xff]  ;;  %5285 = vmatpush1.bf16.msra.mxu0 %v14180_v11 }
 0x19d   : > { %v980_v9 = vld [vmem:[%s17643_s3 + $0xdc0] sm:$0xff]  ;;  %v14189_v13 = vcombine.high %v852_v7, %v856_v8  ;;  %5325 = vmatprep.subr.bf16.mxu1 %v14309_v6  ;;  %v14188_v22 = vcombine.low %v852_v7, %v856_v8 }
 0x19e   : > { %v984_v10 = vld [vmem:[%s17643_s3 + $0xde0] sm:$0xff]  ;;  %5326 = vmatpush1.bf16.msra.mxu1 %v14308_v12 }
 0x19f   : > { %v14317_v14 = vcombine.high %v980_v9, %v984_v10  ;;  %v860_v15 = vld [vmem:[%s17643_s3 + $0xa00] sm:$0xff]  ;;  %5286 = vmatprep.subr.bf16.mxu0 %v14189_v13  ;;  %v14316_v24 = vcombine.low %v980_v9, %v984_v10 }
 0x1a0   : > { %v864_v16 = vld [vmem:[%s17643_s3 + $0xa20] sm:$0xff]  ;;  %5287 = vmatpush1.bf16.msra.mxu0 %v14188_v22 }
 0x1a1   : > { %v988_v18 = vld [vmem:[%s17643_s3 + $0xe00] sm:$0xff]  ;;  %v14197_v25 = vcombine.high %v860_v15, %v864_v16  ;;  %5327 = vmatprep.subr.bf16.mxu1 %v14317_v14  ;;  %v14196_v31 = vcombine.low %v860_v15, %v864_v16 }
 0x1a2   : > { %v992_v19 = vld [vmem:[%s17643_s3 + $0xe20] sm:$0xff]  ;;  %5328 = vmatpush1.bf16.msra.mxu1 %v14316_v24 }
 0x1a3   : > { %v14325_v54 = vcombine.high %v988_v18, %v992_v19  ;;  %v868_v26 = vld [vmem:[%s17643_s3 + $0xa40] sm:$0xff]  ;;  %5288 = vmatprep.subr.bf16.mxu0 %v14197_v25  ;;  %v14324_v32 = vcombine.low %v988_v18, %v992_v19 }
 0x1a4   : > { %v872_v27 = vld [vmem:[%s17643_s3 + $0xa60] sm:$0xff]  ;;  %5289 = vmatpush1.bf16.msra.mxu0 %v14196_v31 }
 0x1a5   : > { %v996_v55 = vld [vmem:[%s17643_s3 + $0xe40] sm:$0xff]  ;;  %v14205_v33 = vcombine.high %v868_v26, %v872_v27  ;;  %5329 = vmatprep.subr.bf16.mxu1 %v14325_v54  ;;  %v14204_v39 = vcombine.low %v868_v26, %v872_v27 }
 0x1a6   : > { %v1000_v29 = vld [vmem:[%s17643_s3 + $0xe60] sm:$0xff]  ;;  %5330 = vmatpush1.bf16.msra.mxu1 %v14324_v32 }
 0x1a7   : > { %v14333_v34 = vcombine.high %v996_v55, %v1000_v29  ;;  %v876_v35 = vld [vmem:[%s17643_s3 + $0xa80] sm:$0xff]  ;;  %5290 = vmatprep.subr.bf16.mxu0 %v14205_v33  ;;  %v14332_v40 = vcombine.low %v996_v55, %v1000_v29 }
 0x1a8   : > { %v880_v36 = vld [vmem:[%s17643_s3 + $0xaa0] sm:$0xff]  ;;  %5291 = vmatpush1.bf16.msra.mxu0 %v14204_v39 }
 0x1a9   : > { %v1004_v37 = vld [vmem:[%s17643_s3 + $0xe80] sm:$0xff]  ;;  %v14213_v41 = vcombine.high %v876_v35, %v880_v36  ;;  %5331 = vmatprep.subr.bf16.mxu1 %v14333_v34  ;;  %v14212_v47 = vcombine.low %v876_v35, %v880_v36 }
 0x1aa   : > { %v1008_v38 = vld [vmem:[%s17643_s3 + $0xea0] sm:$0xff]  ;;  %5332 = vmatpush1.bf16.msra.mxu1 %v14332_v40 }
 0x1ab   : > { %v14341_v42 = vcombine.high %v1004_v37, %v1008_v38  ;;  %v884_v43 = vld [vmem:[%s17643_s3 + $0xac0] sm:$0xff]  ;;  %5292 = vmatprep.subr.bf16.mxu0 %v14213_v41  ;;  %v14340_v48 = vcombine.low %v1004_v37, %v1008_v38  ;;  %v17849_v37 = vcombine.low %v17764_v20, %v17764_v20  ;;  %v17858_v41 = vcombine.low %v17771_v23, %v17771_v23 }
 0x1ac   : > { %v888_v44 = vld [vmem:[%s17643_s3 + $0xae0] sm:$0xff]  ;;  %5293 = vmatpush1.bf16.msra.mxu0 %v14212_v47 }
 0x1ad   : > { %v1012_v45 = vld [vmem:[%s17643_s3 + $0xec0] sm:$0xff]  ;;  %v14221_v49 = vcombine.high %v884_v43, %v888_v44  ;;  %5333 = vmatprep.subr.bf16.mxu1 %v14341_v42  ;;  %v14220_v57 = vcombine.low %v884_v43, %v888_v44  ;;  %v17861_v43 = vld [vmem:[%s17636_s13 + $0x28] sm:$0xff] }
 0x1ae   : > { %v1016_v46 = vld [vmem:[%s17643_s3 + $0xee0] sm:$0xff]  ;;  %5334 = vmatpush1.bf16.msra.mxu1 %v14340_v48 }
 0x1af   : > { %v14349_v50 = vcombine.high %v1012_v45, %v1016_v46  ;;  %v892_v51 = vld [vmem:[%s17643_s3 + $0xb00] sm:$0xff]  ;;  %5294 = vmatprep.subr.bf16.mxu0 %v14221_v49  ;;  %v14348_v58 = vcombine.low %v1012_v45, %v1016_v46 }
 0x1b0   : > { %v896_v52 = vld [vmem:[%s17643_s3 + $0xb20] sm:$0xff]  ;;  %5295 = vmatpush1.bf16.msra.mxu0 %v14220_v57 }
 0x1b1   : > { %v1020_v53 = vld [vmem:[%s17643_s3 + $0xf00] sm:$0xff]  ;;  %v14229_v61 = vcombine.high %v892_v51, %v896_v52  ;;  %5335 = vmatprep.subr.bf16.mxu1 %v14349_v50  ;;  %v14228_v3 = vcombine.low %v892_v51, %v896_v52  ;;  %v17874_v50 = vcombine.high %v17861_v43, %v17861_v43 }
 0x1b2   : > { %v1024_v56 = vld [vmem:[%s17643_s3 + $0xf20] sm:$0xff]  ;;  %5336 = vmatpush1.bf16.msra.mxu1 %v14348_v58 }
 0x1b3   : > { %v14357_v62 = vcombine.high %v1020_v53, %v1024_v56  ;;  %v900_v63 = vld [vmem:[%s17643_s3 + $0xb40] sm:$0xff]  ;;  %5296 = vmatprep.subr.bf16.mxu0 %v14229_v61  ;;  %v14356_v4 = vcombine.low %v1020_v53, %v1024_v56 }
 0x1b4   : > { %v904_v0 = vld [vmem:[%s17643_s3 + $0xb60] sm:$0xff]  ;;  %5297 = vmatpush1.bf16.msra.mxu0 %v14228_v3 }
 0x1b5   : > { %v1028_v1 = vld [vmem:[%s17643_s3 + $0xf40] sm:$0xff]  ;;  %v14237_v5 = vcombine.high %v900_v63, %v904_v0  ;;  %5337 = vmatprep.subr.bf16.mxu1 %v14357_v62  ;;  %v14236_v11 = vcombine.low %v900_v63, %v904_v0 }
 0x1b6   : > { %v1032_v2 = vld [vmem:[%s17643_s3 + $0xf60] sm:$0xff]  ;;  %5338 = vmatpush1.bf16.msra.mxu1 %v14356_v4 }
 0x1b7   : > { %v14365_v6 = vcombine.high %v1028_v1, %v1032_v2  ;;  %v908_v7 = vld [vmem:[%s17643_s3 + $0xb80] sm:$0xff]  ;;  %5298 = vmatprep.subr.bf16.mxu0 %v14237_v5  ;;  %v14364_v12 = vcombine.low %v1028_v1, %v1032_v2 }
 0x1b8   : > { %v912_v8 = vld [vmem:[%s17643_s3 + $0xba0] sm:$0xff]  ;;  %5299 = vmatpush1.bf16.msra.mxu0 %v14236_v11 }
 0x1b9   : > { %v1036_v9 = vld [vmem:[%s17643_s3 + $0xf80] sm:$0xff]  ;;  %v14245_v13 = vcombine.high %v908_v7, %v912_v8  ;;  %5339 = vmatprep.subr.bf16.mxu1 %v14365_v6  ;;  %v14244_v22 = vcombine.low %v908_v7, %v912_v8 }
 0x1ba   : > { %v1040_v10 = vld [vmem:[%s17643_s3 + $0xfa0] sm:$0xff]  ;;  %5340 = vmatpush1.bf16.msra.mxu1 %v14364_v12 }
 0x1bb   : > { %v14373_v14 = vcombine.high %v1036_v9, %v1040_v10  ;;  %v916_v15 = vld [vmem:[%s17643_s3 + $0xbc0] sm:$0xff]  ;;  %5300 = vmatprep.subr.bf16.mxu0 %v14245_v13  ;;  %v14372_v24 = vcombine.low %v1036_v9, %v1040_v10 }
 0x1bc   : > { %v920_v16 = vld [vmem:[%s17643_s3 + $0xbe0] sm:$0xff]  ;;  %5301 = vmatpush1.bf16.msra.mxu0 %v14244_v22 }
 0x1bd   : > { %v1044_v18 = vld [vmem:[%s17643_s3 + $0xfc0] sm:$0xff]  ;;  %v14253_v25 = vcombine.high %v916_v15, %v920_v16  ;;  %5341 = vmatprep.subr.bf16.mxu1 %v14373_v14  ;;  %v14252_v31 = vcombine.low %v916_v15, %v920_v16 }
 0x1be   : > { %v1048_v19 = vld [vmem:[%s17643_s3 + $0xfe0] sm:$0xff]  ;;  %5342 = vmatpush1.bf16.msra.mxu1 %v14372_v24 }
 0x1bf   : > { %v14381_v54 = vcombine.high %v1044_v18, %v1048_v19  ;;  %v1052_v26 = vld [vmem:[%s17643_s3 + $0x1000] sm:$0xff]  ;;  %5302 = vmatprep.subr.bf16.mxu0 %v14253_v25  ;;  %v14380_v32 = vcombine.low %v1044_v18, %v1048_v19 }
 0x1c0   : > { %v1056_v27 = vld [vmem:[%s17643_s3 + $0x1020] sm:$0xff]  ;;  %5303 = vmatpush1.bf16.msra.mxu0 %v14252_v31 }
 0x1c1   : > { %v1180_v55 = vld [vmem:[%s17643_s3 + $0x1400] sm:$0xff]  ;;  %v14389_v33 = vcombine.high %v1052_v26, %v1056_v27  ;;  %5343 = vmatprep.subr.bf16.mxu1 %v14381_v54  ;;  %v14388_v42 = vcombine.low %v1052_v26, %v1056_v27 }
 0x1c2   : > { %v1184_v29 = vld [vmem:[%s17643_s3 + $0x1420] sm:$0xff]  ;;  %5344 = vmatpush1.bf16.msra.mxu1 %v14380_v32 }
 0x1c3   : > { %v14517_v34 = vcombine.high %v1180_v55, %v1184_v29  ;;  %v1060_v35 = vld [vmem:[%s17643_s3 + $0x1040] sm:$0xff]  ;;  %5354 = vmatprep.subr.bf16.mxu0 %v14389_v33  ;;  %v14516_v44 = vcombine.low %v1180_v55, %v1184_v29  ;;  %5305 = vmatmul.mubr.bf16.vlgmr.msra.gmra.mrb[4].mxu0 %v17849_v37 }
 0x1c4   : > { %v1064_v36 = vld [vmem:[%s17643_s3 + $0x1060] sm:$0xff]  ;;  %5355 = vmatpush1.bf16.msra.mxu0 %v14388_v42 }
 0x1c5   : > { %v1188_v38 = vld [vmem:[%s17643_s3 + $0x1440] sm:$0xff]  ;;  %v14397_v45 = vcombine.high %v1060_v35, %v1064_v36  ;;  %5395 = vmatprep.subr.bf16.mxu1 %v14517_v34  ;;  %5346 = vmatmul.mubr.bf16.vlgmr.msra.gmra.mrb[4].mxu1 %v17858_v41  ;;  %v14396_v51 = vcombine.low %v1060_v35, %v1064_v36 }
 0x1c6   : > { %v1192_v39 = vld [vmem:[%s17643_s3 + $0x1460] sm:$0xff]  ;;  %5396 = vmatpush1.bf16.msra.mxu1 %v14516_v44  ;;  %5427 = vmatprep.mubr.bf16.mxu1 %v17874_v50 }
 0x1c7   : > { %v17854_v40 = vld [vmem:[%s17636_s13 + $0x20] sm:$0xff]  ;;  %v14525_v20 = vcombine.high %v1188_v38, %v1192_v39  ;;  %5356 = vmatprep.subr.bf16.mxu0 %v14397_v45  ;;  %v14524_v52 = vcombine.low %v1188_v38, %v1192_v39 }
 0x1c8   : > { %v1068_v46 = vld [vmem:[%s17643_s3 + $0x1080] sm:$0xff]  ;;  %v17867_v48 = vcombine.high %v17854_v40, %v17854_v40  ;;  %5357 = vmatpush1.bf16.msra.mxu0 %v14396_v51 }
 0x1c9   : > { %v1072_v47 = vld [vmem:[%s17643_s3 + $0x10a0] sm:$0xff]  ;;  %5397 = vmatprep.subr.bf16.mxu1 %v14525_v20 }
 0x1ca   : > { %v1196_v23 = vld [vmem:[%s17643_s3 + $0x1480] sm:$0xff]  ;;  %v14405_v53 = vcombine.high %v1068_v46, %v1072_v47  ;;  %5386 = vmatprep.mubr.bf16.mxu0 %v17867_v48  ;;  %v14404_v63 = vcombine.low %v1068_v46, %v1072_v47  ;;  %5398 = vmatpush1.bf16.msra.mxu1 %v14524_v52 }
 0x1cb   : > { %v1200_v49 = vld [vmem:[%s17643_s3 + $0x14a0] sm:$0xff] }
 0x1cc   : > { %v14533_v56 = vcombine.high %v1196_v23, %v1200_v49  ;;  %v1076_v57 = vld [vmem:[%s17643_s3 + $0x10c0] sm:$0xff]  ;;  %5358 = vmatprep.subr.bf16.mxu0 %v14405_v53  ;;  %v14532_v0 = vcombine.low %v1196_v23, %v1200_v49 }
 0x1cd   : > { %v1080_v58 = vld [vmem:[%s17643_s3 + $0x10e0] sm:$0xff]  ;;  %5359 = vmatpush1.bf16.msra.mxu0 %v14404_v63 }
 0x1ce   : > { %v1204_v61 = vld [vmem:[%s17643_s3 + $0x14c0] sm:$0xff]  ;;  %v14413_v1 = vcombine.high %v1076_v57, %v1080_v58  ;;  %5399 = vmatprep.subr.bf16.mxu1 %v14533_v56  ;;  %v14412_v7 = vcombine.low %v1076_v57, %v1080_v58 }
 0x1cf   : > { %v1208_v62 = vld [vmem:[%s17643_s3 + $0x14e0] sm:$0xff]  ;;  %5400 = vmatpush1.bf16.msra.mxu1 %v14532_v0 }
 0x1d0   : > { %v14541_v2 = vcombine.high %v1204_v61, %v1208_v62  ;;  %v1084_v3 = vld [vmem:[%s17643_s3 + $0x1100] sm:$0xff]  ;;  %5360 = vmatprep.subr.bf16.mxu0 %v14413_v1  ;;  %v14540_v8 = vcombine.low %v1204_v61, %v1208_v62 }
 0x1d1   : > { %v1088_v4 = vld [vmem:[%s17643_s3 + $0x1120] sm:$0xff]  ;;  %5361 = vmatpush1.bf16.msra.mxu0 %v14412_v7 }
 0x1d2   : > { %v1212_v5 = vld [vmem:[%s17643_s3 + $0x1500] sm:$0xff]  ;;  %v14421_v9 = vcombine.high %v1084_v3, %v1088_v4  ;;  %5401 = vmatprep.subr.bf16.mxu1 %v14541_v2  ;;  %v14420_v15 = vcombine.low %v1084_v3, %v1088_v4 }
 0x1d3   : > { %v1216_v6 = vld [vmem:[%s17643_s3 + $0x1520] sm:$0xff]  ;;  %5402 = vmatpush1.bf16.msra.mxu1 %v14540_v8 }
 0x1d4   : > { %v14549_v10 = vcombine.high %v1212_v5, %v1216_v6  ;;  %v1092_v11 = vld [vmem:[%s17643_s3 + $0x1140] sm:$0xff]  ;;  %5362 = vmatprep.subr.bf16.mxu0 %v14421_v9  ;;  %v14548_v16 = vcombine.low %v1212_v5, %v1216_v6 }
 0x1d5   : > { %v1096_v12 = vld [vmem:[%s17643_s3 + $0x1160] sm:$0xff]  ;;  %5363 = vmatpush1.bf16.msra.mxu0 %v14420_v15 }
 0x1d6   : > { %v1220_v13 = vld [vmem:[%s17643_s3 + $0x1540] sm:$0xff]  ;;  %v14429_v18 = vcombine.high %v1092_v11, %v1096_v12  ;;  %5403 = vmatprep.subr.bf16.mxu1 %v14549_v10  ;;  %v14428_v26 = vcombine.low %v1092_v11, %v1096_v12 }
 0x1d7   : > { %v1224_v14 = vld [vmem:[%s17643_s3 + $0x1560] sm:$0xff]  ;;  %5404 = vmatpush1.bf16.msra.mxu1 %v14548_v16 }
 0x1d8   : > { %v14557_v19 = vcombine.high %v1220_v13, %v1224_v14  ;;  %v1100_v22 = vld [vmem:[%s17643_s3 + $0x1180] sm:$0xff]  ;;  %5364 = vmatprep.subr.bf16.mxu0 %v14429_v18  ;;  %v14556_v27 = vcombine.low %v1220_v13, %v1224_v14 }
 0x1d9   : > { %v1104_v24 = vld [vmem:[%s17643_s3 + $0x11a0] sm:$0xff]  ;;  %5365 = vmatpush1.bf16.msra.mxu0 %v14428_v26 }
 0x1da   : > { %v1228_v25 = vld [vmem:[%s17643_s3 + $0x1580] sm:$0xff]  ;;  %v14437_v55 = vcombine.high %v1100_v22, %v1104_v24  ;;  %5405 = vmatprep.subr.bf16.mxu1 %v14557_v19  ;;  %v14436_v35 = vcombine.low %v1100_v22, %v1104_v24 }
 0x1db   : > { %v1232_v54 = vld [vmem:[%s17643_s3 + $0x15a0] sm:$0xff]  ;;  %5406 = vmatpush1.bf16.msra.mxu1 %v14556_v27 }
 0x1dc   : > { %v14565_v29 = vcombine.high %v1228_v25, %v1232_v54  ;;  %v1108_v31 = vld [vmem:[%s17643_s3 + $0x11c0] sm:$0xff]  ;;  %5366 = vmatprep.subr.bf16.mxu0 %v14437_v55  ;;  %v14564_v36 = vcombine.low %v1228_v25, %v1232_v54 }
 0x1dd   : > { %v1112_v32 = vld [vmem:[%s17643_s3 + $0x11e0] sm:$0xff]  ;;  %5367 = vmatpush1.bf16.msra.mxu0 %v14436_v35 }
 0x1de   : > { %v1236_v33 = vld [vmem:[%s17643_s3 + $0x15c0] sm:$0xff]  ;;  %v14445_v38 = vcombine.high %v1108_v31, %v1112_v32  ;;  %5407 = vmatprep.subr.bf16.mxu1 %v14565_v29  ;;  %v14444_v46 = vcombine.low %v1108_v31, %v1112_v32 }
 0x1df   : > { %v1240_v34 = vld [vmem:[%s17643_s3 + $0x15e0] sm:$0xff]  ;;  %5408 = vmatpush1.bf16.msra.mxu1 %v14564_v36 }
 0x1e0   : > { %v14573_v39 = vcombine.high %v1236_v33, %v1240_v34  ;;  %v1116_v42 = vld [vmem:[%s17643_s3 + $0x1200] sm:$0xff]  ;;  %5368 = vmatprep.subr.bf16.mxu0 %v14445_v38  ;;  %v14572_v47 = vcombine.low %v1236_v33, %v1240_v34 }
 0x1e1   : > { %v1120_v44 = vld [vmem:[%s17643_s3 + $0x1220] sm:$0xff]  ;;  %5369 = vmatpush1.bf16.msra.mxu0 %v14444_v46 }
 0x1e2   : > { %v1244_v45 = vld [vmem:[%s17643_s3 + $0x1600] sm:$0xff]  ;;  %v14453_v23 = vcombine.high %v1116_v42, %v1120_v44  ;;  %5409 = vmatprep.subr.bf16.mxu1 %v14573_v39  ;;  %v14452_v57 = vcombine.low %v1116_v42, %v1120_v44 }
 0x1e3   : > { %v1248_v20 = vld [vmem:[%s17643_s3 + $0x1620] sm:$0xff]  ;;  %5410 = vmatpush1.bf16.msra.mxu1 %v14572_v47 }
 0x1e4   : > { %v14581_v49 = vcombine.high %v1244_v45, %v1248_v20  ;;  %v1124_v51 = vld [vmem:[%s17643_s3 + $0x1240] sm:$0xff]  ;;  %5370 = vmatprep.subr.bf16.mxu0 %v14453_v23  ;;  %v14580_v58 = vcombine.low %v1244_v45, %v1248_v20 }
 0x1e5   : > { %v1128_v52 = vld [vmem:[%s17643_s3 + $0x1260] sm:$0xff]  ;;  %5371 = vmatpush1.bf16.msra.mxu0 %v14452_v57  ;;  %v541_v57 = vld [vmem:[%s17643_s3 + $0x8] sm:$0xff] }
 0x1e6   : > { %v1252_v53 = vld [vmem:[%s17643_s3 + $0x1640] sm:$0xff]  ;;  %v14461_v61 = vcombine.high %v1124_v51, %v1128_v52  ;;  %5411 = vmatprep.subr.bf16.mxu1 %v14581_v49  ;;  %v14460_v3 = vcombine.low %v1124_v51, %v1128_v52 }
 0x1e7   : > { %v1256_v56 = vld [vmem:[%s17643_s3 + $0x1660] sm:$0xff]  ;;  %5412 = vmatpush1.bf16.msra.mxu1 %v14580_v58  ;;  %v545_v58 = vld [vmem:[%s17643_s3 + $0x28] sm:$0xff] }
 0x1e8   : > { %v14589_v62 = vcombine.high %v1252_v53, %v1256_v56  ;;  %v1132_v63 = vld [vmem:[%s17643_s3 + $0x1280] sm:$0xff]  ;;  %5372 = vmatprep.subr.bf16.mxu0 %v14461_v61  ;;  %v14588_v4 = vcombine.low %v1252_v53, %v1256_v56  ;;  %v669_v61 = vld [vmem:[%s17643_s3 + $0x408] sm:$0xff] }
 0x1e9   : > { %v1136_v0 = vld [vmem:[%s17643_s3 + $0x12a0] sm:$0xff]  ;;  %5373 = vmatpush1.bf16.msra.mxu0 %v14460_v3  ;;  %v549_v3 = vld [vmem:[%s17643_s3 + $0x48] sm:$0xff] }
 0x1ea   : > { %v1260_v1 = vld [vmem:[%s17643_s3 + $0x1680] sm:$0xff]  ;;  %v14469_v5 = vcombine.high %v1132_v63, %v1136_v0  ;;  %5413 = vmatprep.subr.bf16.mxu1 %v14589_v62  ;;  %v14468_v11 = vcombine.low %v1132_v63, %v1136_v0  ;;  %v673_v62 = vld [vmem:[%s17643_s3 + $0x428] sm:$0xff] }
 0x1eb   : > { %v1264_v2 = vld [vmem:[%s17643_s3 + $0x16a0] sm:$0xff]  ;;  %5414 = vmatpush1.bf16.msra.mxu1 %v14588_v4  ;;  %v553_v4 = vld [vmem:[%s17643_s3 + $0x68] sm:$0xff] }
 0x1ec   : > { %v14597_v6 = vcombine.high %v1260_v1, %v1264_v2  ;;  %v1140_v7 = vld [vmem:[%s17643_s3 + $0x12c0] sm:$0xff]  ;;  %5374 = vmatprep.subr.bf16.mxu0 %v14469_v5  ;;  %v14596_v12 = vcombine.low %v1260_v1, %v1264_v2  ;;  %v13879_v1 = vcombine.high %v541_v57, %v545_v58  ;;  %v14007_v2 = vcombine.high %v669_v61, %v673_v62 }
 0x1ed   : > { %v1144_v8 = vld [vmem:[%s17643_s3 + $0x12e0] sm:$0xff]  ;;  %5375 = vmatpush1.bf16.msra.mxu0 %v14468_v11  ;;  %v17939_v5 = vcombine.low %v17854_v40, %v17854_v40  ;;  %v13887_v11 = vcombine.high %v549_v3, %v553_v4  ;;  %v561_v40 = vld [vmem:[%s17643_s3 + $0xa8] sm:$0xff] }
 0x1ee   : > { %v1268_v9 = vld [vmem:[%s17643_s3 + $0x16c0] sm:$0xff]  ;;  %v14477_v13 = vcombine.high %v1140_v7, %v1144_v8  ;;  %5415 = vmatprep.subr.bf16.mxu1 %v14597_v6  ;;  %v14476_v22 = vcombine.low %v1140_v7, %v1144_v8  ;;  %v677_v6 = vld [vmem:[%s17643_s3 + $0x448] sm:$0xff]  ;;  %v17945_v8 = vcombine.low %v17861_v43, %v17861_v43  ;;  %v13886_v43 = vcombine.low %v549_v3, %v553_v4 }
 0x1ef   : > { %v1272_v10 = vld [vmem:[%s17643_s3 + $0x16e0] sm:$0xff]  ;;  %5416 = vmatpush1.bf16.msra.mxu1 %v14596_v12  ;;  %v681_v7 = vld [vmem:[%s17643_s3 + $0x468] sm:$0xff] }
 0x1f0   : > { %v14605_v14 = vcombine.high %v1268_v9, %v1272_v10  ;;  %v1148_v15 = vld [vmem:[%s17643_s3 + $0x1300] sm:$0xff]  ;;  %5376 = vmatprep.subr.bf16.mxu0 %v14477_v13  ;;  %v14604_v24 = vcombine.low %v1268_v9, %v1272_v10  ;;  %v13878_v9 = vcombine.low %v541_v57, %v545_v58  ;;  %v14006_v10 = vcombine.low %v669_v61, %v673_v62  ;;  %v557_v13 = vld [vmem:[%s17643_s3 + $0x88] sm:$0xff] }
 0x1f1   : > { %v1152_v16 = vld [vmem:[%s17643_s3 + $0x1320] sm:$0xff]  ;;  %5377 = vmatpush1.bf16.msra.mxu0 %v14476_v22  ;;  %v14015_v12 = vcombine.high %v677_v6, %v681_v7  ;;  %v565_v22 = vld [vmem:[%s17643_s3 + $0xc8] sm:$0xff] }
 0x1f2   : > { %v1276_v18 = vld [vmem:[%s17643_s3 + $0x1700] sm:$0xff]  ;;  %v14485_v25 = vcombine.high %v1148_v15, %v1152_v16  ;;  %5417 = vmatprep.subr.bf16.mxu1 %v14605_v14  ;;  %v14484_v31 = vcombine.low %v1148_v15, %v1152_v16  ;;  %v685_v14 = vld [vmem:[%s17643_s3 + $0x488] sm:$0xff]  ;;  %v14014_v16 = vcombine.low %v677_v6, %v681_v7 }
 0x1f3   : > { %v1280_v19 = vld [vmem:[%s17643_s3 + $0x1720] sm:$0xff]  ;;  %5418 = vmatpush1.bf16.msra.mxu1 %v14604_v24  ;;  %v689_v15 = vld [vmem:[%s17643_s3 + $0x4a8] sm:$0xff] }
 0x1f4   : > { %v14613_v54 = vcombine.high %v1276_v18, %v1280_v19  ;;  %v1156_v26 = vld [vmem:[%s17643_s3 + $0x1340] sm:$0xff]  ;;  %5378 = vmatprep.subr.bf16.mxu0 %v14485_v25  ;;  %v14612_v32 = vcombine.low %v1276_v18, %v1280_v19  ;;  %v13895_v18 = vcombine.high %v557_v13, %v561_v40  ;;  %v14023_v19 = vcombine.high %v685_v14, %v689_v15  ;;  %v569_v24 = vld [vmem:[%s17643_s3 + $0xe8] sm:$0xff] }
 0x1f5   : > { %v1160_v27 = vld [vmem:[%s17643_s3 + $0x1360] sm:$0xff]  ;;  %5379 = vmatpush1.bf16.msra.mxu0 %v14484_v31  ;;  %v693_v25 = vld [vmem:[%s17643_s3 + $0x4c8] sm:$0xff] }
 0x1f6   : > { %v1284_v55 = vld [vmem:[%s17643_s3 + $0x1740] sm:$0xff]  ;;  %v14493_v33 = vcombine.high %v1156_v26, %v1160_v27  ;;  %5419 = vmatprep.subr.bf16.mxu1 %v14613_v54  ;;  %v14492_v42 = vcombine.low %v1156_v26, %v1160_v27  ;;  %v697_v54 = vld [vmem:[%s17643_s3 + $0x4e8] sm:$0xff]  ;;  %v13894_v26 = vcombine.low %v557_v13, %v561_v40  ;;  %v14022_v27 = vcombine.low %v685_v14, %v689_v15 }
 0x1f7   : > { %v1288_v29 = vld [vmem:[%s17643_s3 + $0x1760] sm:$0xff]  ;;  %5420 = vmatpush1.bf16.msra.mxu1 %v14612_v32  ;;  %v573_v31 = vld [vmem:[%s17643_s3 + $0x108] sm:$0xff] }
 0x1f8   : > { %v14621_v34 = vcombine.high %v1284_v55, %v1288_v29  ;;  %v1164_v35 = vld [vmem:[%s17643_s3 + $0x1380] sm:$0xff]  ;;  %5380 = vmatprep.subr.bf16.mxu0 %v14493_v33  ;;  %v14620_v44 = vcombine.low %v1284_v55, %v1288_v29  ;;  %v13903_v55 = vcombine.high %v565_v22, %v569_v24  ;;  %v14031_v29 = vcombine.high %v693_v25, %v697_v54  ;;  %v577_v32 = vld [vmem:[%s17643_s3 + $0x128] sm:$0xff] }
 0x1f9   : > { %v1168_v36 = vld [vmem:[%s17643_s3 + $0x13a0] sm:$0xff]  ;;  %5381 = vmatpush1.bf16.msra.mxu0 %v14492_v42  ;;  %v701_v33 = vld [vmem:[%s17643_s3 + $0x508] sm:$0xff] }
 0x1fa   : > { %v1292_v38 = vld [vmem:[%s17643_s3 + $0x1780] sm:$0xff]  ;;  %v14501_v45 = vcombine.high %v1164_v35, %v1168_v36  ;;  %5421 = vmatprep.subr.bf16.mxu1 %v14621_v34  ;;  %v14500_v51 = vcombine.low %v1164_v35, %v1168_v36  ;;  %v705_v34 = vld [vmem:[%s17643_s3 + $0x528] sm:$0xff]  ;;  %v13902_v35 = vcombine.low %v565_v22, %v569_v24  ;;  %v14030_v36 = vcombine.low %v693_v25, %v697_v54 }
 0x1fb   : > { %v1296_v39 = vld [vmem:[%s17643_s3 + $0x17a0] sm:$0xff]  ;;  %5422 = vmatpush1.bf16.msra.mxu1 %v14620_v44  ;;  %v581_v42 = vld [vmem:[%s17643_s3 + $0x148] sm:$0xff] }
 0x1fc   : > { %v14629_v20 = vcombine.high %v1292_v38, %v1296_v39  ;;  %v1172_v46 = vld [vmem:[%s17643_s3 + $0x13c0] sm:$0xff]  ;;  %5382 = vmatprep.subr.bf16.mxu0 %v14501_v45  ;;  %v14628_v52 = vcombine.low %v1292_v38, %v1296_v39  ;;  %v13911_v38 = vcombine.high %v573_v31, %v577_v32  ;;  %v14039_v39 = vcombine.high %v701_v33, %v705_v34  ;;  %v585_v44 = vld [vmem:[%s17643_s3 + $0x168] sm:$0xff] }
 0x1fd   : > { %v1176_v47 = vld [vmem:[%s17643_s3 + $0x13e0] sm:$0xff]  ;;  %5383 = vmatpush1.bf16.msra.mxu0 %v14500_v51  ;;  %v709_v45 = vld [vmem:[%s17643_s3 + $0x548] sm:$0xff]  ;;  %v13918_v57 = vcombine.low %v581_v42, %v585_v44 }
 0x1fe   : > { %v1300_v23 = vld [vmem:[%s17643_s3 + $0x17c0] sm:$0xff]  ;;  %v14509_v53 = vcombine.high %v1172_v46, %v1176_v47  ;;  %5423 = vmatprep.subr.bf16.mxu1 %v14629_v20  ;;  %v14508_v63 = vcombine.low %v1172_v46, %v1176_v47  ;;  %v713_v20 = vld [vmem:[%s17643_s3 + $0x568] sm:$0xff]  ;;  %v13910_v46 = vcombine.low %v573_v31, %v577_v32  ;;  %v14038_v47 = vcombine.low %v701_v33, %v705_v34 }
 0x1ff   : > { %v1304_v49 = vld [vmem:[%s17643_s3 + $0x17e0] sm:$0xff]  ;;  %5424 = vmatpush1.bf16.msra.mxu1 %v14628_v52  ;;  %v589_v51 = vld [vmem:[%s17643_s3 + $0x188] sm:$0xff]  ;;  %v14046_v58 = vcombine.low %v709_v45, %v713_v20 }
 0x200   : > { %v14637_v56 = vcombine.high %v1300_v23, %v1304_v49  ;;  %5384 = vmatprep.subr.bf16.mxu0 %v14509_v53  ;;  %v14636_v0 = vcombine.low %v1300_v23, %v1304_v49  ;;  %v13919_v23 = vcombine.high %v581_v42, %v585_v44  ;;  %v14047_v49 = vcombine.high %v709_v45, %v713_v20  ;;  %v593_v52 = vld [vmem:[%s17643_s3 + $0x1a8] sm:$0xff] }
 0x201   : > { %5385 = vmatpush1.bf16.msra.mxu0 %v14508_v63  ;;  %v717_v53 = vld [vmem:[%s17643_s3 + $0x588] sm:$0xff]  ;;  %v13927_v61 = vcombine.high %v589_v51, %v593_v52  ;;  %v13926_v3 = vcombine.low %v589_v51, %v593_v52 }
 0x202   : > { %5425 = vmatprep.subr.bf16.mxu1 %v14637_v56  ;;  %5436 = vmatprep.subr.bf16.mxu0 %v13879_v1  ;;  %v721_v56 = vld [vmem:[%s17643_s3 + $0x5a8] sm:$0xff] }
 0x203   : > { %5426 = vmatpush1.bf16.msra.mxu1 %v14636_v0  ;;  %v14055_v62 = vcombine.high %v717_v53, %v721_v56  ;;  %v597_v63 = vld [vmem:[%s17643_s3 + $0x1c8] sm:$0xff]  ;;  %v14054_v4 = vcombine.low %v717_v53, %v721_v56 }
 0x204   : > { %5477 = vmatprep.subr.bf16.mxu1 %v14007_v2  ;;  %5387 = vmatmul.mubr.bf16.vlgmr.msra.gmra.mrb[8].mxu0 %v17939_v5  ;;  %v601_v0 = vld [vmem:[%s17643_s3 + $0x1e8] sm:$0xff] }
 0x205   : > { %5437 = vmatpush1.bf16.msra.mxu0 %v13878_v9  ;;  %5468 = vmatprep.mubr.bf16.mxu0 %v17709_v59  ;;  %v725_v1 = vld [vmem:[%s17643_s3 + $0x5c8] sm:$0xff]  ;;  %v13935_v6 = vcombine.high %v597_v63, %v601_v0  ;;  %v13934_v13 = vcombine.low %v597_v63, %v601_v0 }
 0x206   : > { %5428 = vmatmul.mubr.bf16.vlgmr.msra.gmra.mrb[8].mxu1 %v17945_v8  ;;  %5438 = vmatprep.subr.bf16.mxu0 %v13887_v11  ;;  %v729_v2 = vld [vmem:[%s17643_s3 + $0x5e8] sm:$0xff] }
 0x207   : > { %5478 = vmatpush1.bf16.msra.mxu1 %v14006_v10  ;;  %5509 = vmatprep.mubr.bf16.mxu1 %v17713_v60  ;;  %v14063_v7 = vcombine.high %v725_v1, %v729_v2  ;;  %v605_v9 = vld [vmem:[%s17643_s3 + $0x208] sm:$0xff]  ;;  %v14062_v40 = vcombine.low %v725_v1, %v729_v2 }
 0x208   : > { %5479 = vmatprep.subr.bf16.mxu1 %v14015_v12  ;;  %v609_v10 = vld [vmem:[%s17643_s3 + $0x228] sm:$0xff] }
 0x209   : > { %5439 = vmatpush1.bf16.msra.mxu0 %v13886_v43  ;;  %v733_v11 = vld [vmem:[%s17643_s3 + $0x608] sm:$0xff]  ;;  %v13943_v14 = vcombine.high %v605_v9, %v609_v10  ;;  %v13942_v22 = vcombine.low %v605_v9, %v609_v10 }
 0x20a   : > { %5440 = vmatprep.subr.bf16.mxu0 %v13895_v18  ;;  %v737_v12 = vld [vmem:[%s17643_s3 + $0x628] sm:$0xff] }
 0x20b   : > { %5480 = vmatpush1.bf16.msra.mxu1 %v14014_v16  ;;  %v14071_v15 = vcombine.high %v733_v11, %v737_v12  ;;  %v613_v43 = vld [vmem:[%s17643_s3 + $0x248] sm:$0xff]  ;;  %v14070_v24 = vcombine.low %v733_v11, %v737_v12 }
 0x20c   : > { %5481 = vmatprep.subr.bf16.mxu1 %v14023_v19  ;;  %v617_v16 = vld [vmem:[%s17643_s3 + $0x268] sm:$0xff] }
 0x20d   : > { %5441 = vmatpush1.bf16.msra.mxu0 %v13894_v26  ;;  %v741_v18 = vld [vmem:[%s17643_s3 + $0x648] sm:$0xff]  ;;  %v13951_v25 = vcombine.high %v613_v43, %v617_v16  ;;  %v13950_v31 = vcombine.low %v613_v43, %v617_v16 }
 0x20e   : > { %5442 = vmatprep.subr.bf16.mxu0 %v13903_v55  ;;  %v745_v19 = vld [vmem:[%s17643_s3 + $0x668] sm:$0xff] }
 0x20f   : > { %5482 = vmatpush1.bf16.msra.mxu1 %v14022_v27  ;;  %v14079_v54 = vcombine.high %v741_v18, %v745_v19  ;;  %v621_v26 = vld [vmem:[%s17643_s3 + $0x288] sm:$0xff]  ;;  %v14078_v32 = vcombine.low %v741_v18, %v745_v19 }
 0x210   : > { %5483 = vmatprep.subr.bf16.mxu1 %v14031_v29  ;;  %v625_v27 = vld [vmem:[%s17643_s3 + $0x2a8] sm:$0xff] }
 0x211   : > { %5443 = vmatpush1.bf16.msra.mxu0 %v13902_v35  ;;  %v749_v55 = vld [vmem:[%s17643_s3 + $0x688] sm:$0xff]  ;;  %v13959_v33 = vcombine.high %v621_v26, %v625_v27  ;;  %v13958_v42 = vcombine.low %v621_v26, %v625_v27 }
 0x212   : > { %5444 = vmatprep.subr.bf16.mxu0 %v13911_v38  ;;  %v753_v29 = vld [vmem:[%s17643_s3 + $0x6a8] sm:$0xff] }
 0x213   : > { %5484 = vmatpush1.bf16.msra.mxu1 %v14030_v36  ;;  %v14087_v34 = vcombine.high %v749_v55, %v753_v29  ;;  %v629_v35 = vld [vmem:[%s17643_s3 + $0x2c8] sm:$0xff]  ;;  %v14086_v44 = vcombine.low %v749_v55, %v753_v29 }
 0x214   : > { %5485 = vmatprep.subr.bf16.mxu1 %v14039_v39  ;;  %v633_v36 = vld [vmem:[%s17643_s3 + $0x2e8] sm:$0xff] }
 0x215   : > { %5445 = vmatpush1.bf16.msra.mxu0 %v13910_v46  ;;  %v757_v38 = vld [vmem:[%s17643_s3 + $0x6c8] sm:$0xff]  ;;  %v13967_v45 = vcombine.high %v629_v35, %v633_v36  ;;  %v13966_v51 = vcombine.low %v629_v35, %v633_v36 }
 0x216   : > { %5446 = vmatprep.subr.bf16.mxu0 %v13919_v23  ;;  %v761_v39 = vld [vmem:[%s17643_s3 + $0x6e8] sm:$0xff] }
 0x217   : > { %5486 = vmatpush1.bf16.msra.mxu1 %v14038_v47  ;;  %v14095_v20 = vcombine.high %v757_v38, %v761_v39  ;;  %v637_v46 = vld [vmem:[%s17643_s3 + $0x308] sm:$0xff]  ;;  %v14094_v52 = vcombine.low %v757_v38, %v761_v39 }
 0x218   : > { %5487 = vmatprep.subr.bf16.mxu1 %v14047_v49  ;;  %v641_v47 = vld [vmem:[%s17643_s3 + $0x328] sm:$0xff] }
 0x219   : > { %5447 = vmatpush1.bf16.msra.mxu0 %v13918_v57  ;;  %v765_v23 = vld [vmem:[%s17643_s3 + $0x708] sm:$0xff]  ;;  %v13975_v53 = vcombine.high %v637_v46, %v641_v47  ;;  %v13974_v63 = vcombine.low %v637_v46, %v641_v47 }
 0x21a   : > { %5448 = vmatprep.subr.bf16.mxu0 %v13927_v61  ;;  %v769_v49 = vld [vmem:[%s17643_s3 + $0x728] sm:$0xff] }
 0x21b   : > { %5488 = vmatpush1.bf16.msra.mxu1 %v14046_v58  ;;  %v14103_v56 = vcombine.high %v765_v23, %v769_v49  ;;  %v645_v57 = vld [vmem:[%s17643_s3 + $0x348] sm:$0xff]  ;;  %v14102_v0 = vcombine.low %v765_v23, %v769_v49 }
 0x21c   : > { %5489 = vmatprep.subr.bf16.mxu1 %v14055_v62  ;;  %v649_v58 = vld [vmem:[%s17643_s3 + $0x368] sm:$0xff] }
 0x21d   : > { %5449 = vmatpush1.bf16.msra.mxu0 %v13926_v3  ;;  %v773_v61 = vld [vmem:[%s17643_s3 + $0x748] sm:$0xff]  ;;  %v13983_v1 = vcombine.high %v645_v57, %v649_v58  ;;  %v13982_v9 = vcombine.low %v645_v57, %v649_v58 }
 0x21e   : > { %5450 = vmatprep.subr.bf16.mxu0 %v13935_v6  ;;  %v777_v62 = vld [vmem:[%s17643_s3 + $0x768] sm:$0xff] }
 0x21f   : > { %5490 = vmatpush1.bf16.msra.mxu1 %v14054_v4  ;;  %v14111_v2 = vcombine.high %v773_v61, %v777_v62  ;;  %v653_v3 = vld [vmem:[%s17643_s3 + $0x388] sm:$0xff]  ;;  %v14110_v10 = vcombine.low %v773_v61, %v777_v62 }
 0x220   : > { %5491 = vmatprep.subr.bf16.mxu1 %v14063_v7  ;;  %v657_v4 = vld [vmem:[%s17643_s3 + $0x3a8] sm:$0xff] }
 0x221   : > { %5451 = vmatpush1.bf16.msra.mxu0 %v13934_v13  ;;  %v781_v6 = vld [vmem:[%s17643_s3 + $0x788] sm:$0xff]  ;;  %v13991_v11 = vcombine.high %v653_v3, %v657_v4  ;;  %v13990_v43 = vcombine.low %v653_v3, %v657_v4 }
 0x222   : > { %5452 = vmatprep.subr.bf16.mxu0 %v13943_v14  ;;  %v785_v7 = vld [vmem:[%s17643_s3 + $0x7a8] sm:$0xff] }
 0x223   : > { %5492 = vmatpush1.bf16.msra.mxu1 %v14062_v40  ;;  %v14119_v12 = vcombine.high %v781_v6, %v785_v7  ;;  %v661_v13 = vld [vmem:[%s17643_s3 + $0x3c8] sm:$0xff]  ;;  %v14118_v16 = vcombine.low %v781_v6, %v785_v7 }
 0x224   : > { %5493 = vmatprep.subr.bf16.mxu1 %v14071_v15  ;;  %v665_v40 = vld [vmem:[%s17643_s3 + $0x3e8] sm:$0xff] }
 0x225   : > { %5453 = vmatpush1.bf16.msra.mxu0 %v13942_v22  ;;  %v789_v14 = vld [vmem:[%s17643_s3 + $0x7c8] sm:$0xff]  ;;  %v13999_v18 = vcombine.high %v661_v13, %v665_v40  ;;  %v13998_v26 = vcombine.low %v661_v13, %v665_v40 }
 0x226   : > { %5454 = vmatprep.subr.bf16.mxu0 %v13951_v25  ;;  %v793_v15 = vld [vmem:[%s17643_s3 + $0x7e8] sm:$0xff] }
 0x227   : > { %5494 = vmatpush1.bf16.msra.mxu1 %v14070_v24  ;;  %v14127_v19 = vcombine.high %v789_v14, %v793_v15  ;;  %v797_v22 = vld [vmem:[%s17643_s3 + $0x808] sm:$0xff]  ;;  %v14126_v27 = vcombine.low %v789_v14, %v793_v15 }
 0x228   : > { %5495 = vmatprep.subr.bf16.mxu1 %v14079_v54  ;;  %v801_v24 = vld [vmem:[%s17643_s3 + $0x828] sm:$0xff] }
 0x229   : > { %5455 = vmatpush1.bf16.msra.mxu0 %v13950_v31  ;;  %v925_v25 = vld [vmem:[%s17643_s3 + $0xc08] sm:$0xff]  ;;  %v14135_v55 = vcombine.high %v797_v22, %v801_v24  ;;  %v14134_v35 = vcombine.low %v797_v22, %v801_v24 }
 0x22a   : > { %5456 = vmatprep.subr.bf16.mxu0 %v13959_v33  ;;  %v929_v54 = vld [vmem:[%s17643_s3 + $0xc28] sm:$0xff] }
 0x22b   : > { %5496 = vmatpush1.bf16.msra.mxu1 %v14078_v32  ;;  %v14263_v29 = vcombine.high %v925_v25, %v929_v54  ;;  %v805_v31 = vld [vmem:[%s17643_s3 + $0x848] sm:$0xff]  ;;  %v14262_v36 = vcombine.low %v925_v25, %v929_v54 }
 0x22c   : > { %5497 = vmatprep.subr.bf16.mxu1 %v14087_v34  ;;  %v809_v32 = vld [vmem:[%s17643_s3 + $0x868] sm:$0xff] }
 0x22d   : > { %5457 = vmatpush1.bf16.msra.mxu0 %v13958_v42  ;;  %v933_v33 = vld [vmem:[%s17643_s3 + $0xc48] sm:$0xff]  ;;  %v14143_v38 = vcombine.high %v805_v31, %v809_v32  ;;  %v14142_v46 = vcombine.low %v805_v31, %v809_v32 }
 0x22e   : > { %5458 = vmatprep.subr.bf16.mxu0 %v13967_v45  ;;  %v937_v34 = vld [vmem:[%s17643_s3 + $0xc68] sm:$0xff] }
 0x22f   : > { %5498 = vmatpush1.bf16.msra.mxu1 %v14086_v44  ;;  %v14271_v39 = vcombine.high %v933_v33, %v937_v34  ;;  %v813_v42 = vld [vmem:[%s17643_s3 + $0x888] sm:$0xff]  ;;  %v14270_v47 = vcombine.low %v933_v33, %v937_v34 }
 0x230   : > { %5499 = vmatprep.subr.bf16.mxu1 %v14095_v20  ;;  %v817_v44 = vld [vmem:[%s17643_s3 + $0x8a8] sm:$0xff] }
 0x231   : > { %5459 = vmatpush1.bf16.msra.mxu0 %v13966_v51  ;;  %v941_v45 = vld [vmem:[%s17643_s3 + $0xc88] sm:$0xff]  ;;  %v14151_v23 = vcombine.high %v813_v42, %v817_v44  ;;  %v14150_v57 = vcombine.low %v813_v42, %v817_v44 }
 0x232   : > { %5460 = vmatprep.subr.bf16.mxu0 %v13975_v53  ;;  %v945_v20 = vld [vmem:[%s17643_s3 + $0xca8] sm:$0xff] }
 0x233   : > { %5500 = vmatpush1.bf16.msra.mxu1 %v14094_v52  ;;  %v14279_v49 = vcombine.high %v941_v45, %v945_v20  ;;  %v821_v51 = vld [vmem:[%s17643_s3 + $0x8c8] sm:$0xff]  ;;  %v14278_v58 = vcombine.low %v941_v45, %v945_v20 }
 0x234   : > { %5501 = vmatprep.subr.bf16.mxu1 %v14103_v56  ;;  %v825_v52 = vld [vmem:[%s17643_s3 + $0x8e8] sm:$0xff] }
 0x235   : > { %5461 = vmatpush1.bf16.msra.mxu0 %v13974_v63  ;;  %v949_v53 = vld [vmem:[%s17643_s3 + $0xcc8] sm:$0xff]  ;;  %v14159_v61 = vcombine.high %v821_v51, %v825_v52  ;;  %v14158_v3 = vcombine.low %v821_v51, %v825_v52 }
 0x236   : > { %5462 = vmatprep.subr.bf16.mxu0 %v13983_v1  ;;  %v953_v56 = vld [vmem:[%s17643_s3 + $0xce8] sm:$0xff] }
 0x237   : > { %5502 = vmatpush1.bf16.msra.mxu1 %v14102_v0  ;;  %v14287_v62 = vcombine.high %v949_v53, %v953_v56  ;;  %v829_v63 = vld [vmem:[%s17643_s3 + $0x908] sm:$0xff]  ;;  %v14286_v4 = vcombine.low %v949_v53, %v953_v56 }
 0x238   : > { %5503 = vmatprep.subr.bf16.mxu1 %v14111_v2  ;;  %v833_v0 = vld [vmem:[%s17643_s3 + $0x928] sm:$0xff] }
 0x239   : > { %5463 = vmatpush1.bf16.msra.mxu0 %v13982_v9  ;;  %v957_v1 = vld [vmem:[%s17643_s3 + $0xd08] sm:$0xff]  ;;  %v14167_v6 = vcombine.high %v829_v63, %v833_v0  ;;  %v14166_v13 = vcombine.low %v829_v63, %v833_v0 }
 0x23a   : > { %5464 = vmatprep.subr.bf16.mxu0 %v13991_v11  ;;  %v961_v2 = vld [vmem:[%s17643_s3 + $0xd28] sm:$0xff] }
 0x23b   : > { %5504 = vmatpush1.bf16.msra.mxu1 %v14110_v10  ;;  %v14295_v7 = vcombine.high %v957_v1, %v961_v2  ;;  %v837_v9 = vld [vmem:[%s17643_s3 + $0x948] sm:$0xff]  ;;  %v14294_v40 = vcombine.low %v957_v1, %v961_v2 }
 0x23c   : > { %5505 = vmatprep.subr.bf16.mxu1 %v14119_v12  ;;  %v841_v10 = vld [vmem:[%s17643_s3 + $0x968] sm:$0xff] }
 0x23d   : > { %5465 = vmatpush1.bf16.msra.mxu0 %v13990_v43  ;;  %v965_v11 = vld [vmem:[%s17643_s3 + $0xd48] sm:$0xff]  ;;  %v14175_v14 = vcombine.high %v837_v9, %v841_v10  ;;  %v14174_v22 = vcombine.low %v837_v9, %v841_v10 }
 0x23e   : > { %5466 = vmatprep.subr.bf16.mxu0 %v13999_v18  ;;  %v969_v12 = vld [vmem:[%s17643_s3 + $0xd68] sm:$0xff] }
 0x23f   : > { %5506 = vmatpush1.bf16.msra.mxu1 %v14118_v16  ;;  %v14303_v15 = vcombine.high %v965_v11, %v969_v12  ;;  %v845_v43 = vld [vmem:[%s17643_s3 + $0x988] sm:$0xff]  ;;  %v14302_v24 = vcombine.low %v965_v11, %v969_v12 }
 0x240   : > { %5507 = vmatprep.subr.bf16.mxu1 %v14127_v19  ;;  %v849_v16 = vld [vmem:[%s17643_s3 + $0x9a8] sm:$0xff] }
 0x241   : > { %5467 = vmatpush1.bf16.msra.mxu0 %v13998_v26  ;;  %v973_v18 = vld [vmem:[%s17643_s3 + $0xd88] sm:$0xff]  ;;  %v14183_v25 = vcombine.high %v845_v43, %v849_v16 }
 0x242   : > { %5518 = vmatprep.subr.bf16.mxu0 %v14135_v55  ;;  %v977_v19 = vld [vmem:[%s17643_s3 + $0xda8] sm:$0xff] }
 0x243   : > { %5508 = vmatpush1.bf16.msra.mxu1 %v14126_v27  ;;  %v14311_v26 = vcombine.high %v973_v18, %v977_v19  ;;  %v853_v27 = vld [vmem:[%s17643_s3 + $0x9c8] sm:$0xff]  ;;  %v14310_v45 = vcombine.low %v973_v18, %v977_v19 }
 0x244   : > { %5559 = vmatprep.subr.bf16.mxu1 %v14263_v29  ;;  %5469 = vmatmul.mubr.bf16.vlgmr.msra.gmra.mrb[12].mxu0 %v17759_v17  ;;  %v857_v55 = vld [vmem:[%s17643_s3 + $0x9e8] sm:$0xff] }
 0x245   : > { %5519 = vmatpush1.bf16.msra.mxu0 %v14134_v35  ;;  %5550 = vmatprep.mubr.bf16.mxu0 %v17777_v28  ;;  %v981_v32 = vld [vmem:[%s17643_s3 + $0xdc8] sm:$0xff]  ;;  %v14191_v20 = vcombine.high %v853_v27, %v857_v55  ;;  %v14190_v53 = vcombine.low %v853_v27, %v857_v55 }
 0x246   : > { %5510 = vmatmul.mubr.bf16.vlgmr.msra.gmra.mrb[12].mxu1 %v17768_v21  ;;  %5520 = vmatprep.subr.bf16.mxu0 %v14143_v38  ;;  %v985_v33 = vld [vmem:[%s17643_s3 + $0xde8] sm:$0xff]  ;;  %v14182_v38 = vcombine.low %v845_v43, %v849_v16 }
 0x247   : > { %5560 = vmatpush1.bf16.msra.mxu1 %v14262_v36  ;;  %5591 = vmatprep.mubr.bf16.mxu1 %v17784_v30  ;;  %v989_v51 = vld [vmem:[%s17643_s3 + $0xe08] sm:$0xff]  ;;  %v14318_v56 = vcombine.low %v981_v32, %v985_v33 }
 0x248   : > { %5561 = vmatprep.subr.bf16.mxu1 %v14271_v39  ;;  %v993_v52 = vld [vmem:[%s17643_s3 + $0xe28] sm:$0xff] }
 0x249   : > { %5521 = vmatpush1.bf16.msra.mxu0 %v14142_v46  ;;  %v997_v63 = vld [vmem:[%s17643_s3 + $0xe48] sm:$0xff]  ;;  %v14326_v2 = vcombine.low %v989_v51, %v993_v52 }
 0x24a   : > { %5522 = vmatprep.subr.bf16.mxu0 %v14151_v23  ;;  %v861_v23 = vld [vmem:[%s17643_s3 + $0xa08] sm:$0xff] }
 0x24b   : > { %5562 = vmatpush1.bf16.msra.mxu1 %v14270_v47  ;;  %v14319_v47 = vcombine.high %v981_v32, %v985_v33  ;;  %v1001_v0 = vld [vmem:[%s17643_s3 + $0xe68] sm:$0xff] }
 0x24c   : > { %5563 = vmatprep.subr.bf16.mxu1 %v14279_v49  ;;  %v865_v49 = vld [vmem:[%s17643_s3 + $0xa28] sm:$0xff]  ;;  %v14334_v12 = vcombine.low %v997_v63, %v1001_v0 }
 0x24d   : > { %5523 = vmatpush1.bf16.msra.mxu0 %v14150_v57  ;;  %v14199_v57 = vcombine.high %v861_v23, %v865_v49  ;;  %v14198_v1 = vcombine.low %v861_v23, %v865_v49  ;;  %v1005_v9 = vld [vmem:[%s17643_s3 + $0xe88] sm:$0xff] }
 0x24e   : > { %5524 = vmatprep.subr.bf16.mxu0 %v14159_v61  ;;  %v869_v61 = vld [vmem:[%s17643_s3 + $0xa48] sm:$0xff] }
 0x24f   : > { %5564 = vmatpush1.bf16.msra.mxu1 %v14278_v58  ;;  %v14327_v58 = vcombine.high %v989_v51, %v993_v52  ;;  %v1009_v10 = vld [vmem:[%s17643_s3 + $0xea8] sm:$0xff] }
 0x250   : > { %5565 = vmatprep.subr.bf16.mxu1 %v14287_v62  ;;  %v873_v62 = vld [vmem:[%s17643_s3 + $0xa68] sm:$0xff]  ;;  %v14342_v19 = vcombine.low %v1005_v9, %v1009_v10 }
 0x251   : > { %5525 = vmatpush1.bf16.msra.mxu0 %v14158_v3  ;;  %v14207_v3 = vcombine.high %v869_v61, %v873_v62  ;;  %v14206_v11 = vcombine.low %v869_v61, %v873_v62  ;;  %v1013_v43 = vld [vmem:[%s17643_s3 + $0xec8] sm:$0xff] }
 0x252   : > { %5526 = vmatprep.subr.bf16.mxu0 %v14167_v6  ;;  %v877_v6 = vld [vmem:[%s17643_s3 + $0xa88] sm:$0xff] }
 0x253   : > { %5566 = vmatpush1.bf16.msra.mxu1 %v14286_v4  ;;  %v14335_v4 = vcombine.high %v997_v63, %v1001_v0  ;;  %v1017_v16 = vld [vmem:[%s17643_s3 + $0xee8] sm:$0xff] }
 0x254   : > { %5567 = vmatprep.subr.bf16.mxu1 %v14295_v7  ;;  %v881_v7 = vld [vmem:[%s17643_s3 + $0xaa8] sm:$0xff] }
 0x255   : > { %5527 = vmatpush1.bf16.msra.mxu0 %v14166_v13  ;;  %v5224_v54 = vpop.f32.mrb[0].mxu0  ;;  %v14215_v13 = vcombine.high %v877_v6, %v881_v7  ;;  %v14214_v18 = vcombine.low %v877_v6, %v881_v7  ;;  %v1025_v27 = vld [vmem:[%s17643_s3 + $0xf28] sm:$0xff] }
 0x256   : > { %5528 = vmatprep.subr.bf16.mxu0 %v14175_v14  ;;  %v5226_v31 = vpop.f32.mrb[1].mxu0  ;;  %v885_v14 = vld [vmem:[%s17643_s3 + $0xac8] sm:$0xff] }
 0x257   : > { %5568 = vmatpush1.bf16.msra.mxu1 %v14294_v40  ;;  %v5265_v29 = vpop.f32.mrb[0].mxu1  ;;  %v5228_v36 = vpop.f32.mrb[2].mxu0  ;;  %v14343_v40 = vcombine.high %v1005_v9, %v1009_v10  ;;  %v901_v33 = vld [vmem:[%s17643_s3 + $0xb48] sm:$0xff] }
 0x258   : > { %5569 = vmatprep.subr.bf16.mxu1 %v14303_v15  ;;  %v18043_v34 = vadd.f32 %v5265_v29, %v5224_v54  ;;  %v5267_v35 = vpop.f32.mrb[1].mxu1  ;;  %v5229_v44 = vpop.f32.mrb[3].mxu0  ;;  %v889_v15 = vld [vmem:[%s17643_s3 + $0xae8] sm:$0xff]  ;;  %v14350_v29 = vcombine.low %v1013_v43, %v1017_v16 }
 0x259   : > { %5529 = vmatpush1.bf16.msra.mxu0 %v14174_v22  ;;  %v18045_v39 = vadd.f32 %v5267_v35, %v5226_v31  ;;  %v5269_v42 = vpop.f32.mrb[2].mxu1  ;;  %v14223_v22 = vcombine.high %v885_v14, %v889_v15  ;;  %v897_v54 = vld [vmem:[%s17643_s3 + $0xb28] sm:$0xff]  ;;  %v14222_v55 = vcombine.low %v885_v14, %v889_v15 }
 0x25a   : > { %5530 = vmatprep.subr.bf16.mxu0 %v14183_v25  ;;  %v5270_v46 = vpop.f32.mrb[3].mxu1  ;;  %v893_v25 = vld [vmem:[%s17643_s3 + $0xb08] sm:$0xff] }
 0x25b   : > { %5570 = vmatpush1.bf16.msra.mxu1 %v14302_v24  ;;  %v14351_v24 = vcombine.high %v1013_v43, %v1017_v16  ;;  %v14231_v31 = vcombine.high %v893_v25, %v897_v54  ;;  %v905_v35 = vld [vmem:[%s17643_s3 + $0xb68] sm:$0xff]  ;;  %v14230_v42 = vcombine.low %v893_v25, %v897_v54 }
 0x25c   : > { %5571 = vmatprep.subr.bf16.mxu1 %v14311_v26  ;;  %v1021_v26 = vld [vmem:[%s17643_s3 + $0xf08] sm:$0xff]  ;;  %v14238_v51 = vcombine.low %v901_v33, %v905_v35 }
 0x25d   : > { %5531 = vmatpush1.bf16.msra.mxu0 %v14182_v38  ;;  %v14359_v32 = vcombine.high %v1021_v26, %v1025_v27  ;;  %v1029_v36 = vld [vmem:[%s17643_s3 + $0xf48] sm:$0xff]  ;;  %v14358_v44 = vcombine.low %v1021_v26, %v1025_v27 }
 0x25e   : > { %5532 = vmatprep.subr.bf16.mxu0 %v14191_v20  ;;  %v1033_v38 = vld [vmem:[%s17643_s3 + $0xf68] sm:$0xff] }
 0x25f   : > { %5572 = vmatpush1.bf16.msra.mxu1 %v14310_v45  ;;  %v14239_v45 = vcombine.high %v901_v33, %v905_v35  ;;  %v14367_v20 = vcombine.high %v1029_v36, %v1033_v38  ;;  %v909_v46 = vld [vmem:[%s17643_s3 + $0xb88] sm:$0xff]  ;;  %v14366_v52 = vcombine.low %v1029_v36, %v1033_v38 }
 0x260   : > { %5573 = vmatprep.subr.bf16.mxu1 %v14319_v47  ;;  %v913_v47 = vld [vmem:[%s17643_s3 + $0xba8] sm:$0xff] }
 0x261   : > { %5533 = vmatpush1.bf16.msra.mxu0 %v14190_v53  ;;  %v1037_v23 = vld [vmem:[%s17643_s3 + $0xf88] sm:$0xff]  ;;  %v14247_v53 = vcombine.high %v909_v46, %v913_v47  ;;  %v14246_v63 = vcombine.low %v909_v46, %v913_v47 }
 0x262   : > { %5534 = vmatprep.subr.bf16.mxu0 %v14199_v57  ;;  %v1041_v49 = vld [vmem:[%s17643_s3 + $0xfa8] sm:$0xff] }
 0x263   : > { %5574 = vmatpush1.bf16.msra.mxu1 %v14318_v56  ;;  %v14375_v56 = vcombine.high %v1037_v23, %v1041_v49  ;;  %v917_v57 = vld [vmem:[%s17643_s3 + $0xbc8] sm:$0xff]  ;;  %v14374_v0 = vcombine.low %v1037_v23, %v1041_v49 }
 0x264   : > { %5575 = vmatprep.subr.bf16.mxu1 %v14327_v58  ;;  %v921_v58 = vld [vmem:[%s17643_s3 + $0xbe8] sm:$0xff] }
 0x265   : > { %5535 = vmatpush1.bf16.msra.mxu0 %v14198_v1  ;;  %v1045_v61 = vld [vmem:[%s17643_s3 + $0xfc8] sm:$0xff]  ;;  %v14255_v1 = vcombine.high %v917_v57, %v921_v58  ;;  %v14254_v9 = vcombine.low %v917_v57, %v921_v58 }
 0x266   : > { %5536 = vmatprep.subr.bf16.mxu0 %v14207_v3  ;;  %v1049_v62 = vld [vmem:[%s17643_s3 + $0xfe8] sm:$0xff] }
 0x267   : > { %5576 = vmatpush1.bf16.msra.mxu1 %v14326_v2  ;;  %v14383_v2 = vcombine.high %v1045_v61, %v1049_v62  ;;  %v1053_v3 = vld [vmem:[%s17643_s3 + $0x1008] sm:$0xff]  ;;  %v14382_v10 = vcombine.low %v1045_v61, %v1049_v62 }
 0x268   : > { %5577 = vmatprep.subr.bf16.mxu1 %v14335_v4  ;;  %v1057_v4 = vld [vmem:[%s17643_s3 + $0x1028] sm:$0xff] }
 0x269   : > { %5537 = vmatpush1.bf16.msra.mxu0 %v14206_v11  ;;  %v1181_v6 = vld [vmem:[%s17643_s3 + $0x1408] sm:$0xff]  ;;  %v14391_v11 = vcombine.high %v1053_v3, %v1057_v4  ;;  %v14390_v43 = vcombine.low %v1053_v3, %v1057_v4 }
 0x26a   : > { %5538 = vmatprep.subr.bf16.mxu0 %v14215_v13  ;;  %v1185_v7 = vld [vmem:[%s17643_s3 + $0x1428] sm:$0xff] }
 0x26b   : > { %5578 = vmatpush1.bf16.msra.mxu1 %v14334_v12  ;;  %v14519_v12 = vcombine.high %v1181_v6, %v1185_v7  ;;  %v1061_v13 = vld [vmem:[%s17643_s3 + $0x1048] sm:$0xff]  ;;  %v14518_v16 = vcombine.low %v1181_v6, %v1185_v7 }
 0x26c   : > { %5579 = vmatprep.subr.bf16.mxu1 %v14343_v40  ;;  %v1065_v40 = vld [vmem:[%s17643_s3 + $0x1068] sm:$0xff] }
 0x26d   : > { %5539 = vmatpush1.bf16.msra.mxu0 %v14214_v18  ;;  %v1189_v14 = vld [vmem:[%s17643_s3 + $0x1448] sm:$0xff]  ;;  %v14399_v18 = vcombine.high %v1061_v13, %v1065_v40  ;;  %v14398_v26 = vcombine.low %v1061_v13, %v1065_v40 }
 0x26e   : > { %5540 = vmatprep.subr.bf16.mxu0 %v14223_v22  ;;  %v1193_v15 = vld [vmem:[%s17643_s3 + $0x1468] sm:$0xff] }
 0x26f   : > { %5580 = vmatpush1.bf16.msra.mxu1 %v14342_v19  ;;  %v14527_v19 = vcombine.high %v1189_v14, %v1193_v15  ;;  %v1069_v22 = vld [vmem:[%s17643_s3 + $0x1088] sm:$0xff]  ;;  %v14526_v27 = vcombine.low %v1189_v14, %v1193_v15 }
 0x270   : > { %5581 = vmatprep.subr.bf16.mxu1 %v14351_v24  ;;  %v1073_v24 = vld [vmem:[%s17643_s3 + $0x10a8] sm:$0xff] }
 0x271   : > { %5541 = vmatpush1.bf16.msra.mxu0 %v14222_v55  ;;  %v1197_v25 = vld [vmem:[%s17643_s3 + $0x1488] sm:$0xff]  ;;  %v14407_v55 = vcombine.high %v1069_v22, %v1073_v24  ;;  %v14406_v36 = vcombine.low %v1069_v22, %v1073_v24 }
 0x272   : > { %5542 = vmatprep.subr.bf16.mxu0 %v14231_v31  ;;  %v1201_v54 = vld [vmem:[%s17643_s3 + $0x14a8] sm:$0xff] }
 0x273   : > { %5582 = vmatpush1.bf16.msra.mxu1 %v14350_v29  ;;  %v14535_v29 = vcombine.high %v1197_v25, %v1201_v54  ;;  %v1077_v31 = vld [vmem:[%s17643_s3 + $0x10c8] sm:$0xff]  ;;  %v14534_v38 = vcombine.low %v1197_v25, %v1201_v54 }
 0x274   : > { %5583 = vmatprep.subr.bf16.mxu1 %v14359_v32  ;;  %v1081_v32 = vld [vmem:[%s17643_s3 + $0x10e8] sm:$0xff] }
 0x275   : > { %5543 = vmatpush1.bf16.msra.mxu0 %v14230_v42  ;;  %v1205_v33 = vld [vmem:[%s17643_s3 + $0x14c8] sm:$0xff]  ;;  %v14415_v42 = vcombine.high %v1077_v31, %v1081_v32  ;;  %v14414_v23 = vcombine.low %v1077_v31, %v1081_v32 }
 0x276   : > { %5544 = vmatprep.subr.bf16.mxu0 %v14239_v45  ;;  %v1209_v35 = vld [vmem:[%s17643_s3 + $0x14e8] sm:$0xff] }
 0x277   : > { %5584 = vmatpush1.bf16.msra.mxu1 %v14358_v44  ;;  %v14543_v44 = vcombine.high %v1205_v33, %v1209_v35  ;;  %v1085_v45 = vld [vmem:[%s17643_s3 + $0x1108] sm:$0xff]  ;;  %v14542_v49 = vcombine.low %v1205_v33, %v1209_v35 }
 0x278   : > { %5585 = vmatprep.subr.bf16.mxu1 %v14367_v20  ;;  %v1089_v20 = vld [vmem:[%s17643_s3 + $0x1128] sm:$0xff] }
 0x279   : > { %5545 = vmatpush1.bf16.msra.mxu0 %v14238_v51  ;;  %v1213_v46 = vld [vmem:[%s17643_s3 + $0x1508] sm:$0xff]  ;;  %v14423_v51 = vcombine.high %v1085_v45, %v1089_v20  ;;  %v14422_v61 = vcombine.low %v1085_v45, %v1089_v20 }
 0x27a   : > { %5546 = vmatprep.subr.bf16.mxu0 %v14247_v53  ;;  %v1217_v47 = vld [vmem:[%s17643_s3 + $0x1528] sm:$0xff] }
 0x27b   : > { %5586 = vmatpush1.bf16.msra.mxu1 %v14366_v52  ;;  %v14551_v52 = vcombine.high %v1213_v46, %v1217_v47  ;;  %v1093_v53 = vld [vmem:[%s17643_s3 + $0x1148] sm:$0xff]  ;;  %v14550_v62 = vcombine.low %v1213_v46, %v1217_v47 }
 0x27c   : > { %5587 = vmatprep.subr.bf16.mxu1 %v14375_v56  ;;  %v1097_v56 = vld [vmem:[%s17643_s3 + $0x1168] sm:$0xff] }
 0x27d   : > { %5547 = vmatpush1.bf16.msra.mxu0 %v14246_v63  ;;  %v1221_v57 = vld [vmem:[%s17643_s3 + $0x1548] sm:$0xff]  ;;  %v14431_v63 = vcombine.high %v1093_v53, %v1097_v56  ;;  %v14430_v6 = vcombine.low %v1093_v53, %v1097_v56 }
 0x27e   : > { %5548 = vmatprep.subr.bf16.mxu0 %v14255_v1  ;;  %v1225_v58 = vld [vmem:[%s17643_s3 + $0x1568] sm:$0xff] }
 0x27f   : > { %5588 = vmatpush1.bf16.msra.mxu1 %v14374_v0  ;;  %v14559_v0 = vcombine.high %v1221_v57, %v1225_v58  ;;  %v1101_v1 = vld [vmem:[%s17643_s3 + $0x1188] sm:$0xff]  ;;  %v14558_v7 = vcombine.low %v1221_v57, %v1225_v58 }
 0x280   : > { %5589 = vmatprep.subr.bf16.mxu1 %v14383_v2  ;;  %v1105_v2 = vld [vmem:[%s17643_s3 + $0x11a8] sm:$0xff] }
 0x281   : > { %5549 = vmatpush1.bf16.msra.mxu0 %v14254_v9  ;;  %v1229_v3 = vld [vmem:[%s17643_s3 + $0x1588] sm:$0xff]  ;;  %v14439_v9 = vcombine.high %v1101_v1, %v1105_v2  ;;  %v14438_v24 = vcombine.low %v1101_v1, %v1105_v2 }
 0x282   : > { %5600 = vmatprep.subr.bf16.mxu0 %v14391_v11  ;;  %v1233_v4 = vld [vmem:[%s17643_s3 + $0x15a8] sm:$0xff] }
 0x283   : > { %5590 = vmatpush1.bf16.msra.mxu1 %v14382_v10  ;;  %v14567_v11 = vcombine.high %v1229_v3, %v1233_v4  ;;  %v1113_v13 = vld [vmem:[%s17643_s3 + $0x11e8] sm:$0xff] }
 0x284   : > { %5641 = vmatprep.subr.bf16.mxu1 %v14519_v12  ;;  %5551 = vmatmul.mubr.bf16.vlgmr.msra.gmra.mrb[16].mxu0 %v17849_v37  ;;  %v1109_v12 = vld [vmem:[%s17643_s3 + $0x11c8] sm:$0xff] }
 0x285   : > { %5601 = vmatpush1.bf16.msra.mxu0 %v14390_v43  ;;  %5632 = vmatprep.mubr.bf16.mxu0 %v17867_v48  ;;  %v1237_v43 = vld [vmem:[%s17643_s3 + $0x15c8] sm:$0xff] }
 0x286   : > { %5592 = vmatmul.mubr.bf16.vlgmr.msra.gmra.mrb[16].mxu1 %v17858_v41  ;;  %5602 = vmatprep.subr.bf16.mxu0 %v14399_v18  ;;  %v1117_v31 = vld [vmem:[%s17643_s3 + $0x1208] sm:$0xff] }
 0x287   : > { %5642 = vmatpush1.bf16.msra.mxu1 %v14518_v16  ;;  %5673 = vmatprep.mubr.bf16.mxu1 %v17874_v50  ;;  %v1241_v16 = vld [vmem:[%s17643_s3 + $0x15e8] sm:$0xff] }
 0x288   : > { %5643 = vmatprep.subr.bf16.mxu1 %v14527_v19  ;;  %v1121_v32 = vld [vmem:[%s17643_s3 + $0x1228] sm:$0xff] }
 0x289   : > { %5603 = vmatpush1.bf16.msra.mxu0 %v14398_v26  ;;  %v1245_v33 = vld [vmem:[%s17643_s3 + $0x1608] sm:$0xff] }
 0x28a   : > { %5604 = vmatprep.subr.bf16.mxu0 %v14407_v55  ;;  %v1249_v35 = vld [vmem:[%s17643_s3 + $0x1628] sm:$0xff] }
 0x28b   : > { %5644 = vmatpush1.bf16.msra.mxu1 %v14526_v27  ;;  %v14447_v27 = vcombine.high %v1109_v12, %v1113_v13  ;;  %v1125_v45 = vld [vmem:[%s17643_s3 + $0x1248] sm:$0xff] }
 0x28c   : > { %5645 = vmatprep.subr.bf16.mxu1 %v14535_v29  ;;  %v14575_v29 = vcombine.high %v1237_v43, %v1241_v16  ;;  %v1129_v20 = vld [vmem:[%s17643_s3 + $0x1268] sm:$0xff] }
 0x28d   : > { %5605 = vmatpush1.bf16.msra.mxu0 %v14406_v36  ;;  %v14446_v36 = vcombine.low %v1109_v12, %v1113_v13  ;;  %v1253_v46 = vld [vmem:[%s17643_s3 + $0x1648] sm:$0xff] }
 0x28e   : > { %5606 = vmatprep.subr.bf16.mxu0 %v14415_v42  ;;  %v14455_v42 = vcombine.high %v1117_v31, %v1121_v32  ;;  %v1257_v47 = vld [vmem:[%s17643_s3 + $0x1668] sm:$0xff] }
 0x28f   : > { %5646 = vmatpush1.bf16.msra.mxu1 %v14534_v38  ;;  %v14574_v38 = vcombine.low %v1237_v43, %v1241_v16  ;;  %v1133_v53 = vld [vmem:[%s17643_s3 + $0x1288] sm:$0xff] }
 0x290   : > { %5647 = vmatprep.subr.bf16.mxu1 %v14543_v44  ;;  %v14583_v44 = vcombine.high %v1245_v33, %v1249_v35  ;;  %v1137_v56 = vld [vmem:[%s17643_s3 + $0x12a8] sm:$0xff] }
 0x291   : > { %5607 = vmatpush1.bf16.msra.mxu0 %v14414_v23  ;;  %v14454_v23 = vcombine.low %v1117_v31, %v1121_v32  ;;  %v1261_v57 = vld [vmem:[%s17643_s3 + $0x1688] sm:$0xff] }
 0x292   : > { %5608 = vmatprep.subr.bf16.mxu0 %v14423_v51  ;;  %v14463_v51 = vcombine.high %v1125_v45, %v1129_v20  ;;  %v1265_v58 = vld [vmem:[%s17643_s3 + $0x16a8] sm:$0xff] }
 0x293   : > { %5648 = vmatpush1.bf16.msra.mxu1 %v14542_v49  ;;  %v14582_v49 = vcombine.low %v1245_v33, %v1249_v35  ;;  %v1141_v1 = vld [vmem:[%s17643_s3 + $0x12c8] sm:$0xff] }
 0x294   : > { %5649 = vmatprep.subr.bf16.mxu1 %v14551_v52  ;;  %v14591_v52 = vcombine.high %v1253_v46, %v1257_v47  ;;  %v1145_v2 = vld [vmem:[%s17643_s3 + $0x12e8] sm:$0xff] }
 0x295   : > { %5609 = vmatpush1.bf16.msra.mxu0 %v14422_v61  ;;  %v14462_v61 = vcombine.low %v1125_v45, %v1129_v20  ;;  %v1153_v12 = vld [vmem:[%s17643_s3 + $0x1328] sm:$0xff] }
 0x296   : > { %5610 = vmatprep.subr.bf16.mxu0 %v14431_v63  ;;  %v5306_v10 = vpop.f32.mrb[4].mxu0  ;;  %v14471_v63 = vcombine.high %v1133_v53, %v1137_v56  ;;  %v1277_v13 = vld [vmem:[%s17643_s3 + $0x1708] sm:$0xff] }
 0x297   : > { %5650 = vmatpush1.bf16.msra.mxu1 %v14550_v62  ;;  %v5307_v40 = vadd.f32 %v5306_v10, %v18043_v34  ;;  %v5308_v15 = vpop.f32.mrb[5].mxu0  ;;  %v14566_v34 = vcombine.low %v1229_v3, %v1233_v4  ;;  %v14590_v62 = vcombine.low %v1253_v46, %v1257_v47  ;;  %v1269_v3 = vld [vmem:[%s17643_s3 + $0x16c8] sm:$0xff] }
 0x298   : > { %5651 = vmatprep.subr.bf16.mxu1 %v14559_v0  ;;  %v5347_v14 = vpop.f32.mrb[4].mxu1  ;;  %v5309_v18 = vadd.f32 %v5308_v15, %v18045_v39  ;;  %v5310_v22 = vpop.f32.mrb[6].mxu0  ;;  %v14599_v0 = vcombine.high %v1261_v57, %v1265_v58  ;;  %v1273_v4 = vld [vmem:[%s17643_s3 + $0x16e8] sm:$0xff] }
 0x299   : > { %v5349_v19 = vpop.f32.mrb[5].mxu1  ;;  %5611 = vmatpush1.bf16.msra.mxu0 %v14430_v6  ;;  %v18117_v25 = vadd.f32 %v5347_v14, %v5307_v40  ;;  %v5311_v26 = vpop.f32.mrb[7].mxu0  ;;  %v14470_v6 = vcombine.low %v1133_v53, %v1137_v56  ;;  %v14607_v10 = vcombine.high %v1269_v3, %v1273_v4  ;;  %v1281_v40 = vld [vmem:[%s17643_s3 + $0x1728] sm:$0xff]  ;;  %v14478_v14 = vcombine.low %v1141_v1, %v1145_v2  ;;  %v670_v53 = vld [vmem:[%s17643_s3 + $0x410] sm:$0xff] }
 0x29a   : > { %v5351_v54 = vpop.f32.mrb[6].mxu1  ;;  %5612 = vmatprep.subr.bf16.mxu0 %v14439_v9  ;;  %v18119_v55 = vadd.f32 %v5349_v19, %v5309_v18  ;;  %v14479_v9 = vcombine.high %v1141_v1, %v1145_v2  ;;  %v14606_v15 = vcombine.low %v1269_v3, %v1273_v4  ;;  %v14615_v16 = vcombine.high %v1277_v13, %v1281_v40  ;;  %v1157_v18 = vld [vmem:[%s17643_s3 + $0x1348] sm:$0xff]  ;;  %v674_v56 = vld [vmem:[%s17643_s3 + $0x430] sm:$0xff] }
 0x29b   : > { %5652 = vmatpush1.bf16.msra.mxu1 %v14558_v7  ;;  %v5352_v39 = vpop.f32.mrb[7].mxu1  ;;  %v14598_v7 = vcombine.low %v1261_v57, %v1265_v58  ;;  %v1161_v19 = vld [vmem:[%s17643_s3 + $0x1368] sm:$0xff]  ;;  %v14614_v26 = vcombine.low %v1277_v13, %v1281_v40  ;;  %v678_v1 = vld [vmem:[%s17643_s3 + $0x450] sm:$0xff]  ;;  %v14008_v4 = vcombine.low %v670_v53, %v674_v56 }
 0x29c   : > { %5653 = vmatprep.subr.bf16.mxu1 %v14567_v11  ;;  %v1149_v11 = vld [vmem:[%s17643_s3 + $0x1308] sm:$0xff]  ;;  %v14494_v33 = vcombine.low %v1157_v18, %v1161_v19  ;;  %v682_v2 = vld [vmem:[%s17643_s3 + $0x470] sm:$0xff] }
 0x29d   : > { %5613 = vmatpush1.bf16.msra.mxu0 %v14438_v24  ;;  %v14487_v43 = vcombine.high %v1149_v11, %v1153_v12  ;;  %v1285_v22 = vld [vmem:[%s17643_s3 + $0x1748] sm:$0xff]  ;;  %v14486_v54 = vcombine.low %v1149_v11, %v1153_v12  ;;  %v686_v11 = vld [vmem:[%s17643_s3 + $0x490] sm:$0xff]  ;;  %v14016_v40 = vcombine.low %v678_v1, %v682_v2 }
 0x29e   : > { %5614 = vmatprep.subr.bf16.mxu0 %v14447_v27  ;;  %v1289_v24 = vld [vmem:[%s17643_s3 + $0x1768] sm:$0xff]  ;;  %v690_v12 = vld [vmem:[%s17643_s3 + $0x4b0] sm:$0xff] }
 0x29f   : > { %5654 = vmatpush1.bf16.msra.mxu1 %v14566_v34  ;;  %v14495_v34 = vcombine.high %v1157_v18, %v1161_v19  ;;  %v14623_v27 = vcombine.high %v1285_v22, %v1289_v24  ;;  %v1165_v39 = vld [vmem:[%s17643_s3 + $0x1388] sm:$0xff]  ;;  %v14622_v35 = vcombine.low %v1285_v22, %v1289_v24  ;;  %v694_v18 = vld [vmem:[%s17643_s3 + $0x4d0] sm:$0xff]  ;;  %v14024_v24 = vcombine.low %v686_v11, %v690_v12 }
 0x2a0   : > { %5655 = vmatprep.subr.bf16.mxu1 %v14575_v29  ;;  %v1169_v29 = vld [vmem:[%s17643_s3 + $0x13a8] sm:$0xff]  ;;  %v698_v19 = vld [vmem:[%s17643_s3 + $0x4f0] sm:$0xff] }
 0x2a1   : > { %5615 = vmatpush1.bf16.msra.mxu0 %v14446_v36  ;;  %v1293_v31 = vld [vmem:[%s17643_s3 + $0x1788] sm:$0xff]  ;;  %v14503_v36 = vcombine.high %v1165_v39, %v1169_v29  ;;  %v14502_v46 = vcombine.low %v1165_v39, %v1169_v29  ;;  %v702_v39 = vld [vmem:[%s17643_s3 + $0x510] sm:$0xff] }
 0x2a2   : > { %5616 = vmatprep.subr.bf16.mxu0 %v14455_v42  ;;  %v1297_v32 = vld [vmem:[%s17643_s3 + $0x17a8] sm:$0xff]  ;;  %v706_v29 = vld [vmem:[%s17643_s3 + $0x530] sm:$0xff] }
 0x2a3   : > { %5656 = vmatpush1.bf16.msra.mxu1 %v14574_v38  ;;  %v14631_v38 = vcombine.high %v1293_v31, %v1297_v32  ;;  %v1173_v42 = vld [vmem:[%s17643_s3 + $0x13c8] sm:$0xff]  ;;  %v14630_v47 = vcombine.low %v1293_v31, %v1297_v32  ;;  %v14032_v32 = vcombine.low %v694_v18, %v698_v19 }
 0x2a4   : > { %5657 = vmatprep.subr.bf16.mxu1 %v14583_v44  ;;  %v1177_v44 = vld [vmem:[%s17643_s3 + $0x13e8] sm:$0xff] }
 0x2a5   : > { %5617 = vmatpush1.bf16.msra.mxu0 %v14454_v23  ;;  %v1301_v45 = vld [vmem:[%s17643_s3 + $0x17c8] sm:$0xff]  ;;  %v14511_v23 = vcombine.high %v1173_v42, %v1177_v44  ;;  %v14510_v57 = vcombine.low %v1173_v42, %v1177_v44  ;;  %v710_v42 = vld [vmem:[%s17643_s3 + $0x550] sm:$0xff] }
 0x2a6   : > { %5618 = vmatprep.subr.bf16.mxu0 %v14463_v51  ;;  %v1305_v20 = vld [vmem:[%s17643_s3 + $0x17e8] sm:$0xff]  ;;  %v542_v51 = vld [vmem:[%s17643_s3 + $0x10] sm:$0xff] }
 0x2a7   : > { %5658 = vmatpush1.bf16.msra.mxu1 %v14582_v49  ;;  %v14639_v49 = vcombine.high %v1301_v45, %v1305_v20  ;;  %v14638_v58 = vcombine.low %v1301_v45, %v1305_v20  ;;  %v714_v44 = vld [vmem:[%s17643_s3 + $0x570] sm:$0xff]  ;;  %v14040_v20 = vcombine.low %v702_v39, %v706_v29 }
 0x2a8   : > { %5659 = vmatprep.subr.bf16.mxu1 %v14591_v52  ;;  %v546_v52 = vld [vmem:[%s17643_s3 + $0x30] sm:$0xff] }
 0x2a9   : > { %5619 = vmatpush1.bf16.msra.mxu0 %v14462_v61  ;;  %v13881_v61 = vcombine.high %v542_v51, %v546_v52  ;;  %v13880_v3 = vcombine.low %v542_v51, %v546_v52  ;;  %v718_v51 = vld [vmem:[%s17643_s3 + $0x590] sm:$0xff] }
 0x2aa   : > { %5620 = vmatprep.subr.bf16.mxu0 %v14471_v63  ;;  %v550_v63 = vld [vmem:[%s17643_s3 + $0x50] sm:$0xff] }
 0x2ab   : > { %5660 = vmatpush1.bf16.msra.mxu1 %v14590_v62  ;;  %v14009_v62 = vcombine.high %v670_v53, %v674_v56  ;;  %v722_v52 = vld [vmem:[%s17643_s3 + $0x5b0] sm:$0xff]  ;;  %v14048_v56 = vcombine.low %v710_v42, %v714_v44 }
 0x2ac   : > { %5661 = vmatprep.subr.bf16.mxu1 %v14599_v0  ;;  %v554_v0 = vld [vmem:[%s17643_s3 + $0x70] sm:$0xff] }
 0x2ad   : > { %5621 = vmatpush1.bf16.msra.mxu0 %v14470_v6  ;;  %v13889_v6 = vcombine.high %v550_v63, %v554_v0  ;;  %v13888_v13 = vcombine.low %v550_v63, %v554_v0  ;;  %v602_v63 = vld [vmem:[%s17643_s3 + $0x1f0] sm:$0xff] }
 0x2ae   : > { %5622 = vmatprep.subr.bf16.mxu0 %v14479_v9  ;;  %v558_v9 = vld [vmem:[%s17643_s3 + $0x90] sm:$0xff] }
 0x2af   : > { %5662 = vmatpush1.bf16.msra.mxu1 %v14598_v7  ;;  %v14017_v7 = vcombine.high %v678_v1, %v682_v2 }
 0x2b0   : > { %5663 = vmatprep.subr.bf16.mxu1 %v14607_v10  ;;  %v562_v10 = vld [vmem:[%s17643_s3 + $0xb0] sm:$0xff] }
 0x2b1   : > { %5623 = vmatpush1.bf16.msra.mxu0 %v14478_v14  ;;  %v13897_v14 = vcombine.high %v558_v9, %v562_v10  ;;  %v13896_v22 = vcombine.low %v558_v9, %v562_v10 }
 0x2b2   : > { %5624 = vmatprep.subr.bf16.mxu0 %v14487_v43  ;;  %v566_v43 = vld [vmem:[%s17643_s3 + $0xd0] sm:$0xff] }
 0x2b3   : > { %5664 = vmatpush1.bf16.msra.mxu1 %v14606_v15  ;;  %v14025_v15 = vcombine.high %v686_v11, %v690_v12 }
 0x2b4   : > { %5665 = vmatprep.subr.bf16.mxu1 %v14615_v16  ;;  %v570_v16 = vld [vmem:[%s17643_s3 + $0xf0] sm:$0xff] }
 0x2b5   : > { %5625 = vmatpush1.bf16.msra.mxu0 %v14486_v54  ;;  %v13905_v54 = vcombine.high %v566_v43, %v570_v16  ;;  %v13904_v31 = vcombine.low %v566_v43, %v570_v16 }
 0x2b6   : > { %5626 = vmatprep.subr.bf16.mxu0 %v14495_v34  ;;  %v574_v34 = vld [vmem:[%s17643_s3 + $0x110] sm:$0xff] }
 0x2b7   : > { %5666 = vmatpush1.bf16.msra.mxu1 %v14614_v26  ;;  %v14033_v26 = vcombine.high %v694_v18, %v698_v19  ;;  %v606_v18 = vld [vmem:[%s17643_s3 + $0x210] sm:$0xff] }
 0x2b8   : > { %5667 = vmatprep.subr.bf16.mxu1 %v14623_v27  ;;  %v578_v27 = vld [vmem:[%s17643_s3 + $0x130] sm:$0xff] }
 0x2b9   : > { %5627 = vmatpush1.bf16.msra.mxu0 %v14494_v33  ;;  %v13913_v33 = vcombine.high %v574_v34, %v578_v27  ;;  %v13912_v45 = vcombine.low %v574_v34, %v578_v27  ;;  %v610_v19 = vld [vmem:[%s17643_s3 + $0x230] sm:$0xff] }
 0x2ba   : > { %5628 = vmatprep.subr.bf16.mxu0 %v14503_v36  ;;  %v582_v36 = vld [vmem:[%s17643_s3 + $0x150] sm:$0xff] }
 0x2bb   : > { %5668 = vmatpush1.bf16.msra.mxu1 %v14622_v35  ;;  %v14041_v35 = vcombine.high %v702_v39, %v706_v29  ;;  %v13945_v39 = vcombine.high %v606_v18, %v610_v19 }
 0x2bc   : > { %5669 = vmatprep.subr.bf16.mxu1 %v14631_v38  ;;  %v586_v38 = vld [vmem:[%s17643_s3 + $0x170] sm:$0xff] }
 0x2bd   : > { %5629 = vmatpush1.bf16.msra.mxu0 %v14502_v46  ;;  %v13921_v46 = vcombine.high %v582_v36, %v586_v38  ;;  %v13920_v53 = vcombine.low %v582_v36, %v586_v38  ;;  %v13944_v36 = vcombine.low %v606_v18, %v610_v19  ;;  %v782_v18 = vld [vmem:[%s17643_s3 + $0x790] sm:$0xff] }
 0x2be   : > { %5630 = vmatprep.subr.bf16.mxu0 %v14511_v23  ;;  %v590_v23 = vld [vmem:[%s17643_s3 + $0x190] sm:$0xff] }
 0x2bf   : > { %5670 = vmatpush1.bf16.msra.mxu1 %v14630_v47  ;;  %v14049_v47 = vcombine.high %v710_v42, %v714_v44  ;;  %v786_v19 = vld [vmem:[%s17643_s3 + $0x7b0] sm:$0xff] }
 0x2c0   : > { %5671 = vmatprep.subr.bf16.mxu1 %v14639_v49  ;;  %v594_v49 = vld [vmem:[%s17643_s3 + $0x1b0] sm:$0xff] }
 0x2c1   : > { %5631 = vmatpush1.bf16.msra.mxu0 %v14510_v57  ;;  %v13929_v57 = vcombine.high %v590_v23, %v594_v49  ;;  %v13928_v11 = vcombine.low %v590_v23, %v594_v49 }
 0x2c2   : > { %5682 = vmatprep.subr.bf16.mxu0 %v13881_v61  ;;  %v14057_v61 = vcombine.high %v718_v51, %v722_v52 }
 0x2c3   : > { %5672 = vmatpush1.bf16.msra.mxu1 %v14638_v58 }
 0x2c4   : > { %5723 = vmatprep.subr.bf16.mxu1 %v14009_v62  ;;  %5633 = vmatmul.mubr.bf16.vlgmr.msra.gmra.mrb[20].mxu0 %v17939_v5  ;;  %v598_v62 = vld [vmem:[%s17643_s3 + $0x1d0] sm:$0xff] }
 0x2c5   : > { %5683 = vmatpush1.bf16.msra.mxu0 %v13880_v3  ;;  %5714 = vmatprep.mubr.bf16.mxu0 %v17709_v59  ;;  %v726_v3 = vld [vmem:[%s17643_s3 + $0x5d0] sm:$0xff]  ;;  %v13936_v34 = vcombine.low %v598_v62, %v602_v63 }
 0x2c6   : > { %5674 = vmatmul.mubr.bf16.vlgmr.msra.gmra.mrb[20].mxu1 %v17945_v8  ;;  %5684 = vmatprep.subr.bf16.mxu0 %v13889_v6  ;;  %v526_v6 = vld [vmem:[#allocation2] sm:$0xff] }
 0x2c7   : > { %5724 = vmatpush1.bf16.msra.mxu1 %v14008_v4  ;;  %5755 = vmatprep.mubr.bf16.mxu1 %v17713_v60  ;;  %v730_v4 = vld [vmem:[%s17643_s3 + $0x5f0] sm:$0xff] }
 0x2c8   : > { %5725 = vmatprep.subr.bf16.mxu1 %v14017_v7  ;;  %v14064_v27 = vcombine.low %v726_v3, %v730_v4 }
 0x2c9   : > { %5685 = vmatpush1.bf16.msra.mxu0 %v13888_v13  ;;  %v527_v13 = vld [vmem:[#allocation2 + $0x8] sm:$0xff] }
 0x2ca   : > { %5686 = vmatprep.subr.bf16.mxu0 %v13897_v14  ;;  %v14056_v14 = vcombine.low %v718_v51, %v722_v52 }
 0x2cb   : > { %5726 = vmatpush1.bf16.msra.mxu1 %v14016_v40 }
 0x2cc   : > { %5727 = vmatprep.subr.bf16.mxu1 %v14025_v15  ;;  %v13937_v15 = vcombine.high %v598_v62, %v602_v63 }
 0x2cd   : > { %5687 = vmatpush1.bf16.msra.mxu0 %v13896_v22 }
 0x2ce   : > { %5688 = vmatprep.subr.bf16.mxu0 %v13905_v54  ;;  %v738_v54 = vld [vmem:[%s17643_s3 + $0x630] sm:$0xff] }
 0x2cf   : > { %5728 = vmatpush1.bf16.msra.mxu1 %v14024_v24  ;;  %v734_v24 = vld [vmem:[%s17643_s3 + $0x610] sm:$0xff] }
 0x2d0   : > { %5729 = vmatprep.subr.bf16.mxu1 %v14033_v26  ;;  %v14073_v29 = vcombine.high %v734_v24, %v738_v54  ;;  %v14072_v38 = vcombine.low %v734_v24, %v738_v54 }
 0x2d1   : > { %5689 = vmatpush1.bf16.msra.mxu0 %v13904_v31  ;;  %v614_v31 = vld [vmem:[%s17643_s3 + $0x250] sm:$0xff] }
 0x2d2   : > { %5690 = vmatprep.subr.bf16.mxu0 %v13913_v33  ;;  %v742_v33 = vld [vmem:[%s17643_s3 + $0x650] sm:$0xff] }
 0x2d3   : > { %5730 = vmatpush1.bf16.msra.mxu1 %v14032_v32  ;;  %v618_v32 = vld [vmem:[%s17643_s3 + $0x270] sm:$0xff] }
 0x2d4   : > { %5731 = vmatprep.subr.bf16.mxu1 %v14041_v35  ;;  %v746_v35 = vld [vmem:[%s17643_s3 + $0x670] sm:$0xff]  ;;  %v13953_v42 = vcombine.high %v614_v31, %v618_v32  ;;  %v13952_v23 = vcombine.low %v614_v31, %v618_v32  ;;  %v14120_v32 = vcombine.low %v782_v18, %v786_v19 }
 0x2d5   : > { %5691 = vmatpush1.bf16.msra.mxu0 %v13912_v45  ;;  %v14081_v44 = vcombine.high %v742_v33, %v746_v35  ;;  %v622_v45 = vld [vmem:[%s17643_s3 + $0x290] sm:$0xff]  ;;  %v14080_v49 = vcombine.low %v742_v33, %v746_v35 }
 0x2d6   : > { %5692 = vmatprep.subr.bf16.mxu0 %v13921_v46  ;;  %v750_v46 = vld [vmem:[%s17643_s3 + $0x690] sm:$0xff] }
 0x2d7   : > { %5732 = vmatpush1.bf16.msra.mxu1 %v14040_v20  ;;  %v5388_v58 = vpop.f32.mrb[8].mxu0  ;;  %v626_v20 = vld [vmem:[%s17643_s3 + $0x2b0] sm:$0xff] }
 0x2d8   : > { %5733 = vmatprep.subr.bf16.mxu1 %v14049_v47  ;;  %v5389_v0 = vadd.f32 %v5388_v58, %v18117_v25  ;;  %v5390_v2 = vpop.f32.mrb[9].mxu0  ;;  %v754_v47 = vld [vmem:[%s17643_s3 + $0x6b0] sm:$0xff]  ;;  %v13961_v51 = vcombine.high %v622_v45, %v626_v20 }
 0x2d9   : > { %v5429_v1 = vpop.f32.mrb[8].mxu1  ;;  %v5391_v7 = vadd.f32 %v5390_v2, %v18119_v55  ;;  %v5392_v10 = vpop.f32.mrb[10].mxu0  ;;  %5693 = vmatpush1.bf16.msra.mxu0 %v13920_v53  ;;  %v14065_v55 = vcombine.high %v726_v3, %v730_v4  ;;  %v14089_v52 = vcombine.high %v750_v46, %v754_v47  ;;  %v630_v53 = vld [vmem:[%s17643_s3 + $0x2d0] sm:$0xff]  ;;  %v14088_v62 = vcombine.low %v750_v46, %v754_v47 }
 0x2da   : > { %v5431_v9 = vpop.f32.mrb[9].mxu1  ;;  %v5430_v12 = vadd.f32 %v5429_v1, %v5389_v0  ;;  %v5393_v25 = vpop.f32.mrb[11].mxu0  ;;  %5694 = vmatprep.subr.bf16.mxu0 %v13929_v57  ;;  %v758_v57 = vld [vmem:[%s17643_s3 + $0x6d0] sm:$0xff] }
 0x2db   : > { %v5433_v40 = vpop.f32.mrb[10].mxu1  ;;  %5734 = vmatpush1.bf16.msra.mxu1 %v14048_v56  ;;  %v5432_v43 = vadd.f32 %v5431_v9, %v5391_v7  ;;  %v634_v56 = vld [vmem:[%s17643_s3 + $0x2f0] sm:$0xff] }
 0x2dc   : > { %v5434_v16 = vpop.f32.mrb[11].mxu1  ;;  %5735 = vmatprep.subr.bf16.mxu1 %v14057_v61  ;;  %v6174_v22 = vadd.f32 %v5430_v12, %v526_v6  ;;  %v762_v58 = vld [vmem:[%s17643_s3 + $0x6f0] sm:$0xff]  ;;  %v13960_v61 = vcombine.low %v622_v45, %v626_v20  ;;  %v13969_v63 = vcombine.high %v630_v53, %v634_v56  ;;  %v13968_v6 = vcombine.low %v630_v53, %v634_v56 }
 0x2dd   : > { %v6175_v26 = vadd.f32 %v5432_v43, %v527_v13  ;;  %5695 = vmatpush1.bf16.msra.mxu0 %v13928_v11  ;;  %v14097_v0 = vcombine.high %v758_v57, %v762_v58  ;;  %v638_v1 = vld [vmem:[%s17643_s3 + $0x310] sm:$0xff]  ;;  %v14096_v7 = vcombine.low %v758_v57, %v762_v58 }
 0x2de   : > { %6182 = vst [vmem:[#allocation2] sm:$0xff] %v6174_v22  ;;  %5696 = vmatprep.subr.bf16.mxu0 %v13937_v15  ;;  %v642_v2 = vld [vmem:[%s17643_s3 + $0x330] sm:$0xff] }
 0x2df   : > { %5736 = vmatpush1.bf16.msra.mxu1 %v14056_v14  ;;  %6183 = vst [vmem:[#allocation2 + $0x8] sm:$0xff] %v6175_v26  ;;  %v766_v3 = vld [vmem:[%s17643_s3 + $0x710] sm:$0xff]  ;;  %v13977_v9 = vcombine.high %v638_v1, %v642_v2  ;;  %v13976_v25 = vcombine.low %v638_v1, %v642_v2  ;;  %v14121_v26 = vcombine.high %v782_v18, %v786_v19 }
 0x2e0   : > { %5737 = vmatprep.subr.bf16.mxu1 %v14065_v55  ;;  %v770_v4 = vld [vmem:[%s17643_s3 + $0x730] sm:$0xff] }
 0x2e1   : > { %5697 = vmatpush1.bf16.msra.mxu0 %v13936_v34  ;;  %v14105_v10 = vcombine.high %v766_v3, %v770_v4  ;;  %v646_v11 = vld [vmem:[%s17643_s3 + $0x350] sm:$0xff]  ;;  %v14104_v14 = vcombine.low %v766_v3, %v770_v4 }
 0x2e2   : > { %5698 = vmatprep.subr.bf16.mxu0 %v13945_v39  ;;  %v650_v12 = vld [vmem:[%s17643_s3 + $0x370] sm:$0xff] }
 0x2e3   : > { %5738 = vmatpush1.bf16.msra.mxu1 %v14064_v27  ;;  %v774_v13 = vld [vmem:[%s17643_s3 + $0x750] sm:$0xff]  ;;  %v13985_v15 = vcombine.high %v646_v11, %v650_v12  ;;  %v13984_v22 = vcombine.low %v646_v11, %v650_v12 }
 0x2e4   : > { %5739 = vmatprep.subr.bf16.mxu1 %v14073_v29  ;;  %v778_v40 = vld [vmem:[%s17643_s3 + $0x770] sm:$0xff] }
 0x2e5   : > { %5699 = vmatpush1.bf16.msra.mxu0 %v13944_v36  ;;  %v14113_v43 = vcombine.high %v774_v13, %v778_v40  ;;  %v654_v16 = vld [vmem:[%s17643_s3 + $0x390] sm:$0xff]  ;;  %v14112_v24 = vcombine.low %v774_v13, %v778_v40 }
 0x2e6   : > { %5700 = vmatprep.subr.bf16.mxu0 %v13953_v42  ;;  %v658_v55 = vld [vmem:[%s17643_s3 + $0x3b0] sm:$0xff] }
 0x2e7   : > { %5740 = vmatpush1.bf16.msra.mxu1 %v14072_v38  ;;  %v13993_v54 = vcombine.high %v654_v16, %v658_v55  ;;  %v662_v34 = vld [vmem:[%s17643_s3 + $0x3d0] sm:$0xff]  ;;  %v13992_v31 = vcombine.low %v654_v16, %v658_v55 }
 0x2e8   : > { %5741 = vmatprep.subr.bf16.mxu1 %v14081_v44  ;;  %v666_v27 = vld [vmem:[%s17643_s3 + $0x3f0] sm:$0xff] }
 0x2e9   : > { %5701 = vmatpush1.bf16.msra.mxu0 %v13952_v23  ;;  %v790_v39 = vld [vmem:[%s17643_s3 + $0x7d0] sm:$0xff]  ;;  %v14001_v33 = vcombine.high %v662_v34, %v666_v27  ;;  %v14000_v45 = vcombine.low %v662_v34, %v666_v27 }
 0x2ea   : > { %5702 = vmatprep.subr.bf16.mxu0 %v13961_v51  ;;  %v794_v29 = vld [vmem:[%s17643_s3 + $0x7f0] sm:$0xff] }
 0x2eb   : > { %5742 = vmatpush1.bf16.msra.mxu1 %v14080_v49  ;;  %v14129_v35 = vcombine.high %v790_v39, %v794_v29  ;;  %v798_v36 = vld [vmem:[%s17643_s3 + $0x810] sm:$0xff]  ;;  %v14128_v20 = vcombine.low %v790_v39, %v794_v29 }
 0x2ec   : > { %5743 = vmatprep.subr.bf16.mxu1 %v14089_v52  ;;  %v802_v38 = vld [vmem:[%s17643_s3 + $0x830] sm:$0xff] }
 0x2ed   : > { %5703 = vmatpush1.bf16.msra.mxu0 %v13960_v61  ;;  %v926_v42 = vld [vmem:[%s17643_s3 + $0xc10] sm:$0xff]  ;;  %v14137_v46 = vcombine.high %v798_v36, %v802_v38  ;;  %v14136_v53 = vcombine.low %v798_v36, %v802_v38 }
 0x2ee   : > { %5704 = vmatprep.subr.bf16.mxu0 %v13969_v63  ;;  %v930_v44 = vld [vmem:[%s17643_s3 + $0xc30] sm:$0xff] }
 0x2ef   : > { %5744 = vmatpush1.bf16.msra.mxu1 %v14088_v62  ;;  %v14265_v47 = vcombine.high %v926_v42, %v930_v44  ;;  %v806_v23 = vld [vmem:[%s17643_s3 + $0x850] sm:$0xff]  ;;  %v14264_v56 = vcombine.low %v926_v42, %v930_v44 }
 0x2f0   : > { %5745 = vmatprep.subr.bf16.mxu1 %v14097_v0  ;;  %v810_v49 = vld [vmem:[%s17643_s3 + $0x870] sm:$0xff] }
 0x2f1   : > { %5705 = vmatpush1.bf16.msra.mxu0 %v13968_v6  ;;  %v934_v51 = vld [vmem:[%s17643_s3 + $0xc50] sm:$0xff]  ;;  %v14145_v57 = vcombine.high %v806_v23, %v810_v49  ;;  %v14144_v1 = vcombine.low %v806_v23, %v810_v49 }
 0x2f2   : > { %5706 = vmatprep.subr.bf16.mxu0 %v13977_v9  ;;  %v938_v52 = vld [vmem:[%s17643_s3 + $0xc70] sm:$0xff] }
 0x2f3   : > { %5746 = vmatpush1.bf16.msra.mxu1 %v14096_v7  ;;  %v14273_v58 = vcombine.high %v934_v51, %v938_v52  ;;  %v814_v61 = vld [vmem:[%s17643_s3 + $0x890] sm:$0xff]  ;;  %v14272_v2 = vcombine.low %v934_v51, %v938_v52 }
 0x2f4   : > { %5747 = vmatprep.subr.bf16.mxu1 %v14105_v10  ;;  %v818_v62 = vld [vmem:[%s17643_s3 + $0x8b0] sm:$0xff] }
 0x2f5   : > { %5707 = vmatpush1.bf16.msra.mxu0 %v13976_v25  ;;  %v942_v63 = vld [vmem:[%s17643_s3 + $0xc90] sm:$0xff]  ;;  %v14153_v3 = vcombine.high %v814_v61, %v818_v62  ;;  %v14152_v11 = vcombine.low %v814_v61, %v818_v62 }
 0x2f6   : > { %5708 = vmatprep.subr.bf16.mxu0 %v13985_v15  ;;  %v946_v0 = vld [vmem:[%s17643_s3 + $0xcb0] sm:$0xff] }
 0x2f7   : > { %5748 = vmatpush1.bf16.msra.mxu1 %v14104_v14  ;;  %v14281_v4 = vcombine.high %v942_v63, %v946_v0  ;;  %v822_v6 = vld [vmem:[%s17643_s3 + $0x8d0] sm:$0xff]  ;;  %v14280_v12 = vcombine.low %v942_v63, %v946_v0 }
 0x2f8   : > { %5749 = vmatprep.subr.bf16.mxu1 %v14113_v43  ;;  %v826_v7 = vld [vmem:[%s17643_s3 + $0x8f0] sm:$0xff] }
 0x2f9   : > { %5709 = vmatpush1.bf16.msra.mxu0 %v13984_v22  ;;  %v950_v9 = vld [vmem:[%s17643_s3 + $0xcd0] sm:$0xff]  ;;  %v14161_v13 = vcombine.high %v822_v6, %v826_v7  ;;  %v14160_v16 = vcombine.low %v822_v6, %v826_v7 }
 0x2fa   : > { %5710 = vmatprep.subr.bf16.mxu0 %v13993_v54  ;;  %v954_v10 = vld [vmem:[%s17643_s3 + $0xcf0] sm:$0xff] }
 0x2fb   : > { %5750 = vmatpush1.bf16.msra.mxu1 %v14112_v24  ;;  %v14289_v40 = vcombine.high %v950_v9, %v954_v10  ;;  %v830_v25 = vld [vmem:[%s17643_s3 + $0x910] sm:$0xff]  ;;  %v14288_v55 = vcombine.low %v950_v9, %v954_v10 }
 0x2fc   : > { %5751 = vmatprep.subr.bf16.mxu1 %v14121_v26  ;;  %v834_v14 = vld [vmem:[%s17643_s3 + $0x930] sm:$0xff] }
 0x2fd   : > { %5711 = vmatpush1.bf16.msra.mxu0 %v13992_v31  ;;  %v958_v15 = vld [vmem:[%s17643_s3 + $0xd10] sm:$0xff]  ;;  %v14169_v18 = vcombine.high %v830_v25, %v834_v14  ;;  %v14168_v34 = vcombine.low %v830_v25, %v834_v14 }
 0x2fe   : > { %5712 = vmatprep.subr.bf16.mxu0 %v14001_v33  ;;  %v962_v43 = vld [vmem:[%s17643_s3 + $0xd30] sm:$0xff] }
 0x2ff   : > { %5752 = vmatpush1.bf16.msra.mxu1 %v14120_v32  ;;  %v14297_v19 = vcombine.high %v958_v15, %v962_v43  ;;  %v838_v22 = vld [vmem:[%s17643_s3 + $0x950] sm:$0xff]  ;;  %v14296_v27 = vcombine.low %v958_v15, %v962_v43 }
 0x300   : > { %5753 = vmatprep.subr.bf16.mxu1 %v14129_v35  ;;  %v842_v24 = vld [vmem:[%s17643_s3 + $0x970] sm:$0xff] }
 0x301   : > { %5713 = vmatpush1.bf16.msra.mxu0 %v14000_v45  ;;  %v966_v54 = vld [vmem:[%s17643_s3 + $0xd50] sm:$0xff]  ;;  %v14177_v39 = vcombine.high %v838_v22, %v842_v24  ;;  %v14176_v36 = vcombine.low %v838_v22, %v842_v24 }
 0x302   : > { %5764 = vmatprep.subr.bf16.mxu0 %v14137_v46  ;;  %v970_v26 = vld [vmem:[%s17643_s3 + $0xd70] sm:$0xff] }
 0x303   : > { %5754 = vmatpush1.bf16.msra.mxu1 %v14128_v20  ;;  %v14305_v29 = vcombine.high %v966_v54, %v970_v26  ;;  %v846_v31 = vld [vmem:[%s17643_s3 + $0x990] sm:$0xff]  ;;  %v14304_v38 = vcombine.low %v966_v54, %v970_v26 }
 0x304   : > { %5805 = vmatprep.subr.bf16.mxu1 %v14265_v47  ;;  %5715 = vmatmul.mubr.bf16.vlgmr.msra.gmra.mrb[24].mxu0 %v17759_v17  ;;  %v850_v32 = vld [vmem:[%s17643_s3 + $0x9b0] sm:$0xff] }
 0x305   : > { %5765 = vmatpush1.bf16.msra.mxu0 %v14136_v53  ;;  %5796 = vmatprep.mubr.bf16.mxu0 %v17777_v28  ;;  %v974_v33 = vld [vmem:[%s17643_s3 + $0xd90] sm:$0xff]  ;;  %v14185_v42 = vcombine.high %v846_v31, %v850_v32 }
 0x306   : > { %5756 = vmatmul.mubr.bf16.vlgmr.msra.gmra.mrb[24].mxu1 %v17768_v21  ;;  %5766 = vmatprep.subr.bf16.mxu0 %v14145_v57  ;;  %v978_v35 = vld [vmem:[%s17643_s3 + $0xdb0] sm:$0xff]  ;;  %v14184_v57 = vcombine.low %v846_v31, %v850_v32 }
 0x307   : > { %5806 = vmatpush1.bf16.msra.mxu1 %v14264_v56  ;;  %5837 = vmatprep.mubr.bf16.mxu1 %v17784_v30  ;;  %v14313_v45 = vcombine.high %v974_v33, %v978_v35  ;;  %v854_v20 = vld [vmem:[%s17643_s3 + $0x9d0] sm:$0xff]  ;;  %v14312_v63 = vcombine.low %v974_v33, %v978_v35 }
 0x308   : > { %5807 = vmatprep.subr.bf16.mxu1 %v14273_v58  ;;  %v858_v46 = vld [vmem:[%s17643_s3 + $0x9f0] sm:$0xff] }
 0x309   : > { %5767 = vmatpush1.bf16.msra.mxu0 %v14144_v1  ;;  %v982_v49 = vld [vmem:[%s17643_s3 + $0xdd0] sm:$0xff]  ;;  %v14193_v0 = vcombine.high %v854_v20, %v858_v46  ;;  %v14192_v9 = vcombine.low %v854_v20, %v858_v46 }
 0x30a   : > { %5768 = vmatprep.subr.bf16.mxu0 %v14153_v3  ;;  %v986_v51 = vld [vmem:[%s17643_s3 + $0xdf0] sm:$0xff] }
 0x30b   : > { %5808 = vmatpush1.bf16.msra.mxu1 %v14272_v2  ;;  %v14321_v2 = vcombine.high %v982_v49, %v986_v51  ;;  %v862_v3 = vld [vmem:[%s17643_s3 + $0xa10] sm:$0xff]  ;;  %v14320_v10 = vcombine.low %v982_v49, %v986_v51 }
 0x30c   : > { %5809 = vmatprep.subr.bf16.mxu1 %v14281_v4  ;;  %v866_v4 = vld [vmem:[%s17643_s3 + $0xa30] sm:$0xff] }
 0x30d   : > { %5769 = vmatpush1.bf16.msra.mxu0 %v14152_v11  ;;  %v990_v6 = vld [vmem:[%s17643_s3 + $0xe10] sm:$0xff]  ;;  %v14201_v11 = vcombine.high %v862_v3, %v866_v4  ;;  %v14200_v15 = vcombine.low %v862_v3, %v866_v4 }
 0x30e   : > { %5770 = vmatprep.subr.bf16.mxu0 %v14161_v13  ;;  %v994_v7 = vld [vmem:[%s17643_s3 + $0xe30] sm:$0xff] }
 0x30f   : > { %5810 = vmatpush1.bf16.msra.mxu1 %v14280_v12  ;;  %v14329_v12 = vcombine.high %v990_v6, %v994_v7  ;;  %v870_v13 = vld [vmem:[%s17643_s3 + $0xa50] sm:$0xff]  ;;  %v14328_v43 = vcombine.low %v990_v6, %v994_v7 }
 0x310   : > { %5811 = vmatprep.subr.bf16.mxu1 %v14289_v40  ;;  %v874_v40 = vld [vmem:[%s17643_s3 + $0xa70] sm:$0xff] }
 0x311   : > { %5771 = vmatpush1.bf16.msra.mxu0 %v14160_v16  ;;  %v998_v25 = vld [vmem:[%s17643_s3 + $0xe50] sm:$0xff]  ;;  %v14209_v16 = vcombine.high %v870_v13, %v874_v40  ;;  %v14208_v54 = vcombine.low %v870_v13, %v874_v40 }
 0x312   : > { %5772 = vmatprep.subr.bf16.mxu0 %v14169_v18  ;;  %v1002_v14 = vld [vmem:[%s17643_s3 + $0xe70] sm:$0xff] }
 0x313   : > { %5812 = vmatpush1.bf16.msra.mxu1 %v14288_v55  ;;  %v14337_v55 = vcombine.high %v998_v25, %v1002_v14  ;;  %v878_v18 = vld [vmem:[%s17643_s3 + $0xa90] sm:$0xff]  ;;  %v14336_v26 = vcombine.low %v998_v25, %v1002_v14 }
 0x314   : > { %5813 = vmatprep.subr.bf16.mxu1 %v14297_v19  ;;  %v882_v19 = vld [vmem:[%s17643_s3 + $0xab0] sm:$0xff] }
 0x315   : > { %5773 = vmatpush1.bf16.msra.mxu0 %v14168_v34  ;;  %v1006_v22 = vld [vmem:[%s17643_s3 + $0xe90] sm:$0xff]  ;;  %v14217_v34 = vcombine.high %v878_v18, %v882_v19  ;;  %v14216_v33 = vcombine.low %v878_v18, %v882_v19 }
 0x316   : > { %5774 = vmatprep.subr.bf16.mxu0 %v14177_v39  ;;  %v1010_v24 = vld [vmem:[%s17643_s3 + $0xeb0] sm:$0xff] }
 0x317   : > { %5814 = vmatpush1.bf16.msra.mxu1 %v14296_v27  ;;  %v5470_v44 = vpop.f32.mrb[12].mxu0  ;;  %v14345_v27 = vcombine.high %v1006_v22, %v1010_v24  ;;  %v886_v39 = vld [vmem:[%s17643_s3 + $0xad0] sm:$0xff]  ;;  %v14344_v35 = vcombine.low %v1006_v22, %v1010_v24 }
 0x318   : > { %5815 = vmatprep.subr.bf16.mxu1 %v14305_v29  ;;  %v5472_v23 = vpop.f32.mrb[13].mxu0  ;;  %v890_v29 = vld [vmem:[%s17643_s3 + $0xaf0] sm:$0xff] }
 0x319   : > { %v5511_v47 = vpop.f32.mrb[12].mxu1  ;;  %v5474_v56 = vpop.f32.mrb[14].mxu0  ;;  %5775 = vmatpush1.bf16.msra.mxu0 %v14176_v36  ;;  %v1014_v31 = vld [vmem:[%s17643_s3 + $0xed0] sm:$0xff]  ;;  %v14225_v36 = vcombine.high %v886_v39, %v890_v29  ;;  %v14224_v46 = vcombine.low %v886_v39, %v890_v29 }
 0x31a   : > { %v18259_v52 = vadd.f32 %v5511_v47, %v5470_v44  ;;  %v5513_v53 = vpop.f32.mrb[13].mxu1  ;;  %v5475_v62 = vpop.f32.mrb[15].mxu0  ;;  %5776 = vmatprep.subr.bf16.mxu0 %v14185_v42  ;;  %v1018_v32 = vld [vmem:[%s17643_s3 + $0xef0] sm:$0xff] }
 0x31b   : > { %v18261_v58 = vadd.f32 %v5513_v53, %v5472_v23  ;;  %v5515_v61 = vpop.f32.mrb[14].mxu1  ;;  %5816 = vmatpush1.bf16.msra.mxu1 %v14304_v38  ;;  %v14353_v38 = vcombine.high %v1014_v31, %v1018_v32  ;;  %v894_v42 = vld [vmem:[%s17643_s3 + $0xb10] sm:$0xff]  ;;  %v14352_v47 = vcombine.low %v1014_v31, %v1018_v32 }
 0x31c   : > { %v5516_v1 = vpop.f32.mrb[15].mxu1  ;;  %5817 = vmatprep.subr.bf16.mxu1 %v14313_v45  ;;  %v898_v44 = vld [vmem:[%s17643_s3 + $0xb30] sm:$0xff] }
 0x31d   : > { %5777 = vmatpush1.bf16.msra.mxu0 %v14184_v57  ;;  %v1022_v45 = vld [vmem:[%s17643_s3 + $0xf10] sm:$0xff]  ;;  %v14233_v23 = vcombine.high %v894_v42, %v898_v44  ;;  %v14232_v61 = vcombine.low %v894_v42, %v898_v44 }
 0x31e   : > { %5778 = vmatprep.subr.bf16.mxu0 %v14193_v0  ;;  %v1026_v20 = vld [vmem:[%s17643_s3 + $0xf30] sm:$0xff] }
 0x31f   : > { %5818 = vmatpush1.bf16.msra.mxu1 %v14312_v63  ;;  %v14361_v49 = vcombine.high %v1022_v45, %v1026_v20  ;;  %v902_v51 = vld [vmem:[%s17643_s3 + $0xb50] sm:$0xff]  ;;  %v14360_v62 = vcombine.low %v1022_v45, %v1026_v20 }
 0x320   : > { %5819 = vmatprep.subr.bf16.mxu1 %v14321_v2  ;;  %v906_v53 = vld [vmem:[%s17643_s3 + $0xb70] sm:$0xff] }
 0x321   : > { %5779 = vmatpush1.bf16.msra.mxu0 %v14192_v9  ;;  %v1030_v56 = vld [vmem:[%s17643_s3 + $0xf50] sm:$0xff]  ;;  %v14241_v63 = vcombine.high %v902_v51, %v906_v53  ;;  %v14240_v6 = vcombine.low %v902_v51, %v906_v53 }
 0x322   : > { %5780 = vmatprep.subr.bf16.mxu0 %v14201_v11  ;;  %v1034_v57 = vld [vmem:[%s17643_s3 + $0xf70] sm:$0xff] }
 0x323   : > { %5820 = vmatpush1.bf16.msra.mxu1 %v14320_v10  ;;  %v14369_v0 = vcombine.high %v1030_v56, %v1034_v57  ;;  %v910_v1 = vld [vmem:[%s17643_s3 + $0xb90] sm:$0xff]  ;;  %v14368_v7 = vcombine.low %v1030_v56, %v1034_v57 }
 0x324   : > { %5821 = vmatprep.subr.bf16.mxu1 %v14329_v12  ;;  %v914_v2 = vld [vmem:[%s17643_s3 + $0xbb0] sm:$0xff] }
 0x325   : > { %5781 = vmatpush1.bf16.msra.mxu0 %v14200_v15  ;;  %v1038_v3 = vld [vmem:[%s17643_s3 + $0xf90] sm:$0xff]  ;;  %v14249_v9 = vcombine.high %v910_v1, %v914_v2  ;;  %v14248_v25 = vcombine.low %v910_v1, %v914_v2 }
 0x326   : > { %5782 = vmatprep.subr.bf16.mxu0 %v14209_v16  ;;  %v1042_v4 = vld [vmem:[%s17643_s3 + $0xfb0] sm:$0xff] }
 0x327   : > { %5822 = vmatpush1.bf16.msra.mxu1 %v14328_v43  ;;  %v14377_v10 = vcombine.high %v1038_v3, %v1042_v4  ;;  %v918_v11 = vld [vmem:[%s17643_s3 + $0xbd0] sm:$0xff]  ;;  %v14376_v14 = vcombine.low %v1038_v3, %v1042_v4 }
 0x328   : > { %5823 = vmatprep.subr.bf16.mxu1 %v14337_v55  ;;  %v922_v12 = vld [vmem:[%s17643_s3 + $0xbf0] sm:$0xff] }
 0x329   : > { %5783 = vmatpush1.bf16.msra.mxu0 %v14208_v54  ;;  %v1046_v13 = vld [vmem:[%s17643_s3 + $0xfd0] sm:$0xff]  ;;  %v14257_v15 = vcombine.high %v918_v11, %v922_v12  ;;  %v14256_v22 = vcombine.low %v918_v11, %v922_v12 }
 0x32a   : > { %5784 = vmatprep.subr.bf16.mxu0 %v14217_v34  ;;  %v1050_v40 = vld [vmem:[%s17643_s3 + $0xff0] sm:$0xff] }
 0x32b   : > { %5824 = vmatpush1.bf16.msra.mxu1 %v14336_v26  ;;  %v14385_v43 = vcombine.high %v1046_v13, %v1050_v40  ;;  %v1054_v16 = vld [vmem:[%s17643_s3 + $0x1010] sm:$0xff]  ;;  %v14384_v24 = vcombine.low %v1046_v13, %v1050_v40 }
 0x32c   : > { %5825 = vmatprep.subr.bf16.mxu1 %v14345_v27  ;;  %v1058_v55 = vld [vmem:[%s17643_s3 + $0x1030] sm:$0xff] }
 0x32d   : > { %5785 = vmatpush1.bf16.msra.mxu0 %v14216_v33  ;;  %v1182_v18 = vld [vmem:[%s17643_s3 + $0x1410] sm:$0xff]  ;;  %v14393_v54 = vcombine.high %v1054_v16, %v1058_v55  ;;  %v14392_v31 = vcombine.low %v1054_v16, %v1058_v55 }
 0x32e   : > { %5786 = vmatprep.subr.bf16.mxu0 %v14225_v36  ;;  %v1186_v19 = vld [vmem:[%s17643_s3 + $0x1430] sm:$0xff] }
 0x32f   : > { %5826 = vmatpush1.bf16.msra.mxu1 %v14344_v35  ;;  %v14521_v26 = vcombine.high %v1182_v18, %v1186_v19  ;;  %v1062_v34 = vld [vmem:[%s17643_s3 + $0x1050] sm:$0xff]  ;;  %v14520_v32 = vcombine.low %v1182_v18, %v1186_v19 }
 0x330   : > { %5827 = vmatprep.subr.bf16.mxu1 %v14353_v38  ;;  %v1066_v27 = vld [vmem:[%s17643_s3 + $0x1070] sm:$0xff] }
 0x331   : > { %5787 = vmatpush1.bf16.msra.mxu0 %v14224_v46  ;;  %v1190_v39 = vld [vmem:[%s17643_s3 + $0x1450] sm:$0xff]  ;;  %v14401_v33 = vcombine.high %v1062_v34, %v1066_v27  ;;  %v14400_v45 = vcombine.low %v1062_v34, %v1066_v27 }
 0x332   : > { %5788 = vmatprep.subr.bf16.mxu0 %v14233_v23  ;;  %v1194_v29 = vld [vmem:[%s17643_s3 + $0x1470] sm:$0xff] }
 0x333   : > { %5828 = vmatpush1.bf16.msra.mxu1 %v14352_v47  ;;  %v14529_v35 = vcombine.high %v1190_v39, %v1194_v29  ;;  %v1070_v36 = vld [vmem:[%s17643_s3 + $0x1090] sm:$0xff]  ;;  %v14528_v20 = vcombine.low %v1190_v39, %v1194_v29 }
 0x334   : > { %5829 = vmatprep.subr.bf16.mxu1 %v14361_v49  ;;  %v1074_v38 = vld [vmem:[%s17643_s3 + $0x10b0] sm:$0xff] }
 0x335   : > { %5789 = vmatpush1.bf16.msra.mxu0 %v14232_v61  ;;  %v1198_v42 = vld [vmem:[%s17643_s3 + $0x1490] sm:$0xff]  ;;  %v14409_v46 = vcombine.high %v1070_v36, %v1074_v38  ;;  %v14408_v56 = vcombine.low %v1070_v36, %v1074_v38 }
 0x336   : > { %5790 = vmatprep.subr.bf16.mxu0 %v14241_v63  ;;  %v1202_v44 = vld [vmem:[%s17643_s3 + $0x14b0] sm:$0xff] }
 0x337   : > { %5830 = vmatpush1.bf16.msra.mxu1 %v14360_v62  ;;  %v14537_v47 = vcombine.high %v1198_v42, %v1202_v44  ;;  %v1078_v23 = vld [vmem:[%s17643_s3 + $0x10d0] sm:$0xff]  ;;  %v14536_v57 = vcombine.low %v1198_v42, %v1202_v44 }
 0x338   : > { %5831 = vmatprep.subr.bf16.mxu1 %v14369_v0  ;;  %v1082_v49 = vld [vmem:[%s17643_s3 + $0x10f0] sm:$0xff] }
 0x339   : > { %5791 = vmatpush1.bf16.msra.mxu0 %v14240_v6  ;;  %v1206_v51 = vld [vmem:[%s17643_s3 + $0x14d0] sm:$0xff]  ;;  %v14417_v61 = vcombine.high %v1078_v23, %v1082_v49  ;;  %v14416_v3 = vcombine.low %v1078_v23, %v1082_v49 }
 0x33a   : > { %5792 = vmatprep.subr.bf16.mxu0 %v14249_v9  ;;  %v1210_v53 = vld [vmem:[%s17643_s3 + $0x14f0] sm:$0xff] }
 0x33b   : > { %5832 = vmatpush1.bf16.msra.mxu1 %v14368_v7  ;;  %v14545_v62 = vcombine.high %v1206_v51, %v1210_v53  ;;  %v1086_v63 = vld [vmem:[%s17643_s3 + $0x1110] sm:$0xff]  ;;  %v14544_v4 = vcombine.low %v1206_v51, %v1210_v53 }
 0x33c   : > { %5833 = vmatprep.subr.bf16.mxu1 %v14377_v10  ;;  %v1090_v0 = vld [vmem:[%s17643_s3 + $0x1130] sm:$0xff] }
 0x33d   : > { %5793 = vmatpush1.bf16.msra.mxu0 %v14248_v25  ;;  %v1214_v1 = vld [vmem:[%s17643_s3 + $0x1510] sm:$0xff]  ;;  %v14425_v6 = vcombine.high %v1086_v63, %v1090_v0  ;;  %v14424_v13 = vcombine.low %v1086_v63, %v1090_v0 }
 0x33e   : > { %5794 = vmatprep.subr.bf16.mxu0 %v14257_v15  ;;  %v1218_v2 = vld [vmem:[%s17643_s3 + $0x1530] sm:$0xff] }
 0x33f   : > { %5834 = vmatpush1.bf16.msra.mxu1 %v14376_v14  ;;  %v14553_v7 = vcombine.high %v1214_v1, %v1218_v2  ;;  %v1094_v9 = vld [vmem:[%s17643_s3 + $0x1150] sm:$0xff]  ;;  %v14552_v40 = vcombine.low %v1214_v1, %v1218_v2 }
 0x340   : > { %5835 = vmatprep.subr.bf16.mxu1 %v14385_v43  ;;  %v1098_v10 = vld [vmem:[%s17643_s3 + $0x1170] sm:$0xff] }
 0x341   : > { %5795 = vmatpush1.bf16.msra.mxu0 %v14256_v22  ;;  %v1222_v11 = vld [vmem:[%s17643_s3 + $0x1550] sm:$0xff]  ;;  %v14433_v25 = vcombine.high %v1094_v9, %v1098_v10  ;;  %v14432_v18 = vcombine.low %v1094_v9, %v1098_v10 }
 0x342   : > { %5846 = vmatprep.subr.bf16.mxu0 %v14393_v54  ;;  %v1226_v12 = vld [vmem:[%s17643_s3 + $0x1570] sm:$0xff] }
 0x343   : > { %5836 = vmatpush1.bf16.msra.mxu1 %v14384_v24  ;;  %v14561_v14 = vcombine.high %v1222_v11, %v1226_v12  ;;  %v1102_v15 = vld [vmem:[%s17643_s3 + $0x1190] sm:$0xff]  ;;  %v14560_v19 = vcombine.low %v1222_v11, %v1226_v12 }
 0x344   : > { %5887 = vmatprep.subr.bf16.mxu1 %v14521_v26  ;;  %5797 = vmatmul.mubr.bf16.vlgmr.msra.gmra.mrb[28].mxu0 %v17849_v37  ;;  %v1106_v43 = vld [vmem:[%s17643_s3 + $0x11b0] sm:$0xff] }
 0x345   : > { %5847 = vmatpush1.bf16.msra.mxu0 %v14392_v31  ;;  %5878 = vmatprep.mubr.bf16.mxu0 %v17867_v48  ;;  %v1230_v16 = vld [vmem:[%s17643_s3 + $0x1590] sm:$0xff]  ;;  %v14441_v22 = vcombine.high %v1102_v15, %v1106_v43  ;;  %v14440_v38 = vcombine.low %v1102_v15, %v1106_v43 }
 0x346   : > { %5838 = vmatmul.mubr.bf16.vlgmr.msra.gmra.mrb[28].mxu1 %v17858_v41  ;;  %5848 = vmatprep.subr.bf16.mxu0 %v14401_v33  ;;  %v1234_v55 = vld [vmem:[%s17643_s3 + $0x15b0] sm:$0xff] }
 0x347   : > { %5888 = vmatpush1.bf16.msra.mxu1 %v14520_v32  ;;  %5919 = vmatprep.mubr.bf16.mxu1 %v17874_v50  ;;  %v14569_v54 = vcombine.high %v1230_v16, %v1234_v55  ;;  %v1110_v26 = vld [vmem:[%s17643_s3 + $0x11d0] sm:$0xff] }
 0x348   : > { %5889 = vmatprep.subr.bf16.mxu1 %v14529_v35  ;;  %v1114_v34 = vld [vmem:[%s17643_s3 + $0x11f0] sm:$0xff] }
 0x349   : > { %5849 = vmatpush1.bf16.msra.mxu0 %v14400_v45  ;;  %v1238_v31 = vld [vmem:[%s17643_s3 + $0x15d0] sm:$0xff] }
 0x34a   : > { %5850 = vmatprep.subr.bf16.mxu0 %v14409_v46  ;;  %v1242_v32 = vld [vmem:[%s17643_s3 + $0x15f0] sm:$0xff] }
 0x34b   : > { %5890 = vmatpush1.bf16.msra.mxu1 %v14528_v20  ;;  %v14449_v20 = vcombine.high %v1110_v26, %v1114_v34  ;;  %v1118_v23 = vld [vmem:[%s17643_s3 + $0x1210] sm:$0xff] }
 0x34c   : > { %5891 = vmatprep.subr.bf16.mxu1 %v14537_v47  ;;  %v14577_v47 = vcombine.high %v1238_v31, %v1242_v32  ;;  %v1122_v49 = vld [vmem:[%s17643_s3 + $0x1230] sm:$0xff] }
 0x34d   : > { %5851 = vmatpush1.bf16.msra.mxu0 %v14408_v56  ;;  %v1246_v51 = vld [vmem:[%s17643_s3 + $0x1610] sm:$0xff]  ;;  %v14448_v56 = vcombine.low %v1110_v26, %v1114_v34 }
 0x34e   : > { %5852 = vmatprep.subr.bf16.mxu0 %v14417_v61  ;;  %v1250_v53 = vld [vmem:[%s17643_s3 + $0x1630] sm:$0xff]  ;;  %v14457_v61 = vcombine.high %v1118_v23, %v1122_v49 }
 0x34f   : > { %5892 = vmatpush1.bf16.msra.mxu1 %v14536_v57  ;;  %v14576_v57 = vcombine.low %v1238_v31, %v1242_v32  ;;  %v1126_v63 = vld [vmem:[%s17643_s3 + $0x1250] sm:$0xff] }
 0x350   : > { %5893 = vmatprep.subr.bf16.mxu1 %v14545_v62  ;;  %v14585_v62 = vcombine.high %v1246_v51, %v1250_v53  ;;  %v1130_v0 = vld [vmem:[%s17643_s3 + $0x1270] sm:$0xff] }
 0x351   : > { %5853 = vmatpush1.bf16.msra.mxu0 %v14416_v3  ;;  %v1254_v1 = vld [vmem:[%s17643_s3 + $0x1650] sm:$0xff]  ;;  %v14456_v3 = vcombine.low %v1118_v23, %v1122_v49 }
 0x352   : > { %5854 = vmatprep.subr.bf16.mxu0 %v14425_v6  ;;  %v1258_v2 = vld [vmem:[%s17643_s3 + $0x1670] sm:$0xff]  ;;  %v14465_v6 = vcombine.high %v1126_v63, %v1130_v0 }
 0x353   : > { %5894 = vmatpush1.bf16.msra.mxu1 %v14544_v4  ;;  %v14584_v4 = vcombine.low %v1246_v51, %v1250_v53  ;;  %v1134_v9 = vld [vmem:[%s17643_s3 + $0x1290] sm:$0xff] }
 0x354   : > { %5895 = vmatprep.subr.bf16.mxu1 %v14553_v7  ;;  %v14593_v7 = vcombine.high %v1254_v1, %v1258_v2  ;;  %v1138_v10 = vld [vmem:[%s17643_s3 + $0x12b0] sm:$0xff] }
 0x355   : > { %5855 = vmatpush1.bf16.msra.mxu0 %v14424_v13  ;;  %v1262_v11 = vld [vmem:[%s17643_s3 + $0x1690] sm:$0xff]  ;;  %v14464_v13 = vcombine.low %v1126_v63, %v1130_v0 }
 0x356   : > { %5856 = vmatprep.subr.bf16.mxu0 %v14433_v25  ;;  %v1266_v12 = vld [vmem:[%s17643_s3 + $0x16b0] sm:$0xff]  ;;  %v14473_v25 = vcombine.high %v1134_v9, %v1138_v10 }
 0x357   : > { %5896 = vmatpush1.bf16.msra.mxu1 %v14552_v40  ;;  %v5552_v24 = vpop.f32.mrb[16].mxu0  ;;  %v14592_v40 = vcombine.low %v1254_v1, %v1258_v2  ;;  %v1142_v15 = vld [vmem:[%s17643_s3 + $0x12d0] sm:$0xff] }
 0x358   : > { %5897 = vmatprep.subr.bf16.mxu1 %v14561_v14  ;;  %v5553_v27 = vadd.f32 %v5552_v24, %v18259_v52  ;;  %v5554_v29 = vpop.f32.mrb[17].mxu0  ;;  %v14568_v52 = vcombine.low %v1230_v16, %v1234_v55  ;;  %v14601_v14 = vcombine.high %v1262_v11, %v1266_v12  ;;  %v1146_v43 = vld [vmem:[%s17643_s3 + $0x12f0] sm:$0xff] }
 0x359   : > { %v5593_v39 = vpop.f32.mrb[16].mxu1  ;;  %v5555_v33 = vadd.f32 %v5554_v29, %v18261_v58  ;;  %v5556_v36 = vpop.f32.mrb[18].mxu0  ;;  %5857 = vmatpush1.bf16.msra.mxu0 %v14432_v18  ;;  %v1270_v16 = vld [vmem:[%s17643_s3 + $0x16d0] sm:$0xff]  ;;  %v14472_v18 = vcombine.low %v1134_v9, %v1138_v10  ;;  %v671_v9 = vld [vmem:[%s17643_s3 + $0x418] sm:$0xff] }
 0x35a   : > { %v5595_v35 = vpop.f32.mrb[17].mxu1  ;;  %v18333_v42 = vadd.f32 %v5593_v39, %v5553_v27  ;;  %v5557_v45 = vpop.f32.mrb[19].mxu0  ;;  %5858 = vmatprep.subr.bf16.mxu0 %v14441_v22  ;;  %v1274_v55 = vld [vmem:[%s17643_s3 + $0x16f0] sm:$0xff]  ;;  %v14481_v22 = vcombine.high %v1142_v15, %v1146_v43  ;;  %v14480_v39 = vcombine.low %v1142_v15, %v1146_v43  ;;  %v675_v10 = vld [vmem:[%s17643_s3 + $0x438] sm:$0xff] }
 0x35b   : > { %v5597_v44 = vpop.f32.mrb[18].mxu1  ;;  %5898 = vmatpush1.bf16.msra.mxu1 %v14560_v19  ;;  %v18335_v46 = vadd.f32 %v5595_v35, %v5555_v33  ;;  %v14600_v19 = vcombine.low %v1262_v11, %v1266_v12  ;;  %v14609_v24 = vcombine.high %v1270_v16, %v1274_v55  ;;  %v1154_v26 = vld [vmem:[%s17643_s3 + $0x1330] sm:$0xff]  ;;  %v14608_v29 = vcombine.low %v1270_v16, %v1274_v55  ;;  %v679_v15 = vld [vmem:[%s17643_s3 + $0x458] sm:$0xff] }
 0x35c   : > { %v5598_v58 = vpop.f32.mrb[19].mxu1  ;;  %5899 = vmatprep.subr.bf16.mxu1 %v14569_v54  ;;  %v1150_v54 = vld [vmem:[%s17643_s3 + $0x1310] sm:$0xff]  ;;  %v683_v43 = vld [vmem:[%s17643_s3 + $0x478] sm:$0xff]  ;;  %v14010_v55 = vcombine.low %v671_v9, %v675_v10 }
 0x35d   : > { %5859 = vmatpush1.bf16.msra.mxu0 %v14440_v38  ;;  %v1278_v34 = vld [vmem:[%s17643_s3 + $0x1710] sm:$0xff]  ;;  %v14489_v31 = vcombine.high %v1150_v54, %v1154_v26  ;;  %v14488_v44 = vcombine.low %v1150_v54, %v1154_v26  ;;  %v687_v54 = vld [vmem:[%s17643_s3 + $0x498] sm:$0xff] }
 0x35e   : > { %5860 = vmatprep.subr.bf16.mxu0 %v14449_v20  ;;  %v1282_v27 = vld [vmem:[%s17643_s3 + $0x1730] sm:$0xff]  ;;  %v691_v26 = vld [vmem:[%s17643_s3 + $0x4b8] sm:$0xff] }
 0x35f   : > { %5900 = vmatpush1.bf16.msra.mxu1 %v14568_v52  ;;  %v14617_v32 = vcombine.high %v1278_v34, %v1282_v27  ;;  %v1158_v33 = vld [vmem:[%s17643_s3 + $0x1350] sm:$0xff]  ;;  %v14616_v45 = vcombine.low %v1278_v34, %v1282_v27  ;;  %v14018_v27 = vcombine.low %v679_v15, %v683_v43 }
 0x360   : > { %5901 = vmatprep.subr.bf16.mxu1 %v14577_v47  ;;  %v1162_v35 = vld [vmem:[%s17643_s3 + $0x1370] sm:$0xff] }
 0x361   : > { %5861 = vmatpush1.bf16.msra.mxu0 %v14448_v56  ;;  %v1286_v36 = vld [vmem:[%s17643_s3 + $0x1750] sm:$0xff]  ;;  %v14497_v52 = vcombine.high %v1158_v33, %v1162_v35  ;;  %v14496_v51 = vcombine.low %v1158_v33, %v1162_v35  ;;  %v695_v33 = vld [vmem:[%s17643_s3 + $0x4d8] sm:$0xff] }
 0x362   : > { %5862 = vmatprep.subr.bf16.mxu0 %v14457_v61  ;;  %v1290_v38 = vld [vmem:[%s17643_s3 + $0x1770] sm:$0xff]  ;;  %v699_v35 = vld [vmem:[%s17643_s3 + $0x4f8] sm:$0xff] }
 0x363   : > { %5902 = vmatpush1.bf16.msra.mxu1 %v14576_v57  ;;  %v14625_v20 = vcombine.high %v1286_v36, %v1290_v38  ;;  %v1166_v58 = vld [vmem:[%s17643_s3 + $0x1390] sm:$0xff]  ;;  %v14624_v53 = vcombine.low %v1286_v36, %v1290_v38  ;;  %v14026_v38 = vcombine.low %v687_v54, %v691_v26 }
 0x364   : > { %5903 = vmatprep.subr.bf16.mxu1 %v14585_v62  ;;  %v1170_v47 = vld [vmem:[%s17643_s3 + $0x13b0] sm:$0xff] }
 0x365   : > { %5863 = vmatpush1.bf16.msra.mxu0 %v14456_v3  ;;  %v1294_v23 = vld [vmem:[%s17643_s3 + $0x1790] sm:$0xff]  ;;  %v14505_v56 = vcombine.high %v1166_v58, %v1170_v47  ;;  %v14504_v1 = vcombine.low %v1166_v58, %v1170_v47  ;;  %v703_v58 = vld [vmem:[%s17643_s3 + $0x518] sm:$0xff] }
 0x366   : > { %5864 = vmatprep.subr.bf16.mxu0 %v14465_v6  ;;  %v1298_v49 = vld [vmem:[%s17643_s3 + $0x17b0] sm:$0xff]  ;;  %v543_v6 = vld [vmem:[%s17643_s3 + $0x18] sm:$0xff] }
 0x367   : > { %5904 = vmatpush1.bf16.msra.mxu1 %v14584_v4  ;;  %v14633_v57 = vcombine.high %v1294_v23, %v1298_v49  ;;  %v1174_v61 = vld [vmem:[%s17643_s3 + $0x13d0] sm:$0xff]  ;;  %v14632_v2 = vcombine.low %v1294_v23, %v1298_v49 }
 0x368   : > { %5905 = vmatprep.subr.bf16.mxu1 %v14593_v7  ;;  %v1178_v62 = vld [vmem:[%s17643_s3 + $0x13f0] sm:$0xff]  ;;  %v547_v7 = vld [vmem:[%s17643_s3 + $0x38] sm:$0xff] }
 0x369   : > { %5865 = vmatpush1.bf16.msra.mxu0 %v14464_v13  ;;  %v1302_v63 = vld [vmem:[%s17643_s3 + $0x17d0] sm:$0xff]  ;;  %v14513_v3 = vcombine.high %v1174_v61, %v1178_v62  ;;  %v14512_v11 = vcombine.low %v1174_v61, %v1178_v62  ;;  %v13883_v13 = vcombine.high %v543_v6, %v547_v7  ;;  %v13882_v16 = vcombine.low %v543_v6, %v547_v7 }
 0x36a   : > { %5866 = vmatprep.subr.bf16.mxu0 %v14473_v25  ;;  %v1306_v0 = vld [vmem:[%s17643_s3 + $0x17f0] sm:$0xff]  ;;  %v551_v25 = vld [vmem:[%s17643_s3 + $0x58] sm:$0xff] }
 0x36b   : > { %5906 = vmatpush1.bf16.msra.mxu1 %v14592_v40  ;;  %v14641_v4 = vcombine.high %v1302_v63, %v1306_v0  ;;  %v14640_v12 = vcombine.low %v1302_v63, %v1306_v0  ;;  %v14011_v40 = vcombine.high %v671_v9, %v675_v10 }
 0x36c   : > { %5907 = vmatprep.subr.bf16.mxu1 %v14601_v14  ;;  %v555_v14 = vld [vmem:[%s17643_s3 + $0x78] sm:$0xff] }
 0x36d   : > { %5867 = vmatpush1.bf16.msra.mxu0 %v14472_v18  ;;  %v13891_v18 = vcombine.high %v551_v25, %v555_v14  ;;  %v13890_v34 = vcombine.low %v551_v25, %v555_v14 }
 0x36e   : > { %5868 = vmatprep.subr.bf16.mxu0 %v14481_v22  ;;  %v559_v22 = vld [vmem:[%s17643_s3 + $0x98] sm:$0xff] }
 0x36f   : > { %5908 = vmatpush1.bf16.msra.mxu1 %v14600_v19  ;;  %v14019_v19 = vcombine.high %v679_v15, %v683_v43  ;;  %v727_v15 = vld [vmem:[%s17643_s3 + $0x5d8] sm:$0xff] }
 0x370   : > { %5909 = vmatprep.subr.bf16.mxu1 %v14609_v24  ;;  %v563_v24 = vld [vmem:[%s17643_s3 + $0xb8] sm:$0xff] }
 0x371   : > { %5869 = vmatpush1.bf16.msra.mxu0 %v14480_v39  ;;  %v13899_v39 = vcombine.high %v559_v22, %v563_v24  ;;  %v13898_v36 = vcombine.low %v559_v22, %v563_v24  ;;  %v731_v43 = vld [vmem:[%s17643_s3 + $0x5f8] sm:$0xff] }
 0x372   : > { %5870 = vmatprep.subr.bf16.mxu0 %v14489_v31  ;;  %v567_v31 = vld [vmem:[%s17643_s3 + $0xd8] sm:$0xff] }
 0x373   : > { %5910 = vmatpush1.bf16.msra.mxu1 %v14608_v29  ;;  %v14027_v29 = vcombine.high %v687_v54, %v691_v26  ;;  %v529_v54 = vld [vmem:[#allocation2 + $0x18] sm:$0xff] }
 0x374   : > { %5911 = vmatprep.subr.bf16.mxu1 %v14617_v32  ;;  %v571_v32 = vld [vmem:[%s17643_s3 + $0xf8] sm:$0xff] }
 0x375   : > { %5871 = vmatpush1.bf16.msra.mxu0 %v14488_v44  ;;  %v13907_v44 = vcombine.high %v567_v31, %v571_v32  ;;  %v13906_v47 = vcombine.low %v567_v31, %v571_v32  ;;  %v607_v31 = vld [vmem:[%s17643_s3 + $0x218] sm:$0xff] }
 0x376   : > { %5872 = vmatprep.subr.bf16.mxu0 %v14497_v52  ;;  %v575_v52 = vld [vmem:[%s17643_s3 + $0x118] sm:$0xff] }
 0x377   : > { %5912 = vmatpush1.bf16.msra.mxu1 %v14616_v45  ;;  %v14035_v45 = vcombine.high %v695_v33, %v699_v35  ;;  %v611_v32 = vld [vmem:[%s17643_s3 + $0x238] sm:$0xff] }
 0x378   : > { %5913 = vmatprep.subr.bf16.mxu1 %v14625_v20  ;;  %v579_v20 = vld [vmem:[%s17643_s3 + $0x138] sm:$0xff] }
 0x379   : > { %5873 = vmatpush1.bf16.msra.mxu0 %v14496_v51  ;;  %v13915_v23 = vcombine.high %v575_v52, %v579_v20  ;;  %v583_v51 = vld [vmem:[%s17643_s3 + $0x158] sm:$0xff]  ;;  %v13914_v61 = vcombine.low %v575_v52, %v579_v20  ;;  %v13947_v52 = vcombine.high %v607_v31, %v611_v32 }
 0x37a   : > { %5874 = vmatprep.subr.bf16.mxu0 %v14505_v56  ;;  %v711_v56 = vld [vmem:[%s17643_s3 + $0x558] sm:$0xff] }
 0x37b   : > { %5914 = vmatpush1.bf16.msra.mxu1 %v14624_v53  ;;  %v587_v53 = vld [vmem:[%s17643_s3 + $0x178] sm:$0xff] }
 0x37c   : > { %5915 = vmatprep.subr.bf16.mxu1 %v14633_v57  ;;  %v715_v57 = vld [vmem:[%s17643_s3 + $0x578] sm:$0xff]  ;;  %v13923_v63 = vcombine.high %v583_v51, %v587_v53  ;;  %v13922_v6 = vcombine.low %v583_v51, %v587_v53 }
 0x37d   : > { %5875 = vmatpush1.bf16.msra.mxu0 %v14504_v1  ;;  %v14051_v0 = vcombine.high %v711_v56, %v715_v57  ;;  %v591_v1 = vld [vmem:[%s17643_s3 + $0x198] sm:$0xff]  ;;  %v14050_v7 = vcombine.low %v711_v56, %v715_v57 }
 0x37e   : > { %5876 = vmatprep.subr.bf16.mxu0 %v14513_v3  ;;  %v719_v3 = vld [vmem:[%s17643_s3 + $0x598] sm:$0xff] }
 0x37f   : > { %5916 = vmatpush1.bf16.msra.mxu1 %v14632_v2  ;;  %v595_v2 = vld [vmem:[%s17643_s3 + $0x1b8] sm:$0xff] }
 0x380   : > { %5917 = vmatprep.subr.bf16.mxu1 %v14641_v4  ;;  %v723_v4 = vld [vmem:[%s17643_s3 + $0x5b8] sm:$0xff]  ;;  %v13931_v9 = vcombine.high %v591_v1, %v595_v2  ;;  %v13930_v22 = vcombine.low %v591_v1, %v595_v2 }
 0x381   : > { %5877 = vmatpush1.bf16.msra.mxu0 %v14512_v11  ;;  %v14059_v11 = vcombine.high %v719_v3, %v723_v4  ;;  %v623_v56 = vld [vmem:[%s17643_s3 + $0x298] sm:$0xff] }
 0x382   : > { %5928 = vmatprep.subr.bf16.mxu0 %v13883_v13  ;;  %v603_v13 = vld [vmem:[%s17643_s3 + $0x1f8] sm:$0xff] }
 0x383   : > { %5918 = vmatpush1.bf16.msra.mxu1 %v14640_v12  ;;  %v599_v12 = vld [vmem:[%s17643_s3 + $0x1d8] sm:$0xff] }
 0x384   : > { %5969 = vmatprep.subr.bf16.mxu1 %v14011_v40  ;;  %5879 = vmatmul.mubr.bf16.vlgmr.msra.gmra.mrb[32].mxu0 %v17939_v5  ;;  %v627_v57 = vld [vmem:[%s17643_s3 + $0x2b8] sm:$0xff] }
 0x385   : > { %5929 = vmatpush1.bf16.msra.mxu0 %v13882_v16  ;;  %5960 = vmatprep.mubr.bf16.mxu0 %v17709_v59  ;;  %v707_v59 = vld [vmem:[%s17643_s3 + $0x538] sm:$0xff]  ;;  %v528_v16 = vld [vmem:[#allocation2 + $0x10] sm:$0xff]  ;;  %v13963_v1 = vcombine.high %v623_v56, %v627_v57 }
 0x386   : > { %5920 = vmatmul.mubr.bf16.vlgmr.msra.gmra.mrb[32].mxu1 %v17945_v8  ;;  %5930 = vmatprep.subr.bf16.mxu0 %v13891_v18  ;;  %v14043_v49 = vcombine.high %v703_v58, %v707_v59  ;;  %v14042_v62 = vcombine.low %v703_v58, %v707_v59  ;;  %v615_v58 = vld [vmem:[%s17643_s3 + $0x258] sm:$0xff] }
 0x387   : > { %5970 = vmatpush1.bf16.msra.mxu1 %v14010_v55  ;;  %6001 = vmatprep.mubr.bf16.mxu1 %v17713_v60  ;;  %v14034_v60 = vcombine.low %v695_v33, %v699_v35  ;;  %v735_v35 = vld [vmem:[%s17643_s3 + $0x618] sm:$0xff] }
 0x388   : > { %5971 = vmatprep.subr.bf16.mxu1 %v14019_v19  ;;  %v619_v59 = vld [vmem:[%s17643_s3 + $0x278] sm:$0xff] }
 0x389   : > { %5931 = vmatpush1.bf16.msra.mxu0 %v13890_v34  ;;  %v14058_v34 = vcombine.low %v719_v3, %v723_v4  ;;  %v13955_v51 = vcombine.high %v615_v58, %v619_v59  ;;  %v631_v3 = vld [vmem:[%s17643_s3 + $0x2d8] sm:$0xff] }
 0x38a   : > { %5932 = vmatprep.subr.bf16.mxu0 %v13899_v39  ;;  %v635_v4 = vld [vmem:[%s17643_s3 + $0x2f8] sm:$0xff] }
 0x38b   : > { %5972 = vmatpush1.bf16.msra.mxu1 %v14018_v27  ;;  %v13939_v27 = vcombine.high %v599_v12, %v603_v13 }
 0x38c   : > { %5973 = vmatprep.subr.bf16.mxu1 %v14027_v29 }
 0x38d   : > { %5933 = vmatpush1.bf16.msra.mxu0 %v13898_v36  ;;  %v739_v36 = vld [vmem:[%s17643_s3 + $0x638] sm:$0xff] }
 0x38e   : > { %5934 = vmatprep.subr.bf16.mxu0 %v13907_v44  ;;  %v13938_v44 = vcombine.low %v599_v12, %v603_v13  ;;  %v14075_v20 = vcombine.high %v735_v35, %v739_v36  ;;  %v639_v13 = vld [vmem:[%s17643_s3 + $0x318] sm:$0xff] }
 0x38f   : > { %5974 = vmatpush1.bf16.msra.mxu1 %v14026_v38 }
 0x390   : > { %5975 = vmatprep.subr.bf16.mxu1 %v14035_v45  ;;  %v14066_v45 = vcombine.low %v727_v15, %v731_v43 }
 0x391   : > { %5935 = vmatpush1.bf16.msra.mxu0 %v13906_v47  ;;  %v743_v47 = vld [vmem:[%s17643_s3 + $0x658] sm:$0xff] }
 0x392   : > { %5936 = vmatprep.subr.bf16.mxu0 %v13915_v23  ;;  %v13946_v23 = vcombine.low %v607_v31, %v611_v32 }
 0x393   : > { %5976 = vmatpush1.bf16.msra.mxu1 %v14034_v60  ;;  %v747_v60 = vld [vmem:[%s17643_s3 + $0x678] sm:$0xff] }
 0x394   : > { %5977 = vmatprep.subr.bf16.mxu1 %v14043_v49  ;;  %v14074_v49 = vcombine.low %v735_v35, %v739_v36  ;;  %v14083_v53 = vcombine.high %v743_v47, %v747_v60  ;;  %v663_v36 = vld [vmem:[%s17643_s3 + $0x3d8] sm:$0xff] }
 0x395   : > { %5937 = vmatpush1.bf16.msra.mxu0 %v13914_v61  ;;  %v751_v61 = vld [vmem:[%s17643_s3 + $0x698] sm:$0xff] }
 0x396   : > { %5938 = vmatprep.subr.bf16.mxu0 %v13923_v63  ;;  %v13954_v63 = vcombine.low %v615_v58, %v619_v59 }
 0x397   : > { %5978 = vmatpush1.bf16.msra.mxu1 %v14042_v62  ;;  %v5634_v10 = vpop.f32.mrb[20].mxu0  ;;  %v755_v62 = vld [vmem:[%s17643_s3 + $0x6b8] sm:$0xff] }
 0x398   : > { %5979 = vmatprep.subr.bf16.mxu1 %v14051_v0  ;;  %v5635_v40 = vadd.f32 %v5634_v10, %v18333_v42  ;;  %v5636_v14 = vpop.f32.mrb[21].mxu0  ;;  %v14082_v0 = vcombine.low %v743_v47, %v747_v60  ;;  %v14091_v2 = vcombine.high %v751_v61, %v755_v62  ;;  %v14090_v10 = vcombine.low %v751_v61, %v755_v62  ;;  %v799_v47 = vld [vmem:[%s17643_s3 + $0x818] sm:$0xff] }
 0x399   : > { %v5675_v25 = vpop.f32.mrb[20].mxu1  ;;  %v5637_v55 = vadd.f32 %v5636_v14, %v18335_v46  ;;  %v5638_v19 = vpop.f32.mrb[22].mxu0  ;;  %5939 = vmatpush1.bf16.msra.mxu0 %v13922_v6  ;;  %v14067_v46 = vcombine.high %v727_v15, %v731_v43  ;;  %v759_v6 = vld [vmem:[%s17643_s3 + $0x6d8] sm:$0xff]  ;;  %v13970_v15 = vcombine.low %v631_v3, %v635_v4 }
 0x39a   : > { %v5677_v18 = vpop.f32.mrb[21].mxu1  ;;  %v5676_v24 = vadd.f32 %v5675_v25, %v5635_v40  ;;  %v5639_v42 = vpop.f32.mrb[23].mxu0  ;;  %5940 = vmatprep.subr.bf16.mxu0 %v13931_v9  ;;  %v13962_v9 = vcombine.low %v623_v56, %v627_v57  ;;  %v643_v40 = vld [vmem:[%s17643_s3 + $0x338] sm:$0xff] }
 0x39b   : > { %v5679_v26 = vpop.f32.mrb[22].mxu1  ;;  %5980 = vmatpush1.bf16.msra.mxu1 %v14050_v7  ;;  %v5678_v39 = vadd.f32 %v5677_v18, %v5637_v55  ;;  %v763_v7 = vld [vmem:[%s17643_s3 + $0x6f8] sm:$0xff] }
 0x39c   : > { %v5680_v29 = vpop.f32.mrb[23].mxu1  ;;  %5981 = vmatprep.subr.bf16.mxu1 %v14059_v11  ;;  %v6176_v33 = vadd.f32 %v5676_v24, %v528_v16  ;;  %v13971_v11 = vcombine.high %v631_v3, %v635_v4  ;;  %v14099_v12 = vcombine.high %v759_v6, %v763_v7  ;;  %v767_v25 = vld [vmem:[%s17643_s3 + $0x718] sm:$0xff]  ;;  %v14098_v43 = vcombine.low %v759_v6, %v763_v7 }
 0x39d   : > { %v6177_v38 = vadd.f32 %v5678_v39, %v529_v54  ;;  %5941 = vmatpush1.bf16.msra.mxu0 %v13930_v22  ;;  %v771_v14 = vld [vmem:[%s17643_s3 + $0x738] sm:$0xff]  ;;  %v13979_v16 = vcombine.high %v639_v13, %v643_v40  ;;  %v13978_v54 = vcombine.low %v639_v13, %v643_v40 }
 0x39e   : > { %6184 = vst [vmem:[#allocation2 + $0x10] sm:$0xff] %v6176_v33  ;;  %5942 = vmatprep.subr.bf16.mxu0 %v13939_v27  ;;  %v14107_v55 = vcombine.high %v767_v25, %v771_v14  ;;  %v647_v18 = vld [vmem:[%s17643_s3 + $0x358] sm:$0xff]  ;;  %v14106_v26 = vcombine.low %v767_v25, %v771_v14 }
 0x39f   : > { %5982 = vmatpush1.bf16.msra.mxu1 %v14058_v34  ;;  %6185 = vst [vmem:[#allocation2 + $0x18] sm:$0xff] %v6177_v38  ;;  %v651_v19 = vld [vmem:[%s17643_s3 + $0x378] sm:$0xff] }
 0x3a0   : > { %5983 = vmatprep.subr.bf16.mxu1 %v14067_v46  ;;  %v775_v22 = vld [vmem:[%s17643_s3 + $0x758] sm:$0xff]  ;;  %v13987_v42 = vcombine.high %v647_v18, %v651_v19  ;;  %v13986_v31 = vcombine.low %v647_v18, %v651_v19 }
 0x3a1   : > { %5943 = vmatpush1.bf16.msra.mxu0 %v13938_v44  ;;  %v779_v24 = vld [vmem:[%s17643_s3 + $0x778] sm:$0xff] }
 0x3a2   : > { %5944 = vmatprep.subr.bf16.mxu0 %v13947_v52  ;;  %v14115_v34 = vcombine.high %v775_v22, %v779_v24  ;;  %v655_v27 = vld [vmem:[%s17643_s3 + $0x398] sm:$0xff]  ;;  %v14114_v32 = vcombine.low %v775_v22, %v779_v24 }
 0x3a3   : > { %5984 = vmatpush1.bf16.msra.mxu1 %v14066_v45  ;;  %v659_v39 = vld [vmem:[%s17643_s3 + $0x3b8] sm:$0xff] }
 0x3a4   : > { %5985 = vmatprep.subr.bf16.mxu1 %v14075_v20  ;;  %v783_v29 = vld [vmem:[%s17643_s3 + $0x798] sm:$0xff]  ;;  %v13995_v33 = vcombine.high %v655_v27, %v659_v39  ;;  %v13994_v52 = vcombine.low %v655_v27, %v659_v39 }
 0x3a5   : > { %5945 = vmatpush1.bf16.msra.mxu0 %v13946_v23  ;;  %v787_v46 = vld [vmem:[%s17643_s3 + $0x7b8] sm:$0xff] }
 0x3a6   : > { %5946 = vmatprep.subr.bf16.mxu0 %v13955_v51  ;;  %v14123_v35 = vcombine.high %v783_v29, %v787_v46  ;;  %v667_v38 = vld [vmem:[%s17643_s3 + $0x3f8] sm:$0xff]  ;;  %v14122_v20 = vcombine.low %v783_v29, %v787_v46 }
 0x3a7   : > { %5986 = vmatpush1.bf16.msra.mxu1 %v14074_v49  ;;  %v791_v44 = vld [vmem:[%s17643_s3 + $0x7d8] sm:$0xff]  ;;  %v14003_v58 = vcombine.high %v663_v36, %v667_v38  ;;  %v14002_v51 = vcombine.low %v663_v36, %v667_v38 }
 0x3a8   : > { %5987 = vmatprep.subr.bf16.mxu1 %v14083_v53  ;;  %v795_v45 = vld [vmem:[%s17643_s3 + $0x7f8] sm:$0xff] }
 0x3a9   : > { %5947 = vmatpush1.bf16.msra.mxu0 %v13954_v63  ;;  %v14131_v59 = vcombine.high %v791_v44, %v795_v45  ;;  %v803_v60 = vld [vmem:[%s17643_s3 + $0x838] sm:$0xff]  ;;  %v14130_v53 = vcombine.low %v791_v44, %v795_v45 }
 0x3aa   : > { %5948 = vmatprep.subr.bf16.mxu0 %v13963_v1  ;;  %v927_v23 = vld [vmem:[%s17643_s3 + $0xc18] sm:$0xff]  ;;  %v14139_v56 = vcombine.high %v799_v47, %v803_v60  ;;  %v14138_v1 = vcombine.low %v799_v47, %v803_v60 }
 0x3ab   : > { %5988 = vmatpush1.bf16.msra.mxu1 %v14082_v0  ;;  %v931_v49 = vld [vmem:[%s17643_s3 + $0xc38] sm:$0xff] }
 0x3ac   : > { %5989 = vmatprep.subr.bf16.mxu1 %v14091_v2  ;;  %v14267_v57 = vcombine.high %v927_v23, %v931_v49  ;;  %v807_v61 = vld [vmem:[%s17643_s3 + $0x858] sm:$0xff]  ;;  %v14266_v2 = vcombine.low %v927_v23, %v931_v49 }
 0x3ad   : > { %5949 = vmatpush1.bf16.msra.mxu0 %v13962_v9  ;;  %v811_v62 = vld [vmem:[%s17643_s3 + $0x878] sm:$0xff] }
 0x3ae   : > { %5950 = vmatprep.subr.bf16.mxu0 %v13971_v11  ;;  %v935_v63 = vld [vmem:[%s17643_s3 + $0xc58] sm:$0xff]  ;;  %v14147_v3 = vcombine.high %v807_v61, %v811_v62  ;;  %v14146_v11 = vcombine.low %v807_v61, %v811_v62 }
 0x3af   : > { %5990 = vmatpush1.bf16.msra.mxu1 %v14090_v10  ;;  %v939_v0 = vld [vmem:[%s17643_s3 + $0xc78] sm:$0xff] }
 0x3b0   : > { %5991 = vmatprep.subr.bf16.mxu1 %v14099_v12  ;;  %v14275_v4 = vcombine.high %v935_v63, %v939_v0  ;;  %v815_v6 = vld [vmem:[%s17643_s3 + $0x898] sm:$0xff]  ;;  %v14274_v12 = vcombine.low %v935_v63, %v939_v0 }
 0x3b1   : > { %5951 = vmatpush1.bf16.msra.mxu0 %v13970_v15  ;;  %v819_v7 = vld [vmem:[%s17643_s3 + $0x8b8] sm:$0xff] }
 0x3b2   : > { %5952 = vmatprep.subr.bf16.mxu0 %v13979_v16  ;;  %v943_v9 = vld [vmem:[%s17643_s3 + $0xc98] sm:$0xff]  ;;  %v14155_v13 = vcombine.high %v815_v6, %v819_v7 }
 0x3b3   : > { %5992 = vmatpush1.bf16.msra.mxu1 %v14098_v43  ;;  %v947_v10 = vld [vmem:[%s17643_s3 + $0xcb8] sm:$0xff] }
 0x3b4   : > { %5993 = vmatprep.subr.bf16.mxu1 %v14107_v55  ;;  %v14283_v40 = vcombine.high %v943_v9, %v947_v10  ;;  %v823_v25 = vld [vmem:[%s17643_s3 + $0x8d8] sm:$0xff]  ;;  %v14282_v43 = vcombine.low %v943_v9, %v947_v10 }
 0x3b5   : > { %5953 = vmatpush1.bf16.msra.mxu0 %v13978_v54  ;;  %v827_v14 = vld [vmem:[%s17643_s3 + $0x8f8] sm:$0xff] }
 0x3b6   : > { %5954 = vmatprep.subr.bf16.mxu0 %v13987_v42  ;;  %v955_v15 = vld [vmem:[%s17643_s3 + $0xcf8] sm:$0xff]  ;;  %v14163_v16 = vcombine.high %v823_v25, %v827_v14  ;;  %v14162_v24 = vcombine.low %v823_v25, %v827_v14 }
 0x3b7   : > { %5994 = vmatpush1.bf16.msra.mxu1 %v14106_v26  ;;  %v831_v18 = vld [vmem:[%s17643_s3 + $0x918] sm:$0xff] }
 0x3b8   : > { %5995 = vmatprep.subr.bf16.mxu1 %v14115_v34  ;;  %v835_v19 = vld [vmem:[%s17643_s3 + $0x938] sm:$0xff] }
 0x3b9   : > { %5955 = vmatpush1.bf16.msra.mxu0 %v13986_v31  ;;  %v959_v22 = vld [vmem:[%s17643_s3 + $0xd18] sm:$0xff]  ;;  %v14171_v54 = vcombine.high %v831_v18, %v835_v19  ;;  %v14170_v29 = vcombine.low %v831_v18, %v835_v19 }
 0x3ba   : > { %5956 = vmatprep.subr.bf16.mxu0 %v13995_v33  ;;  %v839_v42 = vld [vmem:[%s17643_s3 + $0x958] sm:$0xff] }
 0x3bb   : > { %5996 = vmatpush1.bf16.msra.mxu1 %v14114_v32  ;;  %v843_v34 = vld [vmem:[%s17643_s3 + $0x978] sm:$0xff] }
 0x3bc   : > { %5997 = vmatprep.subr.bf16.mxu1 %v14123_v35  ;;  %v967_v27 = vld [vmem:[%s17643_s3 + $0xd58] sm:$0xff]  ;;  %v14179_v31 = vcombine.high %v839_v42, %v843_v34  ;;  %v14178_v44 = vcombine.low %v839_v42, %v843_v34 }
 0x3bd   : > { %5957 = vmatpush1.bf16.msra.mxu0 %v13994_v52  ;;  %v971_v39 = vld [vmem:[%s17643_s3 + $0xd78] sm:$0xff] }
 0x3be   : > { %5958 = vmatprep.subr.bf16.mxu0 %v14003_v58  ;;  %v14307_v32 = vcombine.high %v967_v27, %v971_v39  ;;  %v847_v33 = vld [vmem:[%s17643_s3 + $0x998] sm:$0xff]  ;;  %v14306_v45 = vcombine.low %v967_v27, %v971_v39 }
 0x3bf   : > { %5998 = vmatpush1.bf16.msra.mxu1 %v14122_v20  ;;  %v851_v35 = vld [vmem:[%s17643_s3 + $0x9b8] sm:$0xff] }
 0x3c0   : > { %5999 = vmatprep.subr.bf16.mxu1 %v14131_v59  ;;  %v975_v36 = vld [vmem:[%s17643_s3 + $0xd98] sm:$0xff]  ;;  %v14187_v52 = vcombine.high %v847_v33, %v851_v35  ;;  %v14186_v61 = vcombine.low %v847_v33, %v851_v35 }
 0x3c1   : > { %5959 = vmatpush1.bf16.msra.mxu0 %v14002_v51  ;;  %v979_v38 = vld [vmem:[%s17643_s3 + $0xdb8] sm:$0xff] }
 0x3c2   : > { %6010 = vmatprep.subr.bf16.mxu0 %v14139_v56  ;;  %v14315_v58 = vcombine.high %v975_v36, %v979_v38  ;;  %v855_v59 = vld [vmem:[%s17643_s3 + $0x9d8] sm:$0xff] }
 0x3c3   : > { %6000 = vmatpush1.bf16.msra.mxu1 %v14130_v53  ;;  %v859_v47 = vld [vmem:[%s17643_s3 + $0x9f8] sm:$0xff] }
 0x3c4   : > { %6051 = vmatprep.subr.bf16.mxu1 %v14267_v57  ;;  %5961 = vmatmul.mubr.bf16.vlgmr.msra.gmra.mrb[36].mxu0 %v17759_v17  ;;  %v951_v17 = vld [vmem:[%s17643_s3 + $0xcd8] sm:$0xff] }
 0x3c5   : > { %6011 = vmatpush1.bf16.msra.mxu0 %v14138_v1  ;;  %6042 = vmatprep.mubr.bf16.mxu0 %v17777_v28  ;;  %v14291_v55 = vcombine.high %v951_v17, %v955_v15  ;;  %v963_v28 = vld [vmem:[%s17643_s3 + $0xd38] sm:$0xff]  ;;  %v14314_v1 = vcombine.low %v975_v36, %v979_v38 }
 0x3c6   : > { %6002 = vmatmul.mubr.bf16.vlgmr.msra.gmra.mrb[36].mxu1 %v17768_v21  ;;  %6012 = vmatprep.subr.bf16.mxu0 %v14147_v3  ;;  %v14154_v21 = vcombine.low %v815_v6, %v819_v7  ;;  %v14299_v26 = vcombine.high %v959_v22, %v963_v28  ;;  %v14298_v46 = vcombine.low %v959_v22, %v963_v28  ;;  %v983_v49 = vld [vmem:[%s17643_s3 + $0xdd8] sm:$0xff] }
 0x3c7   : > { %6052 = vmatpush1.bf16.msra.mxu1 %v14266_v2  ;;  %6083 = vmatprep.mubr.bf16.mxu1 %v17784_v30  ;;  %v14290_v30 = vcombine.low %v951_v17, %v955_v15  ;;  %v987_v51 = vld [vmem:[%s17643_s3 + $0xdf8] sm:$0xff]  ;;  %v14195_v2 = vcombine.high %v855_v59, %v859_v47 }
 0x3c8   : > { %6053 = vmatprep.subr.bf16.mxu1 %v14275_v4  ;;  %v14323_v4 = vcombine.high %v983_v49, %v987_v51  ;;  %v863_v6 = vld [vmem:[%s17643_s3 + $0xa18] sm:$0xff] }
 0x3c9   : > { %6013 = vmatpush1.bf16.msra.mxu0 %v14146_v11  ;;  %v867_v7 = vld [vmem:[%s17643_s3 + $0xa38] sm:$0xff]  ;;  %v14194_v11 = vcombine.low %v855_v59, %v859_v47 }
 0x3ca   : > { %6014 = vmatprep.subr.bf16.mxu0 %v14155_v13  ;;  %v991_v9 = vld [vmem:[%s17643_s3 + $0xe18] sm:$0xff]  ;;  %v14203_v13 = vcombine.high %v863_v6, %v867_v7 }
 0x3cb   : > { %6054 = vmatpush1.bf16.msra.mxu1 %v14274_v12  ;;  %v995_v10 = vld [vmem:[%s17643_s3 + $0xe38] sm:$0xff]  ;;  %v14322_v12 = vcombine.low %v983_v49, %v987_v51 }
 0x3cc   : > { %6055 = vmatprep.subr.bf16.mxu1 %v14283_v40  ;;  %v14331_v40 = vcombine.high %v991_v9, %v995_v10  ;;  %v871_v25 = vld [vmem:[%s17643_s3 + $0xa58] sm:$0xff] }
 0x3cd   : > { %6015 = vmatpush1.bf16.msra.mxu0 %v14154_v21  ;;  %v875_v14 = vld [vmem:[%s17643_s3 + $0xa78] sm:$0xff]  ;;  %v14202_v21 = vcombine.low %v863_v6, %v867_v7 }
 0x3ce   : > { %6016 = vmatprep.subr.bf16.mxu0 %v14163_v16  ;;  %v999_v17 = vld [vmem:[%s17643_s3 + $0xe58] sm:$0xff]  ;;  %v14211_v16 = vcombine.high %v871_v25, %v875_v14 }
 0x3cf   : > { %6056 = vmatpush1.bf16.msra.mxu1 %v14282_v43  ;;  %v1003_v15 = vld [vmem:[%s17643_s3 + $0xe78] sm:$0xff]  ;;  %v14330_v43 = vcombine.low %v991_v9, %v995_v10 }
 0x3d0   : > { %6057 = vmatprep.subr.bf16.mxu1 %v14291_v55  ;;  %v14339_v55 = vcombine.high %v999_v17, %v1003_v15  ;;  %v879_v18 = vld [vmem:[%s17643_s3 + $0xa98] sm:$0xff] }
 0x3d1   : > { %6017 = vmatpush1.bf16.msra.mxu0 %v14162_v24  ;;  %v883_v19 = vld [vmem:[%s17643_s3 + $0xab8] sm:$0xff]  ;;  %v14210_v24 = vcombine.low %v871_v25, %v875_v14 }
 0x3d2   : > { %6018 = vmatprep.subr.bf16.mxu0 %v14171_v54  ;;  %v1007_v22 = vld [vmem:[%s17643_s3 + $0xe98] sm:$0xff]  ;;  %v14219_v54 = vcombine.high %v879_v18, %v883_v19 }
 0x3d3   : > { %6058 = vmatpush1.bf16.msra.mxu1 %v14290_v30  ;;  %v1011_v28 = vld [vmem:[%s17643_s3 + $0xeb8] sm:$0xff]  ;;  %v14338_v30 = vcombine.low %v999_v17, %v1003_v15 }
 0x3d4   : > { %6059 = vmatprep.subr.bf16.mxu1 %v14299_v26  ;;  %v14347_v26 = vcombine.high %v1007_v22, %v1011_v28  ;;  %v887_v42 = vld [vmem:[%s17643_s3 + $0xad8] sm:$0xff] }
 0x3d5   : > { %6019 = vmatpush1.bf16.msra.mxu0 %v14170_v29  ;;  %v891_v34 = vld [vmem:[%s17643_s3 + $0xaf8] sm:$0xff]  ;;  %v14218_v29 = vcombine.low %v879_v18, %v883_v19 }
 0x3d6   : > { %6020 = vmatprep.subr.bf16.mxu0 %v14179_v31  ;;  %v1015_v27 = vld [vmem:[%s17643_s3 + $0xed8] sm:$0xff]  ;;  %v14227_v31 = vcombine.high %v887_v42, %v891_v34 }
 0x3d7   : > { %6060 = vmatpush1.bf16.msra.mxu1 %v14298_v46  ;;  %v5716_v20 = vpop.f32.mrb[24].mxu0  ;;  %v1019_v39 = vld [vmem:[%s17643_s3 + $0xef8] sm:$0xff]  ;;  %v14346_v46 = vcombine.low %v1007_v22, %v1011_v28 }
 0x3d8   : > { %6061 = vmatprep.subr.bf16.mxu1 %v14307_v32  ;;  %v5718_v23 = vpop.f32.mrb[25].mxu0  ;;  %v14355_v32 = vcombine.high %v1015_v27, %v1019_v39  ;;  %v895_v33 = vld [vmem:[%s17643_s3 + $0xb18] sm:$0xff] }
 0x3d9   : > { %v5757_v60 = vpop.f32.mrb[24].mxu1  ;;  %v5720_v57 = vpop.f32.mrb[26].mxu0  ;;  %6021 = vmatpush1.bf16.msra.mxu0 %v14178_v44  ;;  %v899_v35 = vld [vmem:[%s17643_s3 + $0xb38] sm:$0xff]  ;;  %v14226_v44 = vcombine.low %v887_v42, %v891_v34 }
 0x3da   : > { %v18475_v53 = vadd.f32 %v5757_v60, %v5716_v20  ;;  %v5759_v56 = vpop.f32.mrb[25].mxu1  ;;  %v5721_v0 = vpop.f32.mrb[27].mxu0  ;;  %6022 = vmatprep.subr.bf16.mxu0 %v14187_v52  ;;  %v1023_v36 = vld [vmem:[%s17643_s3 + $0xf18] sm:$0xff]  ;;  %v14235_v52 = vcombine.high %v895_v33, %v899_v35 }
 0x3db   : > { %v18477_v62 = vadd.f32 %v5759_v56, %v5718_v23  ;;  %v5761_v63 = vpop.f32.mrb[26].mxu1  ;;  %6062 = vmatpush1.bf16.msra.mxu1 %v14306_v45  ;;  %v1027_v38 = vld [vmem:[%s17643_s3 + $0xf38] sm:$0xff]  ;;  %v14354_v45 = vcombine.low %v1015_v27, %v1019_v39  ;;  %v14234_v23 = vcombine.low %v895_v33, %v899_v35 }
 0x3dc   : > { %v5762_v3 = vpop.f32.mrb[27].mxu1  ;;  %6063 = vmatprep.subr.bf16.mxu1 %v14315_v58  ;;  %v14363_v20 = vcombine.high %v1023_v36, %v1027_v38  ;;  %v903_v58 = vld [vmem:[%s17643_s3 + $0xb58] sm:$0xff]  ;;  %v14362_v49 = vcombine.low %v1023_v36, %v1027_v38 }
 0x3dd   : > { %6023 = vmatpush1.bf16.msra.mxu0 %v14186_v61  ;;  %v907_v59 = vld [vmem:[%s17643_s3 + $0xb78] sm:$0xff] }
 0x3de   : > { %6024 = vmatprep.subr.bf16.mxu0 %v14195_v2  ;;  %v1031_v47 = vld [vmem:[%s17643_s3 + $0xf58] sm:$0xff]  ;;  %v14243_v51 = vcombine.high %v903_v58, %v907_v59 }
 0x3df   : > { %6064 = vmatpush1.bf16.msra.mxu1 %v14314_v1  ;;  %v1035_v60 = vld [vmem:[%s17643_s3 + $0xf78] sm:$0xff]  ;;  %v14242_v1 = vcombine.low %v903_v58, %v907_v59 }
 0x3e0   : > { %6065 = vmatprep.subr.bf16.mxu1 %v14323_v4  ;;  %v14371_v56 = vcombine.high %v1031_v47, %v1035_v60  ;;  %v911_v57 = vld [vmem:[%s17643_s3 + $0xb98] sm:$0xff]  ;;  %v14370_v2 = vcombine.low %v1031_v47, %v1035_v60 }
 0x3e1   : > { %6025 = vmatpush1.bf16.msra.mxu0 %v14194_v11  ;;  %v915_v61 = vld [vmem:[%s17643_s3 + $0xbb8] sm:$0xff] }
 0x3e2   : > { %6026 = vmatprep.subr.bf16.mxu0 %v14203_v13  ;;  %v1039_v63 = vld [vmem:[%s17643_s3 + $0xf98] sm:$0xff]  ;;  %v14251_v3 = vcombine.high %v911_v57, %v915_v61  ;;  %v14250_v11 = vcombine.low %v911_v57, %v915_v61 }
 0x3e3   : > { %6066 = vmatpush1.bf16.msra.mxu1 %v14322_v12  ;;  %v1043_v0 = vld [vmem:[%s17643_s3 + $0xfb8] sm:$0xff] }
 0x3e4   : > { %6067 = vmatprep.subr.bf16.mxu1 %v14331_v40  ;;  %v14379_v4 = vcombine.high %v1039_v63, %v1043_v0  ;;  %v919_v6 = vld [vmem:[%s17643_s3 + $0xbd8] sm:$0xff]  ;;  %v14378_v12 = vcombine.low %v1039_v63, %v1043_v0 }
 0x3e5   : > { %6027 = vmatpush1.bf16.msra.mxu0 %v14202_v21  ;;  %v923_v7 = vld [vmem:[%s17643_s3 + $0xbf8] sm:$0xff] }
 0x3e6   : > { %6028 = vmatprep.subr.bf16.mxu0 %v14211_v16  ;;  %v1047_v9 = vld [vmem:[%s17643_s3 + $0xfd8] sm:$0xff]  ;;  %v14259_v13 = vcombine.high %v919_v6, %v923_v7  ;;  %v14258_v21 = vcombine.low %v919_v6, %v923_v7 }
 0x3e7   : > { %6068 = vmatpush1.bf16.msra.mxu1 %v14330_v43  ;;  %v1051_v10 = vld [vmem:[%s17643_s3 + $0xff8] sm:$0xff] }
 0x3e8   : > { %6069 = vmatprep.subr.bf16.mxu1 %v14339_v55  ;;  %v14387_v40 = vcombine.high %v1047_v9, %v1051_v10  ;;  %v1055_v25 = vld [vmem:[%s17643_s3 + $0x1018] sm:$0xff]  ;;  %v14386_v43 = vcombine.low %v1047_v9, %v1051_v10 }
 0x3e9   : > { %6029 = vmatpush1.bf16.msra.mxu0 %v14210_v24  ;;  %v1059_v14 = vld [vmem:[%s17643_s3 + $0x1038] sm:$0xff] }
 0x3ea   : > { %6030 = vmatprep.subr.bf16.mxu0 %v14219_v54  ;;  %v1183_v17 = vld [vmem:[%s17643_s3 + $0x1418] sm:$0xff]  ;;  %v14395_v16 = vcombine.high %v1055_v25, %v1059_v14  ;;  %v14394_v24 = vcombine.low %v1055_v25, %v1059_v14 }
 0x3eb   : > { %6070 = vmatpush1.bf16.msra.mxu1 %v14338_v30  ;;  %v1187_v15 = vld [vmem:[%s17643_s3 + $0x1438] sm:$0xff] }
 0x3ec   : > { %6071 = vmatprep.subr.bf16.mxu1 %v14347_v26  ;;  %v14523_v55 = vcombine.high %v1183_v17, %v1187_v15  ;;  %v1063_v18 = vld [vmem:[%s17643_s3 + $0x1058] sm:$0xff]  ;;  %v14522_v30 = vcombine.low %v1183_v17, %v1187_v15 }
 0x3ed   : > { %6031 = vmatpush1.bf16.msra.mxu0 %v14218_v29  ;;  %v1067_v19 = vld [vmem:[%s17643_s3 + $0x1078] sm:$0xff] }
 0x3ee   : > { %6032 = vmatprep.subr.bf16.mxu0 %v14227_v31  ;;  %v1191_v22 = vld [vmem:[%s17643_s3 + $0x1458] sm:$0xff]  ;;  %v14403_v54 = vcombine.high %v1063_v18, %v1067_v19  ;;  %v14402_v29 = vcombine.low %v1063_v18, %v1067_v19 }
 0x3ef   : > { %6072 = vmatpush1.bf16.msra.mxu1 %v14346_v46  ;;  %v1195_v28 = vld [vmem:[%s17643_s3 + $0x1478] sm:$0xff] }
 0x3f0   : > { %6073 = vmatprep.subr.bf16.mxu1 %v14355_v32  ;;  %v14531_v26 = vcombine.high %v1191_v22, %v1195_v28  ;;  %v1071_v42 = vld [vmem:[%s17643_s3 + $0x1098] sm:$0xff]  ;;  %v14530_v46 = vcombine.low %v1191_v22, %v1195_v28 }
 0x3f1   : > { %6033 = vmatpush1.bf16.msra.mxu0 %v14226_v44  ;;  %v1075_v34 = vld [vmem:[%s17643_s3 + $0x10b8] sm:$0xff] }
 0x3f2   : > { %6034 = vmatprep.subr.bf16.mxu0 %v14235_v52  ;;  %v1199_v27 = vld [vmem:[%s17643_s3 + $0x1498] sm:$0xff]  ;;  %v14411_v31 = vcombine.high %v1071_v42, %v1075_v34 }
 0x3f3   : > { %6074 = vmatpush1.bf16.msra.mxu1 %v14354_v45  ;;  %v1203_v39 = vld [vmem:[%s17643_s3 + $0x14b8] sm:$0xff] }
 0x3f4   : > { %6075 = vmatprep.subr.bf16.mxu1 %v14363_v20  ;;  %v14539_v32 = vcombine.high %v1199_v27, %v1203_v39  ;;  %v1079_v33 = vld [vmem:[%s17643_s3 + $0x10d8] sm:$0xff]  ;;  %v14538_v38 = vcombine.low %v1199_v27, %v1203_v39 }
 0x3f5   : > { %6035 = vmatpush1.bf16.msra.mxu0 %v14234_v23  ;;  %v1083_v35 = vld [vmem:[%s17643_s3 + $0x10f8] sm:$0xff] }
 0x3f6   : > { %6036 = vmatprep.subr.bf16.mxu0 %v14243_v51  ;;  %v1211_v36 = vld [vmem:[%s17643_s3 + $0x14f8] sm:$0xff]  ;;  %v14419_v44 = vcombine.high %v1079_v33, %v1083_v35  ;;  %v14418_v59 = vcombine.low %v1079_v33, %v1083_v35 }
 0x3f7   : > { %6076 = vmatpush1.bf16.msra.mxu1 %v14362_v49  ;;  %v1087_v52 = vld [vmem:[%s17643_s3 + $0x1118] sm:$0xff] }
 0x3f8   : > { %6077 = vmatprep.subr.bf16.mxu1 %v14371_v56  ;;  %v1091_v20 = vld [vmem:[%s17643_s3 + $0x1138] sm:$0xff] }
 0x3f9   : > { %6037 = vmatpush1.bf16.msra.mxu0 %v14242_v1  ;;  %v1215_v58 = vld [vmem:[%s17643_s3 + $0x1518] sm:$0xff]  ;;  %v14427_v47 = vcombine.high %v1087_v52, %v1091_v20  ;;  %v14426_v57 = vcombine.low %v1087_v52, %v1091_v20 }
 0x3fa   : > { %6038 = vmatprep.subr.bf16.mxu0 %v14251_v3  ;;  %v1095_v23 = vld [vmem:[%s17643_s3 + $0x1158] sm:$0xff] }
 0x3fb   : > { %6078 = vmatpush1.bf16.msra.mxu1 %v14370_v2  ;;  %v1099_v49 = vld [vmem:[%s17643_s3 + $0x1178] sm:$0xff] }
 0x3fc   : > { %6079 = vmatprep.subr.bf16.mxu1 %v14379_v4  ;;  %v1223_v51 = vld [vmem:[%s17643_s3 + $0x1558] sm:$0xff]  ;;  %v14435_v63 = vcombine.high %v1095_v23, %v1099_v49  ;;  %v14434_v6 = vcombine.low %v1095_v23, %v1099_v49 }
 0x3fd   : > { %6039 = vmatpush1.bf16.msra.mxu0 %v14250_v11  ;;  %v1227_v56 = vld [vmem:[%s17643_s3 + $0x1578] sm:$0xff] }
 0x3fe   : > { %6040 = vmatprep.subr.bf16.mxu0 %v14259_v13  ;;  %v14563_v0 = vcombine.high %v1223_v51, %v1227_v56  ;;  %v1103_v1 = vld [vmem:[%s17643_s3 + $0x1198] sm:$0xff]  ;;  %v14562_v7 = vcombine.low %v1223_v51, %v1227_v56 }
 0x3ff   : > { %6080 = vmatpush1.bf16.msra.mxu1 %v14378_v12  ;;  %v1107_v2 = vld [vmem:[%s17643_s3 + $0x11b8] sm:$0xff] }
 0x400   : > { %6081 = vmatprep.subr.bf16.mxu1 %v14387_v40  ;;  %v1231_v3 = vld [vmem:[%s17643_s3 + $0x1598] sm:$0xff]  ;;  %v14443_v9 = vcombine.high %v1103_v1, %v1107_v2 }
 0x401   : > { %6041 = vmatpush1.bf16.msra.mxu0 %v14258_v21  ;;  %v1235_v4 = vld [vmem:[%s17643_s3 + $0x15b8] sm:$0xff] }
 0x402   : > { %6092 = vmatprep.subr.bf16.mxu0 %v14395_v16  ;;  %v14571_v11 = vcombine.high %v1231_v3, %v1235_v4  ;;  %v1111_v12 = vld [vmem:[%s17643_s3 + $0x11d8] sm:$0xff] }
 0x403   : > { %6082 = vmatpush1.bf16.msra.mxu1 %v14386_v43  ;;  %v1115_v13 = vld [vmem:[%s17643_s3 + $0x11f8] sm:$0xff] }
 0x404   : > { %6133 = vmatprep.subr.bf16.mxu1 %v14523_v55  ;;  %6043 = vmatmul.mubr.bf16.vlgmr.msra.gmra.mrb[40].mxu0 %v17849_v37  ;;  %v1207_v37 = vld [vmem:[%s17643_s3 + $0x14d8] sm:$0xff]  ;;  %v14442_v55 = vcombine.low %v1103_v1, %v1107_v2  ;;  %v14451_v28 = vcombine.high %v1111_v12, %v1115_v13  ;;  %v14450_v27 = vcombine.low %v1111_v12, %v1115_v13 }
 0x405   : > { %6093 = vmatpush1.bf16.msra.mxu0 %v14394_v24  ;;  %6124 = vmatprep.mubr.bf16.mxu0 %v17867_v48  ;;  %v14547_v45 = vcombine.high %v1207_v37, %v1211_v36  ;;  %v1219_v48 = vld [vmem:[%s17643_s3 + $0x1538] sm:$0xff] }
 0x406   : > { %6084 = vmatmul.mubr.bf16.vlgmr.msra.gmra.mrb[40].mxu1 %v17858_v41  ;;  %6094 = vmatprep.subr.bf16.mxu0 %v14403_v54  ;;  %v14410_v41 = vcombine.low %v1071_v42, %v1075_v34  ;;  %v14555_v60 = vcombine.high %v1215_v58, %v1219_v48  ;;  %v14554_v61 = vcombine.low %v1215_v58, %v1219_v48  ;;  %v1239_v17 = vld [vmem:[%s17643_s3 + $0x15d8] sm:$0xff] }
 0x407   : > { %6134 = vmatpush1.bf16.msra.mxu1 %v14522_v30  ;;  %6165 = vmatprep.mubr.bf16.mxu1 %v17874_v50  ;;  %v14546_v50 = vcombine.low %v1207_v37, %v1211_v36  ;;  %v1243_v15 = vld [vmem:[%s17643_s3 + $0x15f8] sm:$0xff] }
 0x408   : > { %6135 = vmatprep.subr.bf16.mxu1 %v14531_v26  ;;  %v14579_v30 = vcombine.high %v1239_v17, %v1243_v15  ;;  %v1119_v54 = vld [vmem:[%s17643_s3 + $0x1218] sm:$0xff]  ;;  %v14578_v39 = vcombine.low %v1239_v17, %v1243_v15 }
 0x409   : > { %6095 = vmatpush1.bf16.msra.mxu0 %v14402_v29  ;;  %v1123_v26 = vld [vmem:[%s17643_s3 + $0x1238] sm:$0xff] }
 0x40a   : > { %6096 = vmatprep.subr.bf16.mxu0 %v14411_v31  ;;  %v1247_v42 = vld [vmem:[%s17643_s3 + $0x1618] sm:$0xff]  ;;  %v14459_v29 = vcombine.high %v1119_v54, %v1123_v26  ;;  %v14458_v37 = vcombine.low %v1119_v54, %v1123_v26 }
 0x40b   : > { %6136 = vmatpush1.bf16.msra.mxu1 %v14530_v46  ;;  %v1251_v34 = vld [vmem:[%s17643_s3 + $0x1638] sm:$0xff] }
 0x40c   : > { %6137 = vmatprep.subr.bf16.mxu1 %v14539_v32  ;;  %v14587_v46 = vcombine.high %v1247_v42, %v1251_v34  ;;  %v1127_v31 = vld [vmem:[%s17643_s3 + $0x1258] sm:$0xff]  ;;  %v14586_v36 = vcombine.low %v1247_v42, %v1251_v34 }
 0x40d   : > { %6097 = vmatpush1.bf16.msra.mxu0 %v14410_v41  ;;  %v1131_v32 = vld [vmem:[%s17643_s3 + $0x1278] sm:$0xff] }
 0x40e   : > { %6098 = vmatprep.subr.bf16.mxu0 %v14419_v44  ;;  %v1255_v33 = vld [vmem:[%s17643_s3 + $0x1658] sm:$0xff]  ;;  %v14467_v41 = vcombine.high %v1127_v31, %v1131_v32  ;;  %v14466_v58 = vcombine.low %v1127_v31, %v1131_v32 }
 0x40f   : > { %6138 = vmatpush1.bf16.msra.mxu1 %v14538_v38  ;;  %v1259_v35 = vld [vmem:[%s17643_s3 + $0x1678] sm:$0xff] }
 0x410   : > { %6139 = vmatprep.subr.bf16.mxu1 %v14547_v45  ;;  %v14595_v38 = vcombine.high %v1255_v33, %v1259_v35  ;;  %v1135_v44 = vld [vmem:[%s17643_s3 + $0x1298] sm:$0xff]  ;;  %v14594_v48 = vcombine.low %v1255_v33, %v1259_v35  ;;  %v530_v33 = vld [vmem:[#allocation2 + $0x20] sm:$0xff] }
 0x411   : > { %6099 = vmatpush1.bf16.msra.mxu0 %v14418_v59  ;;  %v1139_v45 = vld [vmem:[%s17643_s3 + $0x12b8] sm:$0xff] }
 0x412   : > { %6100 = vmatprep.subr.bf16.mxu0 %v14427_v47  ;;  %v1263_v52 = vld [vmem:[%s17643_s3 + $0x1698] sm:$0xff]  ;;  %v14475_v59 = vcombine.high %v1135_v44, %v1139_v45  ;;  %v14474_v51 = vcombine.low %v1135_v44, %v1139_v45 }
 0x413   : > { %6140 = vmatpush1.bf16.msra.mxu1 %v14546_v50  ;;  %v1267_v20 = vld [vmem:[%s17643_s3 + $0x16b8] sm:$0xff] }
 0x414   : > { %6141 = vmatprep.subr.bf16.mxu1 %v14555_v60  ;;  %v14603_v50 = vcombine.high %v1263_v52, %v1267_v20  ;;  %v1143_v47 = vld [vmem:[%s17643_s3 + $0x12d8] sm:$0xff]  ;;  %v14602_v56 = vcombine.low %v1263_v52, %v1267_v20 }
 0x415   : > { %6101 = vmatpush1.bf16.msra.mxu0 %v14426_v57  ;;  %v1147_v60 = vld [vmem:[%s17643_s3 + $0x12f8] sm:$0xff] }
 0x416   : > { %6102 = vmatprep.subr.bf16.mxu0 %v14435_v63  ;;  %v1271_v23 = vld [vmem:[%s17643_s3 + $0x16d8] sm:$0xff]  ;;  %v14483_v57 = vcombine.high %v1143_v47, %v1147_v60 }
 0x417   : > { %6142 = vmatpush1.bf16.msra.mxu1 %v14554_v61  ;;  %v5798_v10 = vpop.f32.mrb[28].mxu0  ;;  %v1275_v49 = vld [vmem:[%s17643_s3 + $0x16f8] sm:$0xff] }
 0x418   : > { %6143 = vmatprep.subr.bf16.mxu1 %v14563_v0  ;;  %v5799_v40 = vadd.f32 %v5798_v10, %v18475_v53  ;;  %v5800_v14 = vpop.f32.mrb[29].mxu0  ;;  %v14570_v53 = vcombine.low %v1231_v3, %v1235_v4  ;;  %v14611_v61 = vcombine.high %v1271_v23, %v1275_v49  ;;  %v1151_v63 = vld [vmem:[%s17643_s3 + $0x1318] sm:$0xff]  ;;  %v14482_v3 = vcombine.low %v1143_v47, %v1147_v60 }
 0x419   : > { %v5839_v25 = vpop.f32.mrb[28].mxu1  ;;  %v5801_v21 = vadd.f32 %v5800_v14, %v18477_v62  ;;  %v5802_v16 = vpop.f32.mrb[30].mxu0  ;;  %6103 = vmatpush1.bf16.msra.mxu0 %v14434_v6  ;;  %v1155_v0 = vld [vmem:[%s17643_s3 + $0x1338] sm:$0xff]  ;;  %v14610_v4 = vcombine.low %v1271_v23, %v1275_v49 }
 0x41a   : > { %v5841_v43 = vpop.f32.mrb[29].mxu1  ;;  %v18549_v18 = vadd.f32 %v5839_v25, %v5799_v40  ;;  %v5803_v22 = vpop.f32.mrb[31].mxu0  ;;  %6104 = vmatprep.subr.bf16.mxu0 %v14443_v9  ;;  %v1279_v1 = vld [vmem:[%s17643_s3 + $0x1718] sm:$0xff]  ;;  %v14491_v6 = vcombine.high %v1151_v63, %v1155_v0  ;;  %v14490_v13 = vcombine.low %v1151_v63, %v1155_v0 }
 0x41b   : > { %v5843_v19 = vpop.f32.mrb[30].mxu1  ;;  %6144 = vmatpush1.bf16.msra.mxu1 %v14562_v7  ;;  %v18551_v24 = vadd.f32 %v5841_v43, %v5801_v21  ;;  %v1283_v2 = vld [vmem:[%s17643_s3 + $0x1738] sm:$0xff] }
 0x41c   : > { %v5844_v62 = vpop.f32.mrb[31].mxu1  ;;  %6145 = vmatprep.subr.bf16.mxu1 %v14571_v11  ;;  %v14619_v7 = vcombine.high %v1279_v1, %v1283_v2  ;;  %v1159_v9 = vld [vmem:[%s17643_s3 + $0x1358] sm:$0xff]  ;;  %v14618_v40 = vcombine.low %v1279_v1, %v1283_v2 }
 0x41d   : > { %6105 = vmatpush1.bf16.msra.mxu0 %v14442_v55  ;;  %v1163_v10 = vld [vmem:[%s17643_s3 + $0x1378] sm:$0xff] }
 0x41e   : > { %6106 = vmatprep.subr.bf16.mxu0 %v14451_v28  ;;  %v1287_v11 = vld [vmem:[%s17643_s3 + $0x1758] sm:$0xff]  ;;  %v14499_v25 = vcombine.high %v1159_v9, %v1163_v10  ;;  %v14498_v16 = vcombine.low %v1159_v9, %v1163_v10 }
 0x41f   : > { %6146 = vmatpush1.bf16.msra.mxu1 %v14570_v53  ;;  %v1291_v12 = vld [vmem:[%s17643_s3 + $0x1778] sm:$0xff] }
 0x420   : > { %6147 = vmatprep.subr.bf16.mxu1 %v14579_v30  ;;  %v14627_v14 = vcombine.high %v1287_v11, %v1291_v12  ;;  %v1167_v17 = vld [vmem:[%s17643_s3 + $0x1398] sm:$0xff]  ;;  %v14626_v55 = vcombine.low %v1287_v11, %v1291_v12 }
 0x421   : > { %6107 = vmatpush1.bf16.msra.mxu0 %v14450_v27  ;;  %v1171_v15 = vld [vmem:[%s17643_s3 + $0x13b8] sm:$0xff] }
 0x422   : > { %6108 = vmatprep.subr.bf16.mxu0 %v14459_v29  ;;  %v1295_v21 = vld [vmem:[%s17643_s3 + $0x1798] sm:$0xff]  ;;  %v14507_v19 = vcombine.high %v1167_v17, %v1171_v15  ;;  %v14506_v54 = vcombine.low %v1167_v17, %v1171_v15 }
 0x423   : > { %6148 = vmatpush1.bf16.msra.mxu1 %v14578_v39  ;;  %v1299_v43 = vld [vmem:[%s17643_s3 + $0x17b8] sm:$0xff] }
 0x424   : > { %6149 = vmatprep.subr.bf16.mxu1 %v14587_v46  ;;  %v14635_v22 = vcombine.high %v1295_v21, %v1299_v43  ;;  %v1175_v53 = vld [vmem:[%s17643_s3 + $0x13d8] sm:$0xff]  ;;  %v14634_v26 = vcombine.low %v1295_v21, %v1299_v43 }
 0x425   : > { %6109 = vmatpush1.bf16.msra.mxu0 %v14458_v37  ;;  %v1179_v28 = vld [vmem:[%s17643_s3 + $0x13f8] sm:$0xff] }
 0x426   : > { %6110 = vmatprep.subr.bf16.mxu0 %v14467_v41  ;;  %v1303_v62 = vld [vmem:[%s17643_s3 + $0x17d8] sm:$0xff]  ;;  %v14515_v42 = vcombine.high %v1175_v53, %v1179_v28  ;;  %v14514_v27 = vcombine.low %v1175_v53, %v1179_v28  ;;  %v15634_v53 = vld [vmem:[#allocation11] sm:$0xff] (!%p14644_p4)   ;;  %v17260_v28 = vmov (!%p14644_p4), 0.0  }
 0x427   : > { %6150 = vmatpush1.bf16.msra.mxu1 %v14586_v36  ;;  %v1307_v30 = vld [vmem:[%s17643_s3 + $0x17f8] sm:$0xff] }
 0x428   : > { %6151 = vmatprep.subr.bf16.mxu1 %v14595_v38  ;;  %v14643_v34 = vcombine.high %v1303_v62, %v1307_v30  ;;  %v14642_v39 = vcombine.low %v1303_v62, %v1307_v30  ;;  %v531_v38 = vld [vmem:[#allocation2 + $0x28] sm:$0xff]  ;;  %v533_v15 = vld [vmem:[#allocation2 + $0x38] sm:$0xff] }
 0x429   : > { %6111 = vmatpush1.bf16.msra.mxu0 %v14466_v58  ;;  %v15635_v62 = vld [vmem:[#allocation11 + $0x8] sm:$0x7f] (!%p14644_p4)  }
 0x42a   : > { %6112 = vmatprep.subr.bf16.mxu0 %v14475_v59  ;;  %v7545_v30 = vsel (!%p14644_p4), %vm7543_vm0, %v15635_v62, 0 }
 0x42b   : > { %6152 = vmatpush1.bf16.msra.mxu1 %v14594_v48 }
 0x42c   : > { %6153 = vmatprep.subr.bf16.mxu1 %v14603_v50 }
 0x42d   : > { %6113 = vmatpush1.bf16.msra.mxu0 %v14474_v51 }
 0x42e   : > { %6114 = vmatprep.subr.bf16.mxu0 %v14483_v57 }
 0x42f   : > { %6154 = vmatpush1.bf16.msra.mxu1 %v14602_v56 }
 0x430   : > { %6155 = vmatprep.subr.bf16.mxu1 %v14611_v61 }
 0x431   : > { %6115 = vmatpush1.bf16.msra.mxu0 %v14482_v3 }
 0x432   : > { %6116 = vmatprep.subr.bf16.mxu0 %v14491_v6 }
 0x433   : > { %6156 = vmatpush1.bf16.msra.mxu1 %v14610_v4 }
 0x434   : > { %6157 = vmatprep.subr.bf16.mxu1 %v14619_v7 }
 0x435   : > { %6117 = vmatpush1.bf16.msra.mxu0 %v14490_v13  ;;  %v532_v13 = vld [vmem:[#allocation2 + $0x30] sm:$0xff] }
 0x436   : > { %6118 = vmatprep.subr.bf16.mxu0 %v14499_v25 }
 0x437   : > { %6158 = vmatpush1.bf16.msra.mxu1 %v14618_v40 }
 0x438   : > { %6159 = vmatprep.subr.bf16.mxu1 %v14627_v14 }
 0x439   : > { %6119 = vmatpush1.bf16.msra.mxu0 %v14498_v16 }
 0x43a   : > { %6120 = vmatprep.subr.bf16.mxu0 %v14507_v19 }
 0x43b   : > { %6160 = vmatpush1.bf16.msra.mxu1 %v14626_v55 }
 0x43c   : > { %6161 = vmatprep.subr.bf16.mxu1 %v14635_v22 }
 0x43d   : > { %6121 = vmatpush1.bf16.msra.mxu0 %v14506_v54  ;;  %v15636_v54 = vld [vmem:[#allocation14 + $0x4] ss:$16 sps:$4 sm:$0xff] (!%p14644_p4)  }
 0x43e   : > { %6122 = vmatprep.subr.bf16.mxu0 %v14515_v42  ;;  %v7516_v42 = vld [vmem:[#allocation9] sm:$0x1] (!%p14644_p4) }
 0x43f   : > { %6162 = vmatpush1.bf16.msra.mxu1 %v14634_v26  ;;  %v15638_v26 = vld [vmem:[#allocation14] ss:$16 sps:$4 sm:$0xff] (!%p14644_p4)  }
 0x440   : > { %6163 = vmatprep.subr.bf16.mxu1 %v14643_v34  ;;  %v15639_v34 = vld [vmem:[#allocation14 + $0x200] ss:$16 sps:$4 sm:$0xff] (!%p14644_p4)  }
 0x441   : > { %6123 = vmatpush1.bf16.msra.mxu0 %v14514_v27  ;;  %v15641_v27 = vld [vmem:[#allocation14 + $0x204] ss:$16 sps:$4 sm:$0xff] (!%p14644_p4)  }
 0x442   : > { %15466 = vmatprep.subr.bf16.mxu0 (!%p14644_p4), %v17260_v28 }
 0x443   : > { %6164 = vmatpush1.bf16.msra.mxu1 %v14642_v39  ;;  %v15642_v39 = vld [vmem:[#allocation14 + $0x24] ss:$16 sps:$4 sm:$0xff] (!%p14644_p4)  }
 0x444   : > { %6125 = vmatmul.mubr.bf16.vlgmr.msra.gmra.mrb[44].mxu0 %v17939_v5  ;;  %9224 = vmatprep.subr.bf16.mxu1 (!%p14644_p4), %v15636_v54  ;;  %v6197_v54 = vld [vmem:[#allocation2 + $0x18] sm:$0xff] (!%p14644_p4) }
 0x445   : > { %15467 = vmatpush3.bf16.msra.mxu0 (!%p14644_p4), %v15634_v53  ;;  %15470 = vmatprep.mubr.msk.bf16.mxu0 (!%p14644_p4), %vm17261_vm1, %v17260_v28  ;;  %v6195_v53 = vld [vmem:[#allocation2 + $0x8] sm:$0xff] (!%p14644_p4) }
 0x446   : > { %6166 = vmatmul.mubr.bf16.vlgmr.msra.gmra.mrb[44].mxu1 %v17945_v8  ;;  %15468 = vmatprep.subr.bf16.mxu0 (!%p14644_p4), %v17260_v28 }
 0x447   : > { %9225 = vmatpush1.bf16.msra.mxu1 (!%p14644_p4), %v15638_v26 }
 0x448   : > { %9226 = vmatprep.subr.bf16.mxu1 (!%p14644_p4), %v15642_v39  ;;  %v15710_v39 = vld [vmem:[#allocation14 + $0x180] ss:$16 sps:$4 sm:$0xff] (!%p14644_p4)  }
 0x449   : > { %15469 = vmatpush3.bf16.msra.mxu0 (!%p14644_p4), %v7545_v30  ;;  %v6196_v30 = vld [vmem:[#allocation2 + $0x10] sm:$0xff] (!%p14644_p4) }
 0x44a   : > { %9265 = vmatprep.subr.bf16.mxu0 (!%p14644_p4), %v15641_v27  ;;  %v15705_v27 = vld [vmem:[#allocation14 + $0x360] ss:$16 sps:$4 sm:$0xff] (!%p14644_p4)  }
 0x44c   : > { %15471 = vmatmul.mubr.msk.bf16.vlgmr.msra.gmra.mrb[0].mxu0 (!%p14644_p4), %vm7539_vm2, %v7516_v42 }
 0x44d   : > { %9266 = vmatpush1.bf16.msra.mxu0 (!%p14644_p4), %v15639_v34 }
 0x457   : > { %v5880_v29 = vpop.f32.mrb[32].mxu0 }
 0x458   : > { %v5881_v46 = vadd.f32 %v5880_v29, %v18549_v18  ;;  %v5882_v32 = vpop.f32.mrb[33].mxu0  ;;  %v15644_v29 = vld [vmem:[#allocation14 + $0x20] ss:$16 sps:$4 sm:$0xff] (!%p14644_p4)  }
 0x459   : > { %v5921_v31 = vpop.f32.mrb[32].mxu1  ;;  %v5883_v35 = vadd.f32 %v5882_v32, %v18551_v24  ;;  %v5884_v36 = vpop.f32.mrb[34].mxu0  ;;  %9227 = vmatpush1.bf16.msra.mxu1 (!%p14644_p4), %v15644_v29  ;;  %v15645_v32 = vld [vmem:[#allocation14 + $0x220] ss:$16 sps:$4 sm:$0xff] (!%p14644_p4)  }
 0x45a   : > { %v5923_v37 = vpop.f32.mrb[33].mxu1  ;;  %v5922_v41 = vadd.f32 %v5921_v31, %v5881_v46  ;;  %v5885_v45 = vpop.f32.mrb[35].mxu0  ;;  %v15647_v46 = vld [vmem:[#allocation14 + $0x224] ss:$16 sps:$4 sm:$0xff] (!%p14644_p4)   ;;  %v15651_v36 = vld [vmem:[#allocation14 + $0x240] ss:$16 sps:$4 sm:$0xff] (!%p14644_p4)  }
 0x45b   : > { %v5925_v44 = vpop.f32.mrb[34].mxu1  ;;  %v5924_v52 = vadd.f32 %v5923_v37, %v5883_v35  ;;  %v15648_v31 = vld [vmem:[#allocation14 + $0x44] ss:$16 sps:$4 sm:$0xff] (!%p14644_p4)   ;;  %9267 = vmatprep.subr.bf16.mxu0 (!%p14644_p4), %v15647_v46  ;;  %v15657_v45 = vld [vmem:[#allocation14 + $0x260] ss:$16 sps:$4 sm:$0xff] (!%p14644_p4)  }
 0x45c   : > { %v5926_v20 = vpop.f32.mrb[35].mxu1  ;;  %v6178_v58 = vadd.f32 %v5922_v41, %v530_v33  ;;  %v15650_v33 = vld [vmem:[#allocation14 + $0x40] ss:$16 sps:$4 sm:$0xff] (!%p14644_p4)   ;;  %9228 = vmatprep.subr.bf16.mxu1 (!%p14644_p4), %v15648_v31  ;;  %v15653_v35 = vld [vmem:[#allocation14 + $0x244] ss:$16 sps:$4 sm:$0xff] (!%p14644_p4)   ;;  %9268 = vmatpush1.bf16.msra.mxu0 (!%p14644_p4), %v15645_v32 }
 0x45d   : > { %v6179_v5 = vadd.f32 %v5924_v52, %v531_v38  ;;  %v15654_v37 = vld [vmem:[#allocation14 + $0x64] ss:$16 sps:$4 sm:$0xff] (!%p14644_p4)   ;;  %9229 = vmatpush1.bf16.msra.mxu1 (!%p14644_p4), %v15650_v33  ;;  %v15656_v41 = vld [vmem:[#allocation14 + $0x60] ss:$16 sps:$4 sm:$0xff] (!%p14644_p4)   ;;  %9269 = vmatprep.subr.bf16.mxu0 (!%p14644_p4), %v15653_v35 }
 0x45e   : > { %6186 = vst [vmem:[#allocation2 + $0x20] sm:$0xff] %v6178_v58  ;;  %9230 = vmatprep.subr.bf16.mxu1 (!%p14644_p4), %v15654_v37  ;;  %v15659_v38 = vld [vmem:[#allocation14 + $0x264] ss:$16 sps:$4 sm:$0xff] (!%p14644_p4)   ;;  %v15662_v52 = vld [vmem:[#allocation14 + $0x80] ss:$16 sps:$4 sm:$0xff] (!%p14644_p4)  }
 0x45f   : > { %6187 = vst [vmem:[#allocation2 + $0x28] sm:$0xff] %v6179_v5  ;;  %v15660_v44 = vld [vmem:[#allocation14 + $0x84] ss:$16 sps:$4 sm:$0xff] (!%p14644_p4)   ;;  %v15663_v5 = vld [vmem:[#allocation14 + $0x280] ss:$16 sps:$4 sm:$0xff] (!%p14644_p4)  }
 0x460   : > { %9270 = vmatpush1.bf16.msra.mxu0 (!%p14644_p4), %v15651_v36  ;;  %v15665_v20 = vld [vmem:[#allocation14 + $0x284] ss:$16 sps:$4 sm:$0xff] (!%p14644_p4)  }
 0x461   : > { %9231 = vmatpush1.bf16.msra.mxu1 (!%p14644_p4), %v15656_v41  ;;  %9271 = vmatprep.subr.bf16.mxu0 (!%p14644_p4), %v15659_v38  ;;  %v15666_v58 = vld [vmem:[#allocation14 + $0xa4] ss:$16 sps:$4 sm:$0xff] (!%p14644_p4)  }
 0x462   : > { %9232 = vmatprep.subr.bf16.mxu1 (!%p14644_p4), %v15660_v44  ;;  %v6202_v31 = vld [vmem:[#allocation8] sm:$0xff] (!%p14644_p4) }
 0x463   : > { %v15713_v33 = vld [vmem:[#allocation14 + $0x384] ss:$16 sps:$4 sm:$0xff] (!%p14644_p4)  }
 0x464   : > { %9272 = vmatpush1.bf16.msra.mxu0 (!%p14644_p4), %v15657_v45  ;;  %v15714_v35 = vld [vmem:[#allocation14 + $0x1a4] ss:$16 sps:$4 sm:$0xff] (!%p14644_p4)  }
 0x465   : > { %9233 = vmatpush1.bf16.msra.mxu1 (!%p14644_p4), %v15662_v52  ;;  %9273 = vmatprep.subr.bf16.mxu0 (!%p14644_p4), %v15665_v20  ;;  %v6198_v26 = vld [vmem:[#allocation2 + $0x20] sm:$0xff] (!%p14644_p4) }
 0x466   : > { %9234 = vmatprep.subr.bf16.mxu1 (!%p14644_p4), %v15666_v58  ;;  %v6199_v42 = vld [vmem:[#allocation2 + $0x28] sm:$0xff] (!%p14644_p4) }
 0x468   : > { %9274 = vmatpush1.bf16.msra.mxu0 (!%p14644_p4), %v15663_v5 }
 0x497   : > { %v5962_v8 = vpop.f32.mrb[36].mxu0 }
 0x498   : > { %v5964_v18 = vpop.f32.mrb[37].mxu0 }
 0x499   : > { %v6003_v48 = vpop.f32.mrb[36].mxu1  ;;  %v5966_v47 = vpop.f32.mrb[38].mxu0 }
 0x49a   : > { %v6004_v59 = vadd.f32 %v6003_v48, %v5962_v8  ;;  %v6005_v50 = vpop.f32.mrb[37].mxu1  ;;  %v5967_v23 = vpop.f32.mrb[39].mxu0  ;;  %v15668_v8 = vld [vmem:[#allocation14 + $0xa0] ss:$16 sps:$4 sm:$0xff] (!%p14644_p4)   ;;  %v15671_v48 = vld [vmem:[#allocation14 + $0x2a4] ss:$16 sps:$4 sm:$0xff] (!%p14644_p4)  }
 0x49b   : > { %v6006_v60 = vadd.f32 %v6005_v50, %v5964_v18  ;;  %v6007_v24 = vpop.f32.mrb[38].mxu1  ;;  %v15672_v18 = vld [vmem:[#allocation14 + $0xc4] ss:$16 sps:$4 sm:$0xff] (!%p14644_p4)   ;;  %9235 = vmatpush1.bf16.msra.mxu1 (!%p14644_p4), %v15668_v8  ;;  %v15674_v50 = vld [vmem:[#allocation14 + $0xc0] ss:$16 sps:$4 sm:$0xff] (!%p14644_p4)   ;;  %9275 = vmatprep.subr.bf16.mxu0 (!%p14644_p4), %v15671_v48 }
 0x49c   : > { %v6008_v49 = vpop.f32.mrb[39].mxu1  ;;  %9236 = vmatprep.subr.bf16.mxu1 (!%p14644_p4), %v15672_v18  ;;  %v15677_v47 = vld [vmem:[#allocation14 + $0x2c4] ss:$16 sps:$4 sm:$0xff] (!%p14644_p4)   ;;  %v15675_v24 = vld [vmem:[#allocation14 + $0x2c0] ss:$16 sps:$4 sm:$0xff] (!%p14644_p4)  }
 0x49d   : > { %v15680_v23 = vld [vmem:[#allocation14 + $0xe0] ss:$16 sps:$4 sm:$0xff] (!%p14644_p4)   ;;  %v15683_v49 = vld [vmem:[#allocation14 + $0x2e4] ss:$16 sps:$4 sm:$0xff] (!%p14644_p4)  }
 0x49e   : > { %v15711_v8 = vld [vmem:[#allocation14 + $0x380] ss:$16 sps:$4 sm:$0xff] (!%p14644_p4)  }
 0x49f   : > { %9237 = vmatpush1.bf16.msra.mxu1 (!%p14644_p4), %v15674_v50  ;;  %v15716_v48 = vld [vmem:[#allocation14 + $0x1a0] ss:$16 sps:$4 sm:$0xff] (!%p14644_p4)  }
 0x4d7   : > { %v6044_v51 = vpop.f32.mrb[40].mxu0 }
 0x4d8   : > { %v6045_v56 = vadd.f32 %v6044_v51, %v6004_v59  ;;  %v6046_v61 = vpop.f32.mrb[41].mxu0  ;;  %v15669_v59 = vld [vmem:[#allocation14 + $0x2a0] ss:$16 sps:$4 sm:$0xff] (!%p14644_p4)   ;;  %v15684_v51 = vld [vmem:[#allocation14 + $0x104] ss:$16 sps:$4 sm:$0xff] (!%p14644_p4)  }
 0x4d9   : > { %v6085_v57 = vpop.f32.mrb[40].mxu1  ;;  %v6047_v63 = vadd.f32 %v6046_v61, %v6006_v60  ;;  %v6048_v1 = vpop.f32.mrb[42].mxu0  ;;  %v15678_v60 = vld [vmem:[#allocation14 + $0xe4] ss:$16 sps:$4 sm:$0xff] (!%p14644_p4)   ;;  %9276 = vmatpush1.bf16.msra.mxu0 (!%p14644_p4), %v15669_v59  ;;  %v6204_v61 = vlaneseq (!%p14644_p4) }
 0x4da   : > { %v6087_v0 = vpop.f32.mrb[41].mxu1  ;;  %v6086_v2 = vadd.f32 %v6085_v57, %v6045_v56  ;;  %v6049_v4 = vpop.f32.mrb[43].mxu0  ;;  %9277 = vmatprep.subr.bf16.mxu0 (!%p14644_p4), %v15677_v47  ;;  %9238 = vmatprep.subr.bf16.mxu1 (!%p14644_p4), %v15678_v60  ;;  %v15681_v56 = vld [vmem:[#allocation14 + $0x2e0] ss:$16 sps:$4 sm:$0xff] (!%p14644_p4)   ;;  %v15719_v60 = vld [vmem:[#allocation14 + $0x3a4] ss:$16 sps:$4 sm:$0xff] (!%p14644_p4)  }
 0x4db   : > { %v6089_v3 = vpop.f32.mrb[42].mxu1  ;;  %v6088_v6 = vadd.f32 %v6087_v0, %v6047_v63  ;;  %9239 = vmatpush1.bf16.msra.mxu1 (!%p14644_p4), %v15680_v23  ;;  %v15686_v57 = vld [vmem:[#allocation14 + $0x100] ss:$16 sps:$4 sm:$0xff] (!%p14644_p4)   ;;  %v15689_v63 = vld [vmem:[#allocation14 + $0x304] ss:$16 sps:$4 sm:$0xff] (!%p14644_p4)  }
 0x4dc   : > { %v6090_v7 = vpop.f32.mrb[43].mxu1  ;;  %9240 = vmatprep.subr.bf16.mxu1 (!%p14644_p4), %v15684_v51  ;;  %v15690_v0 = vld [vmem:[#allocation14 + $0x124] ss:$16 sps:$4 sm:$0xff] (!%p14644_p4)   ;;  %v15687_v1 = vld [vmem:[#allocation14 + $0x300] ss:$16 sps:$4 sm:$0xff] (!%p14644_p4)   ;;  %v18590_v3 = vshrl.u32 (!%p14644_p4), %v6204_v61, 7 }
 0x4dd   : > { %9278 = vmatpush1.bf16.msra.mxu0 (!%p14644_p4), %v15675_v24  ;;  %v15695_v4 = vld [vmem:[#allocation14 + $0x324] ss:$16 sps:$4 sm:$0xff] (!%p14644_p4)   ;;  %v17262_v7 = vmov (!%p14644_p4), 1966171168  }
 0x4de   : > { %9279 = vmatprep.subr.bf16.mxu0 (!%p14644_p4), %v15683_v49  ;;  %v6226_v28 = vsub.s32 (!%p14644_p4), 5, %v18590_v3  ;;  %v6230_v62 = vsub.s32 (!%p14644_p4), 6, %v18590_v3  ;;  %v6234_v34 = vsub.s32 (!%p14644_p4), 7, %v18590_v3  ;;  %v15720_v24 = vld [vmem:[#allocation14 + $0x1c4] ss:$16 sps:$4 sm:$0xff] (!%p14644_p4)  }
 0x4df   : > { %9241 = vmatpush1.bf16.msra.mxu1 (!%p14644_p4), %v15686_v57 }
 0x4e0   : > { %9242 = vmatprep.subr.bf16.mxu1 (!%p14644_p4), %v15690_v0  ;;  %v6227_v45 = vrot.slane (!%p14644_p4), %v6202_v31, %v6226_v28  ;;  %v6231_v52 = vrot.slane (!%p14644_p4), %v6202_v31, %v6230_v62  ;;  %v6235_v20 = vrot.slane (!%p14644_p4), %v6202_v31, %v6234_v34 }
 0x4e1   : > { %9280 = vmatpush1.bf16.msra.mxu0 (!%p14644_p4), %v15681_v56 }
 0x4e2   : > { %9281 = vmatprep.subr.bf16.mxu0 (!%p14644_p4), %v15689_v63  ;;  %v6249_v47 = vadd.f32 (!%p14644_p4), %v6227_v45, %v6199_v42 }
 0x4e5   : > { %9282 = vmatpush1.bf16.msra.mxu0 (!%p14644_p4), %v15687_v1 }
 0x4e6   : > { %9283 = vmatprep.subr.bf16.mxu0 (!%p14644_p4), %v15695_v4  ;;  %v15717_v4 = vld [vmem:[#allocation14 + $0x3a0] ss:$16 sps:$4 sm:$0xff] (!%p14644_p4)  }
 0x517   : > { %v6126_v9 = vpop.f32.mrb[44].mxu0 }
 0x518   : > { %v6127_v10 = vadd.f32 %v6126_v9, %v6086_v2  ;;  %v6128_v12 = vpop.f32.mrb[45].mxu0  ;;  %v15692_v2 = vld [vmem:[#allocation14 + $0x120] ss:$16 sps:$4 sm:$0xff] (!%p14644_p4)   ;;  %v6269_v9 = vunpack.c.l.s4 (!%p14644_p4), %v17262_v7 }
 0x519   : > { %v6167_v11 = vpop.f32.mrb[44].mxu1  ;;  %v6129_v40 = vadd.f32 %v6128_v12, %v6088_v6  ;;  %v6130_v14 = vpop.f32.mrb[46].mxu0  ;;  %6193 = sbr.rel (%p14644_p4) target bundleno = 2456 (0x998), region = 108  ;;  %v15696_v6 = vld [vmem:[#allocation14 + $0x144] ss:$16 sps:$4 sm:$0xff] (!%p14644_p4)   ;;  %9243 = vmatpush1.bf16.msra.mxu1 (!%p14644_p4), %v15692_v2  ;;  %v6206_v12 = vsub.s32 (!%p14644_p4), 0, %v18590_v3 }
 0x51a   : > { %v6169_v25 = vpop.f32.mrb[45].mxu1  ;;  %v6168_v17 = vadd.f32 %v6167_v11, %v6127_v10  ;;  %v6131_v43 = vpop.f32.mrb[47].mxu0  ;;  %v15693_v10 = vld [vmem:[#allocation14 + $0x320] ss:$16 sps:$4 sm:$0xff] (!%p14644_p4)   ;;  %9244 = vmatprep.subr.bf16.mxu1 (!%p14644_p4), %v15696_v6  ;;  %v6214_v14 = vsub.s32 (!%p14644_p4), 2, %v18590_v3 }
 0x51b   : > { %v6171_v21 = vpop.f32.mrb[46].mxu1  ;;  %v6170_v16 = vadd.f32 %v6169_v25, %v6129_v40  ;;  %v15698_v11 = vld [vmem:[#allocation14 + $0x140] ss:$16 sps:$4 sm:$0xff] (!%p14644_p4)   ;;  %v15702_v40 = vld [vmem:[#allocation14 + $0x164] ss:$16 sps:$4 sm:$0xff] (!%p14644_p4)   ;;  %v6210_v25 = vsub.s32 (!%p14644_p4), 1, %v18590_v3  ;;  %9284 = vmatpush1.bf16.msra.mxu0 (!%p14644_p4), %v15693_v10  ;;  %v6207_v37 = vrot.slane (!%p14644_p4), %v6202_v31, %v6206_v12 }
 0x51c   : > { %v6172_v55 = vpop.f32.mrb[47].mxu1  ;;  %v6180_v19 = vadd.f32 %v6168_v17, %v532_v13  ;;  %v15701_v13 = vld [vmem:[#allocation14 + $0x344] ss:$16 sps:$4 sm:$0xff] (!%p14644_p4)   ;;  %v6218_v17 = vsub.s32 (!%p14644_p4), 3, %v18590_v3  ;;  %v6270_v21 = vunpack.c.0.s8 (!%p14644_p4), %v6269_v9  ;;  %v15699_v43 = vld [vmem:[#allocation14 + $0x340] ss:$16 sps:$4 sm:$0xff] (!%p14644_p4)   ;;  %v6215_v41 = vrot.slane (!%p14644_p4), %v6202_v31, %v6214_v14 }
 0x51d   : > { %v6181_v22 = vadd.f32 %v6170_v16, %v533_v15  ;;  %v6222_v15 = vsub.s32 (!%p14644_p4), 4, %v18590_v3  ;;  %v15704_v16 = vld [vmem:[#allocation14 + $0x160] ss:$16 sps:$4 sm:$0xff] (!%p14644_p4)   ;;  %v15707_v55 = vld [vmem:[#allocation14 + $0x364] ss:$16 sps:$4 sm:$0xff] (!%p14644_p4)   ;;  %9245 = vmatpush1.bf16.msra.mxu1 (!%p14644_p4), %v15698_v11  ;;  %9285 = vmatprep.subr.bf16.mxu0 (!%p14644_p4), %v15701_v13  ;;  %v6211_v36 = vrot.slane (!%p14644_p4), %v6202_v31, %v6210_v25 }
 0x51e   : > { %6188 = vst [vmem:[#allocation2 + $0x30] sm:$0xff] %v6180_v19  ;;  %v15708_v19 = vld [vmem:[#allocation14 + $0x184] ss:$16 sps:$4 sm:$0xff] (!%p14644_p4)   ;;  %9246 = vmatprep.subr.bf16.mxu1 (!%p14644_p4), %v15702_v40  ;;  %v18601_v32 = vsub.s32 (!%p14644_p4), %v6270_v21, %v18590_v3  ;;  %v6219_v38 = vrot.slane (!%p14644_p4), %v6202_v31, %v6218_v17  ;;  %v6246_v18 = vadd.f32 (!%p14644_p4), %v6215_v41, %v6196_v30  ;;  %v15722_v6 = vld [vmem:[#allocation14 + $0x1c0] ss:$16 sps:$4 sm:$0xff] (!%p14644_p4)  }
 0x51f   : > { %6189 = vst [vmem:[#allocation2 + $0x38] sm:$0xff] %v6181_v22  ;;  %v6194_v22 = vld [vmem:[#allocation2] sm:$0xff] (!%p14644_p4)  ;;  %9286 = vmatpush1.bf16.msra.mxu0 (!%p14644_p4), %v15699_v43  ;;  %v6223_v44 = vrot.slane (!%p14644_p4), %v6202_v31, %v6222_v15  ;;  %v6245_v5 = vadd.f32 (!%p14644_p4), %v6211_v36, %v6195_v53  ;;  %v15723_v30 = vld [vmem:[#allocation14 + $0x3c0] ss:$16 sps:$4 sm:$0xff] (!%p14644_p4)  }
 0x520   : > { %9287 = vmatprep.subr.bf16.mxu0 %v15707_v55  ;;  %v6244_v58 = vadd.f32 %v6207_v37, %v6194_v22  ;;  %v6247_v59 = vadd.f32 %v6219_v38, %v6197_v54  ;;  %v15725_v13 = vld [vmem:[#allocation14 + $0x3c4] ss:$16 sps:$4 sm:$0xff]   ;;  %v15728_v54 = vld [vmem:[#allocation14 + $0x1e0] ss:$16 sps:$4 sm:$0xff]  }
 0x521   : > { %9247 = vmatpush1.bf16.msra.mxu1 %v15704_v16  ;;  %v6248_v50 = vadd.f32 %v6223_v44, %v6198_v26  ;;  %v15726_v40 = vld [vmem:[#allocation14 + $0x1e4] ss:$16 sps:$4 sm:$0xff]   ;;  %v15729_v41 = vld [vmem:[#allocation14 + $0x3e0] ss:$16 sps:$4 sm:$0xff]  }
 0x522   : > { %9248 = vmatprep.subr.bf16.mxu1 %v15708_v19  ;;  %v6260_v51 = vcombine.low %v6244_v58, %v6245_v5  ;;  %v6261_v56 = vcombine.high %v6244_v58, %v6245_v5  ;;  %v6262_v57 = vcombine.low %v6246_v18, %v6247_v59  ;;  %v6263_v61 = vcombine.high %v6246_v18, %v6247_v59 }
 0x523   : > { %9288 = vmatpush1.bf16.msra.mxu0 %v15705_v27  ;;  %v6264_v63 = vcombine.low %v6248_v50, %v6249_v47  ;;  %v6265_v0 = vcombine.high %v6248_v50, %v6249_v47 }
 0x524   : > { %9289 = vmatprep.subr.bf16.mxu0 %v15713_v33  ;;  %v6274_v7 = vrot.slane %v6260_v51, %v18601_v32  ;;  %v6281_v9 = vrot.slane %v6261_v56, %v18601_v32  ;;  %v6288_v10 = vrot.slane %v6262_v57, %v18601_v32  ;;  %v6295_v11 = vrot.slane %v6263_v61, %v18601_v32 }
 0x525   : > { %v6200_v29 = vld [vmem:[#allocation2 + $0x30] sm:$0xff]  ;;  %9249 = vmatpush1.bf16.msra.mxu1 %v15710_v39  ;;  %v6302_v15 = vrot.slane %v6264_v63, %v18601_v32  ;;  %v6309_v21 = vrot.slane %v6265_v0, %v18601_v32 }
 0x526   : > { %v6201_v46 = vld [vmem:[#allocation2 + $0x38] sm:$0xff]  ;;  %v6250_v23 = vadd.f32 %v6231_v52, %v6200_v29  ;;  %9250 = vmatprep.subr.bf16.mxu1 %v15714_v35  ;;  %v6324_v55 = vcombine.low %v6274_v7, %v6288_v10  ;;  %v6325_v19 = vcombine.high %v6274_v7, %v6288_v10  ;;  %v6326_v22 = vcombine.low %v6281_v9, %v6295_v11  ;;  %v15731_v39 = vld [vmem:[#allocation14 + $0x3e4] ss:$16 sps:$4 sm:$0xff]  }
 0x527   : > { %v6251_v49 = vadd.f32 %v6235_v20, %v6201_v46  ;;  %9290 = vmatpush1.bf16.msra.mxu0 %v15711_v8  ;;  %v6327_v53 = vcombine.high %v6281_v9, %v6295_v11 }
 0x528   : > { %9291 = vmatprep.subr.bf16.mxu0 %v15719_v60  ;;  %v18620_v34 = vrot.slane %v6324_v55, %v18601_v32  ;;  %v6345_v27 = vrot.slane %v6326_v22, %v18601_v32  ;;  %v18624_v29 = vrot.slane %v6325_v19, %v18601_v32 }
 0x529   : > { %v6266_v1 = vcombine.low %v6250_v23, %v6251_v49  ;;  %v6267_v2 = vcombine.high %v6250_v23, %v6251_v49  ;;  %9251 = vmatpush1.bf16.msra.mxu1 %v15716_v48  ;;  %v6359_v46 = vrot.slane %v6327_v53, %v18601_v32 }
 0x52a   : > { %9252 = vmatprep.subr.bf16.mxu1 %v15720_v24  ;;  %v14645_v52 = vcombine.low %v18620_v34, %v18624_v29 }
 0x52b   : > { %v6316_v43 = vrot.slane %v6266_v1, %v18601_v32  ;;  %v6323_v16 = vrot.slane %v6267_v2, %v18601_v32  ;;  %9292 = vmatpush1.bf16.msra.mxu0 %v15717_v4 }
 0x52c   : > { %9293 = vmatprep.subr.bf16.mxu0 %v15725_v13  ;;  %v6409_v48 = vrot.slane %v14645_v52, %v18601_v32 }
 0x52d   : > { %v6328_v28 = vcombine.low %v6302_v15, %v6316_v43  ;;  %v6329_v62 = vcombine.high %v6302_v15, %v6316_v43  ;;  %v6330_v26 = vcombine.low %v6309_v21, %v6323_v16  ;;  %v6331_v42 = vcombine.high %v6309_v21, %v6323_v16  ;;  %9253 = vmatpush1.bf16.msra.mxu1 %v15722_v6 }
 0x52e   : > { %9254 = vmatprep.subr.bf16.mxu1 %v15726_v40 }
 0x52f   : > { %v18628_v31 = vrot.slane %v6328_v28, %v18601_v32  ;;  %v18631_v33 = vrot.slane %v6329_v62, %v18601_v32  ;;  %v6373_v35 = vrot.slane %v6330_v26, %v18601_v32  ;;  %v6387_v37 = vrot.slane %v6331_v42, %v18601_v32  ;;  %9294 = vmatpush1.bf16.msra.mxu0 %v15723_v30 }
 0x530   : > { %9295 = vmatprep.subr.bf16.mxu0 %v15731_v39 }
 0x531   : > { %v18637_v36 = vcombine.high %v18620_v34, %v18628_v31  ;;  %v18639_v38 = vcombine.low %v6345_v27, %v6373_v35  ;;  %v18643_v44 = vcombine.high %v18624_v29, %v18631_v33  ;;  %v18645_v45 = vcombine.low %v6359_v46, %v6387_v37  ;;  %9255 = vmatpush1.bf16.msra.mxu1 %v15728_v54 }
 0x532   : > { %v14646_v20 = vcombine.low %v18628_v31, %v18631_v33  ;;  %v14647_v58 = vcombine.high %v18628_v31, %v18628_v31  ;;  %v14650_v8 = vcombine.low %v6387_v37, %v6387_v37  ;;  %v6388_v57 = vcombine.low %v18620_v34, %v18628_v31 }
 0x533   : > { %v6423_v5 = vrot.slane %v18637_v36, %v18601_v32  ;;  %v14648_v18 = vcombine.low %v18643_v44, %v6345_v27  ;;  %v14649_v59 = vcombine.high %v18631_v33, %v18639_v38  ;;  %v6490_v60 = vrot.slane %v18645_v45, %v18601_v32  ;;  %9296 = vmatpush1.bf16.msra.mxu0 %v15729_v41 }
 0x534   : > { %v6416_v50 = vrot.slane %v14646_v20, %v18601_v32  ;;  %v6430_v47 = vrot.slane %v14647_v58, %v18601_v32  ;;  %v6497_v24 = vrot.slane %v14650_v8, %v18601_v32  ;;  %v6391_v61 = vcombine.low %v18624_v29, %v18631_v33 }
 0x535   : > { %v6431_v23 = vcombine.low %v6409_v48, %v6423_v5  ;;  %v6432_v49 = vcombine.high %v6409_v48, %v6423_v5  ;;  %v6476_v51 = vrot.slane %v14648_v18, %v18601_v32  ;;  %v6483_v56 = vrot.slane %v14649_v59, %v18601_v32 }
 0x536   : > { %v6433_v63 = vcombine.low %v6416_v50, %v6430_v47  ;;  %v6434_v0 = vcombine.high %v6416_v50, %v6430_v47 }
 0x537   : > { %v6441_v1 = vrot.slane %v6431_v23, %v18601_v32  ;;  %v6455_v2 = vrot.slane %v6432_v49, %v18601_v32  ;;  %v6498_v4 = vcombine.low %v6476_v51, %v6490_v60  ;;  %v6499_v6 = vcombine.high %v6476_v51, %v6490_v60 }
 0x538   : > { %v6448_v7 = vrot.slane %v6433_v63, %v18601_v32  ;;  %v6462_v9 = vrot.slane %v6434_v0, %v18601_v32  ;;  %v6500_v10 = vcombine.low %v6483_v56, %v6497_v24  ;;  %v6501_v11 = vcombine.high %v6483_v56, %v6497_v24 }
 0x539   : > { %v6463_v13 = vcombine.high %v6441_v1, %v6441_v1  ;;  %v6465_v40 = vcombine.high %v6455_v2, %v6455_v2  ;;  %v18675_v15 = vrot.slane %v6498_v4, %v18601_v32  ;;  %v18678_v21 = vrot.slane %v6499_v6, %v18601_v32 }
 0x53a   : > { %v6464_v43 = vcombine.high %v6448_v7, %v6448_v7  ;;  %v6466_v16 = vcombine.high %v6462_v9, %v6462_v9  ;;  %v18681_v55 = vrot.slane %v6500_v10, %v18601_v32  ;;  %v18684_v19 = vrot.slane %v6501_v11, %v18601_v32 }
 0x53b   : > { %v6530_v22 = vcombine.high %v18675_v15, %v18675_v15  ;;  %v6532_v53 = vcombine.high %v18678_v21, %v18678_v21  ;;  %v6551_v28 = vsel %vm6550_vm3, %v6441_v1, 0.0  ;;  %v6558_v62 = vsel %vm6550_vm3, %v6455_v2, 0.0 }
 0x53c   : > { %v6531_v30 = vcombine.high %v18681_v55, %v18681_v55  ;;  %v6533_v54 = vcombine.high %v18684_v19, %v18684_v19  ;;  %v6552_v26 = vrot.slane %v6551_v28, 4  ;;  %v6559_v42 = vrot.slane %v6558_v62, 4 }
 0x53d   : > { %v6565_v27 = vsel %vm6550_vm3, %v6463_v13, 0.0  ;;  %v6572_v39 = vsel %vm6550_vm3, %v6465_v40, 0.0  ;;  %v6579_v46 = vsel %vm6550_vm3, %v6448_v7, 0.0  ;;  %v6586_v35 = vsel %vm6550_vm3, %v6462_v9, 0.0 }
 0x53e   : > { %v6553_v37 = vadd.f32 %v6552_v26, %v6551_v28  ;;  %v6560_v41 = vadd.f32 %v6559_v42, %v6558_v62  ;;  %v6566_v52 = vrot.slane %v6565_v27, 4  ;;  %v6573_v20 = vrot.slane %v6572_v39, 4 }
 0x53f   : > { %v6580_v58 = vrot.slane %v6579_v46, 4  ;;  %v6587_v5 = vrot.slane %v6586_v35, 4  ;;  %v6593_v8 = vsel %vm6550_vm3, %v6464_v43, 0.0  ;;  %v6600_v48 = vsel %vm6550_vm3, %v6466_v16, 0.0 }
 0x540   : > { %v6554_v18 = vrot.slane %v6553_v37, 2  ;;  %v6561_v59 = vrot.slane %v6560_v41, 2  ;;  %v6567_v50 = vadd.f32 %v6566_v52, %v6565_v27  ;;  %v6574_v47 = vadd.f32 %v6573_v20, %v6572_v39 }
 0x541   : > { %v6581_v60 = vadd.f32 %v6580_v58, %v6579_v46  ;;  %v6588_v24 = vadd.f32 %v6587_v5, %v6586_v35  ;;  %v6594_v23 = vrot.slane %v6593_v8, 4  ;;  %v6601_v49 = vrot.slane %v6600_v48, 4 }
 0x542   : > { %v6555_v51 = vadd.f32 %v6554_v18, %v6553_v37  ;;  %v6562_v56 = vadd.f32 %v6561_v59, %v6560_v41  ;;  %v6568_v63 = vrot.slane %v6567_v50, 2  ;;  %v6575_v0 = vrot.slane %v6574_v47, 2 }
 0x543   : > { %v6582_v1 = vrot.slane %v6581_v60, 2  ;;  %v6589_v2 = vrot.slane %v6588_v24, 2  ;;  %v6595_v4 = vadd.f32 %v6594_v23, %v6593_v8  ;;  %v6602_v6 = vadd.f32 %v6601_v49, %v6600_v48 }
 0x544   : > { %v6556_v7 = vrot.slane %v6555_v51, 1  ;;  %v6563_v9 = vrot.slane %v6562_v56, 1  ;;  %v6569_v10 = vadd.f32 %v6568_v63, %v6567_v50  ;;  %v6576_v11 = vadd.f32 %v6575_v0, %v6574_v47 }
 0x545   : > { %v6583_v13 = vadd.f32 %v6582_v1, %v6581_v60  ;;  %v6590_v40 = vadd.f32 %v6589_v2, %v6588_v24  ;;  %v6596_v43 = vrot.slane %v6595_v4, 2  ;;  %v6603_v16 = vrot.slane %v6602_v6, 2 }
 0x546   : > { %v18702_v28 = vadd.f32 %v6556_v7, %v6555_v51  ;;  %v18704_v62 = vadd.f32 %v6563_v9, %v6562_v56  ;;  %v6570_v26 = vrot.slane %v6569_v10, 1  ;;  %v6577_v42 = vrot.slane %v6576_v11, 1 }
 0x547   : > { %v6584_v27 = vrot.slane %v6583_v13, 1  ;;  %v6591_v39 = vrot.slane %v6590_v40, 1  ;;  %v6597_v46 = vadd.f32 %v6596_v43, %v6595_v4  ;;  %v6604_v35 = vadd.f32 %v6603_v16, %v6602_v6 }
 0x548   : > { %v18706_v37 = vadd.f32 %v6570_v26, %v6569_v10  ;;  %v18708_v41 = vadd.f32 %v6577_v42, %v6576_v11  ;;  %v6607_v52 = vsel %vm6550_vm3, %v18675_v15, 0.0  ;;  %v6614_v20 = vsel %vm6550_vm3, %v18678_v21, 0.0 }
 0x549   : > { %v18714_v58 = vadd.f32 %v6584_v27, %v6583_v13  ;;  %v18716_v5 = vadd.f32 %v6591_v39, %v6590_v40  ;;  %v6598_v8 = vrot.slane %v6597_v46, 1  ;;  %v6605_v48 = vrot.slane %v6604_v35, 1 }
 0x54a   : > { %v6608_v18 = vrot.slane %v6607_v52, 4  ;;  %v6615_v59 = vrot.slane %v6614_v20, 4  ;;  %v6621_v50 = vsel %vm6550_vm3, %v6530_v22, 0.0  ;;  %v6628_v47 = vsel %vm6550_vm3, %v6532_v53, 0.0 }
 0x54b   : > { %v6599_v60 = vadd.f32 %v6598_v8, %v6597_v46  ;;  %v6606_v24 = vadd.f32 %v6605_v48, %v6604_v35  ;;  %v6622_v23 = vrot.slane %v6621_v50, 4  ;;  %v6629_v49 = vrot.slane %v6628_v47, 4 }
 0x54c   : > { %v6609_v15 = vadd.f32 %v6608_v18, %v6607_v52  ;;  %v6616_v51 = vadd.f32 %v6615_v59, %v6614_v20  ;;  %v6635_v21 = vsel %vm6550_vm3, %v18681_v55, 0.0  ;;  %v6642_v56 = vsel %vm6550_vm3, %v18684_v19, 0.0  ;;  %v15734_v55 = vld [vmem:[#allocation14 + $0x404] ss:$16 sps:$4 sm:$0xff]  }
 0x54d   : > { %v6623_v63 = vadd.f32 %v6622_v23, %v6621_v50  ;;  %v6630_v0 = vadd.f32 %v6629_v49, %v6628_v47  ;;  %v6636_v1 = vrot.slane %v6635_v21, 4  ;;  %v6643_v2 = vrot.slane %v6642_v56, 4  ;;  %9306 = vmatprep.subr.bf16.mxu1 %v15734_v55  ;;  %v15737_v47 = vld [vmem:[#allocation14 + $0x604] ss:$16 sps:$4 sm:$0xff]  }
 0x54e   : > { %v6610_v4 = vrot.slane %v6609_v15, 2  ;;  %v6617_v22 = vrot.slane %v6616_v51, 2  ;;  %v6649_v53 = vsel %vm6550_vm3, %v6531_v30, 0.0  ;;  %v6656_v6 = vsel %vm6550_vm3, %v6533_v54, 0.0  ;;  %9347 = vmatprep.subr.bf16.mxu0 %v15737_v47 }
 0x54f   : > { %v6624_v7 = vrot.slane %v6623_v63, 2  ;;  %v6631_v9 = vrot.slane %v6630_v0, 2  ;;  %v6637_v10 = vadd.f32 %v6636_v1, %v6635_v21  ;;  %v6644_v11 = vadd.f32 %v6643_v2, %v6642_v56 }
 0x550   : > { %v6611_v13 = vadd.f32 %v6610_v4, %v6609_v15  ;;  %v6618_v40 = vadd.f32 %v6617_v22, %v6616_v51  ;;  %v6650_v43 = vrot.slane %v6649_v53, 4  ;;  %v6657_v16 = vrot.slane %v6656_v6, 4 }
 0x551   : > { %v6625_v26 = vadd.f32 %v6624_v7, %v6623_v63  ;;  %v6632_v42 = vadd.f32 %v6631_v9, %v6630_v0  ;;  %v6638_v27 = vrot.slane %v6637_v10, 2  ;;  %v6645_v39 = vrot.slane %v6644_v11, 2 }
 0x552   : > { %v6612_v46 = vrot.slane %v6611_v13, 1  ;;  %v6619_v30 = vrot.slane %v6618_v40, 1  ;;  %v6651_v35 = vadd.f32 %v6650_v43, %v6649_v53  ;;  %v6658_v52 = vadd.f32 %v6657_v16, %v6656_v6 }
 0x553   : > { %v6626_v19 = vrot.slane %v6625_v26, 1  ;;  %v6633_v20 = vrot.slane %v6632_v42, 1  ;;  %v6639_v54 = vadd.f32 %v6638_v27, %v6637_v10  ;;  %v6646_v8 = vadd.f32 %v6645_v39, %v6644_v11 }
 0x554   : > { %v6613_v48 = vadd.f32 %v6612_v46, %v6611_v13  ;;  %v6620_v18 = vadd.f32 %v6619_v30, %v6618_v40  ;;  %v6652_v59 = vrot.slane %v6651_v35, 2  ;;  %v6659_v50 = vrot.slane %v6658_v52, 2 }
 0x555   : > { %v6627_v23 = vadd.f32 %v6626_v19, %v6625_v26  ;;  %v6634_v49 = vadd.f32 %v6633_v20, %v6632_v42  ;;  %v6640_v15 = vrot.slane %v6639_v54, 1  ;;  %v6647_v51 = vrot.slane %v6646_v8, 1 }
 0x556   : > { %v6653_v21 = vadd.f32 %v6652_v59, %v6651_v35  ;;  %v6660_v56 = vadd.f32 %v6659_v50, %v6658_v52  ;;  %v6664_v63 = vmul.f32 0.33333334, %v18702_v28  ;;  %v6665_v0 = vmul.f32 0.33333334, %v18704_v62 }
 0x557   : > { %v6641_v1 = vadd.f32 %v6640_v15, %v6639_v54  ;;  %v6648_v2 = vadd.f32 %v6647_v51, %v6646_v8  ;;  %v6666_v4 = vmul.f32 0.33333334, %v18706_v37  ;;  %v6667_v22 = vmul.f32 0.33333334, %v18708_v41 }
 0x558   : > { %v6654_v53 = vrot.slane %v6653_v21, 1  ;;  %v6661_v6 = vrot.slane %v6660_v56, 1  ;;  %v6668_v7 = vmul.f32 0.33333334, %v18714_v58  ;;  %v6669_v9 = vmul.f32 0.33333334, %v18716_v5 }
 0x559   : > { %v6670_v10 = vmul.f32 0.33333334, %v6599_v60  ;;  %v6671_v11 = vmul.f32 0.33333334, %v6606_v24  ;;  %v6672_v13 = vmul.f32 0.33333334, %v6613_v48  ;;  %v6696_v40 = vcombine.low %v6664_v63, %v6665_v0 }
 0x55a   : > { %v6655_v28 = vadd.f32 %v6654_v53, %v6653_v21  ;;  %v6662_v43 = vadd.f32 %v6661_v6, %v6660_v56  ;;  %v6673_v62 = vmul.f32 0.33333334, %v6620_v18  ;;  %v6674_v16 = vmul.f32 0.33333334, %v6627_v23 }
 0x55b   : > { %v6675_v26 = vmul.f32 0.33333334, %v6634_v49  ;;  %v6676_v42 = vmul.f32 0.33333334, %v6641_v1  ;;  %v6677_v27 = vmul.f32 0.33333334, %v6648_v2  ;;  %v6697_v37 = vcombine.low %v6666_v4, %v6667_v22 }
 0x55c   : > { %v6678_v39 = vmul.f32 0.33333334, %v6655_v28  ;;  %v6679_v41 = vmul.f32 0.33333334, %v6662_v43  ;;  %v6698_v55 = vcombine.low %v6668_v7, %v6669_v9  ;;  %v6699_v46 = vcombine.low %v6670_v10, %v6671_v11 }
 0x55d   : > { %v6706_v58 = vrot.slane %v6696_v40, %v18601_v32  ;;  %v6713_v5 = vrot.slane %v6697_v37, %v18601_v32  ;;  %v6763_v60 = vcombine.low %v6672_v13, %v6673_v62  ;;  %v6764_v24 = vcombine.low %v6674_v16, %v6675_v26 }
 0x55e   : > { %v6720_v30 = vrot.slane %v6698_v55, %v18601_v32  ;;  %v6727_v35 = vrot.slane %v6699_v46, %v18601_v32  ;;  %v6765_v52 = vcombine.low %v6676_v42, %v6677_v27  ;;  %v6766_v19 = vcombine.low %v6678_v39, %v6679_v41 }
 0x55f   : > { %v6728_v20 = vcombine.low %v6706_v58, %v6713_v5  ;;  %v6729_v54 = vcombine.high %v6706_v58, %v6713_v5  ;;  %v6773_v8 = vrot.slane %v6763_v60, %v18601_v32  ;;  %v6780_v48 = vrot.slane %v6764_v24, %v18601_v32 }
 0x560   : > { %v6730_v18 = vcombine.low %v6720_v30, %v6727_v35  ;;  %v6731_v59 = vcombine.high %v6720_v30, %v6727_v35  ;;  %v6787_v50 = vrot.slane %v6765_v52, %v18601_v32  ;;  %v6794_v47 = vrot.slane %v6766_v19, %v18601_v32 }
 0x561   : > { %v6738_v23 = vrot.slane %v6728_v20, %v18601_v32  ;;  %v6745_v49 = vrot.slane %v6729_v54, %v18601_v32  ;;  %v6795_v15 = vcombine.low %v6773_v8, %v6780_v48  ;;  %v6796_v51 = vcombine.high %v6773_v8, %v6780_v48 }
 0x562   : > { %v6752_v21 = vrot.slane %v6730_v18, %v18601_v32  ;;  %v6759_v56 = vrot.slane %v6731_v59, %v18601_v32  ;;  %v6797_v63 = vcombine.low %v6787_v50, %v6794_v47  ;;  %v6798_v0 = vcombine.high %v6787_v50, %v6794_v47 }
 0x563   : > { %v6805_v1 = vrot.slane %v6795_v15, %v18601_v32  ;;  %v6812_v2 = vrot.slane %v6796_v51, %v18601_v32 }
 0x564   : > { %v6760_v4 = vcombine.low %v6738_v23, %v6752_v21  ;;  %v6761_v22 = vcombine.high %v6738_v23, %v6752_v21  ;;  %v6762_v53 = vcombine.low %v6745_v49, %v6759_v56  ;;  %v6819_v6 = vrot.slane %v6797_v63, %v18601_v32 }
 0x565   : > { %v6826_v7 = vrot.slane %v6798_v0, %v18601_v32 }
 0x566   : > { %v6827_v9 = vcombine.low %v6805_v1, %v6819_v6  ;;  %v6828_v10 = vcombine.high %v6805_v1, %v6819_v6  ;;  %v18757_v11 = vsub.f32 %v6388_v57, %v6760_v4  ;;  %v18762_v13 = vsub.f32 %v6391_v61, %v6762_v53 }
 0x567   : > { %v6829_v40 = vcombine.low %v6812_v2, %v6826_v7  ;;  %v18765_v28 = vsub.f32 %v18637_v36, %v6761_v22 }
 0x568   : > { %v18768_v43 = vsub.f32 %v18643_v44, %v6827_v9  ;;  %v18771_v62 = vsub.f32 %v18645_v45, %v6828_v10  ;;  %v6842_v34 = vmul.f32 %v18757_v11, %v18757_v11  ;;  %v6843_v31 = vmul.f32 %v18762_v13, %v18762_v13 }
 0x569   : > { %v18778_v29 = vsub.f32 %v18639_v38, %v6829_v40  ;;  %v6844_v33 = vmul.f32 %v18765_v28, %v18765_v28 }
 0x56a   : > { %v6845_v36 = vmul.f32 %v18768_v43, %v18768_v43  ;;  %v6854_v44 = vcombine.low %v6842_v34, %v6843_v31  ;;  %v6855_v57 = vcombine.high %v6842_v34, %v6843_v31  ;;  %v6847_v26 = vmul.f32 %v18771_v62, %v18771_v62 }
 0x56b   : > { %v6846_v45 = vmul.f32 %v18778_v29, %v18778_v29  ;;  %v6856_v61 = vcombine.high %v6844_v33, %v6844_v33  ;;  %v6877_v16 = vrot.slane %v6844_v33, %v18601_v32 }
 0x56c   : > { %v6863_v38 = vrot.slane %v6854_v44, %v18601_v32  ;;  %v6870_v42 = vrot.slane %v6855_v57, %v18601_v32  ;;  %v6923_v24 = vcombine.high %v6847_v26, %v6847_v26  ;;  %v6944_v54 = vrot.slane %v6847_v26, %v18601_v32 }
 0x56d   : > { %v6884_v27 = vrot.slane %v6856_v61, %v18601_v32  ;;  %v6921_v41 = vcombine.low %v6845_v36, %v6846_v45  ;;  %v6922_v60 = vcombine.high %v6845_v36, %v6846_v45 }
 0x56e   : > { %v6885_v37 = vcombine.low %v6863_v38, %v6877_v16  ;;  %v6886_v39 = vcombine.high %v6863_v38, %v6877_v16  ;;  %v6951_v48 = vrot.slane %v6923_v24, %v18601_v32 }
 0x56f   : > { %v6887_v55 = vcombine.low %v6870_v42, %v6884_v27  ;;  %v6888_v46 = vcombine.high %v6870_v42, %v6884_v27  ;;  %v6930_v20 = vrot.slane %v6921_v41, %v18601_v32  ;;  %v6937_v8 = vrot.slane %v6922_v60, %v18601_v32 }
 0x570   : > { %v6895_v58 = vrot.slane %v6885_v37, %v18601_v32  ;;  %v6909_v5 = vrot.slane %v6886_v39, %v18601_v32 }
 0x571   : > { %v6902_v30 = vrot.slane %v6887_v55, %v18601_v32  ;;  %v6916_v35 = vrot.slane %v6888_v46, %v18601_v32  ;;  %v6952_v15 = vcombine.low %v6930_v20, %v6944_v54  ;;  %v6953_v56 = vcombine.high %v6930_v20, %v6944_v54 }
 0x572   : > { %v6917_v52 = vcombine.high %v6895_v58, %v6895_v58  ;;  %v6919_v19 = vcombine.high %v6909_v5, %v6909_v5  ;;  %v7004_v18 = vsel %vm6550_vm3, %v6895_v58, 0.0  ;;  %v7011_v59 = vsel %vm6550_vm3, %v6909_v5, 0.0 }
 0x573   : > { %v6918_v50 = vcombine.high %v6902_v30, %v6902_v30  ;;  %v6920_v47 = vcombine.high %v6916_v35, %v6916_v35  ;;  %v7005_v23 = vrot.slane %v7004_v18, 4  ;;  %v7012_v49 = vrot.slane %v7011_v59, 4 }
 0x574   : > { %v7018_v51 = vsel %vm6550_vm3, %v6917_v52, 0.0  ;;  %v7025_v21 = vsel %vm6550_vm3, %v6919_v19, 0.0  ;;  %v6954_v2 = vcombine.low %v6937_v8, %v6951_v48  ;;  %v6955_v4 = vcombine.high %v6937_v8, %v6951_v48 }
 0x575   : > { %v7006_v63 = vadd.f32 %v7005_v23, %v7004_v18  ;;  %v7019_v0 = vrot.slane %v7018_v51, 4  ;;  %v7026_v1 = vrot.slane %v7025_v21, 4  ;;  %v7032_v22 = vsel %vm6550_vm3, %v6902_v30, 0.0 }
 0x576   : > { %v7039_v53 = vsel %vm6550_vm3, %v6916_v35, 0.0  ;;  %v7013_v7 = vadd.f32 %v7012_v49, %v7011_v59  ;;  %v7046_v9 = vsel %vm6550_vm3, %v6918_v50, 0.0  ;;  %v7053_v10 = vsel %vm6550_vm3, %v6920_v47, 0.0 }
 0x577   : > { %v7007_v6 = vrot.slane %v7006_v63, 2  ;;  %v7020_v40 = vadd.f32 %v7019_v0, %v7018_v51  ;;  %v7027_v34 = vadd.f32 %v7026_v1, %v7025_v21  ;;  %v7033_v31 = vrot.slane %v7032_v22, 4 }
 0x578   : > { %v7040_v33 = vrot.slane %v7039_v53, 4  ;;  %v6962_v36 = vrot.slane %v6952_v15, %v18601_v32  ;;  %v6976_v44 = vrot.slane %v6953_v56, %v18601_v32  ;;  %v7047_v61 = vrot.slane %v7046_v9, 4 }
 0x579   : > { %v7034_v57 = vadd.f32 %v7033_v31, %v7032_v22  ;;  %v7054_v16 = vrot.slane %v7053_v10, 4  ;;  %v6969_v26 = vrot.slane %v6954_v2, %v18601_v32  ;;  %v6983_v38 = vrot.slane %v6955_v4, %v18601_v32 }
 0x57a   : > { %v7041_v45 = vadd.f32 %v7040_v33, %v7039_v53  ;;  %v7008_v42 = vadd.f32 %v7007_v6, %v7006_v63  ;;  %v7014_v27 = vrot.slane %v7013_v7, 2  ;;  %v7021_v37 = vrot.slane %v7020_v40, 2 }
 0x57b   : > { %v7028_v39 = vrot.slane %v7027_v34, 2  ;;  %v6984_v41 = vcombine.high %v6962_v36, %v6962_v36  ;;  %v6986_v55 = vcombine.high %v6976_v44, %v6976_v44  ;;  %v7035_v46 = vrot.slane %v7034_v57, 2 }
 0x57c   : > { %v7042_v58 = vrot.slane %v7041_v45, 2  ;;  %v7048_v5 = vadd.f32 %v7047_v61, %v7046_v9  ;;  %v7055_v60 = vadd.f32 %v7054_v16, %v7053_v10  ;;  %v6985_v24 = vcombine.high %v6969_v26, %v6969_v26 }
 0x57d   : > { %v6987_v30 = vcombine.high %v6983_v38, %v6983_v38  ;;  %v7060_v35 = vsel %vm6550_vm3, %v6962_v36, 0.0  ;;  %v7067_v52 = vsel %vm6550_vm3, %v6976_v44, 0.0  ;;  %v7009_v19 = vrot.slane %v7008_v42, 1 }
 0x57e   : > { %v7015_v20 = vadd.f32 %v7014_v27, %v7013_v7  ;;  %v7022_v54 = vadd.f32 %v7021_v37, %v7020_v40  ;;  %v7029_v8 = vadd.f32 %v7028_v39, %v7027_v34  ;;  %v7061_v48 = vrot.slane %v7060_v35, 4 }
 0x57f   : > { %v7068_v18 = vrot.slane %v7067_v52, 4  ;;  %v7074_v59 = vsel %vm6550_vm3, %v6984_v41, 0.0  ;;  %v7081_v50 = vsel %vm6550_vm3, %v6986_v55, 0.0  ;;  %v7036_v47 = vadd.f32 %v7035_v46, %v7034_v57 }
 0x580   : > { %v7043_v23 = vadd.f32 %v7042_v58, %v7041_v45  ;;  %v7049_v49 = vrot.slane %v7048_v5, 2  ;;  %v7056_v15 = vrot.slane %v7055_v60, 2  ;;  %v7062_v51 = vadd.f32 %v7061_v48, %v7060_v35 }
 0x581   : > { %v7069_v21 = vadd.f32 %v7068_v18, %v7067_v52  ;;  %v7075_v56 = vrot.slane %v7074_v59, 4  ;;  %v7082_v63 = vrot.slane %v7081_v50, 4  ;;  %v7088_v0 = vsel %vm6550_vm3, %v6969_v26, 0.0 }
 0x582   : > { %v7095_v1 = vsel %vm6550_vm3, %v6983_v38, 0.0  ;;  %v7102_v2 = vsel %vm6550_vm3, %v6985_v24, 0.0  ;;  %v7109_v4 = vsel %vm6550_vm3, %v6987_v30, 0.0  ;;  %v7063_v22 = vrot.slane %v7062_v51, 2 }
 0x583   : > { %v7070_v53 = vrot.slane %v7069_v21, 2  ;;  %v7076_v6 = vadd.f32 %v7075_v56, %v7074_v59  ;;  %v7083_v7 = vadd.f32 %v7082_v63, %v7081_v50  ;;  %v7089_v9 = vrot.slane %v7088_v0, 4 }
 0x584   : > { %v7096_v10 = vrot.slane %v7095_v1, 4  ;;  %v7103_v40 = vrot.slane %v7102_v2, 4  ;;  %v7110_v34 = vrot.slane %v7109_v4, 4  ;;  %v7050_v31 = vadd.f32 %v7049_v49, %v7048_v5 }
 0x585   : > { %v7057_v33 = vadd.f32 %v7056_v15, %v7055_v60  ;;  %v7077_v36 = vrot.slane %v7076_v6, 2  ;;  %v7084_v44 = vrot.slane %v7083_v7, 2  ;;  %v7090_v57 = vadd.f32 %v7089_v9, %v7088_v0 }
 0x586   : > { %v7097_v45 = vadd.f32 %v7096_v10, %v7095_v1  ;;  %v7104_v61 = vadd.f32 %v7103_v40, %v7102_v2  ;;  %v7111_v16 = vadd.f32 %v7110_v34, %v7109_v4  ;;  %v7016_v26 = vrot.slane %v7015_v20, 1 }
 0x587   : > { %v7023_v38 = vrot.slane %v7022_v54, 1  ;;  %v7030_v27 = vrot.slane %v7029_v8, 1  ;;  %v7037_v37 = vrot.slane %v7036_v47, 1  ;;  %v7044_v39 = vrot.slane %v7043_v23, 1 }
 0x588   : > { %v7064_v41 = vadd.f32 %v7063_v22, %v7062_v51  ;;  %v7071_v55 = vadd.f32 %v7070_v53, %v7069_v21  ;;  %v7091_v46 = vrot.slane %v7090_v57, 2  ;;  %v7051_v58 = vrot.slane %v7050_v31, 1 }
 0x589   : > { %v7098_v24 = vrot.slane %v7097_v45, 2  ;;  %v7105_v30 = vrot.slane %v7104_v61, 2  ;;  %v7112_v35 = vrot.slane %v7111_v16, 2  ;;  %v7010_v5 = vadd.f32 %v7009_v19, %v7008_v42 }
 0x58a   : > { %v7058_v60 = vrot.slane %v7057_v33, 1  ;;  %v7078_v52 = vadd.f32 %v7077_v36, %v7076_v6  ;;  %v7085_v48 = vadd.f32 %v7084_v44, %v7083_v7  ;;  %v7017_v18 = vadd.f32 %v7016_v26, %v7015_v20 }
 0x58b   : > { %v7024_v59 = vadd.f32 %v7023_v38, %v7022_v54  ;;  %v7031_v50 = vadd.f32 %v7030_v27, %v7029_v8  ;;  %v7038_v49 = vadd.f32 %v7037_v37, %v7036_v47  ;;  %v7045_v15 = vadd.f32 %v7044_v39, %v7043_v23 }
 0x58c   : > { %v7065_v56 = vrot.slane %v7064_v41, 1  ;;  %v7072_v63 = vrot.slane %v7071_v55, 1  ;;  %v7092_v0 = vadd.f32 %v7091_v46, %v7090_v57  ;;  %v7052_v1 = vadd.f32 %v7051_v58, %v7050_v31 }
 0x58d   : > { %v7099_v51 = vadd.f32 %v7098_v24, %v7097_v45  ;;  %v7106_v21 = vadd.f32 %v7105_v30, %v7104_v61  ;;  %v7113_v2 = vadd.f32 %v7112_v35, %v7111_v16  ;;  %v7059_v4 = vadd.f32 %v7058_v60, %v7057_v33 }
 0x58e   : > { %v7079_v22 = vrot.slane %v7078_v52, 1  ;;  %v7086_v53 = vrot.slane %v7085_v48, 1  ;;  %v7116_v9 = vmul.f32 0.33333334, %v7010_v5  ;;  %v7117_v42 = vmul.f32 0.33333334, %v7017_v18 }
 0x58f   : > { %v7118_v19 = vmul.f32 0.33333334, %v7024_v59  ;;  %v7119_v6 = vmul.f32 0.33333334, %v7031_v50  ;;  %v7066_v7 = vadd.f32 %v7065_v56, %v7064_v41  ;;  %v7073_v20 = vadd.f32 %v7072_v63, %v7071_v55 }
 0x590   : > { %v7093_v54 = vrot.slane %v7092_v0, 1  ;;  %v7120_v8 = vmul.f32 0.33333334, %v7038_v49  ;;  %v7100_v47 = vrot.slane %v7099_v51, 1  ;;  %v7107_v23 = vrot.slane %v7106_v21, 1 }
 0x591   : > { %v7114_v10 = vrot.slane %v7113_v2, 1  ;;  %v7121_v40 = vmul.f32 0.33333334, %v7045_v15  ;;  %v7080_v34 = vadd.f32 %v7079_v22, %v7078_v52  ;;  %v7122_v31 = vmul.f32 0.33333334, %v7052_v1 }
 0x592   : > { %v7123_v36 = vmul.f32 0.33333334, %v7059_v4  ;;  %v7132_v44 = vadd.f32 1e-05, %v7116_v9  ;;  %v7087_v57 = vadd.f32 %v7086_v53, %v7085_v48  ;;  %v7133_v33 = vadd.f32 1e-05, %v7117_v42 }
 0x593   : > { %v7134_v45 = vadd.f32 1e-05, %v7118_v19  ;;  %v7135_v61 = vadd.f32 1e-05, %v7119_v6  ;;  %v7094_v16 = vadd.f32 %v7093_v54, %v7092_v0  ;;  %v7124_v26 = vmul.f32 0.33333334, %v7066_v7 }
 0x594   : > { %v7136_v38 = vadd.f32 1e-05, %v7120_v8  ;;  %16837 = vrsqrt.f32 %v7132_v44  ;;  %v7101_v27 = vadd.f32 %v7100_v47, %v7099_v51  ;;  %v7125_v37 = vmul.f32 0.33333334, %v7073_v20 }
 0x595   : > { %v7137_v39 = vadd.f32 1e-05, %v7121_v40  ;;  %16839 = vrsqrt.f32 %v7133_v33  ;;  %v7108_v41 = vadd.f32 %v7107_v23, %v7106_v21  ;;  %v7126_v55 = vmul.f32 0.33333334, %v7080_v34 }
 0x596   : > { %v7138_v46 = vadd.f32 1e-05, %v7122_v31  ;;  %16841 = vrsqrt.f32 %v7134_v45  ;;  %v7115_v58 = vadd.f32 %v7114_v10, %v7113_v2  ;;  %v7127_v24 = vmul.f32 0.33333334, %v7087_v57 }
 0x597   : > { %v7139_v30 = vadd.f32 1e-05, %v7123_v36  ;;  %16843 = vrsqrt.f32 %v7135_v61  ;;  %v7128_v35 = vmul.f32 0.33333334, %v7094_v16  ;;  %v7140_v5 = vadd.f32 1e-05, %v7124_v26 }
 0x598   : > { %16845 = vrsqrt.f32 %v7136_v38  ;;  %v7129_v60 = vmul.f32 0.33333334, %v7101_v27  ;;  %v7141_v52 = vadd.f32 1e-05, %v7125_v37  ;;  %v7130_v48 = vmul.f32 0.33333334, %v7108_v41 }
 0x599   : > { %16847 = vrsqrt.f32 %v7137_v39  ;;  %v7142_v18 = vadd.f32 1e-05, %v7126_v55  ;;  %v7131_v59 = vmul.f32 0.33333334, %v7115_v58  ;;  %v7143_v50 = vadd.f32 1e-05, %v7127_v24 }
 0x59a   : > { %16849 = vrsqrt.f32 %v7138_v46  ;;  %v7144_v49 = vadd.f32 1e-05, %v7128_v35  ;;  %v7145_v15 = vadd.f32 1e-05, %v7129_v60  ;;  %v7146_v63 = vadd.f32 1e-05, %v7130_v48 }
 0x59b   : > { %16851 = vrsqrt.f32 %v7139_v30  ;;  %v7147_v1 = vadd.f32 1e-05, %v7131_v59 }
 0x59c   : > { %16853 = vrsqrt.f32 %v7140_v5 }
 0x59d   : > { %16855 = vrsqrt.f32 %v7141_v52 }
 0x59e   : > { %v16838_v56 = vpop.eup %16837  ;;  %16857 = vrsqrt.f32 %v7142_v18 }
 0x59f   : > { %v16840_v0 = vpop.eup %16839  ;;  %16859 = vrsqrt.f32 %v7143_v50 }
 0x5a0   : > { %v16842_v51 = vpop.eup %16841  ;;  %16861 = vrsqrt.f32 %v7144_v49  ;;  %v7180_v21 = vcombine.low %v16838_v56, %v16840_v0 }
 0x5a1   : > { %v16844_v2 = vpop.eup %16843  ;;  %16863 = vrsqrt.f32 %v7145_v15 }
 0x5a2   : > { %v16846_v4 = vpop.eup %16845  ;;  %16865 = vrsqrt.f32 %v7146_v63  ;;  %v7181_v22 = vcombine.low %v16842_v51, %v16844_v2  ;;  %v7190_v53 = vrot.slane %v7180_v21, %v18601_v32 }
 0x5a3   : > { %v16848_v9 = vpop.eup %16847  ;;  %16867 = vrsqrt.f32 %v7147_v1 }
 0x5a4   : > { %v16850_v42 = vpop.eup %16849  ;;  %v7182_v19 = vcombine.low %v16846_v4, %v16848_v9  ;;  %v7197_v6 = vrot.slane %v7181_v22, %v18601_v32 }
 0x5a5   : > { %v16852_v7 = vpop.eup %16851 }
 0x5a6   : > { %v16854_v20 = vpop.eup %16853  ;;  %v7183_v54 = vcombine.low %v16850_v42, %v16852_v7  ;;  %v7204_v8 = vrot.slane %v7182_v19, %v18601_v32  ;;  %v7212_v47 = vcombine.low %v7190_v53, %v7197_v6  ;;  %v7213_v23 = vcombine.high %v7190_v53, %v7197_v6 }
 0x5a7   : > { %v16856_v10 = vpop.eup %16855 }
 0x5a8   : > { %v16858_v40 = vpop.eup %16857  ;;  %v7211_v34 = vrot.slane %v7183_v54, %v18601_v32  ;;  %v7247_v31 = vcombine.low %v16854_v20, %v16856_v10  ;;  %v7222_v44 = vrot.slane %v7212_v47, %v18601_v32  ;;  %v7229_v61 = vrot.slane %v7213_v23, %v18601_v32 }
 0x5a9   : > { %v16860_v36 = vpop.eup %16859 }
 0x5aa   : > { %v16862_v57 = vpop.eup %16861  ;;  %v7214_v33 = vcombine.low %v7204_v8, %v7211_v34  ;;  %v7215_v45 = vcombine.high %v7204_v8, %v7211_v34  ;;  %v7248_v16 = vcombine.low %v16858_v40, %v16860_v36  ;;  %v7257_v38 = vrot.slane %v7247_v31, %v18601_v32 }
 0x5ab   : > { %v16864_v26 = vpop.eup %16863 }
 0x5ac   : > { %v16866_v27 = vpop.eup %16865  ;;  %v7236_v37 = vrot.slane %v7214_v33, %v18601_v32  ;;  %v7243_v39 = vrot.slane %v7215_v45, %v18601_v32  ;;  %v7249_v41 = vcombine.low %v16862_v57, %v16864_v26  ;;  %v7264_v55 = vrot.slane %v7248_v16, %v18601_v32 }
 0x5ad   : > { %v16868_v46 = vpop.eup %16867 }
 0x5ae   : > { %v7244_v58 = vcombine.low %v7222_v44, %v7236_v37  ;;  %v7245_v24 = vcombine.high %v7222_v44, %v7236_v37  ;;  %v7246_v30 = vcombine.low %v7229_v61, %v7243_v39  ;;  %v7250_v35 = vcombine.low %v16866_v27, %v16868_v46 }
 0x5af   : > { %v7271_v5 = vrot.slane %v7249_v41, %v18601_v32  ;;  %v7279_v60 = vcombine.low %v7257_v38, %v7264_v55  ;;  %v7280_v52 = vcombine.high %v7257_v38, %v7264_v55 }
 0x5b0   : > { %v7278_v48 = vrot.slane %v7250_v35, %v18601_v32  ;;  %v7320_v18 = vmul.f32 %v7244_v58, %v18757_v11  ;;  %v7321_v59 = vmul.f32 %v7246_v30, %v18762_v13  ;;  %v7322_v50 = vmul.f32 %v7245_v24, %v18765_v28 }
 0x5b1   : > { %v7289_v49 = vrot.slane %v7279_v60, %v18601_v32  ;;  %v7296_v15 = vrot.slane %v7280_v52, %v18601_v32 }
 0x5b2   : > { %v7281_v56 = vcombine.low %v7271_v5, %v7278_v48  ;;  %v7282_v63 = vcombine.high %v7271_v5, %v7278_v48  ;;  %vm7326_vm4 = vcmp.ge.f32.partialorder %v7320_v18, 0.0  ;;  %vm7327_vm5 = vcmp.ge.f32.partialorder %v7321_v59, 0.0 }
 0x5b3   : > { %vm7328_vm6 = vcmp.ge.f32.partialorder %v7322_v50, 0.0  ;;  %v7332_v0 = vmul.f32 0.2, %v7320_v18  ;;  %v7333_v1 = vmul.f32 0.2, %v7321_v59 }
 0x5b4   : > { %v7303_v51 = vrot.slane %v7281_v56, %v18601_v32  ;;  %v7310_v21 = vrot.slane %v7282_v63, %v18601_v32  ;;  %v7334_v11 = vmul.f32 0.2, %v7322_v50 }
 0x5b5   : > { %v7338_v2 = vsel %vm7326_vm4, %v7320_v18, %v7332_v0  ;;  %v7339_v13 = vsel %vm7327_vm5, %v7321_v59, %v7333_v1 }
 0x5b6   : > { %v7311_v4 = vcombine.low %v7289_v49, %v7303_v51  ;;  %v7312_v28 = vcombine.high %v7289_v49, %v7303_v51  ;;  %v7313_v22 = vcombine.low %v7296_v15, %v7310_v21  ;;  %v7340_v53 = vsel %vm7328_vm6, %v7322_v50, %v7334_v11 }
 0x5b7   : > { %v7350_v9 = vcombine.low %v7338_v2, %v7339_v13  ;;  %v7351_v42 = vcombine.high %v7338_v2, %v7339_v13  ;;  %v7352_v19 = vcombine.high %v7340_v53, %v7340_v53  ;;  %v7373_v6 = vrot.slane %v7340_v53, %v18601_v32 }
 0x5b8   : > { %v7323_v7 = vmul.f32 %v7311_v4, %v18768_v43  ;;  %v7324_v20 = vmul.f32 %v7313_v22, %v18778_v29  ;;  %v7325_v54 = vmul.f32 %v7312_v28, %v18771_v62 }
 0x5b9   : > { %v7359_v8 = vrot.slane %v7350_v9, %v18601_v32  ;;  %v18845_v47 = vrot.slane %v7351_v42, %v18601_v32  ;;  %v18848_v23 = vrot.slane %v7352_v19, %v18601_v32 }
 0x5ba   : > { %vm7329_vm7 = vcmp.ge.f32.partialorder %v7323_v7, 0.0  ;;  %vm7330_vm8 = vcmp.ge.f32.partialorder %v7324_v20, 0.0  ;;  %vm7331_vm9 = vcmp.ge.f32.partialorder %v7325_v54, 0.0  ;;  %v7335_v10 = vmul.f32 0.2, %v7323_v7 }
 0x5bb   : > { %v7336_v40 = vmul.f32 0.2, %v7324_v20  ;;  %v7337_v34 = vmul.f32 0.2, %v7325_v54  ;;  %v7382_v31 = vcombine.high %v7359_v8, %v7373_v6  ;;  %v7381_v43 = vcombine.low %v7359_v8, %v7373_v6 }
 0x5bc   : > { %v7341_v36 = vsel %vm7329_vm7, %v7323_v7, %v7335_v10  ;;  %v7384_v62 = vcombine.high %v18845_v47, %v18848_v23 }
 0x5bd   : > { %v7342_v29 = vsel %vm7330_vm8, %v7324_v20, %v7336_v40  ;;  %v7343_v44 = vsel %vm7331_vm9, %v7325_v54, %v7337_v34  ;;  %v7405_v57 = vrot.slane %v7382_v31, %v18601_v32  ;;  %v7391_v33 = vrot.slane %v7381_v43, %v18601_v32 }
 0x5be   : > { %v7417_v45 = vcombine.low %v7341_v36, %v7342_v29  ;;  %v7418_v61 = vcombine.high %v7341_v36, %v7342_v29  ;;  %v7419_v16 = vcombine.high %v7343_v44, %v7343_v44  ;;  %v7440_v26 = vrot.slane %v7343_v44, %v18601_v32 }
 0x5bf   : > { %v7415_v38 = vcombine.high %v7405_v57, %v7405_v57  ;;  %v7413_v27 = vcombine.high %v7391_v33, %v7391_v33  ;;  %v7501_v55 = vpack.c.bf16 %v7405_v57, %v7405_v57  ;;  %v7500_v46 = vpack.c.bf16 %v7391_v33, %v7391_v33 }
 0x5c0   : > { %v7426_v37 = vrot.slane %v7417_v45, %v18601_v32  ;;  %v18857_v39 = vrot.slane %v7418_v61, %v18601_v32  ;;  %v18860_v41 = vrot.slane %v7419_v16, %v18601_v32  ;;  %v7412_v58 = vrot.slane %v7384_v62, %v18601_v32  ;;  %v15732_v62 = vld [vmem:[#allocation14 + $0x400] ss:$16 sps:$4 sm:$0xff]   ;;  %v15740_v61 = vld [vmem:[#allocation14 + $0x424] ss:$16 sps:$4 sm:$0xff]  }
 0x5c1   : > { %v7503_v5 = vpack.c.bf16 %v7415_v38, %v7415_v38  ;;  %v7502_v60 = vpack.c.bf16 %v7413_v27, %v7413_v27  ;;  %v18868_v59 = vunpack.c.l.b16 %v7501_v55  ;;  %v18870_v50 = vunpack.c.l.b16 %v7500_v46  ;;  %v15743_v55 = vld [vmem:[#allocation14 + $0x624] ss:$16 sps:$4 sm:$0xff]   ;;  %v15738_v46 = vld [vmem:[#allocation14 + $0x420] ss:$16 sps:$4 sm:$0xff]  }
 0x5c2   : > { %v7449_v24 = vcombine.high %v7426_v37, %v7440_v26  ;;  %v7448_v30 = vcombine.low %v7426_v37, %v7440_v26  ;;  %v7451_v35 = vcombine.high %v18857_v39, %v18860_v41  ;;  %v7505_v49 = vpack.c.bf16 %v7412_v58, %v7412_v58  ;;  %v15735_v26 = vld [vmem:[#allocation14 + $0x600] ss:$16 sps:$4 sm:$0xff]  }
 0x5c3   : > { %v7416_v15 = vcombine.high %v7412_v58, %v7412_v58  ;;  %v18872_v51 = vunpack.c.l.b16 %v7503_v5  ;;  %v18874_v21 = vunpack.c.l.b16 %v7502_v60  ;;  %v15749_v5 = vld [vmem:[#allocation14 + $0x644] ss:$16 sps:$4 sm:$0xff]   ;;  %v15744_v60 = vld [vmem:[#allocation14 + $0x440] ss:$16 sps:$4 sm:$0xff]  }
 0x5c4   : > { %v7472_v52 = vrot.slane %v7449_v24, %v18601_v32  ;;  %v7458_v48 = vrot.slane %v7448_v30, %v18601_v32  ;;  %v7479_v18 = vrot.slane %v7451_v35, %v18601_v32  ;;  %v18880_v53 = vunpack.c.l.b16 %v7505_v49  ;;  %v15746_v24 = vld [vmem:[#allocation14 + $0x444] ss:$16 sps:$4 sm:$0xff]   ;;  %v15741_v35 = vld [vmem:[#allocation14 + $0x620] ss:$16 sps:$4 sm:$0xff]  }
 0x5c5   : > { %v7507_v42 = vpack.c.bf16 %v7416_v15, %v7416_v15  ;;  %v15750_v49 = vld [vmem:[#allocation14 + $0x460] ss:$16 sps:$4 sm:$0xff]   ;;  %v15758_v15 = vld [vmem:[#allocation14 + $0x484] ss:$16 sps:$4 sm:$0xff]  }
 0x5c6   : > { %v7509_v56 = vpack.c.bf16 %v7472_v52, %v7472_v52  ;;  %v7508_v63 = vpack.c.bf16 %v7458_v48, %v7458_v48  ;;  %v7482_v0 = vcombine.high %v7472_v52, %v7472_v52  ;;  %v7480_v1 = vcombine.high %v7458_v48, %v7458_v48  ;;  %v15752_v52 = vld [vmem:[#allocation14 + $0x464] ss:$16 sps:$4 sm:$0xff]   ;;  %v15747_v48 = vld [vmem:[#allocation14 + $0x640] ss:$16 sps:$4 sm:$0xff]  }
 0x5c7   : > { %v7513_v11 = vpack.c.bf16 %v7479_v18, %v7479_v18  ;;  %v7483_v2 = vcombine.high %v7479_v18, %v7479_v18  ;;  %v18905_v57 = vunpack.c.l.b16 %v7507_v42  ;;  %v15755_v18 = vld [vmem:[#allocation14 + $0x664] ss:$16 sps:$4 sm:$0xff]  }
 0x5c8   : > { %v18876_v13 = vunpack.c.l.b16 %v7509_v56  ;;  %v18878_v4 = vunpack.c.l.b16 %v7508_v63  ;;  %v7511_v28 = vpack.c.bf16 %v7482_v0, %v7482_v0  ;;  %v7510_v22 = vpack.c.bf16 %v7480_v1, %v7480_v1  ;;  %v15753_v56 = vld [vmem:[#allocation14 + $0x660] ss:$16 sps:$4 sm:$0xff]   ;;  %v15761_v63 = vld [vmem:[#allocation14 + $0x684] ss:$16 sps:$4 sm:$0xff]  }
 0x5c9   : > { %v18882_v9 = vunpack.c.l.b16 %v7513_v11  ;;  %v7515_v19 = vpack.c.bf16 %v7483_v2, %v7483_v2  ;;  %v15756_v0 = vld [vmem:[#allocation14 + $0x480] ss:$16 sps:$4 sm:$0xff]   ;;  %v15764_v1 = vld [vmem:[#allocation14 + $0x4a4] ss:$16 sps:$4 sm:$0xff]  }
 0x5ca   : > { %v7914_v6 = vrot.slane %v18876_v13, 7  ;;  %v7911_v7 = vrot.slane %v18878_v4, 7  ;;  %v18886_v20 = vunpack.c.l.b16 %v7511_v28  ;;  %v18888_v54 = vunpack.c.l.b16 %v7510_v22  ;;  %v15759_v11 = vld [vmem:[#allocation14 + $0x680] ss:$16 sps:$4 sm:$0xff]   ;;  %v15767_v2 = vld [vmem:[#allocation14 + $0x6a4] ss:$16 sps:$4 sm:$0xff]  }
 0x5cb   : > { %v7922_v8 = vrot.slane %v18882_v9, 7  ;;  %v18891_v10 = vunpack.c.l.b16 %v7515_v19  ;;  %v15762_v28 = vld [vmem:[#allocation14 + $0x4a0] ss:$16 sps:$4 sm:$0xff]   ;;  %v18928_v22 = vpop.f32.mrb[0].mxu0  ;;  %v15770_v42 = vld [vmem:[#allocation14 + $0x4c4] ss:$16 sps:$4 sm:$0xff]  }
 0x5cc   : > { %v7915_v40 = vsel %vm7912_vm10, %v7914_v6, %v18868_v59  ;;  %v7913_v34 = vsel %vm7912_vm10, %v7911_v7, %v18870_v50  ;;  %v7918_v31 = vrot.slane %v18886_v20, 7  ;;  %v7916_v43 = vrot.slane %v18888_v54, 7  ;;  %v15472_v19 = vpop.f32.mrb[1].mxu0  ;;  %v15765_v6 = vld [vmem:[#allocation14 + $0x6a0] ss:$16 sps:$4 sm:$0xff]  }
 0x5cd   : > { %v18899_v36 = vpack.c.b16 %v7915_v40, %v7915_v40  ;;  %v18901_v29 = vpack.c.b16 %v7913_v34, %v7913_v34  ;;  %v7923_v44 = vsel %vm7912_vm10, %v7922_v8, %v18880_v53  ;;  %v7926_v37 = vrot.slane %v18891_v10, 7  ;;  %v7584_v7 = vpop.f32.mrb[2].mxu0  ;;  %v15773_v8 = vld [vmem:[#allocation14 + $0x6c4] ss:$16 sps:$4 sm:$0xff]   ;;  %v15768_v34 = vld [vmem:[#allocation14 + $0x4c0] ss:$16 sps:$4 sm:$0xff]  }
 0x5ce   : > { %v7919_v33 = vsel %vm7912_vm10, %v7918_v31, %v18872_v51  ;;  %v7917_v45 = vsel %vm7912_vm10, %v7916_v43, %v18874_v21  ;;  %v18916_v27 = vpack.c.b16 %v7923_v44, %v7923_v44  ;;  %v15473_v40 = vpop.f32.mrb[3].mxu0  ;;  %v15776_v31 = vld [vmem:[#allocation14 + $0x4e4] ss:$16 sps:$4 sm:$0xff]   ;;  %v15771_v43 = vld [vmem:[#allocation14 + $0x6c0] ss:$16 sps:$4 sm:$0xff]  }
 0x5cf   : > { %9256 = vmatprep.mubr.bf16.mxu1 %v18899_v36  ;;  %v18912_v16 = vpack.c.b16 %v7919_v33, %v7919_v33  ;;  %v18914_v38 = vpack.c.b16 %v7917_v45, %v7917_v45  ;;  %v7927_v58 = vsel %vm7912_vm10, %v7926_v37, %v18905_v57  ;;  %v15774_v44 = vld [vmem:[#allocation14 + $0x4e0] ss:$16 sps:$4 sm:$0xff]   ;;  %v15782_v33 = vld [vmem:[#allocation14 + $0x504] ss:$16 sps:$4 sm:$0xff]  }
 0x5d0   : > { %9257 = vmatmul.mubr.bf16.vlgmr.msra.gmra.mrb[0].mxu1 %v18901_v29  ;;  %v18924_v30 = vpack.c.b16 %v7927_v58, %v7927_v58  ;;  %v15777_v45 = vld [vmem:[#allocation14 + $0x6e0] ss:$16 sps:$4 sm:$0xff]   ;;  %v15788_v37 = vld [vmem:[#allocation14 + $0x524] ss:$16 sps:$4 sm:$0xff]  }
 0x5d1   : > { %9307 = vmatpush1.bf16.msra.mxu1 %v15732_v62  ;;  %9297 = vmatprep.mubr.bf16.mxu0 %v18912_v16  ;;  %v15779_v62 = vld [vmem:[#allocation14 + $0x6e4] ss:$16 sps:$4 sm:$0xff]   ;;  %v15786_v58 = vld [vmem:[#allocation14 + $0x520] ss:$16 sps:$4 sm:$0xff]  }
 0x5d2   : > { %9298 = vmatmul.mubr.bf16.vlgmr.msra.gmra.mrb[4].mxu0 %v18914_v38  ;;  %9308 = vmatprep.subr.bf16.mxu1 %v15740_v61  ;;  %v15785_v61 = vld [vmem:[#allocation14 + $0x704] ss:$16 sps:$4 sm:$0xff]   ;;  %v15810_v7 = vld [vmem:[#allocation14 + $0x5a0] ss:$16 sps:$4 sm:$0xff]  }
 0x5d3   : > { %9348 = vmatpush1.bf16.msra.mxu0 %v15735_v26  ;;  %9338 = vmatprep.mubr.bf16.mxu1 %v18916_v27  ;;  %v15780_v26 = vld [vmem:[#allocation14 + $0x500] ss:$16 sps:$4 sm:$0xff]  }
 0x5d4   : > { %9349 = vmatprep.subr.bf16.mxu0 %v15743_v55  ;;  %9379 = vmatprep.mubr.bf16.mxu0 %v18924_v30  ;;  %v15783_v55 = vld [vmem:[#allocation14 + $0x700] ss:$16 sps:$4 sm:$0xff]  }
 0x5d5   : > { %9309 = vmatpush1.bf16.msra.mxu1 %v15738_v46  ;;  %v15791_v46 = vld [vmem:[#allocation14 + $0x724] ss:$16 sps:$4 sm:$0xff]  }
 0x5d6   : > { %9310 = vmatprep.subr.bf16.mxu1 %v15746_v24  ;;  %v15794_v24 = vld [vmem:[#allocation14 + $0x544] ss:$16 sps:$4 sm:$0xff]  }
 0x5d7   : > { %9350 = vmatpush1.bf16.msra.mxu0 %v15741_v35  ;;  %v15789_v35 = vld [vmem:[#allocation14 + $0x720] ss:$16 sps:$4 sm:$0xff]  }
 0x5d8   : > { %9351 = vmatprep.subr.bf16.mxu0 %v15749_v5  ;;  %v7450_v5 = vcombine.low %v18857_v39, %v18860_v41  ;;  %v15801_v39 = vld [vmem:[#allocation14 + $0x760] ss:$16 sps:$4 sm:$0xff]  }
 0x5d9   : > { %9311 = vmatpush1.bf16.msra.mxu1 %v15744_v60  ;;  %v15797_v60 = vld [vmem:[#allocation14 + $0x744] ss:$16 sps:$4 sm:$0xff]  }
 0x5da   : > { %9312 = vmatprep.subr.bf16.mxu1 %v15752_v52  ;;  %v15792_v52 = vld [vmem:[#allocation14 + $0x540] ss:$16 sps:$4 sm:$0xff]  }
 0x5db   : > { %9352 = vmatpush1.bf16.msra.mxu0 %v15747_v48  ;;  %v15800_v48 = vld [vmem:[#allocation14 + $0x564] ss:$16 sps:$4 sm:$0xff]  }
 0x5dc   : > { %9353 = vmatprep.subr.bf16.mxu0 %v15755_v18  ;;  %v15795_v18 = vld [vmem:[#allocation14 + $0x740] ss:$16 sps:$4 sm:$0xff]  }
 0x5dd   : > { %9313 = vmatpush1.bf16.msra.mxu1 %v15750_v49  ;;  %v7383_v49 = vcombine.low %v18845_v47, %v18848_v23  ;;  %v15812_v47 = vld [vmem:[#allocation14 + $0x5a4] ss:$16 sps:$4 sm:$0xff]   ;;  %v15807_v23 = vld [vmem:[#allocation14 + $0x780] ss:$16 sps:$4 sm:$0xff]  }
 0x5de   : > { %9314 = vmatprep.subr.bf16.mxu1 %v15758_v15  ;;  %v7465_v15 = vrot.slane %v7450_v5, %v18601_v32  ;;  %v15825_v5 = vld [vmem:[#allocation14 + $0x7e0] ss:$16 sps:$4 sm:$0xff]  }
 0x5df   : > { %9354 = vmatpush1.bf16.msra.mxu0 %v15753_v56  ;;  %v15803_v56 = vld [vmem:[#allocation14 + $0x764] ss:$16 sps:$4 sm:$0xff]   ;;  %v7398_v41 = vrot.slane %v7383_v49, %v18601_v32 }
 0x5e0   : > { %9355 = vmatprep.subr.bf16.mxu0 %v15761_v63  ;;  %v15798_v63 = vld [vmem:[#allocation14 + $0x560] ss:$16 sps:$4 sm:$0xff]   ;;  %v15818_v32 = vld [vmem:[#allocation14 + $0x5c4] ss:$16 sps:$4 sm:$0xff]  }
 0x5e1   : > { %9315 = vmatpush1.bf16.msra.mxu1 %v15756_v0  ;;  %v15806_v0 = vld [vmem:[#allocation14 + $0x584] ss:$16 sps:$4 sm:$0xff]  }
 0x5e2   : > { %9316 = vmatprep.subr.bf16.mxu1 %v15764_v1  ;;  %v7481_v1 = vcombine.high %v7465_v15, %v7465_v15 }
 0x5e3   : > { %9356 = vmatpush1.bf16.msra.mxu0 %v15759_v11  ;;  %v15809_v11 = vld [vmem:[#allocation14 + $0x784] ss:$16 sps:$4 sm:$0xff]  }
 0x5e4   : > { %9357 = vmatprep.subr.bf16.mxu0 %v15767_v2  ;;  %v15804_v2 = vld [vmem:[#allocation14 + $0x580] ss:$16 sps:$4 sm:$0xff]   ;;  %v7514_v19 = vpack.c.bf16 %v7481_v1, %v7481_v1  ;;  %v15845_v1 = vld [vmem:[#allocation14 + $0x24c] ss:$16 sps:$4 sm:$0xff]  }
 0x5e5   : > { %9317 = vmatpush1.bf16.msra.mxu1 %v15762_v28  ;;  %v7512_v28 = vpack.c.bf16 %v7465_v15, %v7465_v15  ;;  %v15836_v15 = vld [vmem:[#allocation14 + $0x2c] ss:$16 sps:$4 sm:$0xff]  }
 0x5e6   : > { %9318 = vmatprep.subr.bf16.mxu1 %v15770_v42  ;;  %v7414_v42 = vcombine.high %v7398_v41, %v7398_v41 }
 0x5e7   : > { %9358 = vmatpush1.bf16.msra.mxu0 %v15765_v6  ;;  %v15815_v6 = vld [vmem:[#allocation14 + $0x7a4] ss:$16 sps:$4 sm:$0xff]   ;;  %v18936_v40 = vunpack.c.l.b16 %v7512_v28  ;;  %v15843_v28 = vld [vmem:[#allocation14 + $0x248] ss:$16 sps:$4 sm:$0xff]  }
 0x5e8   : > { %9359 = vmatprep.subr.bf16.mxu0 %v15773_v8  ;;  %v7504_v8 = vpack.c.bf16 %v7398_v41, %v7398_v41  ;;  %v15837_v41 = vld [vmem:[#allocation14 + $0x228] ss:$16 sps:$4 sm:$0xff]  }
 0x5e9   : > { %9319 = vmatpush1.bf16.msra.mxu1 %v15768_v34  ;;  %v15813_v34 = vld [vmem:[#allocation14 + $0x7a0] ss:$16 sps:$4 sm:$0xff]  }
 0x5ea   : > { %9320 = vmatprep.subr.bf16.mxu1 %v15776_v31  ;;  %v7506_v31 = vpack.c.bf16 %v7414_v42, %v7414_v42  ;;  %v15849_v42 = vld [vmem:[#allocation14 + $0x268] ss:$16 sps:$4 sm:$0xff]  }
 0x5eb   : > { %9360 = vmatpush1.bf16.msra.mxu0 %v15771_v43  ;;  %v18938_v43 = vunpack.c.l.b16 %v7514_v19  ;;  %v15857_v19 = vld [vmem:[#allocation14 + $0x28c] ss:$16 sps:$4 sm:$0xff]  }
 0x5ec   : > { %9361 = vmatprep.subr.bf16.mxu0 %v15779_v62  ;;  %v15821_v62 = vld [vmem:[#allocation14 + $0x7c4] ss:$16 sps:$4 sm:$0xff]  }
 0x5ed   : > { %9321 = vmatpush1.bf16.msra.mxu1 %v15774_v44  ;;  %v15816_v44 = vld [vmem:[#allocation14 + $0x5c0] ss:$16 sps:$4 sm:$0xff]  }
 0x5ee   : > { %9322 = vmatprep.subr.bf16.mxu1 %v15782_v33  ;;  %v18940_v33 = vunpack.c.l.b16 %v7504_v8  ;;  %v15863_v8 = vld [vmem:[#allocation14 + $0x2ac] ss:$16 sps:$4 sm:$0xff]  }
 0x5ef   : > { %9362 = vmatpush1.bf16.msra.mxu0 %v15777_v45  ;;  %v7920_v45 = vrot.slane %v18936_v40, 7 }
 0x5f0   : > { %9363 = vmatprep.subr.bf16.mxu0 %v15785_v61  ;;  %v15824_v61 = vld [vmem:[#allocation14 + $0x5e4] ss:$16 sps:$4 sm:$0xff]  }
 0x5f1   : > { %9323 = vmatpush1.bf16.msra.mxu1 %v15780_v26  ;;  %v15819_v26 = vld [vmem:[#allocation14 + $0x7c0] ss:$16 sps:$4 sm:$0xff]  }
 0x5f2   : > { %9324 = vmatprep.subr.bf16.mxu1 %v15788_v37  ;;  %v18943_v37 = vunpack.c.l.b16 %v7506_v31  ;;  %v15861_v31 = vld [vmem:[#allocation14 + $0x2a8] ss:$16 sps:$4 sm:$0xff]  }
 0x5f3   : > { %9364 = vmatpush1.bf16.msra.mxu0 %v15783_v55  ;;  %v7924_v55 = vrot.slane %v18938_v43, 7 }
 0x5f4   : > { %9365 = vmatprep.subr.bf16.mxu0 %v15791_v46  ;;  %v15827_v46 = vld [vmem:[#allocation14 + $0x7e4] ss:$16 sps:$4 sm:$0xff]  }
 0x5f5   : > { %9325 = vmatpush1.bf16.msra.mxu1 %v15786_v58  ;;  %v15822_v58 = vld [vmem:[#allocation14 + $0x5e0] ss:$16 sps:$4 sm:$0xff]  }
 0x5f6   : > { %9326 = vmatprep.subr.bf16.mxu1 %v15794_v24  ;;  %v7921_v24 = vsel %vm7912_vm10, %v7920_v45, %v18940_v33  ;;  %v15872_v45 = vld [vmem:[#allocation14 + $0xec] ss:$16 sps:$4 sm:$0xff]  }
 0x5f7   : > { %9366 = vmatpush1.bf16.msra.mxu0 %v15789_v35  ;;  %v15830_v35 = vld [vmem:[#allocation14 + $0xc] ss:$16 sps:$4 sm:$0xff]  }
 0x5f8   : > { %9367 = vmatprep.subr.bf16.mxu0 %v15797_v60  ;;  %v7925_v60 = vsel %vm7912_vm10, %v7924_v55, %v18943_v37  ;;  %v15870_v55 = vld [vmem:[#allocation14 + $0xe8] ss:$16 sps:$4 sm:$0xff]  }
 0x5f9   : > { %9327 = vmatpush1.bf16.msra.mxu1 %v15792_v52  ;;  %v18950_v52 = vpack.c.b16 %v7921_v24, %v7921_v24  ;;  %v18952_v49 = vpack.c.b16 %v7925_v60, %v7925_v60  ;;  %v15881_v24 = vld [vmem:[#allocation14 + $0x30c] ss:$16 sps:$4 sm:$0xff]   ;;  %v15879_v60 = vld [vmem:[#allocation14 + $0x308] ss:$16 sps:$4 sm:$0xff]  }
 0x5fa   : > { %9328 = vmatprep.subr.bf16.mxu1 %v15800_v48  ;;  %v15833_v48 = vld [vmem:[#allocation14 + $0x20c] ss:$16 sps:$4 sm:$0xff]  }
 0x5fb   : > { %9368 = vmatpush1.bf16.msra.mxu0 %v15795_v18  ;;  %v15828_v18 = vld [vmem:[#allocation14 + $0x8] ss:$16 sps:$4 sm:$0xff]  }
 0x5fc   : > { %9369 = vmatprep.subr.bf16.mxu0 %v15803_v56  ;;  %v15831_v56 = vld [vmem:[#allocation14 + $0x208] ss:$16 sps:$4 sm:$0xff]  }
 0x5fd   : > { %9329 = vmatpush1.bf16.msra.mxu1 %v15798_v63  ;;  %v15839_v63 = vld [vmem:[#allocation14 + $0x22c] ss:$16 sps:$4 sm:$0xff]  }
 0x5fe   : > { %9330 = vmatprep.subr.bf16.mxu1 %v15806_v0  ;;  %v15834_v0 = vld [vmem:[#allocation14 + $0x28] ss:$16 sps:$4 sm:$0xff]  }
 0x5ff   : > { %9370 = vmatpush1.bf16.msra.mxu0 %v15801_v39  ;;  %v15842_v39 = vld [vmem:[#allocation14 + $0x4c] ss:$16 sps:$4 sm:$0xff]  }
 0x600   : > { %9371 = vmatprep.subr.bf16.mxu0 %v15809_v11  ;;  %v15840_v11 = vld [vmem:[#allocation14 + $0x48] ss:$16 sps:$4 sm:$0xff]  }
 0x601   : > { %9331 = vmatpush1.bf16.msra.mxu1 %v15804_v2  ;;  %v15848_v2 = vld [vmem:[#allocation14 + $0x6c] ss:$16 sps:$4 sm:$0xff]  }
 0x602   : > { %9332 = vmatprep.subr.bf16.mxu1 %v15812_v47  ;;  %v15851_v47 = vld [vmem:[#allocation14 + $0x26c] ss:$16 sps:$4 sm:$0xff]  }
 0x603   : > { %9372 = vmatpush1.bf16.msra.mxu0 %v15807_v23  ;;  %v15854_v23 = vld [vmem:[#allocation14 + $0x8c] ss:$16 sps:$4 sm:$0xff]  }
 0x604   : > { %9373 = vmatprep.subr.bf16.mxu0 %v15815_v6  ;;  %v15860_v6 = vld [vmem:[#allocation14 + $0xac] ss:$16 sps:$4 sm:$0xff]  }
 0x605   : > { %9333 = vmatpush1.bf16.msra.mxu1 %v15810_v7  ;;  %v15855_v7 = vld [vmem:[#allocation14 + $0x288] ss:$16 sps:$4 sm:$0xff]  }
 0x606   : > { %9334 = vmatprep.subr.bf16.mxu1 %v15818_v32  ;;  %v15858_v32 = vld [vmem:[#allocation14 + $0xa8] ss:$16 sps:$4 sm:$0xff]  }
 0x607   : > { %9374 = vmatpush1.bf16.msra.mxu0 %v15813_v34  ;;  %v15866_v34 = vld [vmem:[#allocation14 + $0xcc] ss:$16 sps:$4 sm:$0xff]  }
 0x608   : > { %9375 = vmatprep.subr.bf16.mxu0 %v15821_v62  ;;  %v15869_v62 = vld [vmem:[#allocation14 + $0x2cc] ss:$16 sps:$4 sm:$0xff]  }
 0x609   : > { %9335 = vmatpush1.bf16.msra.mxu1 %v15816_v44  ;;  %v15864_v44 = vld [vmem:[#allocation14 + $0xc8] ss:$16 sps:$4 sm:$0xff]  }
 0x60a   : > { %9336 = vmatprep.subr.bf16.mxu1 %v15824_v61  ;;  %v15867_v61 = vld [vmem:[#allocation14 + $0x2c8] ss:$16 sps:$4 sm:$0xff]  }
 0x60b   : > { %9376 = vmatpush1.bf16.msra.mxu0 %v15819_v26  ;;  %v15875_v26 = vld [vmem:[#allocation14 + $0x2ec] ss:$16 sps:$4 sm:$0xff]  }
 0x60c   : > { %9377 = vmatprep.subr.bf16.mxu0 %v15827_v46  ;;  %v15878_v46 = vld [vmem:[#allocation14 + $0x10c] ss:$16 sps:$4 sm:$0xff]  }
 0x60d   : > { %9337 = vmatpush1.bf16.msra.mxu1 %v15822_v58  ;;  %v15873_v58 = vld [vmem:[#allocation14 + $0x2e8] ss:$16 sps:$4 sm:$0xff]  }
 0x60e   : > { %9388 = vmatprep.subr.bf16.mxu1 %v15830_v35  ;;  %v15876_v35 = vld [vmem:[#allocation14 + $0x108] ss:$16 sps:$4 sm:$0xff]  }
 0x60f   : > { %9378 = vmatpush1.bf16.msra.mxu0 %v15825_v5  ;;  %v15884_v5 = vld [vmem:[#allocation14 + $0x12c] ss:$16 sps:$4 sm:$0xff]  }
 0x610   : > { %9339 = vmatmul.mubr.bf16.vlgmr.msra.gmra.mrb[4].mxu1 %v18950_v52  ;;  %9429 = vmatprep.subr.bf16.mxu0 %v15833_v48  ;;  %v15887_v48 = vld [vmem:[#allocation14 + $0x32c] ss:$16 sps:$4 sm:$0xff]  }
 0x611   : > { %9389 = vmatpush1.bf16.msra.mxu1 %v15828_v18  ;;  %9420 = vmatprep.mubr.bf16.mxu1 %v18899_v36  ;;  %v15846_v36 = vld [vmem:[#allocation14 + $0x68] ss:$16 sps:$4 sm:$0xff]  }
 0x612   : > { %9380 = vmatmul.mubr.bf16.vlgmr.msra.gmra.mrb[8].mxu0 %v18952_v49  ;;  %9390 = vmatprep.subr.bf16.mxu1 %v15836_v15  ;;  %v15882_v18 = vld [vmem:[#allocation14 + $0x128] ss:$16 sps:$4 sm:$0xff]   ;;  %v15890_v15 = vld [vmem:[#allocation14 + $0x14c] ss:$16 sps:$4 sm:$0xff]  }
 0x613   : > { %9430 = vmatpush1.bf16.msra.mxu0 %v15831_v56  ;;  %9461 = vmatprep.mubr.bf16.mxu0 %v18912_v16  ;;  %v15852_v16 = vld [vmem:[#allocation14 + $0x88] ss:$16 sps:$4 sm:$0xff]  }
 0x614   : > { %9431 = vmatprep.subr.bf16.mxu0 %v15839_v63  ;;  %v15885_v56 = vld [vmem:[#allocation14 + $0x328] ss:$16 sps:$4 sm:$0xff]   ;;  %v15893_v63 = vld [vmem:[#allocation14 + $0x34c] ss:$16 sps:$4 sm:$0xff]  }
 0x615   : > { %9391 = vmatpush1.bf16.msra.mxu1 %v15834_v0  ;;  %v15888_v0 = vld [vmem:[#allocation14 + $0x148] ss:$16 sps:$4 sm:$0xff]  }
 0x616   : > { %9392 = vmatprep.subr.bf16.mxu1 %v15842_v39  ;;  %v15896_v39 = vld [vmem:[#allocation14 + $0x16c] ss:$16 sps:$4 sm:$0xff]  }
 0x617   : > { %9432 = vmatpush1.bf16.msra.mxu0 %v15837_v41  ;;  %v15891_v41 = vld [vmem:[#allocation14 + $0x348] ss:$16 sps:$4 sm:$0xff]  }
 0x618   : > { %9433 = vmatprep.subr.bf16.mxu0 %v15845_v1  ;;  %v15899_v1 = vld [vmem:[#allocation14 + $0x36c] ss:$16 sps:$4 sm:$0xff]  }
 0x619   : > { %9393 = vmatpush1.bf16.msra.mxu1 %v15840_v11  ;;  %v15894_v11 = vld [vmem:[#allocation14 + $0x168] ss:$16 sps:$4 sm:$0xff]  }
 0x61a   : > { %9394 = vmatprep.subr.bf16.mxu1 %v15848_v2  ;;  %v15902_v2 = vld [vmem:[#allocation14 + $0x18c] ss:$16 sps:$4 sm:$0xff]  }
 0x61b   : > { %9434 = vmatpush1.bf16.msra.mxu0 %v15843_v28  ;;  %v15897_v28 = vld [vmem:[#allocation14 + $0x368] ss:$16 sps:$4 sm:$0xff]  }
 0x61c   : > { %9435 = vmatprep.subr.bf16.mxu0 %v15851_v47  ;;  %v15905_v47 = vld [vmem:[#allocation14 + $0x38c] ss:$16 sps:$4 sm:$0xff]  }
 0x61d   : > { %9395 = vmatpush1.bf16.msra.mxu1 %v15846_v36  ;;  %v15900_v36 = vld [vmem:[#allocation14 + $0x188] ss:$16 sps:$4 sm:$0xff]  }
 0x61e   : > { %9396 = vmatprep.subr.bf16.mxu1 %v15854_v23  ;;  %v15908_v23 = vld [vmem:[#allocation14 + $0x1ac] ss:$16 sps:$4 sm:$0xff]  }
 0x61f   : > { %9436 = vmatpush1.bf16.msra.mxu0 %v15849_v42  ;;  %v15903_v42 = vld [vmem:[#allocation14 + $0x388] ss:$16 sps:$4 sm:$0xff]  }
 0x620   : > { %9437 = vmatprep.subr.bf16.mxu0 %v15857_v19  ;;  %v15911_v19 = vld [vmem:[#allocation14 + $0x3ac] ss:$16 sps:$4 sm:$0xff]  }
 0x621   : > { %9397 = vmatpush1.bf16.msra.mxu1 %v15852_v16  ;;  %v15906_v16 = vld [vmem:[#allocation14 + $0x1a8] ss:$16 sps:$4 sm:$0xff]  }
 0x622   : > { %9398 = vmatprep.subr.bf16.mxu1 %v15860_v6  ;;  %v15914_v6 = vld [vmem:[#allocation14 + $0x1cc] ss:$16 sps:$4 sm:$0xff]  }
 0x623   : > { %9438 = vmatpush1.bf16.msra.mxu0 %v15855_v7  ;;  %v15909_v7 = vld [vmem:[#allocation14 + $0x3a8] ss:$16 sps:$4 sm:$0xff]  }
 0x624   : > { %9439 = vmatprep.subr.bf16.mxu0 %v15863_v8  ;;  %v15917_v8 = vld [vmem:[#allocation14 + $0x3cc] ss:$16 sps:$4 sm:$0xff]  }
 0x625   : > { %9399 = vmatpush1.bf16.msra.mxu1 %v15858_v32  ;;  %v15912_v32 = vld [vmem:[#allocation14 + $0x1c8] ss:$16 sps:$4 sm:$0xff]  }
 0x626   : > { %9400 = vmatprep.subr.bf16.mxu1 %v15866_v34  ;;  %v15920_v34 = vld [vmem:[#allocation14 + $0x1ec] ss:$16 sps:$4 sm:$0xff]  }
 0x627   : > { %9440 = vmatpush1.bf16.msra.mxu0 %v15861_v31  ;;  %v15915_v31 = vld [vmem:[#allocation14 + $0x3c8] ss:$16 sps:$4 sm:$0xff]  }
 0x628   : > { %9441 = vmatprep.subr.bf16.mxu0 %v15869_v62  ;;  %v15923_v62 = vld [vmem:[#allocation14 + $0x3ec] ss:$16 sps:$4 sm:$0xff]  }
 0x629   : > { %9401 = vmatpush1.bf16.msra.mxu1 %v15864_v44  ;;  %v15918_v44 = vld [vmem:[#allocation14 + $0x1e8] ss:$16 sps:$4 sm:$0xff]  }
 0x62a   : > { %9402 = vmatprep.subr.bf16.mxu1 %v15872_v45  ;;  %v15926_v45 = vld [vmem:[#allocation14 + $0x40c] ss:$16 sps:$4 sm:$0xff]  }
 0x62b   : > { %9442 = vmatpush1.bf16.msra.mxu0 %v15867_v61  ;;  %v15921_v61 = vld [vmem:[#allocation14 + $0x3e8] ss:$16 sps:$4 sm:$0xff]  }
 0x62c   : > { %9443 = vmatprep.subr.bf16.mxu0 %v15875_v26  ;;  %v15929_v26 = vld [vmem:[#allocation14 + $0x60c] ss:$16 sps:$4 sm:$0xff]  }
 0x62d   : > { %9403 = vmatpush1.bf16.msra.mxu1 %v15870_v55  ;;  %v15924_v55 = vld [vmem:[#allocation14 + $0x408] ss:$16 sps:$4 sm:$0xff]  }
 0x62e   : > { %9404 = vmatprep.subr.bf16.mxu1 %v15878_v46  ;;  %v15932_v46 = vld [vmem:[#allocation14 + $0x42c] ss:$16 sps:$4 sm:$0xff]  }
 0x62f   : > { %9444 = vmatpush1.bf16.msra.mxu0 %v15873_v58  ;;  %v15927_v58 = vld [vmem:[#allocation14 + $0x608] ss:$16 sps:$4 sm:$0xff]  }
 0x630   : > { %9445 = vmatprep.subr.bf16.mxu0 %v15881_v24  ;;  %v15935_v24 = vld [vmem:[#allocation14 + $0x62c] ss:$16 sps:$4 sm:$0xff]  }
 0x631   : > { %9405 = vmatpush1.bf16.msra.mxu1 %v15876_v35  ;;  %v15930_v35 = vld [vmem:[#allocation14 + $0x428] ss:$16 sps:$4 sm:$0xff]  }
 0x632   : > { %9406 = vmatprep.subr.bf16.mxu1 %v15884_v5  ;;  %v15938_v5 = vld [vmem:[#allocation14 + $0x44c] ss:$16 sps:$4 sm:$0xff]  }
 0x633   : > { %9446 = vmatpush1.bf16.msra.mxu0 %v15879_v60  ;;  %v15933_v60 = vld [vmem:[#allocation14 + $0x628] ss:$16 sps:$4 sm:$0xff]  }
 0x634   : > { %9447 = vmatprep.subr.bf16.mxu0 %v15887_v48  ;;  %v15941_v48 = vld [vmem:[#allocation14 + $0x64c] ss:$16 sps:$4 sm:$0xff]  }
 0x635   : > { %9407 = vmatpush1.bf16.msra.mxu1 %v15882_v18  ;;  %v15936_v18 = vld [vmem:[#allocation14 + $0x448] ss:$16 sps:$4 sm:$0xff]  }
 0x636   : > { %9408 = vmatprep.subr.bf16.mxu1 %v15890_v15  ;;  %v15939_v15 = vld [vmem:[#allocation14 + $0x648] ss:$16 sps:$4 sm:$0xff]  }
 0x637   : > { %9448 = vmatpush1.bf16.msra.mxu0 %v15885_v56  ;;  %v15947_v56 = vld [vmem:[#allocation14 + $0x66c] ss:$16 sps:$4 sm:$0xff]  }
 0x638   : > { %9449 = vmatprep.subr.bf16.mxu0 %v15893_v63  ;;  %v15945_v63 = vld [vmem:[#allocation14 + $0x668] ss:$16 sps:$4 sm:$0xff]  }
 0x639   : > { %9409 = vmatpush1.bf16.msra.mxu1 %v15888_v0  ;;  %v15953_v0 = vld [vmem:[#allocation14 + $0x68c] ss:$16 sps:$4 sm:$0xff]  }
 0x63a   : > { %9410 = vmatprep.subr.bf16.mxu1 %v15896_v39  ;;  %v15956_v39 = vld [vmem:[#allocation14 + $0x4ac] ss:$16 sps:$4 sm:$0xff]  }
 0x63b   : > { %9450 = vmatpush1.bf16.msra.mxu0 %v15891_v41  ;;  %v15951_v41 = vld [vmem:[#allocation14 + $0x688] ss:$16 sps:$4 sm:$0xff]  }
 0x63c   : > { %9451 = vmatprep.subr.bf16.mxu0 %v15899_v1  ;;  %v15959_v1 = vld [vmem:[#allocation14 + $0x6ac] ss:$16 sps:$4 sm:$0xff]  }
 0x63d   : > { %9411 = vmatpush1.bf16.msra.mxu1 %v15894_v11  ;;  %v15954_v11 = vld [vmem:[#allocation14 + $0x4a8] ss:$16 sps:$4 sm:$0xff]  }
 0x63e   : > { %9412 = vmatprep.subr.bf16.mxu1 %v15902_v2  ;;  %v15962_v2 = vld [vmem:[#allocation14 + $0x4cc] ss:$16 sps:$4 sm:$0xff]  }
 0x63f   : > { %9452 = vmatpush1.bf16.msra.mxu0 %v15897_v28  ;;  %v15957_v28 = vld [vmem:[#allocation14 + $0x6a8] ss:$16 sps:$4 sm:$0xff]  }
 0x640   : > { %9453 = vmatprep.subr.bf16.mxu0 %v15905_v47  ;;  %v15965_v47 = vld [vmem:[#allocation14 + $0x6cc] ss:$16 sps:$4 sm:$0xff]  }
 0x641   : > { %9413 = vmatpush1.bf16.msra.mxu1 %v15900_v36  ;;  %v15960_v36 = vld [vmem:[#allocation14 + $0x4c8] ss:$16 sps:$4 sm:$0xff]  }
 0x642   : > { %9414 = vmatprep.subr.bf16.mxu1 %v15908_v23  ;;  %v15968_v23 = vld [vmem:[#allocation14 + $0x4ec] ss:$16 sps:$4 sm:$0xff]  }
 0x643   : > { %9454 = vmatpush1.bf16.msra.mxu0 %v15903_v42  ;;  %v15963_v42 = vld [vmem:[#allocation14 + $0x6c8] ss:$16 sps:$4 sm:$0xff]  }
 0x644   : > { %9455 = vmatprep.subr.bf16.mxu0 %v15911_v19  ;;  %v15971_v19 = vld [vmem:[#allocation14 + $0x6ec] ss:$16 sps:$4 sm:$0xff]  }
 0x645   : > { %9415 = vmatpush1.bf16.msra.mxu1 %v15906_v16  ;;  %v15966_v16 = vld [vmem:[#allocation14 + $0x4e8] ss:$16 sps:$4 sm:$0xff]  }
 0x646   : > { %9416 = vmatprep.subr.bf16.mxu1 %v15914_v6  ;;  %v15974_v6 = vld [vmem:[#allocation14 + $0x50c] ss:$16 sps:$4 sm:$0xff]  }
 0x647   : > { %9456 = vmatpush1.bf16.msra.mxu0 %v15909_v7  ;;  %v15969_v7 = vld [vmem:[#allocation14 + $0x6e8] ss:$16 sps:$4 sm:$0xff]  }
 0x648   : > { %9457 = vmatprep.subr.bf16.mxu0 %v15917_v8  ;;  %v15977_v8 = vld [vmem:[#allocation14 + $0x70c] ss:$16 sps:$4 sm:$0xff]  }
 0x649   : > { %9417 = vmatpush1.bf16.msra.mxu1 %v15912_v32  ;;  %v15972_v32 = vld [vmem:[#allocation14 + $0x508] ss:$16 sps:$4 sm:$0xff]  }
 0x64a   : > { %9418 = vmatprep.subr.bf16.mxu1 %v15920_v34  ;;  %v15980_v34 = vld [vmem:[#allocation14 + $0x52c] ss:$16 sps:$4 sm:$0xff]  }
 0x64b   : > { %9458 = vmatpush1.bf16.msra.mxu0 %v15915_v31  ;;  %v15975_v31 = vld [vmem:[#allocation14 + $0x708] ss:$16 sps:$4 sm:$0xff]  }
 0x64c   : > { %9459 = vmatprep.subr.bf16.mxu0 %v15923_v62  ;;  %v15983_v62 = vld [vmem:[#allocation14 + $0x72c] ss:$16 sps:$4 sm:$0xff]  }
 0x64d   : > { %9419 = vmatpush1.bf16.msra.mxu1 %v15918_v44  ;;  %v15978_v44 = vld [vmem:[#allocation14 + $0x528] ss:$16 sps:$4 sm:$0xff]  }
 0x64e   : > { %9470 = vmatprep.subr.bf16.mxu1 %v15926_v45  ;;  %v15986_v45 = vld [vmem:[#allocation14 + $0x54c] ss:$16 sps:$4 sm:$0xff]  }
 0x64f   : > { %9460 = vmatpush1.bf16.msra.mxu0 %v15921_v61  ;;  %v15981_v61 = vld [vmem:[#allocation14 + $0x728] ss:$16 sps:$4 sm:$0xff]  }
 0x650   : > { %9421 = vmatmul.mubr.bf16.vlgmr.msra.gmra.mrb[8].mxu1 %v18901_v29  ;;  %9511 = vmatprep.subr.bf16.mxu0 %v15929_v26  ;;  %v15944_v29 = vld [vmem:[#allocation14 + $0x46c] ss:$16 sps:$4 sm:$0xff]  }
 0x651   : > { %9471 = vmatpush1.bf16.msra.mxu1 %v15924_v55  ;;  %9502 = vmatprep.mubr.bf16.mxu1 %v18916_v27  ;;  %v15942_v27 = vld [vmem:[#allocation14 + $0x468] ss:$16 sps:$4 sm:$0xff]   ;;  %v15989_v26 = vld [vmem:[#allocation14 + $0x74c] ss:$16 sps:$4 sm:$0xff]  }
 0x652   : > { %9462 = vmatmul.mubr.bf16.vlgmr.msra.gmra.mrb[12].mxu0 %v18914_v38  ;;  %9472 = vmatprep.subr.bf16.mxu1 %v15932_v46  ;;  %v15950_v38 = vld [vmem:[#allocation14 + $0x48c] ss:$16 sps:$4 sm:$0xff]   ;;  %v15984_v55 = vld [vmem:[#allocation14 + $0x548] ss:$16 sps:$4 sm:$0xff]  }
 0x653   : > { %9512 = vmatpush1.bf16.msra.mxu0 %v15927_v58  ;;  %9543 = vmatprep.mubr.bf16.mxu0 %v18924_v30  ;;  %v15948_v30 = vld [vmem:[#allocation14 + $0x488] ss:$16 sps:$4 sm:$0xff]   ;;  %v15992_v46 = vld [vmem:[#allocation14 + $0x56c] ss:$16 sps:$4 sm:$0xff]  }
 0x654   : > { %9513 = vmatprep.subr.bf16.mxu0 %v15935_v24  ;;  %v15987_v58 = vld [vmem:[#allocation14 + $0x748] ss:$16 sps:$4 sm:$0xff]   ;;  %v15995_v24 = vld [vmem:[#allocation14 + $0x76c] ss:$16 sps:$4 sm:$0xff]  }
 0x655   : > { %9473 = vmatpush1.bf16.msra.mxu1 %v15930_v35  ;;  %v15990_v35 = vld [vmem:[#allocation14 + $0x568] ss:$16 sps:$4 sm:$0xff]  }
 0x656   : > { %9474 = vmatprep.subr.bf16.mxu1 %v15938_v5  ;;  %v15998_v5 = vld [vmem:[#allocation14 + $0x58c] ss:$16 sps:$4 sm:$0xff]  }
 0x657   : > { %9514 = vmatpush1.bf16.msra.mxu0 %v15933_v60  ;;  %v15993_v60 = vld [vmem:[#allocation14 + $0x768] ss:$16 sps:$4 sm:$0xff]  }
 0x658   : > { %9515 = vmatprep.subr.bf16.mxu0 %v15941_v48  ;;  %v16001_v48 = vld [vmem:[#allocation14 + $0x78c] ss:$16 sps:$4 sm:$0xff]  }
 0x659   : > { %9475 = vmatpush1.bf16.msra.mxu1 %v15936_v18  ;;  %v15996_v18 = vld [vmem:[#allocation14 + $0x588] ss:$16 sps:$4 sm:$0xff]  }
 0x65a   : > { %9476 = vmatprep.subr.bf16.mxu1 %v15944_v29  ;;  %v16004_v29 = vld [vmem:[#allocation14 + $0x5ac] ss:$16 sps:$4 sm:$0xff]  }
 0x65b   : > { %9516 = vmatpush1.bf16.msra.mxu0 %v15939_v15  ;;  %v15999_v15 = vld [vmem:[#allocation14 + $0x788] ss:$16 sps:$4 sm:$0xff]  }
 0x65c   : > { %9517 = vmatprep.subr.bf16.mxu0 %v15947_v56  ;;  %v16007_v56 = vld [vmem:[#allocation14 + $0x7ac] ss:$16 sps:$4 sm:$0xff]  }
 0x65d   : > { %9477 = vmatpush1.bf16.msra.mxu1 %v15942_v27  ;;  %v16002_v27 = vld [vmem:[#allocation14 + $0x5a8] ss:$16 sps:$4 sm:$0xff]  }
 0x65e   : > { %9478 = vmatprep.subr.bf16.mxu1 %v15950_v38  ;;  %v16010_v38 = vld [vmem:[#allocation14 + $0x5cc] ss:$16 sps:$4 sm:$0xff]  }
 0x65f   : > { %9518 = vmatpush1.bf16.msra.mxu0 %v15945_v63  ;;  %v16005_v63 = vld [vmem:[#allocation14 + $0x7a8] ss:$16 sps:$4 sm:$0xff]  }
 0x660   : > { %9519 = vmatprep.subr.bf16.mxu0 %v15953_v0  ;;  %v16013_v0 = vld [vmem:[#allocation14 + $0x7cc] ss:$16 sps:$4 sm:$0xff]  }
 0x661   : > { %9479 = vmatpush1.bf16.msra.mxu1 %v15948_v30  ;;  %v16008_v30 = vld [vmem:[#allocation14 + $0x5c8] ss:$16 sps:$4 sm:$0xff]  }
 0x662   : > { %9480 = vmatprep.subr.bf16.mxu1 %v15956_v39  ;;  %v16016_v39 = vld [vmem:[#allocation14 + $0x5ec] ss:$16 sps:$4 sm:$0xff]  }
 0x663   : > { %9520 = vmatpush1.bf16.msra.mxu0 %v15951_v41  ;;  %v16011_v41 = vld [vmem:[#allocation14 + $0x7c8] ss:$16 sps:$4 sm:$0xff]  }
 0x664   : > { %9521 = vmatprep.subr.bf16.mxu0 %v15959_v1  ;;  %v16019_v1 = vld [vmem:[#allocation14 + $0x7ec] ss:$16 sps:$4 sm:$0xff]  }
 0x665   : > { %9481 = vmatpush1.bf16.msra.mxu1 %v15954_v11  ;;  %v16014_v11 = vld [vmem:[#allocation14 + $0x5e8] ss:$16 sps:$4 sm:$0xff]  }
 0x666   : > { %9482 = vmatprep.subr.bf16.mxu1 %v15962_v2  ;;  %v16022_v2 = vld [vmem:[#allocation15 + $0x4] ss:$16 sps:$4 sm:$0xff]  }
 0x667   : > { %9522 = vmatpush1.bf16.msra.mxu0 %v15957_v28  ;;  %v16017_v28 = vld [vmem:[#allocation14 + $0x7e8] ss:$16 sps:$4 sm:$0xff]  }
 0x668   : > { %9523 = vmatprep.subr.bf16.mxu0 %v15965_v47  ;;  %v16025_v47 = vld [vmem:[#allocation15 + $0xc] ss:$16 sps:$4 sm:$0xff]  }
 0x669   : > { %9483 = vmatpush1.bf16.msra.mxu1 %v15960_v36  ;;  %v16020_v36 = vld [vmem:[#allocation15] ss:$16 sps:$4 sm:$0xff]  }
 0x66a   : > { %9484 = vmatprep.subr.bf16.mxu1 %v15968_v23  ;;  %v16028_v23 = vld [vmem:[#allocation15 + $0x24] ss:$16 sps:$4 sm:$0xff]  }
 0x66b   : > { %9524 = vmatpush1.bf16.msra.mxu0 %v15963_v42  ;;  %v16023_v42 = vld [vmem:[#allocation15 + $0x8] ss:$16 sps:$4 sm:$0xff]  }
 0x66c   : > { %9525 = vmatprep.subr.bf16.mxu0 %v15971_v19  ;;  %v16031_v19 = vld [vmem:[#allocation15 + $0x2c] ss:$16 sps:$4 sm:$0xff]  }
 0x66d   : > { %9485 = vmatpush1.bf16.msra.mxu1 %v15966_v16  ;;  %v16026_v16 = vld [vmem:[#allocation15 + $0x20] ss:$16 sps:$4 sm:$0xff]  }
 0x66e   : > { %9486 = vmatprep.subr.bf16.mxu1 %v15974_v6  ;;  %v17263_v6 = vmov 0  }
 0x66f   : > { %9526 = vmatpush1.bf16.msra.mxu0 %v15969_v7  ;;  %v16034_v7 = vld [vmem:[#allocation15 + $0x44] ss:$16 sps:$4 sm:$0xff]  }
 0x670   : > { %9527 = vmatprep.subr.bf16.mxu0 %v15977_v8  ;;  %v16029_v8 = vld [vmem:[#allocation15 + $0x28] ss:$16 sps:$4 sm:$0xff]  }
 0x671   : > { %9487 = vmatpush1.bf16.msra.mxu1 %v15972_v32  ;;  %v16037_v32 = vld [vmem:[#allocation15 + $0x4c] ss:$16 sps:$4 sm:$0xff]  }
 0x672   : > { %9488 = vmatprep.subr.bf16.mxu1 %v15980_v34  ;;  %v16032_v34 = vld [vmem:[#allocation15 + $0x40] ss:$16 sps:$4 sm:$0xff]  }
 0x673   : > { %9528 = vmatpush1.bf16.msra.mxu0 %v15975_v31  ;;  %v16040_v31 = vld [vmem:[#allocation15 + $0x64] ss:$16 sps:$4 sm:$0xff]  }
 0x674   : > { %9529 = vmatprep.subr.bf16.mxu0 %v15983_v62  ;;  %v16043_v62 = vld [vmem:[#allocation15 + $0x6c] ss:$16 sps:$4 sm:$0xff]  }
 0x675   : > { %9489 = vmatpush1.bf16.msra.mxu1 %v15978_v44  ;;  %v16038_v44 = vld [vmem:[#allocation15 + $0x60] ss:$16 sps:$4 sm:$0xff]  }
 0x676   : > { %9490 = vmatprep.subr.bf16.mxu1 %v15986_v45  ;;  %v16046_v45 = vld [vmem:[#allocation15 + $0x84] ss:$16 sps:$4 sm:$0xff]  }
 0x677   : > { %9530 = vmatpush1.bf16.msra.mxu0 %v15981_v61  ;;  %v16049_v61 = vld [vmem:[#allocation15 + $0x8c] ss:$16 sps:$4 sm:$0xff]  }
 0x678   : > { %9531 = vmatprep.subr.bf16.mxu0 %v15989_v26  ;;  %v16044_v26 = vld [vmem:[#allocation15 + $0x80] ss:$16 sps:$4 sm:$0xff]  }
 0x679   : > { %9491 = vmatpush1.bf16.msra.mxu1 %v15984_v55  ;;  %v16052_v55 = vld [vmem:[#allocation15 + $0xa4] ss:$16 sps:$4 sm:$0xff]  }
 0x67a   : > { %9492 = vmatprep.subr.bf16.mxu1 %v15992_v46  ;;  %v16047_v46 = vld [vmem:[#allocation15 + $0x88] ss:$16 sps:$4 sm:$0xff]  }
 0x67b   : > { %9532 = vmatpush1.bf16.msra.mxu0 %v15987_v58  ;;  %v14651_v58 = vld [vmem:[#allocation12] ss:$0 sm:$0xff] }
 0x67c   : > { %9533 = vmatprep.subr.bf16.mxu0 %v15995_v24  ;;  %v16055_v24 = vld [vmem:[#allocation15 + $0xac] ss:$16 sps:$4 sm:$0xff]  }
 0x67d   : > { %9493 = vmatpush1.bf16.msra.mxu1 %v15990_v35  ;;  %v16050_v35 = vld [vmem:[#allocation15 + $0xa0] ss:$16 sps:$4 sm:$0xff]  }
 0x67e   : > { %9494 = vmatprep.subr.bf16.mxu1 %v15998_v5  ;;  %v16058_v5 = vld [vmem:[#allocation15 + $0xc4] ss:$16 sps:$4 sm:$0xff]  }
 0x67f   : > { %9534 = vmatpush1.bf16.msra.mxu0 %v15993_v60  ;;  %v7582_v60 = vadd.f32 %v14651_v58, %v18928_v22  ;;  %v16088_v58 = vld [vmem:[#allocation14 + $0x864] ss:$16 sps:$4 sm:$0xff]  }
 0x680   : > { %9535 = vmatprep.subr.bf16.mxu0 %v16001_v48 }
 0x681   : > { %9495 = vmatpush1.bf16.msra.mxu1 %v15996_v18  ;;  %v16053_v18 = vld [vmem:[#allocation15 + $0xa8] ss:$16 sps:$4 sm:$0xff]   ;;  %vm7587_vm11 = vcmp.ge.f32.partialorder %v7582_v60, 0.0 }
 0x682   : > { %9496 = vmatprep.subr.bf16.mxu1 %v16004_v29 }
 0x683   : > { %9536 = vmatpush1.bf16.msra.mxu0 %v15999_v15  ;;  %v16061_v15 = vld [vmem:[#allocation15 + $0xcc] ss:$16 sps:$4 sm:$0xff]  }
 0x684   : > { %9537 = vmatprep.subr.bf16.mxu0 %v16007_v56 }
 0x685   : > { %9497 = vmatpush1.bf16.msra.mxu1 %v16002_v27 }
 0x686   : > { %9498 = vmatprep.subr.bf16.mxu1 %v16010_v38  ;;  %v16056_v38 = vld [vmem:[#allocation15 + $0xc0] ss:$16 sps:$4 sm:$0xff]  }
 0x687   : > { %9538 = vmatpush1.bf16.msra.mxu0 %v16005_v63 }
 0x688   : > { %9539 = vmatprep.subr.bf16.mxu0 %v16013_v0 }
 0x689   : > { %9499 = vmatpush1.bf16.msra.mxu1 %v16008_v30 }
 0x68a   : > { %9500 = vmatprep.subr.bf16.mxu1 %v16016_v39  ;;  %v16064_v39 = vld [vmem:[#allocation15 + $0xe4] ss:$16 sps:$4 sm:$0xff]  }
 0x68b   : > { %9540 = vmatpush1.bf16.msra.mxu0 %v16011_v41  ;;  %v10053_v41 = vrot.slane %v18868_v59, 1 }
 0x68c   : > { %9541 = vmatprep.subr.bf16.mxu0 %v16019_v1  ;;  %v7588_v1 = vmul.f32 0.2, %v7582_v60 }
 0x68d   : > { %9501 = vmatpush1.bf16.msra.mxu1 %v16014_v11 }
 0x68e   : > { %9712 = vmatprep.subr.bf16.mxu1 %v16022_v2  ;;  %v16059_v2 = vld [vmem:[#allocation15 + $0xc8] ss:$16 sps:$4 sm:$0xff]  }
 0x68f   : > { %9542 = vmatpush1.bf16.msra.mxu0 %v16017_v28 }
 0x690   : > { %9503 = vmatmul.mubr.bf16.vlgmr.msra.gmra.mrb[12].mxu1 %v18950_v52  ;;  %9753 = vmatprep.subr.bf16.mxu0 %v16025_v47  ;;  %v16035_v52 = vld [vmem:[#allocation15 + $0x48] ss:$16 sps:$4 sm:$0xff]   ;;  %v16067_v47 = vld [vmem:[#allocation15 + $0xec] ss:$16 sps:$4 sm:$0xff]  }
 0x691   : > { %9713 = vmatpush1.bf16.msra.mxu1 %v16020_v36  ;;  %9744 = vmatprep.mubr.bf16.mxu1 %v17263_v6  ;;  %v10057_v36 = vrot.slane %v18872_v51, 1 }
 0x692   : > { %9544 = vmatmul.mubr.bf16.vlgmr.msra.gmra.mrb[16].mxu0 %v18952_v49  ;;  %9714 = vmatprep.subr.bf16.mxu1 %v16028_v23  ;;  %v16041_v49 = vld [vmem:[#allocation15 + $0x68] ss:$16 sps:$4 sm:$0xff]   ;;  %v16062_v23 = vld [vmem:[#allocation15 + $0xe0] ss:$16 sps:$4 sm:$0xff]  }
 0x693   : > { %9754 = vmatpush1.bf16.msra.mxu0 %v16023_v42  ;;  %9785 = vmatprep.mubr.bf16.mxu0 %v17263_v6  ;;  %v16070_v42 = vld [vmem:[#allocation14 + $0x804] ss:$16 sps:$4 sm:$0xff]   ;;  %v16065_v6 = vld [vmem:[#allocation15 + $0xe8] ss:$16 sps:$4 sm:$0xff]  }
 0x694   : > { %9755 = vmatprep.subr.bf16.mxu0 %v16031_v19  ;;  %v10054_v19 = vsel %vm7912_vm10, %v18876_v13, %v10053_v41  ;;  %v16104_v41 = vld [vmem:[#allocation14 + $0x8c0] ss:$16 sps:$4 sm:$0xff]  }
 0x695   : > { %9715 = vmatpush1.bf16.msra.mxu1 %v16026_v16  ;;  %v7589_v16 = vsel %vm7587_vm11, %v7582_v60, %v7588_v1  ;;  %v16094_v60 = vld [vmem:[#allocation14 + $0x884] ss:$16 sps:$4 sm:$0xff]  }
 0x696   : > { %9716 = vmatprep.subr.bf16.mxu1 %v16034_v7  ;;  %v16073_v7 = vld [vmem:[#allocation14 + $0xa04] ss:$16 sps:$4 sm:$0xff]  }
 0x697   : > { %9756 = vmatpush1.bf16.msra.mxu0 %v16029_v8  ;;  %v10058_v8 = vsel %vm7912_vm10, %v18886_v20, %v10057_v36  ;;  %v16112_v1 = vld [vmem:[#allocation14 + $0x8e4] ss:$16 sps:$4 sm:$0xff]   ;;  %v16113_v36 = vld [vmem:[#allocation14 + $0xae0] ss:$16 sps:$4 sm:$0xff]  }
 0x698   : > { %9757 = vmatprep.subr.bf16.mxu0 %v16037_v32  ;;  %v16068_v32 = vld [vmem:[#allocation14 + $0x800] ss:$16 sps:$4 sm:$0xff]  }
 0x699   : > { %9717 = vmatpush1.bf16.msra.mxu1 %v16032_v34  ;;  %v18975_v34 = vpack.c.b16 %v10054_v19, %v10054_v19  ;;  %v16124_v19 = vld [vmem:[#allocation14 + $0x924] ss:$16 sps:$4 sm:$0xff]  }
 0x69a   : > { %9718 = vmatprep.subr.bf16.mxu1 %v16040_v31  ;;  %v7590_v31 = vpack.c.bf16 %v7589_v16, %v7589_v16  ;;  %v16119_v16 = vld [vmem:[#allocation14 + $0xb00] ss:$16 sps:$4 sm:$0xff]  }
 0x69b   : > { %9758 = vmatpush1.bf16.msra.mxu0 %v16035_v52  ;;  %v16076_v52 = vld [vmem:[#allocation14 + $0x824] ss:$16 sps:$4 sm:$0xff]  }
 0x69c   : > { %9759 = vmatprep.subr.bf16.mxu0 %v16043_v62  ;;  %v16071_v62 = vld [vmem:[#allocation14 + $0xa00] ss:$16 sps:$4 sm:$0xff]  }
 0x69d   : > { %9719 = vmatpush1.bf16.msra.mxu1 %v16038_v44  ;;  %v18977_v44 = vpack.c.b16 %v10058_v8, %v10058_v8  ;;  %v16130_v8 = vld [vmem:[#allocation14 + $0x944] ss:$16 sps:$4 sm:$0xff]  }
 0x69e   : > { %9720 = vmatprep.subr.bf16.mxu1 %v16046_v45  ;;  %v16079_v45 = vld [vmem:[#allocation14 + $0xa24] ss:$16 sps:$4 sm:$0xff]  }
 0x69f   : > { %9760 = vmatpush1.bf16.msra.mxu0 %v16041_v49  ;;  %v16074_v49 = vld [vmem:[#allocation14 + $0x820] ss:$16 sps:$4 sm:$0xff]  }
 0x6a0   : > { %9761 = vmatprep.subr.bf16.mxu0 %v16049_v61  ;;  %v16082_v61 = vld [vmem:[#allocation14 + $0x844] ss:$16 sps:$4 sm:$0xff]  }
 0x6a1   : > { %9721 = vmatpush1.bf16.msra.mxu1 %v16044_v26  ;;  %v16077_v26 = vld [vmem:[#allocation14 + $0xa20] ss:$16 sps:$4 sm:$0xff]  }
 0x6a2   : > { %9722 = vmatprep.subr.bf16.mxu1 %v16052_v55  ;;  %v16085_v55 = vld [vmem:[#allocation14 + $0xa44] ss:$16 sps:$4 sm:$0xff]  }
 0x6a3   : > { %9762 = vmatpush1.bf16.msra.mxu0 %v16047_v46  ;;  %v9258_v48 = vpop.f32.mrb[0].mxu1  ;;  %v16080_v46 = vld [vmem:[#allocation14 + $0x840] ss:$16 sps:$4 sm:$0xff]  }
 0x6a4   : > { %v9260_v29 = vpop.f32.mrb[1].mxu1  ;;  %9763 = vmatprep.subr.bf16.mxu0 %v16055_v24  ;;  %v16083_v24 = vld [vmem:[#allocation14 + $0xa40] ss:$16 sps:$4 sm:$0xff]  }
 0x6a5   : > { %9723 = vmatpush1.bf16.msra.mxu1 %v16050_v35  ;;  %v9262_v56 = vpop.f32.mrb[2].mxu1  ;;  %v9299_v27 = vpop.f32.mrb[4].mxu0  ;;  %v16091_v35 = vld [vmem:[#allocation14 + $0xa64] ss:$16 sps:$4 sm:$0xff]  }
 0x6a6   : > { %v18965_v63 = vadd.f32 %v9299_v27, %v9258_v48  ;;  %v9263_v0 = vpop.f32.mrb[3].mxu1  ;;  %v9301_v30 = vpop.f32.mrb[5].mxu0  ;;  %9724 = vmatprep.subr.bf16.mxu1 %v16058_v5  ;;  %v16086_v5 = vld [vmem:[#allocation14 + $0x860] ss:$16 sps:$4 sm:$0xff]   ;;  %v16103_v27 = vld [vmem:[#allocation14 + $0xaa4] ss:$16 sps:$4 sm:$0xff]  }
 0x6a7   : > { %v18968_v22 = vadd.f32 %v9301_v30, %v9260_v29  ;;  %9764 = vmatpush1.bf16.msra.mxu0 %v16053_v18  ;;  %v9303_v11 = vpop.f32.mrb[6].mxu0  ;;  %v16089_v48 = vld [vmem:[#allocation14 + $0xa60] ss:$16 sps:$4 sm:$0xff]   ;;  %v16097_v18 = vld [vmem:[#allocation14 + $0xa84] ss:$16 sps:$4 sm:$0xff]  }
 0x6a8   : > { %v9304_v28 = vpop.f32.mrb[7].mxu0  ;;  %9765 = vmatprep.subr.bf16.mxu0 %v16061_v15  ;;  %v16092_v29 = vld [vmem:[#allocation14 + $0x880] ss:$16 sps:$4 sm:$0xff]   ;;  %v16100_v15 = vld [vmem:[#allocation14 + $0x8a4] ss:$16 sps:$4 sm:$0xff]  }
 0x6a9   : > { %9725 = vmatpush1.bf16.msra.mxu1 %v16056_v38  ;;  %v16095_v56 = vld [vmem:[#allocation14 + $0xa80] ss:$16 sps:$4 sm:$0xff]   ;;  %v16106_v0 = vld [vmem:[#allocation14 + $0x8c4] ss:$16 sps:$4 sm:$0xff]  }
 0x6aa   : > { %9726 = vmatprep.subr.bf16.mxu1 %v16064_v39  ;;  %v16098_v38 = vld [vmem:[#allocation14 + $0x8a0] ss:$16 sps:$4 sm:$0xff]   ;;  %v16109_v39 = vld [vmem:[#allocation14 + $0xac4] ss:$16 sps:$4 sm:$0xff]  }
 0x6ab   : > { %9766 = vmatpush1.bf16.msra.mxu0 %v16059_v2  ;;  %v16101_v30 = vld [vmem:[#allocation14 + $0xaa0] ss:$16 sps:$4 sm:$0xff]   ;;  %v16115_v2 = vld [vmem:[#allocation14 + $0xae4] ss:$16 sps:$4 sm:$0xff]  }
 0x6ac   : > { %9767 = vmatprep.subr.bf16.mxu0 %v16067_v47  ;;  %v16107_v11 = vld [vmem:[#allocation14 + $0xac0] ss:$16 sps:$4 sm:$0xff]   ;;  %v16118_v47 = vld [vmem:[#allocation14 + $0x904] ss:$16 sps:$4 sm:$0xff]  }
 0x6ad   : > { %9727 = vmatpush1.bf16.msra.mxu1 %v16062_v23  ;;  %v16110_v28 = vld [vmem:[#allocation14 + $0x8e0] ss:$16 sps:$4 sm:$0xff]   ;;  %v16121_v23 = vld [vmem:[#allocation14 + $0xb04] ss:$16 sps:$4 sm:$0xff]  }
 0x6ae   : > { %11363 = vmatprep.subr.bf16.mxu1 %v16070_v42  ;;  %v16116_v42 = vld [vmem:[#allocation14 + $0x900] ss:$16 sps:$4 sm:$0xff]  }
 0x6af   : > { %9768 = vmatpush1.bf16.msra.mxu0 %v16065_v6  ;;  %v16127_v6 = vld [vmem:[#allocation14 + $0xb24] ss:$16 sps:$4 sm:$0xff]  }
 0x6b0   : > { %9745 = vmatmul.mubr.bf16.vlgmr.msra.gmra.mrb[16].mxu1 %v7590_v31  ;;  %11404 = vmatprep.subr.bf16.mxu0 %v16073_v7  ;;  %v16122_v7 = vld [vmem:[#allocation14 + $0x920] ss:$16 sps:$4 sm:$0xff]  }
 0x6b1   : > { %11364 = vmatpush1.bf16.msra.mxu1 %v16068_v32  ;;  %11395 = vmatprep.mubr.bf16.mxu1 %v18975_v34  ;;  %v16125_v32 = vld [vmem:[#allocation14 + $0xb20] ss:$16 sps:$4 sm:$0xff]  }
 0x6b2   : > { %9786 = vmatmul.mubr.bf16.vlgmr.msra.gmra.mrb[20].mxu0 %v7590_v31  ;;  %11365 = vmatprep.subr.bf16.mxu1 %v16076_v52  ;;  %v16133_v31 = vld [vmem:[#allocation14 + $0xb44] ss:$16 sps:$4 sm:$0xff]   ;;  %v16128_v52 = vld [vmem:[#allocation14 + $0x940] ss:$16 sps:$4 sm:$0xff]  }
 0x6b3   : > { %11405 = vmatpush1.bf16.msra.mxu0 %v16071_v62  ;;  %11436 = vmatprep.mubr.bf16.mxu0 %v18977_v44  ;;  %v16136_v62 = vld [vmem:[#allocation14 + $0x964] ss:$16 sps:$4 sm:$0xff]  }
 0x6b4   : > { %11406 = vmatprep.subr.bf16.mxu0 %v16079_v45  ;;  %v16131_v45 = vld [vmem:[#allocation14 + $0xb40] ss:$16 sps:$4 sm:$0xff]  }
 0x6b5   : > { %11366 = vmatpush1.bf16.msra.mxu1 %v16074_v49  ;;  %v16139_v49 = vld [vmem:[#allocation14 + $0xb64] ss:$16 sps:$4 sm:$0xff]  }
 0x6b6   : > { %11367 = vmatprep.subr.bf16.mxu1 %v16082_v61  ;;  %v16134_v61 = vld [vmem:[#allocation14 + $0x960] ss:$16 sps:$4 sm:$0xff]  }
 0x6b7   : > { %11407 = vmatpush1.bf16.msra.mxu0 %v16077_v26  ;;  %v16142_v26 = vld [vmem:[#allocation14 + $0x984] ss:$16 sps:$4 sm:$0xff]  }
 0x6b8   : > { %11408 = vmatprep.subr.bf16.mxu0 %v16085_v55  ;;  %v16137_v55 = vld [vmem:[#allocation14 + $0xb60] ss:$16 sps:$4 sm:$0xff]  }
 0x6b9   : > { %11368 = vmatpush1.bf16.msra.mxu1 %v16080_v46  ;;  %v16145_v46 = vld [vmem:[#allocation14 + $0xb84] ss:$16 sps:$4 sm:$0xff]  }
 0x6ba   : > { %11369 = vmatprep.subr.bf16.mxu1 %v16088_v58  ;;  %v16140_v58 = vld [vmem:[#allocation14 + $0x980] ss:$16 sps:$4 sm:$0xff]  }
 0x6bb   : > { %11409 = vmatpush1.bf16.msra.mxu0 %v16083_v24  ;;  %v16148_v24 = vld [vmem:[#allocation14 + $0x9a4] ss:$16 sps:$4 sm:$0xff]  }
 0x6bc   : > { %11410 = vmatprep.subr.bf16.mxu0 %v16091_v35  ;;  %v16143_v35 = vld [vmem:[#allocation14 + $0xb80] ss:$16 sps:$4 sm:$0xff]  }
 0x6bd   : > { %11370 = vmatpush1.bf16.msra.mxu1 %v16086_v5  ;;  %v16151_v5 = vld [vmem:[#allocation14 + $0xba4] ss:$16 sps:$4 sm:$0xff]  }
 0x6be   : > { %11371 = vmatprep.subr.bf16.mxu1 %v16094_v60  ;;  %v16146_v60 = vld [vmem:[#allocation14 + $0x9a0] ss:$16 sps:$4 sm:$0xff]  }
 0x6bf   : > { %11411 = vmatpush1.bf16.msra.mxu0 %v16089_v48  ;;  %v16154_v48 = vld [vmem:[#allocation14 + $0x9c4] ss:$16 sps:$4 sm:$0xff]  }
 0x6c0   : > { %11412 = vmatprep.subr.bf16.mxu0 %v16097_v18 }
 0x6c1   : > { %11372 = vmatpush1.bf16.msra.mxu1 %v16092_v29  ;;  %v16149_v29 = vld [vmem:[#allocation14 + $0xba0] ss:$16 sps:$4 sm:$0xff]  }
 0x6c2   : > { %11373 = vmatprep.subr.bf16.mxu1 %v16100_v15 }
 0x6c3   : > { %11413 = vmatpush1.bf16.msra.mxu0 %v16095_v56 }
 0x6c4   : > { %11414 = vmatprep.subr.bf16.mxu0 %v16103_v27  ;;  %v16157_v27 = vld [vmem:[#allocation14 + $0xbc4] ss:$16 sps:$4 sm:$0xff]  }
 0x6c5   : > { %11374 = vmatpush1.bf16.msra.mxu1 %v16098_v38 }
 0x6c6   : > { %11375 = vmatprep.subr.bf16.mxu1 %v16106_v0 }
 0x6c7   : > { %11415 = vmatpush1.bf16.msra.mxu0 %v16101_v30 }
 0x6c8   : > { %11416 = vmatprep.subr.bf16.mxu0 %v16109_v39  ;;  %v16152_v39 = vld [vmem:[#allocation14 + $0x9c0] ss:$16 sps:$4 sm:$0xff]  }
 0x6c9   : > { %11376 = vmatpush1.bf16.msra.mxu1 %v16104_v41  ;;  %v10051_v41 = vrot.slane %v18870_v50, 1 }
 0x6ca   : > { %11377 = vmatprep.subr.bf16.mxu1 %v16112_v1 }
 0x6cb   : > { %11417 = vmatpush1.bf16.msra.mxu0 %v16107_v11 }
 0x6cc   : > { %11418 = vmatprep.subr.bf16.mxu0 %v16115_v2 }
 0x6cd   : > { %11378 = vmatpush1.bf16.msra.mxu1 %v16110_v28  ;;  %v16160_v28 = vld [vmem:[#allocation14 + $0x9e4] ss:$16 sps:$4 sm:$0xff]  }
 0x6ce   : > { %11379 = vmatprep.subr.bf16.mxu1 %v16118_v47  ;;  %v10061_v47 = vrot.slane %v18880_v53, 1 }
 0x6cf   : > { %11419 = vmatpush1.bf16.msra.mxu0 %v16113_v36 }
 0x6d0   : > { %11420 = vmatprep.subr.bf16.mxu0 %v16121_v23  ;;  %v16155_v23 = vld [vmem:[#allocation14 + $0xbc0] ss:$16 sps:$4 sm:$0xff]  }
 0x6d1   : > { %11380 = vmatpush1.bf16.msra.mxu1 %v16116_v42 }
 0x6d2   : > { %11381 = vmatprep.subr.bf16.mxu1 %v16124_v19  ;;  %v16163_v19 = vld [vmem:[#allocation14 + $0xbe4] ss:$16 sps:$4 sm:$0xff]  }
 0x6d3   : > { %11421 = vmatpush1.bf16.msra.mxu0 %v16119_v16  ;;  %v10065_v16 = vrot.slane %v18905_v57, 1 }
 0x6d4   : > { %11422 = vmatprep.subr.bf16.mxu0 %v16127_v6  ;;  %v16158_v6 = vld [vmem:[#allocation14 + $0x9e0] ss:$16 sps:$4 sm:$0xff]  }
 0x6d5   : > { %11382 = vmatpush1.bf16.msra.mxu1 %v16122_v7  ;;  %v10052_v7 = vsel %vm7912_vm10, %v18878_v4, %v10051_v41  ;;  %v16188_v41 = vld [vmem:[#allocation14 + $0xc80] ss:$16 sps:$4 sm:$0xff]  }
 0x6d6   : > { %11383 = vmatprep.subr.bf16.mxu1 %v16130_v8  ;;  %v16166_v8 = vld [vmem:[#allocation14 + $0xc04] ss:$16 sps:$4 sm:$0xff]  }
 0x6d7   : > { %11423 = vmatpush1.bf16.msra.mxu0 %v16125_v32  ;;  %v10062_v32 = vsel %vm7912_vm10, %v18882_v9, %v10061_v47  ;;  %v16194_v47 = vld [vmem:[#allocation14 + $0xca0] ss:$16 sps:$4 sm:$0xff]  }
 0x6d8   : > { %11424 = vmatprep.subr.bf16.mxu0 %v16133_v31  ;;  %v16161_v31 = vld [vmem:[#allocation14 + $0xbe0] ss:$16 sps:$4 sm:$0xff]  }
 0x6d9   : > { %11384 = vmatpush1.bf16.msra.mxu1 %v16128_v52 }
 0x6da   : > { %11385 = vmatprep.subr.bf16.mxu1 %v16136_v62  ;;  %v18997_v62 = vpack.c.b16 %v10052_v7, %v10052_v7  ;;  %v16206_v7 = vld [vmem:[#allocation14 + $0xce0] ss:$16 sps:$4 sm:$0xff]  }
 0x6db   : > { %11425 = vmatpush1.bf16.msra.mxu0 %v16131_v45  ;;  %v16169_v45 = vld [vmem:[#allocation14 + $0xe04] ss:$16 sps:$4 sm:$0xff]  }
 0x6dc   : > { %11426 = vmatprep.subr.bf16.mxu0 %v16139_v49  ;;  %v10066_v49 = vsel %vm7912_vm10, %v18891_v10, %v10065_v16  ;;  %v16203_v16 = vld [vmem:[#allocation14 + $0xec0] ss:$16 sps:$4 sm:$0xff]  }
 0x6dd   : > { %11386 = vmatpush1.bf16.msra.mxu1 %v16134_v61  ;;  %v16164_v61 = vld [vmem:[#allocation14 + $0xc00] ss:$16 sps:$4 sm:$0xff]  }
 0x6de   : > { %11387 = vmatprep.subr.bf16.mxu1 %v16142_v26  ;;  %v19001_v26 = vpack.c.b16 %v10062_v32, %v10062_v32  ;;  %v16209_v32 = vld [vmem:[#allocation14 + $0xee0] ss:$16 sps:$4 sm:$0xff]  }
 0x6df   : > { %11427 = vmatpush1.bf16.msra.mxu0 %v16137_v55 }
 0x6e0   : > { %11428 = vmatprep.subr.bf16.mxu0 %v16145_v46  ;;  %v16172_v46 = vld [vmem:[#allocation14 + $0xc24] ss:$16 sps:$4 sm:$0xff]  }
 0x6e1   : > { %11388 = vmatpush1.bf16.msra.mxu1 %v16140_v58  ;;  %v16167_v58 = vld [vmem:[#allocation14 + $0xe00] ss:$16 sps:$4 sm:$0xff]  }
 0x6e2   : > { %11389 = vmatprep.subr.bf16.mxu1 %v16148_v24  ;;  %v19005_v24 = vpack.c.b16 %v10066_v49, %v10066_v49  ;;  %v16215_v49 = vld [vmem:[#allocation14 + $0xf00] ss:$16 sps:$4 sm:$0xff]  }
 0x6e3   : > { %v9340_v18 = vpop.f32.mrb[4].mxu1  ;;  %11429 = vmatpush1.bf16.msra.mxu0 %v16143_v35  ;;  %v16175_v35 = vld [vmem:[#allocation14 + $0xe24] ss:$16 sps:$4 sm:$0xff]  }
 0x6e4   : > { %v9341_v15 = vadd.f32 %v9340_v18, %v18965_v63  ;;  %v9342_v56 = vpop.f32.mrb[5].mxu1  ;;  %11430 = vmatprep.subr.bf16.mxu0 %v16151_v5  ;;  %v16170_v5 = vld [vmem:[#allocation14 + $0xc20] ss:$16 sps:$4 sm:$0xff]   ;;  %v16181_v18 = vld [vmem:[#allocation14 + $0xe44] ss:$16 sps:$4 sm:$0xff]  }
 0x6e5   : > { %v9343_v38 = vadd.f32 %v9342_v56, %v18968_v22  ;;  %v9344_v0 = vpop.f32.mrb[6].mxu1  ;;  %v9381_v30 = vpop.f32.mrb[8].mxu0  ;;  %11390 = vmatpush1.bf16.msra.mxu1 %v16146_v60  ;;  %v10055_v22 = vrot.slane %v18874_v21, 1  ;;  %v16178_v60 = vld [vmem:[#allocation14 + $0xc44] ss:$16 sps:$4 sm:$0xff]  }
 0x6e6   : > { %v18984_v1 = vadd.f32 %v9381_v30, %v9341_v15  ;;  %v9345_v11 = vpop.f32.mrb[7].mxu1  ;;  %v9383_v2 = vpop.f32.mrb[9].mxu0  ;;  %11391 = vmatprep.subr.bf16.mxu1 %v16154_v48  ;;  %v16173_v48 = vld [vmem:[#allocation14 + $0xe20] ss:$16 sps:$4 sm:$0xff]   ;;  %v16184_v15 = vld [vmem:[#allocation14 + $0xc64] ss:$16 sps:$4 sm:$0xff]  }
 0x6e7   : > { %v18987_v63 = vadd.f32 %v9383_v2, %v9343_v38  ;;  %v9385_v36 = vpop.f32.mrb[10].mxu0  ;;  %11431 = vmatpush1.bf16.msra.mxu0 %v16149_v29  ;;  %v10056_v52 = vsel %vm7912_vm10, %v18888_v54, %v10055_v22  ;;  %v16176_v29 = vld [vmem:[#allocation14 + $0xc40] ss:$16 sps:$4 sm:$0xff]   ;;  %v16190_v0 = vld [vmem:[#allocation14 + $0xc84] ss:$16 sps:$4 sm:$0xff]  }
 0x6e8   : > { %v9386_v42 = vpop.f32.mrb[11].mxu0  ;;  %11432 = vmatprep.subr.bf16.mxu0 %v16157_v27  ;;  %v19003_v55 = vpack.c.b16 %v10056_v52, %v10056_v52  ;;  %v16179_v56 = vld [vmem:[#allocation14 + $0xe40] ss:$16 sps:$4 sm:$0xff]   ;;  %v16187_v27 = vld [vmem:[#allocation14 + $0xe64] ss:$16 sps:$4 sm:$0xff]  }
 0x6e9   : > { %11392 = vmatpush1.bf16.msra.mxu1 %v16152_v39  ;;  %v16182_v38 = vld [vmem:[#allocation14 + $0xc60] ss:$16 sps:$4 sm:$0xff]   ;;  %v16193_v39 = vld [vmem:[#allocation14 + $0xe84] ss:$16 sps:$4 sm:$0xff]  }
 0x6ea   : > { %11393 = vmatprep.subr.bf16.mxu1 %v16160_v28  ;;  %v16185_v30 = vld [vmem:[#allocation14 + $0xe60] ss:$16 sps:$4 sm:$0xff]   ;;  %v16196_v11 = vld [vmem:[#allocation14 + $0xca4] ss:$16 sps:$4 sm:$0xff]  }
 0x6eb   : > { %11433 = vmatpush1.bf16.msra.mxu0 %v16155_v23  ;;  %v16191_v2 = vld [vmem:[#allocation14 + $0xe80] ss:$16 sps:$4 sm:$0xff]   ;;  %v16199_v28 = vld [vmem:[#allocation14 + $0xea4] ss:$16 sps:$4 sm:$0xff]  }
 0x6ec   : > { %11434 = vmatprep.subr.bf16.mxu0 %v16163_v19  ;;  %v16202_v36 = vld [vmem:[#allocation14 + $0xcc4] ss:$16 sps:$4 sm:$0xff]   ;;  %v16197_v23 = vld [vmem:[#allocation14 + $0xea0] ss:$16 sps:$4 sm:$0xff]  }
 0x6ed   : > { %11394 = vmatpush1.bf16.msra.mxu1 %v16158_v6  ;;  %v16205_v22 = vld [vmem:[#allocation14 + $0xec4] ss:$16 sps:$4 sm:$0xff]   ;;  %v16200_v42 = vld [vmem:[#allocation14 + $0xcc0] ss:$16 sps:$4 sm:$0xff]  }
 0x6ee   : > { %11445 = vmatprep.subr.bf16.mxu1 %v16166_v8  ;;  %v16208_v19 = vld [vmem:[#allocation14 + $0xce4] ss:$16 sps:$4 sm:$0xff]   ;;  %v16212_v52 = vld [vmem:[#allocation14 + $0xd00] ss:$16 sps:$4 sm:$0xff]  }
 0x6ef   : > { %11435 = vmatpush1.bf16.msra.mxu0 %v16161_v31  ;;  %v16211_v6 = vld [vmem:[#allocation14 + $0xee4] ss:$16 sps:$4 sm:$0xff]  }
 0x6f0   : > { %11396 = vmatmul.mubr.bf16.vlgmr.msra.gmra.mrb[20].mxu1 %v18997_v62  ;;  %11486 = vmatprep.subr.bf16.mxu0 %v16169_v45  ;;  %v16214_v8 = vld [vmem:[#allocation14 + $0xd04] ss:$16 sps:$4 sm:$0xff]  }
 0x6f1   : > { %11446 = vmatpush1.bf16.msra.mxu1 %v16164_v61  ;;  %11477 = vmatprep.mubr.bf16.mxu1 %v19001_v26  ;;  %v16217_v31 = vld [vmem:[#allocation14 + $0xf04] ss:$16 sps:$4 sm:$0xff]  }
 0x6f2   : > { %11437 = vmatmul.mubr.bf16.vlgmr.msra.gmra.mrb[24].mxu0 %v19003_v55  ;;  %11447 = vmatprep.subr.bf16.mxu1 %v16172_v46  ;;  %v16220_v45 = vld [vmem:[#allocation14 + $0xd24] ss:$16 sps:$4 sm:$0xff]   ;;  %v16218_v46 = vld [vmem:[#allocation14 + $0xd20] ss:$16 sps:$4 sm:$0xff]  }
 0x6f3   : > { %11487 = vmatpush1.bf16.msra.mxu0 %v16167_v58  ;;  %11518 = vmatprep.mubr.bf16.mxu0 %v19005_v24  ;;  %v16223_v61 = vld [vmem:[#allocation14 + $0xf24] ss:$16 sps:$4 sm:$0xff]  }
 0x6f4   : > { %11488 = vmatprep.subr.bf16.mxu0 %v16175_v35  ;;  %v16226_v58 = vld [vmem:[#allocation14 + $0xd44] ss:$16 sps:$4 sm:$0xff]   ;;  %v16221_v35 = vld [vmem:[#allocation14 + $0xf20] ss:$16 sps:$4 sm:$0xff]  }
 0x6f5   : > { %11448 = vmatpush1.bf16.msra.mxu1 %v16170_v5  ;;  %v16229_v5 = vld [vmem:[#allocation14 + $0xf44] ss:$16 sps:$4 sm:$0xff]  }
 0x6f6   : > { %11449 = vmatprep.subr.bf16.mxu1 %v16178_v60  ;;  %v16224_v60 = vld [vmem:[#allocation14 + $0xd40] ss:$16 sps:$4 sm:$0xff]  }
 0x6f7   : > { %11489 = vmatpush1.bf16.msra.mxu0 %v16173_v48  ;;  %v16232_v48 = vld [vmem:[#allocation14 + $0xd64] ss:$16 sps:$4 sm:$0xff]  }
 0x6f8   : > { %11490 = vmatprep.subr.bf16.mxu0 %v16181_v18  ;;  %v16227_v18 = vld [vmem:[#allocation14 + $0xf40] ss:$16 sps:$4 sm:$0xff]  }
 0x6f9   : > { %11450 = vmatpush1.bf16.msra.mxu1 %v16176_v29  ;;  %v16235_v29 = vld [vmem:[#allocation14 + $0xf64] ss:$16 sps:$4 sm:$0xff]  }
 0x6fa   : > { %11451 = vmatprep.subr.bf16.mxu1 %v16184_v15  ;;  %v16230_v15 = vld [vmem:[#allocation14 + $0xd60] ss:$16 sps:$4 sm:$0xff]  }
 0x6fb   : > { %11491 = vmatpush1.bf16.msra.mxu0 %v16179_v56  ;;  %v16238_v56 = vld [vmem:[#allocation14 + $0xd84] ss:$16 sps:$4 sm:$0xff]  }
 0x6fc   : > { %11492 = vmatprep.subr.bf16.mxu0 %v16187_v27  ;;  %v16233_v27 = vld [vmem:[#allocation14 + $0xf60] ss:$16 sps:$4 sm:$0xff]  }
 0x6fd   : > { %11452 = vmatpush1.bf16.msra.mxu1 %v16182_v38  ;;  %v16241_v38 = vld [vmem:[#allocation14 + $0xf84] ss:$16 sps:$4 sm:$0xff]  }
 0x6fe   : > { %11453 = vmatprep.subr.bf16.mxu1 %v16190_v0  ;;  %v16236_v0 = vld [vmem:[#allocation14 + $0xd80] ss:$16 sps:$4 sm:$0xff]  }
 0x6ff   : > { %11493 = vmatpush1.bf16.msra.mxu0 %v16185_v30  ;;  %v16244_v30 = vld [vmem:[#allocation14 + $0xda4] ss:$16 sps:$4 sm:$0xff]  }
 0x700   : > { %11494 = vmatprep.subr.bf16.mxu0 %v16193_v39  ;;  %v16239_v39 = vld [vmem:[#allocation14 + $0xf80] ss:$16 sps:$4 sm:$0xff]  }
 0x701   : > { %11454 = vmatpush1.bf16.msra.mxu1 %v16188_v41  ;;  %v16247_v41 = vld [vmem:[#allocation14 + $0xfa4] ss:$16 sps:$4 sm:$0xff]  }
 0x702   : > { %11455 = vmatprep.subr.bf16.mxu1 %v16196_v11  ;;  %v16242_v11 = vld [vmem:[#allocation14 + $0xda0] ss:$16 sps:$4 sm:$0xff]  }
 0x703   : > { %11495 = vmatpush1.bf16.msra.mxu0 %v16191_v2  ;;  %v16250_v2 = vld [vmem:[#allocation14 + $0xdc4] ss:$16 sps:$4 sm:$0xff]  }
 0x704   : > { %11496 = vmatprep.subr.bf16.mxu0 %v16199_v28 }
 0x705   : > { %11456 = vmatpush1.bf16.msra.mxu1 %v16194_v47  ;;  %v16245_v47 = vld [vmem:[#allocation14 + $0xfa0] ss:$16 sps:$4 sm:$0xff]  }
 0x706   : > { %11457 = vmatprep.subr.bf16.mxu1 %v16202_v36 }
 0x707   : > { %11497 = vmatpush1.bf16.msra.mxu0 %v16197_v23  ;;  %v16253_v23 = vld [vmem:[#allocation14 + $0xfc4] ss:$16 sps:$4 sm:$0xff]  }
 0x708   : > { %11498 = vmatprep.subr.bf16.mxu0 %v16205_v22 }
 0x709   : > { %11458 = vmatpush1.bf16.msra.mxu1 %v16200_v42 }
 0x70a   : > { %11459 = vmatprep.subr.bf16.mxu1 %v16208_v19  ;;  %v16248_v19 = vld [vmem:[#allocation14 + $0xdc0] ss:$16 sps:$4 sm:$0xff]  }
 0x70b   : > { %11499 = vmatpush1.bf16.msra.mxu0 %v16203_v16  ;;  %v10059_v16 = vrot.slane %v18940_v33, 1 }
 0x70c   : > { %11500 = vmatprep.subr.bf16.mxu0 %v16211_v6 }
 0x70d   : > { %11460 = vmatpush1.bf16.msra.mxu1 %v16206_v7 }
 0x70e   : > { %11461 = vmatprep.subr.bf16.mxu1 %v16214_v8 }
 0x70f   : > { %11501 = vmatpush1.bf16.msra.mxu0 %v16209_v32  ;;  %v16256_v32 = vld [vmem:[#allocation14 + $0xde4] ss:$16 sps:$4 sm:$0xff]  }
 0x710   : > { %11502 = vmatprep.subr.bf16.mxu0 %v16217_v31 }
 0x711   : > { %11462 = vmatpush1.bf16.msra.mxu1 %v16212_v52 }
 0x712   : > { %11463 = vmatprep.subr.bf16.mxu1 %v16220_v45  ;;  %v16251_v45 = vld [vmem:[#allocation14 + $0xfc0] ss:$16 sps:$4 sm:$0xff]  }
 0x713   : > { %11503 = vmatpush1.bf16.msra.mxu0 %v16215_v49  ;;  %v10063_v49 = vrot.slane %v18943_v37, 1 }
 0x714   : > { %11504 = vmatprep.subr.bf16.mxu0 %v16223_v61 }
 0x715   : > { %11464 = vmatpush1.bf16.msra.mxu1 %v16218_v46  ;;  %v16259_v46 = vld [vmem:[#allocation14 + $0xfe4] ss:$16 sps:$4 sm:$0xff]  }
 0x716   : > { %11465 = vmatprep.subr.bf16.mxu1 %v16226_v58  ;;  %v16254_v58 = vld [vmem:[#allocation14 + $0xde0] ss:$16 sps:$4 sm:$0xff]  }
 0x717   : > { %11505 = vmatpush1.bf16.msra.mxu0 %v16221_v35  ;;  %v10060_v35 = vsel %vm7912_vm10, %v18936_v40, %v10059_v16  ;;  %v16287_v16 = vld [vmem:[#allocation14 + $0xa88] ss:$16 sps:$4 sm:$0xff]  }
 0x718   : > { %11506 = vmatprep.subr.bf16.mxu0 %v16229_v5  ;;  %v16262_v5 = vld [vmem:[#allocation14 + $0x80c] ss:$16 sps:$4 sm:$0xff]  }
 0x719   : > { %11466 = vmatpush1.bf16.msra.mxu1 %v16224_v60  ;;  %v16257_v60 = vld [vmem:[#allocation14 + $0xfe0] ss:$16 sps:$4 sm:$0xff]  }
 0x71a   : > { %11467 = vmatprep.subr.bf16.mxu1 %v16232_v48  ;;  %v10064_v48 = vsel %vm7912_vm10, %v18938_v43, %v10063_v49  ;;  %v16296_v49 = vld [vmem:[#allocation14 + $0x8c8] ss:$16 sps:$4 sm:$0xff]  }
 0x71b   : > { %11507 = vmatpush1.bf16.msra.mxu0 %v16227_v18  ;;  %v19021_v18 = vpack.c.b16 %v10060_v35, %v10060_v35  ;;  %v16302_v35 = vld [vmem:[#allocation14 + $0x8e8] ss:$16 sps:$4 sm:$0xff]  }
 0x71c   : > { %11508 = vmatprep.subr.bf16.mxu0 %v16235_v29  ;;  %v16265_v29 = vld [vmem:[#allocation14 + $0xa0c] ss:$16 sps:$4 sm:$0xff]  }
 0x71d   : > { %11468 = vmatpush1.bf16.msra.mxu1 %v16230_v15  ;;  %v16260_v15 = vld [vmem:[#allocation14 + $0x808] ss:$16 sps:$4 sm:$0xff]  }
 0x71e   : > { %11469 = vmatprep.subr.bf16.mxu1 %v16238_v56  ;;  %v19023_v56 = vpack.c.b16 %v10064_v48, %v10064_v48  ;;  %v16313_v48 = vld [vmem:[#allocation14 + $0xb0c] ss:$16 sps:$4 sm:$0xff]  }
 0x71f   : > { %11509 = vmatpush1.bf16.msra.mxu0 %v16233_v27  ;;  %v16268_v27 = vld [vmem:[#allocation14 + $0x82c] ss:$16 sps:$4 sm:$0xff]  }
 0x720   : > { %11510 = vmatprep.subr.bf16.mxu0 %v16241_v38  ;;  %v16263_v38 = vld [vmem:[#allocation14 + $0xa08] ss:$16 sps:$4 sm:$0xff]  }
 0x721   : > { %11470 = vmatpush1.bf16.msra.mxu1 %v16236_v0  ;;  %v16271_v0 = vld [vmem:[#allocation14 + $0xa2c] ss:$16 sps:$4 sm:$0xff]  }
 0x722   : > { %11471 = vmatprep.subr.bf16.mxu1 %v16244_v30  ;;  %v16266_v30 = vld [vmem:[#allocation14 + $0x828] ss:$16 sps:$4 sm:$0xff]  }
 0x723   : > { %v9422_v28 = vpop.f32.mrb[8].mxu1  ;;  %11511 = vmatpush1.bf16.msra.mxu0 %v16239_v39  ;;  %v16274_v39 = vld [vmem:[#allocation14 + $0x84c] ss:$16 sps:$4 sm:$0xff]  }
 0x724   : > { %v9424_v36 = vpop.f32.mrb[9].mxu1  ;;  %11512 = vmatprep.subr.bf16.mxu0 %v16247_v41  ;;  %v16269_v41 = vld [vmem:[#allocation14 + $0xa28] ss:$16 sps:$4 sm:$0xff]  }
 0x725   : > { %v9426_v22 = vpop.f32.mrb[10].mxu1  ;;  %v9463_v42 = vpop.f32.mrb[12].mxu0  ;;  %11472 = vmatpush1.bf16.msra.mxu1 %v16242_v11  ;;  %v16277_v11 = vld [vmem:[#allocation14 + $0xa4c] ss:$16 sps:$4 sm:$0xff]  }
 0x726   : > { %v19012_v6 = vadd.f32 %v9463_v42, %v9422_v28  ;;  %v9427_v7 = vpop.f32.mrb[11].mxu1  ;;  %v9465_v8 = vpop.f32.mrb[13].mxu0  ;;  %11473 = vmatprep.subr.bf16.mxu1 %v16250_v2  ;;  %v16272_v2 = vld [vmem:[#allocation14 + $0x848] ss:$16 sps:$4 sm:$0xff]   ;;  %v16280_v28 = vld [vmem:[#allocation14 + $0x86c] ss:$16 sps:$4 sm:$0xff]  }
 0x727   : > { %v19014_v31 = vadd.f32 %v9465_v8, %v9424_v36  ;;  %v9467_v52 = vpop.f32.mrb[14].mxu0  ;;  %11513 = vmatpush1.bf16.msra.mxu0 %v16245_v47  ;;  %v16275_v47 = vld [vmem:[#allocation14 + $0xa48] ss:$16 sps:$4 sm:$0xff]   ;;  %v16283_v36 = vld [vmem:[#allocation14 + $0xa6c] ss:$16 sps:$4 sm:$0xff]  }
 0x728   : > { %v9468_v61 = vpop.f32.mrb[15].mxu0  ;;  %11514 = vmatprep.subr.bf16.mxu0 %v16253_v23  ;;  %v16286_v23 = vld [vmem:[#allocation14 + $0x88c] ss:$16 sps:$4 sm:$0xff]   ;;  %v16281_v22 = vld [vmem:[#allocation14 + $0xa68] ss:$16 sps:$4 sm:$0xff]  }
 0x729   : > { %11474 = vmatpush1.bf16.msra.mxu1 %v16248_v19  ;;  %v16289_v42 = vld [vmem:[#allocation14 + $0xa8c] ss:$16 sps:$4 sm:$0xff]   ;;  %v16290_v8 = vld [vmem:[#allocation14 + $0x8a8] ss:$16 sps:$4 sm:$0xff]  }
 0x72a   : > { %11475 = vmatprep.subr.bf16.mxu1 %v16256_v32  ;;  %v16292_v19 = vld [vmem:[#allocation14 + $0x8ac] ss:$16 sps:$4 sm:$0xff]   ;;  %v16293_v52 = vld [vmem:[#allocation14 + $0xaa8] ss:$16 sps:$4 sm:$0xff]  }
 0x72b   : > { %11515 = vmatpush1.bf16.msra.mxu0 %v16251_v45  ;;  %v16295_v7 = vld [vmem:[#allocation14 + $0xaac] ss:$16 sps:$4 sm:$0xff]  }
 0x72c   : > { %11516 = vmatprep.subr.bf16.mxu0 %v16259_v46  ;;  %v16298_v32 = vld [vmem:[#allocation14 + $0x8cc] ss:$16 sps:$4 sm:$0xff]   ;;  %v16299_v46 = vld [vmem:[#allocation14 + $0xac8] ss:$16 sps:$4 sm:$0xff]  }
 0x72d   : > { %11476 = vmatpush1.bf16.msra.mxu1 %v16254_v58  ;;  %v16301_v45 = vld [vmem:[#allocation14 + $0xacc] ss:$16 sps:$4 sm:$0xff]  }
 0x72e   : > { %11527 = vmatprep.subr.bf16.mxu1 %v16262_v5  ;;  %v16304_v61 = vld [vmem:[#allocation14 + $0x8ec] ss:$16 sps:$4 sm:$0xff]  }
 0x72f   : > { %11517 = vmatpush1.bf16.msra.mxu0 %v16257_v60  ;;  %v16307_v58 = vld [vmem:[#allocation14 + $0xaec] ss:$16 sps:$4 sm:$0xff]   ;;  %v16305_v60 = vld [vmem:[#allocation14 + $0xae8] ss:$16 sps:$4 sm:$0xff]  }
 0x730   : > { %11478 = vmatmul.mubr.bf16.vlgmr.msra.gmra.mrb[24].mxu1 %v19021_v18  ;;  %11568 = vmatprep.subr.bf16.mxu0 %v16265_v29  ;;  %v16310_v5 = vld [vmem:[#allocation14 + $0x90c] ss:$16 sps:$4 sm:$0xff]   ;;  %v16308_v29 = vld [vmem:[#allocation14 + $0x908] ss:$16 sps:$4 sm:$0xff]  }
 0x731   : > { %11528 = vmatpush1.bf16.msra.mxu1 %v16260_v15  ;;  %11559 = vmatprep.mubr.bf16.mxu1 %v18975_v34  ;;  %v16278_v34 = vld [vmem:[#allocation14 + $0x868] ss:$16 sps:$4 sm:$0xff]   ;;  %v16316_v15 = vld [vmem:[#allocation14 + $0x92c] ss:$16 sps:$4 sm:$0xff]  }
 0x732   : > { %11519 = vmatmul.mubr.bf16.vlgmr.msra.gmra.mrb[28].mxu0 %v19023_v56  ;;  %11529 = vmatprep.subr.bf16.mxu1 %v16268_v27  ;;  %v16311_v27 = vld [vmem:[#allocation14 + $0xb08] ss:$16 sps:$4 sm:$0xff]  }
 0x733   : > { %11569 = vmatpush1.bf16.msra.mxu0 %v16263_v38  ;;  %11600 = vmatprep.mubr.bf16.mxu0 %v18977_v44  ;;  %v16284_v44 = vld [vmem:[#allocation14 + $0x888] ss:$16 sps:$4 sm:$0xff]   ;;  %v16319_v38 = vld [vmem:[#allocation14 + $0xb2c] ss:$16 sps:$4 sm:$0xff]  }
 0x734   : > { %11570 = vmatprep.subr.bf16.mxu0 %v16271_v0  ;;  %v16314_v0 = vld [vmem:[#allocation14 + $0x928] ss:$16 sps:$4 sm:$0xff]  }
 0x735   : > { %11530 = vmatpush1.bf16.msra.mxu1 %v16266_v30  ;;  %v16322_v30 = vld [vmem:[#allocation14 + $0x94c] ss:$16 sps:$4 sm:$0xff]  }
 0x736   : > { %11531 = vmatprep.subr.bf16.mxu1 %v16274_v39  ;;  %v16317_v39 = vld [vmem:[#allocation14 + $0xb28] ss:$16 sps:$4 sm:$0xff]  }
 0x737   : > { %11571 = vmatpush1.bf16.msra.mxu0 %v16269_v41  ;;  %v16325_v41 = vld [vmem:[#allocation14 + $0xb4c] ss:$16 sps:$4 sm:$0xff]  }
 0x738   : > { %11572 = vmatprep.subr.bf16.mxu0 %v16277_v11  ;;  %v16320_v11 = vld [vmem:[#allocation14 + $0x948] ss:$16 sps:$4 sm:$0xff]  }
 0x739   : > { %11532 = vmatpush1.bf16.msra.mxu1 %v16272_v2  ;;  %v16328_v2 = vld [vmem:[#allocation14 + $0x96c] ss:$16 sps:$4 sm:$0xff]  }
 0x73a   : > { %11533 = vmatprep.subr.bf16.mxu1 %v16280_v28  ;;  %v16323_v28 = vld [vmem:[#allocation14 + $0xb48] ss:$16 sps:$4 sm:$0xff]  }
 0x73b   : > { %11573 = vmatpush1.bf16.msra.mxu0 %v16275_v47  ;;  %v16331_v47 = vld [vmem:[#allocation14 + $0xb6c] ss:$16 sps:$4 sm:$0xff]  }
 0x73c   : > { %11574 = vmatprep.subr.bf16.mxu0 %v16283_v36  ;;  %v16326_v36 = vld [vmem:[#allocation14 + $0x968] ss:$16 sps:$4 sm:$0xff]  }
 0x73d   : > { %11534 = vmatpush1.bf16.msra.mxu1 %v16278_v34  ;;  %v16334_v34 = vld [vmem:[#allocation14 + $0x98c] ss:$16 sps:$4 sm:$0xff]  }
 0x73e   : > { %11535 = vmatprep.subr.bf16.mxu1 %v16286_v23  ;;  %v16329_v23 = vld [vmem:[#allocation14 + $0xb68] ss:$16 sps:$4 sm:$0xff]  }
 0x73f   : > { %11575 = vmatpush1.bf16.msra.mxu0 %v16281_v22  ;;  %v16337_v22 = vld [vmem:[#allocation14 + $0xb8c] ss:$16 sps:$4 sm:$0xff]  }
 0x740   : > { %11576 = vmatprep.subr.bf16.mxu0 %v16289_v42  ;;  %v16332_v42 = vld [vmem:[#allocation14 + $0x988] ss:$16 sps:$4 sm:$0xff]  }
 0x741   : > { %11536 = vmatpush1.bf16.msra.mxu1 %v16284_v44  ;;  %v16340_v44 = vld [vmem:[#allocation14 + $0x9ac] ss:$16 sps:$4 sm:$0xff]  }
 0x742   : > { %11537 = vmatprep.subr.bf16.mxu1 %v16292_v19  ;;  %v16335_v19 = vld [vmem:[#allocation14 + $0xb88] ss:$16 sps:$4 sm:$0xff]  }
 0x743   : > { %11577 = vmatpush1.bf16.msra.mxu0 %v16287_v16  ;;  %v16343_v16 = vld [vmem:[#allocation14 + $0xbac] ss:$16 sps:$4 sm:$0xff]  }
 0x744   : > { %11578 = vmatprep.subr.bf16.mxu0 %v16295_v7  ;;  %v16338_v7 = vld [vmem:[#allocation14 + $0x9a8] ss:$16 sps:$4 sm:$0xff]  }
 0x745   : > { %11538 = vmatpush1.bf16.msra.mxu1 %v16290_v8  ;;  %v16346_v8 = vld [vmem:[#allocation14 + $0x9cc] ss:$16 sps:$4 sm:$0xff]  }
 0x746   : > { %11539 = vmatprep.subr.bf16.mxu1 %v16298_v32 }
 0x747   : > { %11579 = vmatpush1.bf16.msra.mxu0 %v16293_v52  ;;  %v16341_v52 = vld [vmem:[#allocation14 + $0xba8] ss:$16 sps:$4 sm:$0xff]  }
 0x748   : > { %11580 = vmatprep.subr.bf16.mxu0 %v16301_v45 }
 0x749   : > { %11540 = vmatpush1.bf16.msra.mxu1 %v16296_v49 }
 0x74a   : > { %11541 = vmatprep.subr.bf16.mxu1 %v16304_v61  ;;  %v16349_v61 = vld [vmem:[#allocation14 + $0xbcc] ss:$16 sps:$4 sm:$0xff]  }
 0x74b   : > { %11581 = vmatpush1.bf16.msra.mxu0 %v16299_v46 }
 0x74c   : > { %11582 = vmatprep.subr.bf16.mxu0 %v16307_v58 }
 0x74d   : > { %11542 = vmatpush1.bf16.msra.mxu1 %v16302_v35 }
 0x74e   : > { %11543 = vmatprep.subr.bf16.mxu1 %v16310_v5  ;;  %v16344_v5 = vld [vmem:[#allocation14 + $0x9c8] ss:$16 sps:$4 sm:$0xff]  }
 0x74f   : > { %11583 = vmatpush1.bf16.msra.mxu0 %v16305_v60 }
 0x750   : > { %11584 = vmatprep.subr.bf16.mxu0 %v16313_v48 }
 0x751   : > { %11544 = vmatpush1.bf16.msra.mxu1 %v16308_v29 }
 0x752   : > { %11545 = vmatprep.subr.bf16.mxu1 %v16316_v15  ;;  %v16352_v15 = vld [vmem:[#allocation14 + $0x9ec] ss:$16 sps:$4 sm:$0xff]  }
 0x753   : > { %11585 = vmatpush1.bf16.msra.mxu0 %v16311_v27 }
 0x754   : > { %11586 = vmatprep.subr.bf16.mxu0 %v16319_v38 }
 0x755   : > { %11546 = vmatpush1.bf16.msra.mxu1 %v16314_v0 }
 0x756   : > { %11547 = vmatprep.subr.bf16.mxu1 %v16322_v30  ;;  %v16355_v30 = vld [vmem:[#allocation14 + $0xbec] ss:$16 sps:$4 sm:$0xff]  }
 0x757   : > { %11587 = vmatpush1.bf16.msra.mxu0 %v16317_v39  ;;  %v16358_v39 = vld [vmem:[#allocation14 + $0xc0c] ss:$16 sps:$4 sm:$0xff]  }
 0x758   : > { %11588 = vmatprep.subr.bf16.mxu0 %v16325_v41  ;;  %v16353_v41 = vld [vmem:[#allocation14 + $0xbe8] ss:$16 sps:$4 sm:$0xff]  }
 0x759   : > { %11548 = vmatpush1.bf16.msra.mxu1 %v16320_v11  ;;  %v16361_v11 = vld [vmem:[#allocation14 + $0xe0c] ss:$16 sps:$4 sm:$0xff]  }
 0x75a   : > { %11549 = vmatprep.subr.bf16.mxu1 %v16328_v2  ;;  %v16356_v2 = vld [vmem:[#allocation14 + $0xc08] ss:$16 sps:$4 sm:$0xff]  }
 0x75b   : > { %11589 = vmatpush1.bf16.msra.mxu0 %v16323_v28  ;;  %v16364_v28 = vld [vmem:[#allocation14 + $0xc2c] ss:$16 sps:$4 sm:$0xff]  }
 0x75c   : > { %11590 = vmatprep.subr.bf16.mxu0 %v16331_v47  ;;  %v16359_v47 = vld [vmem:[#allocation14 + $0xe08] ss:$16 sps:$4 sm:$0xff]  }
 0x75d   : > { %11550 = vmatpush1.bf16.msra.mxu1 %v16326_v36  ;;  %v16367_v36 = vld [vmem:[#allocation14 + $0xe2c] ss:$16 sps:$4 sm:$0xff]  }
 0x75e   : > { %11551 = vmatprep.subr.bf16.mxu1 %v16334_v34  ;;  %v16362_v34 = vld [vmem:[#allocation14 + $0xc28] ss:$16 sps:$4 sm:$0xff]  }
 0x75f   : > { %11591 = vmatpush1.bf16.msra.mxu0 %v16329_v23  ;;  %v16370_v23 = vld [vmem:[#allocation14 + $0xc4c] ss:$16 sps:$4 sm:$0xff]  }
 0x760   : > { %11592 = vmatprep.subr.bf16.mxu0 %v16337_v22  ;;  %v16365_v22 = vld [vmem:[#allocation14 + $0xe28] ss:$16 sps:$4 sm:$0xff]  }
 0x761   : > { %11552 = vmatpush1.bf16.msra.mxu1 %v16332_v42  ;;  %v16373_v42 = vld [vmem:[#allocation14 + $0xe4c] ss:$16 sps:$4 sm:$0xff]  }
 0x762   : > { %11553 = vmatprep.subr.bf16.mxu1 %v16340_v44  ;;  %v16368_v44 = vld [vmem:[#allocation14 + $0xc48] ss:$16 sps:$4 sm:$0xff]  }
 0x763   : > { %v9504_v32 = vpop.f32.mrb[12].mxu1  ;;  %11593 = vmatpush1.bf16.msra.mxu0 %v16335_v19  ;;  %v16371_v19 = vld [vmem:[#allocation14 + $0xe48] ss:$16 sps:$4 sm:$0xff]  }
 0x764   : > { %v9505_v45 = vadd.f32 %v9504_v32, %v19012_v6  ;;  %v9506_v49 = vpop.f32.mrb[13].mxu1  ;;  %11594 = vmatprep.subr.bf16.mxu0 %v16343_v16  ;;  %v16347_v6 = vld [vmem:[#allocation14 + $0xbc8] ss:$16 sps:$4 sm:$0xff]   ;;  %v16379_v16 = vld [vmem:[#allocation14 + $0xe6c] ss:$16 sps:$4 sm:$0xff]  }
 0x765   : > { %v9507_v46 = vadd.f32 %v9506_v49, %v19014_v31  ;;  %v9508_v58 = vpop.f32.mrb[14].mxu1  ;;  %v9545_v35 = vpop.f32.mrb[16].mxu0  ;;  %11554 = vmatpush1.bf16.msra.mxu1 %v16338_v7  ;;  %v16350_v31 = vld [vmem:[#allocation14 + $0x9e8] ss:$16 sps:$4 sm:$0xff]   ;;  %v16388_v32 = vld [vmem:[#allocation14 + $0xcac] ss:$16 sps:$4 sm:$0xff]  }
 0x766   : > { %v19031_v60 = vadd.f32 %v9545_v35, %v9505_v45  ;;  %v9509_v48 = vpop.f32.mrb[15].mxu1  ;;  %v9547_v29 = vpop.f32.mrb[17].mxu0  ;;  %11555 = vmatprep.subr.bf16.mxu1 %v16346_v8  ;;  %v16377_v7 = vld [vmem:[#allocation14 + $0xe68] ss:$16 sps:$4 sm:$0xff]   ;;  %v16385_v8 = vld [vmem:[#allocation14 + $0xe8c] ss:$16 sps:$4 sm:$0xff]  }
 0x767   : > { %v19033_v27 = vadd.f32 %v9547_v29, %v9507_v46  ;;  %v9549_v38 = vpop.f32.mrb[18].mxu0  ;;  %11595 = vmatpush1.bf16.msra.mxu0 %v16341_v52  ;;  %v16383_v52 = vld [vmem:[#allocation14 + $0xe88] ss:$16 sps:$4 sm:$0xff]   ;;  %v16391_v45 = vld [vmem:[#allocation14 + $0xeac] ss:$16 sps:$4 sm:$0xff]  }
 0x768   : > { %v9550_v0 = vpop.f32.mrb[19].mxu0  ;;  %11596 = vmatprep.subr.bf16.mxu0 %v16349_v61  ;;  %v16386_v49 = vld [vmem:[#allocation14 + $0xca8] ss:$16 sps:$4 sm:$0xff]   ;;  %v16394_v61 = vld [vmem:[#allocation14 + $0xccc] ss:$16 sps:$4 sm:$0xff]  }
 0x769   : > { %11556 = vmatpush1.bf16.msra.mxu1 %v16344_v5  ;;  %v16389_v58 = vld [vmem:[#allocation14 + $0xea8] ss:$16 sps:$4 sm:$0xff]   ;;  %v16397_v48 = vld [vmem:[#allocation14 + $0xecc] ss:$16 sps:$4 sm:$0xff]  }
 0x76a   : > { %11557 = vmatprep.subr.bf16.mxu1 %v16352_v15 }
 0x76b   : > { %11597 = vmatpush1.bf16.msra.mxu0 %v16347_v6  ;;  %v16392_v6 = vld [vmem:[#allocation14 + $0xcc8] ss:$16 sps:$4 sm:$0xff]  }
 0x76c   : > { %11598 = vmatprep.subr.bf16.mxu0 %v16355_v30 }
 0x76d   : > { %11558 = vmatpush1.bf16.msra.mxu1 %v16350_v31 }
 0x76e   : > { %11609 = vmatprep.subr.bf16.mxu1 %v16358_v39  ;;  %v16400_v39 = vld [vmem:[#allocation14 + $0xcec] ss:$16 sps:$4 sm:$0xff]  }
 0x76f   : > { %11599 = vmatpush1.bf16.msra.mxu0 %v16353_v41 }
 0x770   : > { %11560 = vmatmul.mubr.bf16.vlgmr.msra.gmra.mrb[28].mxu1 %v18997_v62  ;;  %11650 = vmatprep.subr.bf16.mxu0 %v16361_v11  ;;  %v16376_v62 = vld [vmem:[#allocation14 + $0xc6c] ss:$16 sps:$4 sm:$0xff]   ;;  %v16395_v11 = vld [vmem:[#allocation14 + $0xec8] ss:$16 sps:$4 sm:$0xff]  }
 0x771   : > { %11610 = vmatpush1.bf16.msra.mxu1 %v16356_v2  ;;  %11641 = vmatprep.mubr.bf16.mxu1 %v19001_v26  ;;  %v16374_v26 = vld [vmem:[#allocation14 + $0xc68] ss:$16 sps:$4 sm:$0xff]  }
 0x772   : > { %11601 = vmatmul.mubr.bf16.vlgmr.msra.gmra.mrb[32].mxu0 %v19003_v55  ;;  %11611 = vmatprep.subr.bf16.mxu1 %v16364_v28  ;;  %v16382_v55 = vld [vmem:[#allocation14 + $0xc8c] ss:$16 sps:$4 sm:$0xff]   ;;  %v16398_v28 = vld [vmem:[#allocation14 + $0xce8] ss:$16 sps:$4 sm:$0xff]  }
 0x773   : > { %11651 = vmatpush1.bf16.msra.mxu0 %v16359_v47  ;;  %11682 = vmatprep.mubr.bf16.mxu0 %v19005_v24  ;;  %v16380_v24 = vld [vmem:[#allocation14 + $0xc88] ss:$16 sps:$4 sm:$0xff]   ;;  %v16406_v47 = vld [vmem:[#allocation14 + $0xd0c] ss:$16 sps:$4 sm:$0xff]  }
 0x774   : > { %11652 = vmatprep.subr.bf16.mxu0 %v16367_v36  ;;  %v16409_v36 = vld [vmem:[#allocation14 + $0xf0c] ss:$16 sps:$4 sm:$0xff]  }
 0x775   : > { %11612 = vmatpush1.bf16.msra.mxu1 %v16362_v34  ;;  %v16404_v34 = vld [vmem:[#allocation14 + $0xd08] ss:$16 sps:$4 sm:$0xff]  }
 0x776   : > { %11613 = vmatprep.subr.bf16.mxu1 %v16370_v23  ;;  %v16412_v23 = vld [vmem:[#allocation14 + $0xd2c] ss:$16 sps:$4 sm:$0xff]  }
 0x777   : > { %11653 = vmatpush1.bf16.msra.mxu0 %v16365_v22  ;;  %v16415_v22 = vld [vmem:[#allocation14 + $0xf2c] ss:$16 sps:$4 sm:$0xff]  }
 0x778   : > { %11654 = vmatprep.subr.bf16.mxu0 %v16373_v42  ;;  %v16410_v42 = vld [vmem:[#allocation14 + $0xd28] ss:$16 sps:$4 sm:$0xff]  }
 0x779   : > { %11614 = vmatpush1.bf16.msra.mxu1 %v16368_v44  ;;  %v16418_v44 = vld [vmem:[#allocation14 + $0xd4c] ss:$16 sps:$4 sm:$0xff]  }
 0x77a   : > { %11615 = vmatprep.subr.bf16.mxu1 %v16376_v62  ;;  %v16413_v62 = vld [vmem:[#allocation14 + $0xf28] ss:$16 sps:$4 sm:$0xff]  }
 0x77b   : > { %11655 = vmatpush1.bf16.msra.mxu0 %v16371_v19  ;;  %v16421_v19 = vld [vmem:[#allocation14 + $0xf4c] ss:$16 sps:$4 sm:$0xff]  }
 0x77c   : > { %11656 = vmatprep.subr.bf16.mxu0 %v16379_v16  ;;  %v16416_v16 = vld [vmem:[#allocation14 + $0xd48] ss:$16 sps:$4 sm:$0xff]  }
 0x77d   : > { %11616 = vmatpush1.bf16.msra.mxu1 %v16374_v26  ;;  %v16424_v26 = vld [vmem:[#allocation14 + $0xd6c] ss:$16 sps:$4 sm:$0xff]  }
 0x77e   : > { %11617 = vmatprep.subr.bf16.mxu1 %v16382_v55  ;;  %v16419_v55 = vld [vmem:[#allocation14 + $0xf48] ss:$16 sps:$4 sm:$0xff]  }
 0x77f   : > { %11657 = vmatpush1.bf16.msra.mxu0 %v16377_v7  ;;  %v16427_v7 = vld [vmem:[#allocation14 + $0xf6c] ss:$16 sps:$4 sm:$0xff]  }
 0x780   : > { %11658 = vmatprep.subr.bf16.mxu0 %v16385_v8  ;;  %v16422_v8 = vld [vmem:[#allocation14 + $0xd68] ss:$16 sps:$4 sm:$0xff]  }
 0x781   : > { %11618 = vmatpush1.bf16.msra.mxu1 %v16380_v24  ;;  %v16430_v24 = vld [vmem:[#allocation14 + $0xd8c] ss:$16 sps:$4 sm:$0xff]  }
 0x782   : > { %11619 = vmatprep.subr.bf16.mxu1 %v16388_v32  ;;  %v16425_v32 = vld [vmem:[#allocation14 + $0xf68] ss:$16 sps:$4 sm:$0xff]  }
 0x783   : > { %v9746_v46 = vpop.f32.mrb[16].mxu1  ;;  %11659 = vmatpush1.bf16.msra.mxu0 %v16383_v52  ;;  %v16433_v52 = vld [vmem:[#allocation14 + $0xf8c] ss:$16 sps:$4 sm:$0xff]  }
 0x784   : > { %v19040_v35 = vadd.f32 %v9746_v46, %v18984_v1  ;;  %v9748_v5 = vpop.f32.mrb[17].mxu1  ;;  %11660 = vmatprep.subr.bf16.mxu0 %v16391_v45  ;;  %v16428_v45 = vld [vmem:[#allocation14 + $0xd88] ss:$16 sps:$4 sm:$0xff]   ;;  %v16439_v46 = vld [vmem:[#allocation14 + $0xfac] ss:$16 sps:$4 sm:$0xff]  }
 0x785   : > { %v19043_v29 = vadd.f32 %v9748_v5, %v18987_v63  ;;  %v9750_v15 = vpop.f32.mrb[18].mxu1  ;;  %v9787_v38 = vpop.f32.mrb[20].mxu0  ;;  %11620 = vmatpush1.bf16.msra.mxu1 %v16386_v49  ;;  %v16403_v63 = vld [vmem:[#allocation14 + $0xeec] ss:$16 sps:$4 sm:$0xff]  }
 0x786   : > { %v19046_v0 = vadd.f32 %v9787_v38, %v19031_v60  ;;  %v9751_v30 = vpop.f32.mrb[19].mxu1  ;;  %v9789_v31 = vpop.f32.mrb[21].mxu0  ;;  %11621 = vmatprep.subr.bf16.mxu1 %v16394_v61  ;;  %v16401_v60 = vld [vmem:[#allocation14 + $0xee8] ss:$16 sps:$4 sm:$0xff]   ;;  %v16436_v49 = vld [vmem:[#allocation14 + $0xdac] ss:$16 sps:$4 sm:$0xff]  }
 0x787   : > { %v19049_v1 = vadd.f32 %v9789_v31, %v19033_v27  ;;  %v9791_v41 = vpop.f32.mrb[22].mxu0  ;;  %11661 = vmatpush1.bf16.msra.mxu0 %v16389_v58  ;;  %v16407_v27 = vld [vmem:[#allocation14 + $0xf08] ss:$16 sps:$4 sm:$0xff]   ;;  %v16442_v5 = vld [vmem:[#allocation14 + $0xdcc] ss:$16 sps:$4 sm:$0xff]   ;;  %v11955_v30 = vrot.slane %v18868_v59, 2 }
 0x788   : > { %v9792_v2 = vpop.f32.mrb[23].mxu0  ;;  %11662 = vmatprep.subr.bf16.mxu0 %v16397_v48  ;;  %v16431_v61 = vld [vmem:[#allocation14 + $0xf88] ss:$16 sps:$4 sm:$0xff]   ;;  %v16445_v15 = vld [vmem:[#allocation14 + $0xfcc] ss:$16 sps:$4 sm:$0xff]   ;;  %v11956_v31 = vrot.slane %v18876_v13, 1 }
 0x789   : > { %11622 = vmatpush1.bf16.msra.mxu1 %v16392_v6  ;;  %v16434_v58 = vld [vmem:[#allocation14 + $0xda8] ss:$16 sps:$4 sm:$0xff]   ;;  %v16448_v6 = vld [vmem:[#allocation14 + $0xdec] ss:$16 sps:$4 sm:$0xff]   ;;  %v11962_v2 = vrot.slane %v18886_v20, 1 }
 0x78a   : > { %11623 = vmatprep.subr.bf16.mxu1 %v16400_v39  ;;  %v16437_v48 = vld [vmem:[#allocation14 + $0xfa8] ss:$16 sps:$4 sm:$0xff]   ;;  %v16451_v41 = vld [vmem:[#allocation14 + $0xfec] ss:$16 sps:$4 sm:$0xff]   ;;  %v16457_v59 = vld [vmem:[#allocation14 + $0x1204] ss:$16 sps:$4 sm:$0xff]  }
 0x78b   : > { %11663 = vmatpush1.bf16.msra.mxu0 %v16395_v11  ;;  %v16440_v38 = vld [vmem:[#allocation14 + $0xdc8] ss:$16 sps:$4 sm:$0xff]   ;;  %v11961_v11 = vrot.slane %v18872_v51, 2  ;;  %v16460_v51 = vld [vmem:[#allocation14 + $0x1024] ss:$16 sps:$4 sm:$0xff]  }
 0x78c   : > { %11664 = vmatprep.subr.bf16.mxu0 %v16403_v63  ;;  %v16443_v39 = vld [vmem:[#allocation14 + $0xfc8] ss:$16 sps:$4 sm:$0xff]   ;;  %v16455_v20 = vld [vmem:[#allocation14 + $0x1200] ss:$16 sps:$4 sm:$0xff]  }
 0x78d   : > { %11624 = vmatpush1.bf16.msra.mxu1 %v16398_v28  ;;  %v16446_v63 = vld [vmem:[#allocation14 + $0xde8] ss:$16 sps:$4 sm:$0xff]   ;;  %v16454_v28 = vld [vmem:[#allocation14 + $0x1004] ss:$16 sps:$4 sm:$0xff]   ;;  %v11963_v13 = vsel %vm7912_vm10, %v11962_v2, %v11961_v11 }
 0x78e   : > { %11625 = vmatprep.subr.bf16.mxu1 %v16406_v47  ;;  %v11957_v47 = vsel %vm7912_vm10, %v11956_v31, %v11955_v30 }
 0x78f   : > { %11665 = vmatpush1.bf16.msra.mxu0 %v16401_v60  ;;  %v16449_v60 = vld [vmem:[#allocation14 + $0xfe8] ss:$16 sps:$4 sm:$0xff]  }
 0x790   : > { %11666 = vmatprep.subr.bf16.mxu0 %v16409_v36  ;;  %v16452_v36 = vld [vmem:[#allocation14 + $0x1000] ss:$16 sps:$4 sm:$0xff]  }
 0x791   : > { %11626 = vmatpush1.bf16.msra.mxu1 %v16404_v34  ;;  %v19057_v34 = vpack.c.b16 %v11957_v47, %v11957_v47  ;;  %v16499_v47 = vld [vmem:[#allocation14 + $0x12e4] ss:$16 sps:$4 sm:$0xff]  }
 0x792   : > { %11627 = vmatprep.subr.bf16.mxu1 %v16412_v23  ;;  %v19059_v23 = vpack.c.b16 %v11963_v13, %v11963_v13  ;;  %v16497_v13 = vld [vmem:[#allocation14 + $0x12e0] ss:$16 sps:$4 sm:$0xff]  }
 0x793   : > { %11667 = vmatpush1.bf16.msra.mxu0 %v16407_v27  ;;  %v16463_v27 = vld [vmem:[#allocation14 + $0x1224] ss:$16 sps:$4 sm:$0xff]  }
 0x794   : > { %11668 = vmatprep.subr.bf16.mxu0 %v16415_v22  ;;  %v16458_v22 = vld [vmem:[#allocation14 + $0x1020] ss:$16 sps:$4 sm:$0xff]  }
 0x795   : > { %11628 = vmatpush1.bf16.msra.mxu1 %v16410_v42  ;;  %v16466_v42 = vld [vmem:[#allocation14 + $0x1044] ss:$16 sps:$4 sm:$0xff]  }
 0x796   : > { %11629 = vmatprep.subr.bf16.mxu1 %v16418_v44  ;;  %v16461_v44 = vld [vmem:[#allocation14 + $0x1220] ss:$16 sps:$4 sm:$0xff]  }
 0x797   : > { %11669 = vmatpush1.bf16.msra.mxu0 %v16413_v62  ;;  %v16469_v62 = vld [vmem:[#allocation14 + $0x1244] ss:$16 sps:$4 sm:$0xff]  }
 0x798   : > { %11670 = vmatprep.subr.bf16.mxu0 %v16421_v19  ;;  %v16464_v19 = vld [vmem:[#allocation14 + $0x1040] ss:$16 sps:$4 sm:$0xff]  }
 0x799   : > { %11630 = vmatpush1.bf16.msra.mxu1 %v16416_v16  ;;  %v16467_v16 = vld [vmem:[#allocation14 + $0x1240] ss:$16 sps:$4 sm:$0xff]  }
 0x79a   : > { %11631 = vmatprep.subr.bf16.mxu1 %v16424_v26  ;;  %v16475_v26 = vld [vmem:[#allocation14 + $0x1264] ss:$16 sps:$4 sm:$0xff]  }
 0x79b   : > { %11671 = vmatpush1.bf16.msra.mxu0 %v16419_v55  ;;  %v16470_v55 = vld [vmem:[#allocation14 + $0x1060] ss:$16 sps:$4 sm:$0xff]  }
 0x79c   : > { %11672 = vmatprep.subr.bf16.mxu0 %v16427_v7  ;;  %v16473_v7 = vld [vmem:[#allocation14 + $0x1260] ss:$16 sps:$4 sm:$0xff]  }
 0x79d   : > { %11632 = vmatpush1.bf16.msra.mxu1 %v16422_v8  ;;  %v16481_v8 = vld [vmem:[#allocation14 + $0x1284] ss:$16 sps:$4 sm:$0xff]  }
 0x79e   : > { %11633 = vmatprep.subr.bf16.mxu1 %v16430_v24  ;;  %v16476_v24 = vld [vmem:[#allocation14 + $0x1080] ss:$16 sps:$4 sm:$0xff]  }
 0x79f   : > { %11673 = vmatpush1.bf16.msra.mxu0 %v16425_v32  ;;  %v16484_v32 = vld [vmem:[#allocation14 + $0x10a4] ss:$16 sps:$4 sm:$0xff]  }
 0x7a0   : > { %11674 = vmatprep.subr.bf16.mxu0 %v16433_v52  ;;  %v16479_v52 = vld [vmem:[#allocation14 + $0x1280] ss:$16 sps:$4 sm:$0xff]  }
 0x7a1   : > { %11634 = vmatpush1.bf16.msra.mxu1 %v16428_v45  ;;  %v16487_v45 = vld [vmem:[#allocation14 + $0x12a4] ss:$16 sps:$4 sm:$0xff]  }
 0x7a2   : > { %11635 = vmatprep.subr.bf16.mxu1 %v16436_v49  ;;  %v16482_v49 = vld [vmem:[#allocation14 + $0x10a0] ss:$16 sps:$4 sm:$0xff]  }
 0x7a3   : > { %11675 = vmatpush1.bf16.msra.mxu0 %v16431_v61  ;;  %v16490_v61 = vld [vmem:[#allocation14 + $0x10c4] ss:$16 sps:$4 sm:$0xff]  }
 0x7a4   : > { %11676 = vmatprep.subr.bf16.mxu0 %v16439_v46 }
 0x7a5   : > { %11636 = vmatpush1.bf16.msra.mxu1 %v16434_v58  ;;  %v16485_v58 = vld [vmem:[#allocation14 + $0x12a0] ss:$16 sps:$4 sm:$0xff]  }
 0x7a6   : > { %11637 = vmatprep.subr.bf16.mxu1 %v16442_v5 }
 0x7a7   : > { %11677 = vmatpush1.bf16.msra.mxu0 %v16437_v48  ;;  %v16493_v48 = vld [vmem:[#allocation14 + $0x12c4] ss:$16 sps:$4 sm:$0xff]  }
 0x7a8   : > { %11678 = vmatprep.subr.bf16.mxu0 %v16445_v15 }
 0x7a9   : > { %11638 = vmatpush1.bf16.msra.mxu1 %v16440_v38 }
 0x7aa   : > { %11639 = vmatprep.subr.bf16.mxu1 %v16448_v6  ;;  %v16488_v6 = vld [vmem:[#allocation14 + $0x10c0] ss:$16 sps:$4 sm:$0xff]  }
 0x7ab   : > { %11679 = vmatpush1.bf16.msra.mxu0 %v16443_v39 }
 0x7ac   : > { %11680 = vmatprep.subr.bf16.mxu0 %v16451_v41  ;;  %v16496_v41 = vld [vmem:[#allocation14 + $0x10e4] ss:$16 sps:$4 sm:$0xff]  }
 0x7ad   : > { %11640 = vmatpush1.bf16.msra.mxu1 %v16446_v63  ;;  %v16491_v63 = vld [vmem:[#allocation14 + $0x12c0] ss:$16 sps:$4 sm:$0xff]  }
 0x7ae   : > { %13272 = vmatprep.subr.bf16.mxu1 %v16454_v28 }
 0x7af   : > { %11681 = vmatpush1.bf16.msra.mxu0 %v16449_v60  ;;  %v16494_v60 = vld [vmem:[#allocation14 + $0x10e0] ss:$16 sps:$4 sm:$0xff]  }
 0x7b0   : > { %11642 = vmatmul.mubr.bf16.vlgmr.msra.gmra.mrb[32].mxu1 %v19021_v18  ;;  %13313 = vmatprep.subr.bf16.mxu0 %v16457_v59  ;;  %v16472_v18 = vld [vmem:[#allocation14 + $0x1064] ss:$16 sps:$4 sm:$0xff]  }
 0x7b1   : > { %13273 = vmatpush1.bf16.msra.mxu1 %v16452_v36  ;;  %13304 = vmatprep.mubr.bf16.mxu1 %v19057_v34  ;;  %v16502_v59 = vld [vmem:[#allocation14 + $0x1104] ss:$16 sps:$4 sm:$0xff]  }
 0x7b2   : > { %11683 = vmatmul.mubr.bf16.vlgmr.msra.gmra.mrb[36].mxu0 %v19023_v56  ;;  %13274 = vmatprep.subr.bf16.mxu1 %v16460_v51  ;;  %v16478_v56 = vld [vmem:[#allocation14 + $0x1084] ss:$16 sps:$4 sm:$0xff]   ;;  %v16500_v51 = vld [vmem:[#allocation14 + $0x1100] ss:$16 sps:$4 sm:$0xff]  }
 0x7b3   : > { %13314 = vmatpush1.bf16.msra.mxu0 %v16455_v20  ;;  %13345 = vmatprep.mubr.bf16.mxu0 %v19059_v23  ;;  %v16505_v36 = vld [vmem:[#allocation14 + $0x1304] ss:$16 sps:$4 sm:$0xff]  }
 0x7b4   : > { %13315 = vmatprep.subr.bf16.mxu0 %v16463_v27  ;;  %v16508_v20 = vld [vmem:[#allocation14 + $0x1124] ss:$16 sps:$4 sm:$0xff]   ;;  %v16503_v27 = vld [vmem:[#allocation14 + $0x1300] ss:$16 sps:$4 sm:$0xff]  }
 0x7b5   : > { %13275 = vmatpush1.bf16.msra.mxu1 %v16458_v22  ;;  %v16511_v22 = vld [vmem:[#allocation14 + $0x1324] ss:$16 sps:$4 sm:$0xff]  }
 0x7b6   : > { %13276 = vmatprep.subr.bf16.mxu1 %v16466_v42  ;;  %v16506_v42 = vld [vmem:[#allocation14 + $0x1120] ss:$16 sps:$4 sm:$0xff]  }
 0x7b7   : > { %13316 = vmatpush1.bf16.msra.mxu0 %v16461_v44  ;;  %v16514_v44 = vld [vmem:[#allocation14 + $0x1144] ss:$16 sps:$4 sm:$0xff]  }
 0x7b8   : > { %13317 = vmatprep.subr.bf16.mxu0 %v16469_v62  ;;  %v16509_v62 = vld [vmem:[#allocation14 + $0x1320] ss:$16 sps:$4 sm:$0xff]  }
 0x7b9   : > { %13277 = vmatpush1.bf16.msra.mxu1 %v16464_v19  ;;  %v16517_v19 = vld [vmem:[#allocation14 + $0x1344] ss:$16 sps:$4 sm:$0xff]  }
 0x7ba   : > { %13278 = vmatprep.subr.bf16.mxu1 %v16472_v18  ;;  %v16512_v18 = vld [vmem:[#allocation14 + $0x1140] ss:$16 sps:$4 sm:$0xff]  }
 0x7bb   : > { %13318 = vmatpush1.bf16.msra.mxu0 %v16467_v16  ;;  %v16520_v16 = vld [vmem:[#allocation14 + $0x1164] ss:$16 sps:$4 sm:$0xff]  }
 0x7bc   : > { %13319 = vmatprep.subr.bf16.mxu0 %v16475_v26  ;;  %v16515_v26 = vld [vmem:[#allocation14 + $0x1340] ss:$16 sps:$4 sm:$0xff]  }
 0x7bd   : > { %13279 = vmatpush1.bf16.msra.mxu1 %v16470_v55  ;;  %v16523_v55 = vld [vmem:[#allocation14 + $0x1364] ss:$16 sps:$4 sm:$0xff]  }
 0x7be   : > { %13280 = vmatprep.subr.bf16.mxu1 %v16478_v56  ;;  %v16518_v56 = vld [vmem:[#allocation14 + $0x1160] ss:$16 sps:$4 sm:$0xff]  }
 0x7bf   : > { %13320 = vmatpush1.bf16.msra.mxu0 %v16473_v7  ;;  %v16526_v7 = vld [vmem:[#allocation14 + $0x1184] ss:$16 sps:$4 sm:$0xff]  }
 0x7c0   : > { %13321 = vmatprep.subr.bf16.mxu0 %v16481_v8  ;;  %v16521_v8 = vld [vmem:[#allocation14 + $0x1360] ss:$16 sps:$4 sm:$0xff]  }
 0x7c1   : > { %13281 = vmatpush1.bf16.msra.mxu1 %v16476_v24  ;;  %v16529_v24 = vld [vmem:[#allocation14 + $0x1384] ss:$16 sps:$4 sm:$0xff]  }
 0x7c2   : > { %13282 = vmatprep.subr.bf16.mxu1 %v16484_v32  ;;  %v16524_v32 = vld [vmem:[#allocation14 + $0x1180] ss:$16 sps:$4 sm:$0xff]  }
 0x7c3   : > { %v11397_v46 = vpop.f32.mrb[20].mxu1  ;;  %13322 = vmatpush1.bf16.msra.mxu0 %v16479_v52  ;;  %v16532_v52 = vld [vmem:[#allocation14 + $0x11a4] ss:$16 sps:$4 sm:$0xff]  }
 0x7c4   : > { %v11399_v5 = vpop.f32.mrb[21].mxu1  ;;  %13323 = vmatprep.subr.bf16.mxu0 %v16487_v45  ;;  %v16527_v45 = vld [vmem:[#allocation14 + $0x1380] ss:$16 sps:$4 sm:$0xff]  }
 0x7c5   : > { %v11401_v15 = vpop.f32.mrb[22].mxu1  ;;  %v11438_v38 = vpop.f32.mrb[24].mxu0  ;;  %13283 = vmatpush1.bf16.msra.mxu1 %v16482_v49  ;;  %v16535_v49 = vld [vmem:[#allocation14 + $0x13a4] ss:$16 sps:$4 sm:$0xff]  }
 0x7c6   : > { %v19065_v30 = vadd.f32 %v11438_v38, %v11397_v46  ;;  %v11402_v31 = vpop.f32.mrb[23].mxu1  ;;  %v11440_v39 = vpop.f32.mrb[25].mxu0  ;;  %13284 = vmatprep.subr.bf16.mxu1 %v16490_v61  ;;  %v16530_v61 = vld [vmem:[#allocation14 + $0x11a0] ss:$16 sps:$4 sm:$0xff]   ;;  %v16538_v46 = vld [vmem:[#allocation14 + $0x11c4] ss:$16 sps:$4 sm:$0xff]  }
 0x7c7   : > { %v19067_v11 = vadd.f32 %v11440_v39, %v11399_v5  ;;  %v11442_v2 = vpop.f32.mrb[26].mxu0  ;;  %13324 = vmatpush1.bf16.msra.mxu0 %v16485_v58  ;;  %v16533_v58 = vld [vmem:[#allocation14 + $0x13a0] ss:$16 sps:$4 sm:$0xff]   ;;  %v16541_v5 = vld [vmem:[#allocation14 + $0x13c4] ss:$16 sps:$4 sm:$0xff]   ;;  %v11952_v15 = vrot.slane %v18870_v50, 2 }
 0x7c8   : > { %v11443_v28 = vpop.f32.mrb[27].mxu0  ;;  %13325 = vmatprep.subr.bf16.mxu0 %v16493_v48  ;;  %v16536_v48 = vld [vmem:[#allocation14 + $0x11c0] ss:$16 sps:$4 sm:$0xff]   ;;  %v11953_v38 = vrot.slane %v18878_v4, 1  ;;  %v11967_v31 = vrot.slane %v18880_v53, 2  ;;  %v11968_v39 = vrot.slane %v18882_v9, 1 }
 0x7c9   : > { %13285 = vmatpush1.bf16.msra.mxu1 %v16488_v6  ;;  %v16544_v6 = vld [vmem:[#allocation14 + $0x11e4] ss:$16 sps:$4 sm:$0xff]   ;;  %v11958_v2 = vrot.slane %v18874_v21, 2  ;;  %v11974_v50 = vrot.slane %v18891_v10, 1  ;;  %v16542_v4 = vld [vmem:[#allocation14 + $0x11e0] ss:$16 sps:$4 sm:$0xff]  }
 0x7ca   : > { %13286 = vmatprep.subr.bf16.mxu1 %v16496_v41  ;;  %v16539_v41 = vld [vmem:[#allocation14 + $0x13c0] ss:$16 sps:$4 sm:$0xff]   ;;  %v16547_v28 = vld [vmem:[#allocation14 + $0x13e4] ss:$16 sps:$4 sm:$0xff]   ;;  %v11969_v9 = vsel %vm7912_vm10, %v11968_v39, %v11967_v31 }
 0x7cb   : > { %13326 = vmatpush1.bf16.msra.mxu0 %v16491_v63  ;;  %v11959_v63 = vrot.slane %v18888_v54, 1  ;;  %v16550_v53 = vld [vmem:[#allocation14 + $0x1404] ss:$16 sps:$4 sm:$0xff]   ;;  %v16548_v10 = vld [vmem:[#allocation14 + $0x1400] ss:$16 sps:$4 sm:$0xff]  }
 0x7cc   : > { %13327 = vmatprep.subr.bf16.mxu0 %v16499_v47  ;;  %v11973_v47 = vrot.slane %v18905_v57, 2 }
 0x7cd   : > { %13287 = vmatpush1.bf16.msra.mxu1 %v16494_v60  ;;  %v11954_v60 = vsel %vm7912_vm10, %v11953_v38, %v11952_v15  ;;  %v11960_v21 = vsel %vm7912_vm10, %v11959_v63, %v11958_v2  ;;  %v16584_v2 = vld [vmem:[#allocation14 + $0x14c0] ss:$16 sps:$4 sm:$0xff]  }
 0x7ce   : > { %13288 = vmatprep.subr.bf16.mxu1 %v16502_v59  ;;  %v16545_v59 = vld [vmem:[#allocation14 + $0x13e0] ss:$16 sps:$4 sm:$0xff]   ;;  %v19080_v54 = vpack.c.b16 %v11954_v60, %v11954_v60  ;;  %v11975_v57 = vsel %vm7912_vm10, %v11974_v50, %v11973_v47  ;;  %v16592_v50 = vld [vmem:[#allocation14 + $0x14e4] ss:$16 sps:$4 sm:$0xff]  }
 0x7cf   : > { %13328 = vmatpush1.bf16.msra.mxu0 %v16497_v13  ;;  %v16553_v13 = vld [vmem:[#allocation14 + $0x1604] ss:$16 sps:$4 sm:$0xff]  }
 0x7d0   : > { %13329 = vmatprep.subr.bf16.mxu0 %v16505_v36  ;;  %v19083_v36 = vpack.c.b16 %v11969_v9, %v11969_v9 }
 0x7d1   : > { %13289 = vmatpush1.bf16.msra.mxu1 %v16500_v51  ;;  %v19085_v51 = vpack.c.b16 %v11960_v21, %v11960_v21  ;;  %v16590_v21 = vld [vmem:[#allocation14 + $0x14e0] ss:$16 sps:$4 sm:$0xff]  }
 0x7d2   : > { %13290 = vmatprep.subr.bf16.mxu1 %v16508_v20  ;;  %v16556_v20 = vld [vmem:[#allocation14 + $0x1424] ss:$16 sps:$4 sm:$0xff]  }
 0x7d3   : > { %13330 = vmatpush1.bf16.msra.mxu0 %v16503_v27  ;;  %v16551_v27 = vld [vmem:[#allocation14 + $0x1600] ss:$16 sps:$4 sm:$0xff]  }
 0x7d4   : > { %13331 = vmatprep.subr.bf16.mxu0 %v16511_v22  ;;  %v19087_v22 = vpack.c.b16 %v11975_v57, %v11975_v57  ;;  %v16593_v57 = vld [vmem:[#allocation14 + $0x16e0] ss:$16 sps:$4 sm:$0xff]  }
 0x7d5   : > { %13291 = vmatpush1.bf16.msra.mxu1 %v16506_v42  ;;  %v16559_v42 = vld [vmem:[#allocation14 + $0x1624] ss:$16 sps:$4 sm:$0xff]  }
 0x7d6   : > { %13292 = vmatprep.subr.bf16.mxu1 %v16514_v44  ;;  %v16554_v44 = vld [vmem:[#allocation14 + $0x1420] ss:$16 sps:$4 sm:$0xff]  }
 0x7d7   : > { %13332 = vmatpush1.bf16.msra.mxu0 %v16509_v62  ;;  %v16562_v62 = vld [vmem:[#allocation14 + $0x1444] ss:$16 sps:$4 sm:$0xff]  }
 0x7d8   : > { %13333 = vmatprep.subr.bf16.mxu0 %v16517_v19  ;;  %v16557_v19 = vld [vmem:[#allocation14 + $0x1620] ss:$16 sps:$4 sm:$0xff]  }
 0x7d9   : > { %13293 = vmatpush1.bf16.msra.mxu1 %v16512_v18  ;;  %v16565_v18 = vld [vmem:[#allocation14 + $0x1644] ss:$16 sps:$4 sm:$0xff]  }
 0x7da   : > { %13294 = vmatprep.subr.bf16.mxu1 %v16520_v16  ;;  %v16560_v16 = vld [vmem:[#allocation14 + $0x1440] ss:$16 sps:$4 sm:$0xff]  }
 0x7db   : > { %13334 = vmatpush1.bf16.msra.mxu0 %v16515_v26  ;;  %v16568_v26 = vld [vmem:[#allocation14 + $0x1464] ss:$16 sps:$4 sm:$0xff]  }
 0x7dc   : > { %13335 = vmatprep.subr.bf16.mxu0 %v16523_v55  ;;  %v16563_v55 = vld [vmem:[#allocation14 + $0x1640] ss:$16 sps:$4 sm:$0xff]  }
 0x7dd   : > { %13295 = vmatpush1.bf16.msra.mxu1 %v16518_v56  ;;  %v16571_v56 = vld [vmem:[#allocation14 + $0x1664] ss:$16 sps:$4 sm:$0xff]  }
 0x7de   : > { %13296 = vmatprep.subr.bf16.mxu1 %v16526_v7  ;;  %v16566_v7 = vld [vmem:[#allocation14 + $0x1460] ss:$16 sps:$4 sm:$0xff]  }
 0x7df   : > { %13336 = vmatpush1.bf16.msra.mxu0 %v16521_v8  ;;  %v16574_v8 = vld [vmem:[#allocation14 + $0x1484] ss:$16 sps:$4 sm:$0xff]  }
 0x7e0   : > { %13337 = vmatprep.subr.bf16.mxu0 %v16529_v24  ;;  %v16569_v24 = vld [vmem:[#allocation14 + $0x1660] ss:$16 sps:$4 sm:$0xff]  }
 0x7e1   : > { %13297 = vmatpush1.bf16.msra.mxu1 %v16524_v32  ;;  %v16577_v32 = vld [vmem:[#allocation14 + $0x1684] ss:$16 sps:$4 sm:$0xff]  }
 0x7e2   : > { %13298 = vmatprep.subr.bf16.mxu1 %v16532_v52  ;;  %v16572_v52 = vld [vmem:[#allocation14 + $0x1480] ss:$16 sps:$4 sm:$0xff]  }
 0x7e3   : > { %13338 = vmatpush1.bf16.msra.mxu0 %v16527_v45  ;;  %v16580_v45 = vld [vmem:[#allocation14 + $0x14a4] ss:$16 sps:$4 sm:$0xff]  }
 0x7e4   : > { %13339 = vmatprep.subr.bf16.mxu0 %v16535_v49  ;;  %v16575_v49 = vld [vmem:[#allocation14 + $0x1680] ss:$16 sps:$4 sm:$0xff]  }
 0x7e5   : > { %13299 = vmatpush1.bf16.msra.mxu1 %v16530_v61  ;;  %v16583_v61 = vld [vmem:[#allocation14 + $0x16a4] ss:$16 sps:$4 sm:$0xff]  }
 0x7e6   : > { %13300 = vmatprep.subr.bf16.mxu1 %v16538_v46  ;;  %v16578_v46 = vld [vmem:[#allocation14 + $0x14a0] ss:$16 sps:$4 sm:$0xff]  }
 0x7e7   : > { %13340 = vmatpush1.bf16.msra.mxu0 %v16533_v58  ;;  %v16586_v58 = vld [vmem:[#allocation14 + $0x14c4] ss:$16 sps:$4 sm:$0xff]  }
 0x7e8   : > { %13341 = vmatprep.subr.bf16.mxu0 %v16541_v5 }
 0x7e9   : > { %13301 = vmatpush1.bf16.msra.mxu1 %v16536_v48  ;;  %v16581_v48 = vld [vmem:[#allocation14 + $0x16a0] ss:$16 sps:$4 sm:$0xff]  }
 0x7ea   : > { %13302 = vmatprep.subr.bf16.mxu1 %v16544_v6  ;;  %v16589_v6 = vld [vmem:[#allocation14 + $0x16c4] ss:$16 sps:$4 sm:$0xff]  }
 0x7eb   : > { %13342 = vmatpush1.bf16.msra.mxu0 %v16539_v41 }
 0x7ec   : > { %13343 = vmatprep.subr.bf16.mxu0 %v16547_v28 }
 0x7ed   : > { %13303 = vmatpush1.bf16.msra.mxu1 %v16542_v4 }
 0x7ee   : > { %13354 = vmatprep.subr.bf16.mxu1 %v16550_v53  ;;  %v16587_v53 = vld [vmem:[#allocation14 + $0x16c0] ss:$16 sps:$4 sm:$0xff]  }
 0x7ef   : > { %13344 = vmatpush1.bf16.msra.mxu0 %v16545_v59  ;;  %v16595_v59 = vld [vmem:[#allocation14 + $0x16e4] ss:$16 sps:$4 sm:$0xff]  }
 0x7f0   : > { %13305 = vmatmul.mubr.bf16.vlgmr.msra.gmra.mrb[36].mxu1 %v19080_v54  ;;  %13395 = vmatprep.subr.bf16.mxu0 %v16553_v13  ;;  %v16598_v13 = vld [vmem:[#allocation14 + $0x1504] ss:$16 sps:$4 sm:$0xff]  }
 0x7f1   : > { %13355 = vmatpush1.bf16.msra.mxu1 %v16548_v10  ;;  %13386 = vmatprep.mubr.bf16.mxu1 %v19083_v36  ;;  %v16601_v10 = vld [vmem:[#allocation14 + $0x1704] ss:$16 sps:$4 sm:$0xff]  }
 0x7f2   : > { %13346 = vmatmul.mubr.bf16.vlgmr.msra.gmra.mrb[40].mxu0 %v19085_v51  ;;  %13356 = vmatprep.subr.bf16.mxu1 %v16556_v20  ;;  %v16596_v20 = vld [vmem:[#allocation14 + $0x1500] ss:$16 sps:$4 sm:$0xff]  }
 0x7f3   : > { %13396 = vmatpush1.bf16.msra.mxu0 %v16551_v27  ;;  %13427 = vmatprep.mubr.bf16.mxu0 %v19087_v22  ;;  %v16604_v27 = vld [vmem:[#allocation14 + $0x1524] ss:$16 sps:$4 sm:$0xff]  }
 0x7f4   : > { %13397 = vmatprep.subr.bf16.mxu0 %v16559_v42  ;;  %v16607_v42 = vld [vmem:[#allocation14 + $0x1724] ss:$16 sps:$4 sm:$0xff]  }
 0x7f5   : > { %13357 = vmatpush1.bf16.msra.mxu1 %v16554_v44  ;;  %v16602_v44 = vld [vmem:[#allocation14 + $0x1520] ss:$16 sps:$4 sm:$0xff]  }
 0x7f6   : > { %13358 = vmatprep.subr.bf16.mxu1 %v16562_v62  ;;  %v16605_v62 = vld [vmem:[#allocation14 + $0x1720] ss:$16 sps:$4 sm:$0xff]  }
 0x7f7   : > { %13398 = vmatpush1.bf16.msra.mxu0 %v16557_v19  ;;  %v16613_v19 = vld [vmem:[#allocation14 + $0x1744] ss:$16 sps:$4 sm:$0xff]  }
 0x7f8   : > { %13399 = vmatprep.subr.bf16.mxu0 %v16565_v18  ;;  %v16608_v18 = vld [vmem:[#allocation14 + $0x1540] ss:$16 sps:$4 sm:$0xff]  }
 0x7f9   : > { %13359 = vmatpush1.bf16.msra.mxu1 %v16560_v16  ;;  %v16616_v16 = vld [vmem:[#allocation14 + $0x1564] ss:$16 sps:$4 sm:$0xff]  }
 0x7fa   : > { %13360 = vmatprep.subr.bf16.mxu1 %v16568_v26  ;;  %v16611_v26 = vld [vmem:[#allocation14 + $0x1740] ss:$16 sps:$4 sm:$0xff]  }
 0x7fb   : > { %13400 = vmatpush1.bf16.msra.mxu0 %v16563_v55  ;;  %v16619_v55 = vld [vmem:[#allocation14 + $0x1764] ss:$16 sps:$4 sm:$0xff]  }
 0x7fc   : > { %13401 = vmatprep.subr.bf16.mxu0 %v16571_v56  ;;  %v16614_v56 = vld [vmem:[#allocation14 + $0x1560] ss:$16 sps:$4 sm:$0xff]  }
 0x7fd   : > { %13361 = vmatpush1.bf16.msra.mxu1 %v16566_v7  ;;  %v16622_v7 = vld [vmem:[#allocation14 + $0x1584] ss:$16 sps:$4 sm:$0xff]  }
 0x7fe   : > { %13362 = vmatprep.subr.bf16.mxu1 %v16574_v8  ;;  %v16617_v8 = vld [vmem:[#allocation14 + $0x1760] ss:$16 sps:$4 sm:$0xff]  }
 0x7ff   : > { %13402 = vmatpush1.bf16.msra.mxu0 %v16569_v24  ;;  %v16625_v24 = vld [vmem:[#allocation14 + $0x1784] ss:$16 sps:$4 sm:$0xff]  }
 0x800   : > { %13403 = vmatprep.subr.bf16.mxu0 %v16577_v32  ;;  %v16620_v32 = vld [vmem:[#allocation14 + $0x1580] ss:$16 sps:$4 sm:$0xff]  }
 0x801   : > { %13363 = vmatpush1.bf16.msra.mxu1 %v16572_v52  ;;  %v16628_v52 = vld [vmem:[#allocation14 + $0x15a4] ss:$16 sps:$4 sm:$0xff]  }
 0x802   : > { %13364 = vmatprep.subr.bf16.mxu1 %v16580_v45  ;;  %v16623_v45 = vld [vmem:[#allocation14 + $0x1780] ss:$16 sps:$4 sm:$0xff]  }
 0x803   : > { %v11479_v5 = vpop.f32.mrb[24].mxu1  ;;  %13404 = vmatpush1.bf16.msra.mxu0 %v16575_v49  ;;  %v16631_v49 = vld [vmem:[#allocation14 + $0x17a4] ss:$16 sps:$4 sm:$0xff]  }
 0x804   : > { %v11480_v15 = vadd.f32 %v11479_v5, %v19065_v30  ;;  %v11481_v38 = vpop.f32.mrb[25].mxu1  ;;  %13405 = vmatprep.subr.bf16.mxu0 %v16583_v61  ;;  %v16626_v61 = vld [vmem:[#allocation14 + $0x15a0] ss:$16 sps:$4 sm:$0xff]   ;;  %v16637_v5 = vld [vmem:[#allocation14 + $0x17c4] ss:$16 sps:$4 sm:$0xff]  }
 0x805   : > { %v11482_v31 = vadd.f32 %v11481_v38, %v19067_v11  ;;  %v11483_v39 = vpop.f32.mrb[26].mxu1  ;;  %v11520_v41 = vpop.f32.mrb[28].mxu0  ;;  %13365 = vmatpush1.bf16.msra.mxu1 %v16578_v46  ;;  %v16634_v46 = vld [vmem:[#allocation14 + $0x15c4] ss:$16 sps:$4 sm:$0xff]   ;;  %v11965_v38 = vrot.slane %v18936_v40, 1 }
 0x806   : > { %v11521_v63 = vadd.f32 %v11520_v41, %v11480_v15  ;;  %v11484_v28 = vpop.f32.mrb[27].mxu1  ;;  %v11522_v47 = vpop.f32.mrb[29].mxu0  ;;  %13366 = vmatprep.subr.bf16.mxu1 %v16586_v58  ;;  %v16629_v58 = vld [vmem:[#allocation14 + $0x17a0] ss:$16 sps:$4 sm:$0xff]   ;;  %v11964_v15 = vrot.slane %v18940_v33, 2  ;;  %v11970_v39 = vrot.slane %v18943_v37, 2 }
 0x807   : > { %v11523_v4 = vadd.f32 %v11522_v47, %v11482_v31  ;;  %v11524_v60 = vpop.f32.mrb[30].mxu0  ;;  %13406 = vmatpush1.bf16.msra.mxu0 %v16581_v48  ;;  %v16632_v48 = vld [vmem:[#allocation14 + $0x15c0] ss:$16 sps:$4 sm:$0xff]   ;;  %v11971_v41 = vrot.slane %v18938_v43, 1  ;;  %v16646_v47 = vld [vmem:[#allocation14 + $0x100c] ss:$16 sps:$4 sm:$0xff]  }
 0x808   : > { %v19096_v30 = vadd.f32 %v11521_v63, %v19040_v35  ;;  %v11525_v9 = vpop.f32.mrb[31].mxu0  ;;  %13407 = vmatprep.subr.bf16.mxu0 %v16589_v6  ;;  %v16599_v35 = vld [vmem:[#allocation14 + $0x1700] ss:$16 sps:$4 sm:$0xff]   ;;  %v16640_v6 = vld [vmem:[#allocation14 + $0x15e4] ss:$16 sps:$4 sm:$0xff]   ;;  %v11966_v28 = vsel %vm7912_vm10, %v11965_v38, %v11964_v15 }
 0x809   : > { %v19099_v11 = vadd.f32 %v11523_v4, %v19043_v29  ;;  %13367 = vmatpush1.bf16.msra.mxu1 %v16584_v2  ;;  %v16610_v29 = vld [vmem:[#allocation14 + $0x1544] ss:$16 sps:$4 sm:$0xff]   ;;  %v16635_v31 = vld [vmem:[#allocation14 + $0x17c0] ss:$16 sps:$4 sm:$0xff]   ;;  %v11972_v40 = vsel %vm7912_vm10, %v11971_v41, %v11970_v39  ;;  %v16649_v4 = vld [vmem:[#allocation14 + $0x120c] ss:$16 sps:$4 sm:$0xff]  }
 0x80a   : > { %13368 = vmatprep.subr.bf16.mxu1 %v16592_v50  ;;  %v16643_v2 = vld [vmem:[#allocation14 + $0x17e4] ss:$16 sps:$4 sm:$0xff]   ;;  %v16638_v63 = vld [vmem:[#allocation14 + $0x15e0] ss:$16 sps:$4 sm:$0xff]   ;;  %v19107_v50 = vpack.c.b16 %v11966_v28, %v11966_v28  ;;  %v16644_v37 = vld [vmem:[#allocation14 + $0x1008] ss:$16 sps:$4 sm:$0xff]   ;;  %v19109_v43 = vpack.c.b16 %v11972_v40, %v11972_v40 }
 0x80b   : > { %13408 = vmatpush1.bf16.msra.mxu0 %v16587_v53  ;;  %v16641_v33 = vld [vmem:[#allocation14 + $0x17e0] ss:$16 sps:$4 sm:$0xff]   ;;  %v16652_v60 = vld [vmem:[#allocation14 + $0x102c] ss:$16 sps:$4 sm:$0xff]   ;;  %v16647_v53 = vld [vmem:[#allocation14 + $0x1208] ss:$16 sps:$4 sm:$0xff]  }
 0x80c   : > { %13409 = vmatprep.subr.bf16.mxu0 %v16595_v59  ;;  %v16655_v9 = vld [vmem:[#allocation14 + $0x122c] ss:$16 sps:$4 sm:$0xff]   ;;  %v16650_v59 = vld [vmem:[#allocation14 + $0x1028] ss:$16 sps:$4 sm:$0xff]  }
 0x80d   : > { %13369 = vmatpush1.bf16.msra.mxu1 %v16590_v21  ;;  %v16658_v21 = vld [vmem:[#allocation14 + $0x104c] ss:$16 sps:$4 sm:$0xff]   ;;  %v16689_v39 = vld [vmem:[#allocation14 + $0x12e8] ss:$16 sps:$4 sm:$0xff]  }
 0x80e   : > { %13370 = vmatprep.subr.bf16.mxu1 %v16598_v13  ;;  %v16653_v13 = vld [vmem:[#allocation14 + $0x1228] ss:$16 sps:$4 sm:$0xff]   ;;  %v16691_v38 = vld [vmem:[#allocation14 + $0x12ec] ss:$16 sps:$4 sm:$0xff]  }
 0x80f   : > { %13410 = vmatpush1.bf16.msra.mxu0 %v16593_v57  ;;  %v16661_v57 = vld [vmem:[#allocation14 + $0x124c] ss:$16 sps:$4 sm:$0xff]   ;;  %v16695_v28 = vld [vmem:[#allocation14 + $0x1308] ss:$16 sps:$4 sm:$0xff]  }
 0x810   : > { %13411 = vmatprep.subr.bf16.mxu0 %v16601_v10  ;;  %v16656_v10 = vld [vmem:[#allocation14 + $0x1048] ss:$16 sps:$4 sm:$0xff]   ;;  %v16697_v41 = vld [vmem:[#allocation14 + $0x130c] ss:$16 sps:$4 sm:$0xff]  }
 0x811   : > { %13371 = vmatpush1.bf16.msra.mxu1 %v16596_v20  ;;  %v16664_v20 = vld [vmem:[#allocation14 + $0x106c] ss:$16 sps:$4 sm:$0xff]  }
 0x812   : > { %13372 = vmatprep.subr.bf16.mxu1 %v16604_v27  ;;  %v16659_v27 = vld [vmem:[#allocation14 + $0x1248] ss:$16 sps:$4 sm:$0xff]   ;;  %v16706_v40 = vld [vmem:[#allocation14 + $0x114c] ss:$16 sps:$4 sm:$0xff]  }
 0x813   : > { %13412 = vmatpush1.bf16.msra.mxu0 %v16599_v35  ;;  %v16667_v35 = vld [vmem:[#allocation14 + $0x126c] ss:$16 sps:$4 sm:$0xff]  }
 0x814   : > { %13413 = vmatprep.subr.bf16.mxu0 %v16607_v42  ;;  %v16670_v42 = vld [vmem:[#allocation14 + $0x108c] ss:$16 sps:$4 sm:$0xff]  }
 0x815   : > { %13373 = vmatpush1.bf16.msra.mxu1 %v16602_v44  ;;  %v16665_v44 = vld [vmem:[#allocation14 + $0x1268] ss:$16 sps:$4 sm:$0xff]  }
 0x816   : > { %13374 = vmatprep.subr.bf16.mxu1 %v16610_v29  ;;  %v16673_v29 = vld [vmem:[#allocation14 + $0x128c] ss:$16 sps:$4 sm:$0xff]  }
 0x817   : > { %13414 = vmatpush1.bf16.msra.mxu0 %v16605_v62  ;;  %v16676_v62 = vld [vmem:[#allocation14 + $0x10ac] ss:$16 sps:$4 sm:$0xff]  }
 0x818   : > { %13415 = vmatprep.subr.bf16.mxu0 %v16613_v19  ;;  %v16671_v19 = vld [vmem:[#allocation14 + $0x1288] ss:$16 sps:$4 sm:$0xff]  }
 0x819   : > { %13375 = vmatpush1.bf16.msra.mxu1 %v16608_v18  ;;  %v16679_v18 = vld [vmem:[#allocation14 + $0x12ac] ss:$16 sps:$4 sm:$0xff]  }
 0x81a   : > { %13376 = vmatprep.subr.bf16.mxu1 %v16616_v16  ;;  %v16674_v16 = vld [vmem:[#allocation14 + $0x10a8] ss:$16 sps:$4 sm:$0xff]  }
 0x81b   : > { %13416 = vmatpush1.bf16.msra.mxu0 %v16611_v26  ;;  %v16682_v26 = vld [vmem:[#allocation14 + $0x10cc] ss:$16 sps:$4 sm:$0xff]  }
 0x81c   : > { %13417 = vmatprep.subr.bf16.mxu0 %v16619_v55 }
 0x81d   : > { %13377 = vmatpush1.bf16.msra.mxu1 %v16614_v56  ;;  %v16677_v56 = vld [vmem:[#allocation14 + $0x12a8] ss:$16 sps:$4 sm:$0xff]  }
 0x81e   : > { %13378 = vmatprep.subr.bf16.mxu1 %v16622_v7 }
 0x81f   : > { %13418 = vmatpush1.bf16.msra.mxu0 %v16617_v8  ;;  %v16685_v8 = vld [vmem:[#allocation14 + $0x12cc] ss:$16 sps:$4 sm:$0xff]  }
 0x820   : > { %13419 = vmatprep.subr.bf16.mxu0 %v16625_v24 }
 0x821   : > { %13379 = vmatpush1.bf16.msra.mxu1 %v16620_v32 }
 0x822   : > { %13380 = vmatprep.subr.bf16.mxu1 %v16628_v52  ;;  %v16680_v52 = vld [vmem:[#allocation14 + $0x10c8] ss:$16 sps:$4 sm:$0xff]  }
 0x823   : > { %13420 = vmatpush1.bf16.msra.mxu0 %v16623_v45 }
 0x824   : > { %13421 = vmatprep.subr.bf16.mxu0 %v16631_v49 }
 0x825   : > { %13381 = vmatpush1.bf16.msra.mxu1 %v16626_v61 }
 0x826   : > { %13382 = vmatprep.subr.bf16.mxu1 %v16634_v46  ;;  %v16688_v46 = vld [vmem:[#allocation14 + $0x10ec] ss:$16 sps:$4 sm:$0xff]  }
 0x827   : > { %13422 = vmatpush1.bf16.msra.mxu0 %v16629_v58 }
 0x828   : > { %13423 = vmatprep.subr.bf16.mxu0 %v16637_v5 }
 0x829   : > { %13383 = vmatpush1.bf16.msra.mxu1 %v16632_v48  ;;  %v16683_v48 = vld [vmem:[#allocation14 + $0x12c8] ss:$16 sps:$4 sm:$0xff]  }
 0x82a   : > { %13384 = vmatprep.subr.bf16.mxu1 %v16640_v6  ;;  %v16686_v6 = vld [vmem:[#allocation14 + $0x10e8] ss:$16 sps:$4 sm:$0xff]  }
 0x82b   : > { %13424 = vmatpush1.bf16.msra.mxu0 %v16635_v31  ;;  %v16694_v31 = vld [vmem:[#allocation14 + $0x110c] ss:$16 sps:$4 sm:$0xff]  }
 0x82c   : > { %13425 = vmatprep.subr.bf16.mxu0 %v16643_v2  ;;  %v16692_v2 = vld [vmem:[#allocation14 + $0x1108] ss:$16 sps:$4 sm:$0xff]  }
 0x82d   : > { %13385 = vmatpush1.bf16.msra.mxu1 %v16638_v63  ;;  %v16700_v63 = vld [vmem:[#allocation14 + $0x112c] ss:$16 sps:$4 sm:$0xff]  }
 0x82e   : > { %13436 = vmatprep.subr.bf16.mxu1 %v16646_v47  ;;  %v16703_v47 = vld [vmem:[#allocation14 + $0x132c] ss:$16 sps:$4 sm:$0xff]  }
 0x82f   : > { %13426 = vmatpush1.bf16.msra.mxu0 %v16641_v33  ;;  %v16698_v33 = vld [vmem:[#allocation14 + $0x1128] ss:$16 sps:$4 sm:$0xff]  }
 0x830   : > { %13387 = vmatmul.mubr.bf16.vlgmr.msra.gmra.mrb[40].mxu1 %v19107_v50  ;;  %13477 = vmatprep.subr.bf16.mxu0 %v16649_v4  ;;  %v16701_v4 = vld [vmem:[#allocation14 + $0x1328] ss:$16 sps:$4 sm:$0xff]  }
 0x831   : > { %13437 = vmatpush1.bf16.msra.mxu1 %v16644_v37  ;;  %13468 = vmatprep.mubr.bf16.mxu1 %v19057_v34  ;;  %v16662_v34 = vld [vmem:[#allocation14 + $0x1068] ss:$16 sps:$4 sm:$0xff]   ;;  %v16709_v37 = vld [vmem:[#allocation14 + $0x134c] ss:$16 sps:$4 sm:$0xff]  }
 0x832   : > { %13428 = vmatmul.mubr.bf16.vlgmr.msra.gmra.mrb[44].mxu0 %v19109_v43  ;;  %13438 = vmatprep.subr.bf16.mxu1 %v16652_v60  ;;  %v16704_v60 = vld [vmem:[#allocation14 + $0x1148] ss:$16 sps:$4 sm:$0xff]  }
 0x833   : > { %13478 = vmatpush1.bf16.msra.mxu0 %v16647_v53  ;;  %13509 = vmatprep.mubr.bf16.mxu0 %v19059_v23  ;;  %v16668_v23 = vld [vmem:[#allocation14 + $0x1088] ss:$16 sps:$4 sm:$0xff]   ;;  %v16712_v53 = vld [vmem:[#allocation14 + $0x116c] ss:$16 sps:$4 sm:$0xff]  }
 0x834   : > { %13479 = vmatprep.subr.bf16.mxu0 %v16655_v9  ;;  %v16707_v9 = vld [vmem:[#allocation14 + $0x1348] ss:$16 sps:$4 sm:$0xff]  }
 0x835   : > { %13439 = vmatpush1.bf16.msra.mxu1 %v16650_v59  ;;  %v16715_v59 = vld [vmem:[#allocation14 + $0x136c] ss:$16 sps:$4 sm:$0xff]  }
 0x836   : > { %13440 = vmatprep.subr.bf16.mxu1 %v16658_v21  ;;  %v16710_v21 = vld [vmem:[#allocation14 + $0x1168] ss:$16 sps:$4 sm:$0xff]  }
 0x837   : > { %13480 = vmatpush1.bf16.msra.mxu0 %v16653_v13  ;;  %v16718_v13 = vld [vmem:[#allocation14 + $0x118c] ss:$16 sps:$4 sm:$0xff]  }
 0x838   : > { %13481 = vmatprep.subr.bf16.mxu0 %v16661_v57  ;;  %v16713_v57 = vld [vmem:[#allocation14 + $0x1368] ss:$16 sps:$4 sm:$0xff]  }
 0x839   : > { %13441 = vmatpush1.bf16.msra.mxu1 %v16656_v10  ;;  %v16721_v10 = vld [vmem:[#allocation14 + $0x138c] ss:$16 sps:$4 sm:$0xff]  }
 0x83a   : > { %13442 = vmatprep.subr.bf16.mxu1 %v16664_v20  ;;  %v16716_v20 = vld [vmem:[#allocation14 + $0x1188] ss:$16 sps:$4 sm:$0xff]  }
 0x83b   : > { %13482 = vmatpush1.bf16.msra.mxu0 %v16659_v27  ;;  %v16724_v27 = vld [vmem:[#allocation14 + $0x11ac] ss:$16 sps:$4 sm:$0xff]  }
 0x83c   : > { %13483 = vmatprep.subr.bf16.mxu0 %v16667_v35  ;;  %v16719_v35 = vld [vmem:[#allocation14 + $0x1388] ss:$16 sps:$4 sm:$0xff]  }
 0x83d   : > { %13443 = vmatpush1.bf16.msra.mxu1 %v16662_v34  ;;  %v16727_v34 = vld [vmem:[#allocation14 + $0x13ac] ss:$16 sps:$4 sm:$0xff]  }
 0x83e   : > { %13444 = vmatprep.subr.bf16.mxu1 %v16670_v42  ;;  %v16722_v42 = vld [vmem:[#allocation14 + $0x11a8] ss:$16 sps:$4 sm:$0xff]  }
 0x83f   : > { %13484 = vmatpush1.bf16.msra.mxu0 %v16665_v44  ;;  %v16730_v44 = vld [vmem:[#allocation14 + $0x11cc] ss:$16 sps:$4 sm:$0xff]  }
 0x840   : > { %13485 = vmatprep.subr.bf16.mxu0 %v16673_v29  ;;  %v16725_v29 = vld [vmem:[#allocation14 + $0x13a8] ss:$16 sps:$4 sm:$0xff]  }
 0x841   : > { %13445 = vmatpush1.bf16.msra.mxu1 %v16668_v23  ;;  %v16733_v23 = vld [vmem:[#allocation14 + $0x13cc] ss:$16 sps:$4 sm:$0xff]  }
 0x842   : > { %13446 = vmatprep.subr.bf16.mxu1 %v16676_v62  ;;  %v16728_v62 = vld [vmem:[#allocation14 + $0x11c8] ss:$16 sps:$4 sm:$0xff]  }
 0x843   : > { %v11561_v55 = vpop.f32.mrb[28].mxu1  ;;  %13486 = vmatpush1.bf16.msra.mxu0 %v16671_v19  ;;  %v16736_v19 = vld [vmem:[#allocation14 + $0x11ec] ss:$16 sps:$4 sm:$0xff]  }
 0x844   : > { %v11563_v7 = vpop.f32.mrb[29].mxu1  ;;  %13487 = vmatprep.subr.bf16.mxu0 %v16679_v18  ;;  %v16731_v18 = vld [vmem:[#allocation14 + $0x13c8] ss:$16 sps:$4 sm:$0xff]  }
 0x845   : > { %v11565_v24 = vpop.f32.mrb[30].mxu1  ;;  %v11602_v32 = vpop.f32.mrb[32].mxu0  ;;  %13447 = vmatpush1.bf16.msra.mxu1 %v16674_v16  ;;  %v16739_v16 = vld [vmem:[#allocation14 + $0x13ec] ss:$16 sps:$4 sm:$0xff]  }
 0x846   : > { %v19115_v45 = vadd.f32 %v11602_v32, %v11561_v55  ;;  %v11566_v49 = vpop.f32.mrb[31].mxu1  ;;  %v11604_v61 = vpop.f32.mrb[33].mxu0  ;;  %13448 = vmatprep.subr.bf16.mxu1 %v16682_v26  ;;  %v16734_v26 = vld [vmem:[#allocation14 + $0x11e8] ss:$16 sps:$4 sm:$0xff]   ;;  %v16742_v55 = vld [vmem:[#allocation14 + $0x140c] ss:$16 sps:$4 sm:$0xff]  }
 0x847   : > { %v19117_v58 = vadd.f32 %v11604_v61, %v11563_v7  ;;  %v11606_v5 = vpop.f32.mrb[34].mxu0  ;;  %13488 = vmatpush1.bf16.msra.mxu0 %v16677_v56  ;;  %v16737_v56 = vld [vmem:[#allocation14 + $0x13e8] ss:$16 sps:$4 sm:$0xff]   ;;  %v16745_v7 = vld [vmem:[#allocation14 + $0x160c] ss:$16 sps:$4 sm:$0xff]  }
 0x848   : > { %v11607_v15 = vpop.f32.mrb[35].mxu0  ;;  %13489 = vmatprep.subr.bf16.mxu0 %v16685_v8  ;;  %v16740_v8 = vld [vmem:[#allocation14 + $0x1408] ss:$16 sps:$4 sm:$0xff]   ;;  %v16748_v24 = vld [vmem:[#allocation14 + $0x142c] ss:$16 sps:$4 sm:$0xff]  }
 0x849   : > { %13449 = vmatpush1.bf16.msra.mxu1 %v16680_v52  ;;  %v16743_v32 = vld [vmem:[#allocation14 + $0x1608] ss:$16 sps:$4 sm:$0xff]   ;;  %v16751_v52 = vld [vmem:[#allocation14 + $0x162c] ss:$16 sps:$4 sm:$0xff]  }
 0x84a   : > { %13450 = vmatprep.subr.bf16.mxu1 %v16688_v46  ;;  %v16746_v49 = vld [vmem:[#allocation14 + $0x1428] ss:$16 sps:$4 sm:$0xff]   ;;  %v16754_v61 = vld [vmem:[#allocation14 + $0x144c] ss:$16 sps:$4 sm:$0xff]  }
 0x84b   : > { %13490 = vmatpush1.bf16.msra.mxu0 %v16683_v48  ;;  %v16749_v46 = vld [vmem:[#allocation14 + $0x1628] ss:$16 sps:$4 sm:$0xff]   ;;  %v16757_v5 = vld [vmem:[#allocation14 + $0x164c] ss:$16 sps:$4 sm:$0xff]  }
 0x84c   : > { %13491 = vmatprep.subr.bf16.mxu0 %v16691_v38  ;;  %v16752_v48 = vld [vmem:[#allocation14 + $0x1448] ss:$16 sps:$4 sm:$0xff]   ;;  %v16763_v38 = vld [vmem:[#allocation14 + $0x166c] ss:$16 sps:$4 sm:$0xff]  }
 0x84d   : > { %13451 = vmatpush1.bf16.msra.mxu1 %v16686_v6  ;;  %v16755_v15 = vld [vmem:[#allocation14 + $0x1648] ss:$16 sps:$4 sm:$0xff]  }
 0x84e   : > { %13452 = vmatprep.subr.bf16.mxu1 %v16694_v31  ;;  %v16761_v6 = vld [vmem:[#allocation14 + $0x1668] ss:$16 sps:$4 sm:$0xff]   ;;  %v16769_v31 = vld [vmem:[#allocation14 + $0x168c] ss:$16 sps:$4 sm:$0xff]  }
 0x84f   : > { %13492 = vmatpush1.bf16.msra.mxu0 %v16689_v39  ;;  %v16772_v39 = vld [vmem:[#allocation14 + $0x14ac] ss:$16 sps:$4 sm:$0xff]  }
 0x850   : > { %13493 = vmatprep.subr.bf16.mxu0 %v16697_v41  ;;  %v16767_v41 = vld [vmem:[#allocation14 + $0x1688] ss:$16 sps:$4 sm:$0xff]  }
 0x851   : > { %13453 = vmatpush1.bf16.msra.mxu1 %v16692_v2  ;;  %v16775_v2 = vld [vmem:[#allocation14 + $0x16ac] ss:$16 sps:$4 sm:$0xff]  }
 0x852   : > { %13454 = vmatprep.subr.bf16.mxu1 %v16700_v63  ;;  %v16770_v63 = vld [vmem:[#allocation14 + $0x14a8] ss:$16 sps:$4 sm:$0xff]  }
 0x853   : > { %13494 = vmatpush1.bf16.msra.mxu0 %v16695_v28  ;;  %v16778_v28 = vld [vmem:[#allocation14 + $0x14cc] ss:$16 sps:$4 sm:$0xff]  }
 0x854   : > { %13495 = vmatprep.subr.bf16.mxu0 %v16703_v47 }
 0x855   : > { %13455 = vmatpush1.bf16.msra.mxu1 %v16698_v33  ;;  %v16773_v33 = vld [vmem:[#allocation14 + $0x16a8] ss:$16 sps:$4 sm:$0xff]  }
 0x856   : > { %13456 = vmatprep.subr.bf16.mxu1 %v16706_v40 }
 0x857   : > { %13496 = vmatpush1.bf16.msra.mxu0 %v16701_v4 }
 0x858   : > { %13497 = vmatprep.subr.bf16.mxu0 %v16709_v37  ;;  %v16781_v37 = vld [vmem:[#allocation14 + $0x16cc] ss:$16 sps:$4 sm:$0xff]  }
 0x859   : > { %13457 = vmatpush1.bf16.msra.mxu1 %v16704_v60 }
 0x85a   : > { %13458 = vmatprep.subr.bf16.mxu1 %v16712_v53 }
 0x85b   : > { %13498 = vmatpush1.bf16.msra.mxu0 %v16707_v9 }
 0x85c   : > { %13499 = vmatprep.subr.bf16.mxu0 %v16715_v59  ;;  %v16776_v59 = vld [vmem:[#allocation14 + $0x14c8] ss:$16 sps:$4 sm:$0xff]  }
 0x85d   : > { %13459 = vmatpush1.bf16.msra.mxu1 %v16710_v21 }
 0x85e   : > { %13460 = vmatprep.subr.bf16.mxu1 %v16718_v13 }
 0x85f   : > { %13500 = vmatpush1.bf16.msra.mxu0 %v16713_v57 }
 0x860   : > { %13501 = vmatprep.subr.bf16.mxu0 %v16721_v10  ;;  %v16784_v10 = vld [vmem:[#allocation14 + $0x14ec] ss:$16 sps:$4 sm:$0xff]  }
 0x861   : > { %13461 = vmatpush1.bf16.msra.mxu1 %v16716_v20 }
 0x862   : > { %13462 = vmatprep.subr.bf16.mxu1 %v16724_v27 }
 0x863   : > { %13502 = vmatpush1.bf16.msra.mxu0 %v16719_v35  ;;  %v16779_v35 = vld [vmem:[#allocation14 + $0x16c8] ss:$16 sps:$4 sm:$0xff]  }
 0x864   : > { %13503 = vmatprep.subr.bf16.mxu0 %v16727_v34 }
 0x865   : > { %13463 = vmatpush1.bf16.msra.mxu1 %v16722_v42  ;;  %v16787_v42 = vld [vmem:[#allocation14 + $0x16ec] ss:$16 sps:$4 sm:$0xff]  }
 0x866   : > { %13464 = vmatprep.subr.bf16.mxu1 %v16730_v44  ;;  %v16782_v44 = vld [vmem:[#allocation14 + $0x14e8] ss:$16 sps:$4 sm:$0xff]  }
 0x867   : > { %13504 = vmatpush1.bf16.msra.mxu0 %v16725_v29  ;;  %v16790_v29 = vld [vmem:[#allocation14 + $0x150c] ss:$16 sps:$4 sm:$0xff]  }
 0x868   : > { %13505 = vmatprep.subr.bf16.mxu0 %v16733_v23  ;;  %v16785_v23 = vld [vmem:[#allocation14 + $0x16e8] ss:$16 sps:$4 sm:$0xff]  }
 0x869   : > { %13465 = vmatpush1.bf16.msra.mxu1 %v16728_v62  ;;  %v16793_v62 = vld [vmem:[#allocation14 + $0x170c] ss:$16 sps:$4 sm:$0xff]  }
 0x86a   : > { %13466 = vmatprep.subr.bf16.mxu1 %v16736_v19  ;;  %v16788_v19 = vld [vmem:[#allocation14 + $0x1508] ss:$16 sps:$4 sm:$0xff]  }
 0x86b   : > { %13506 = vmatpush1.bf16.msra.mxu0 %v16731_v18  ;;  %v16796_v18 = vld [vmem:[#allocation14 + $0x152c] ss:$16 sps:$4 sm:$0xff]  }
 0x86c   : > { %13507 = vmatprep.subr.bf16.mxu0 %v16739_v16  ;;  %v16799_v16 = vld [vmem:[#allocation14 + $0x172c] ss:$16 sps:$4 sm:$0xff]  }
 0x86d   : > { %13467 = vmatpush1.bf16.msra.mxu1 %v16734_v26  ;;  %v16794_v26 = vld [vmem:[#allocation14 + $0x1528] ss:$16 sps:$4 sm:$0xff]  }
 0x86e   : > { %13518 = vmatprep.subr.bf16.mxu1 %v16742_v55  ;;  %v16797_v55 = vld [vmem:[#allocation14 + $0x1728] ss:$16 sps:$4 sm:$0xff]  }
 0x86f   : > { %13508 = vmatpush1.bf16.msra.mxu0 %v16737_v56  ;;  %v16805_v56 = vld [vmem:[#allocation14 + $0x174c] ss:$16 sps:$4 sm:$0xff]  }
 0x870   : > { %13469 = vmatmul.mubr.bf16.vlgmr.msra.gmra.mrb[44].mxu1 %v19080_v54  ;;  %13559 = vmatprep.subr.bf16.mxu0 %v16745_v7  ;;  %v16760_v54 = vld [vmem:[#allocation14 + $0x146c] ss:$16 sps:$4 sm:$0xff]   ;;  %v16800_v7 = vld [vmem:[#allocation14 + $0x1548] ss:$16 sps:$4 sm:$0xff]  }
 0x871   : > { %13519 = vmatpush1.bf16.msra.mxu1 %v16740_v8  ;;  %13550 = vmatprep.mubr.bf16.mxu1 %v19083_v36  ;;  %v16758_v36 = vld [vmem:[#allocation14 + $0x1468] ss:$16 sps:$4 sm:$0xff]   ;;  %v16808_v8 = vld [vmem:[#allocation14 + $0x156c] ss:$16 sps:$4 sm:$0xff]  }
 0x872   : > { %13510 = vmatmul.mubr.bf16.vlgmr.msra.gmra.mrb[48].mxu0 %v19085_v51  ;;  %13520 = vmatprep.subr.bf16.mxu1 %v16748_v24  ;;  %v16766_v51 = vld [vmem:[#allocation14 + $0x148c] ss:$16 sps:$4 sm:$0xff]   ;;  %v16803_v24 = vld [vmem:[#allocation14 + $0x1748] ss:$16 sps:$4 sm:$0xff]  }
 0x873   : > { %13560 = vmatpush1.bf16.msra.mxu0 %v16743_v32  ;;  %13591 = vmatprep.mubr.bf16.mxu0 %v19087_v22  ;;  %v16764_v22 = vld [vmem:[#allocation14 + $0x1488] ss:$16 sps:$4 sm:$0xff]   ;;  %v16811_v32 = vld [vmem:[#allocation14 + $0x176c] ss:$16 sps:$4 sm:$0xff]  }
 0x874   : > { %13561 = vmatprep.subr.bf16.mxu0 %v16751_v52  ;;  %v16806_v52 = vld [vmem:[#allocation14 + $0x1568] ss:$16 sps:$4 sm:$0xff]  }
 0x875   : > { %13521 = vmatpush1.bf16.msra.mxu1 %v16746_v49  ;;  %v16814_v49 = vld [vmem:[#allocation14 + $0x158c] ss:$16 sps:$4 sm:$0xff]  }
 0x876   : > { %13522 = vmatprep.subr.bf16.mxu1 %v16754_v61  ;;  %v16809_v61 = vld [vmem:[#allocation14 + $0x1768] ss:$16 sps:$4 sm:$0xff]  }
 0x877   : > { %13562 = vmatpush1.bf16.msra.mxu0 %v16749_v46  ;;  %v16817_v46 = vld [vmem:[#allocation14 + $0x178c] ss:$16 sps:$4 sm:$0xff]  }
 0x878   : > { %13563 = vmatprep.subr.bf16.mxu0 %v16757_v5  ;;  %v16812_v5 = vld [vmem:[#allocation14 + $0x1588] ss:$16 sps:$4 sm:$0xff]  }
 0x879   : > { %13523 = vmatpush1.bf16.msra.mxu1 %v16752_v48  ;;  %v16820_v48 = vld [vmem:[#allocation14 + $0x15ac] ss:$16 sps:$4 sm:$0xff]  }
 0x87a   : > { %13524 = vmatprep.subr.bf16.mxu1 %v16760_v54  ;;  %v16815_v54 = vld [vmem:[#allocation14 + $0x1788] ss:$16 sps:$4 sm:$0xff]  }
 0x87b   : > { %13564 = vmatpush1.bf16.msra.mxu0 %v16755_v15  ;;  %v16823_v15 = vld [vmem:[#allocation14 + $0x17ac] ss:$16 sps:$4 sm:$0xff]  }
 0x87c   : > { %13565 = vmatprep.subr.bf16.mxu0 %v16763_v38  ;;  %v16818_v38 = vld [vmem:[#allocation14 + $0x15a8] ss:$16 sps:$4 sm:$0xff]  }
 0x87d   : > { %13525 = vmatpush1.bf16.msra.mxu1 %v16758_v36  ;;  %v16826_v36 = vld [vmem:[#allocation14 + $0x15cc] ss:$16 sps:$4 sm:$0xff]  }
 0x87e   : > { %13526 = vmatprep.subr.bf16.mxu1 %v16766_v51  ;;  %v16821_v51 = vld [vmem:[#allocation14 + $0x17a8] ss:$16 sps:$4 sm:$0xff]  }
 0x87f   : > { %13566 = vmatpush1.bf16.msra.mxu0 %v16761_v6  ;;  %v16829_v6 = vld [vmem:[#allocation14 + $0x17cc] ss:$16 sps:$4 sm:$0xff]  }
 0x880   : > { %13567 = vmatprep.subr.bf16.mxu0 %v16769_v31  ;;  %v16824_v31 = vld [vmem:[#allocation14 + $0x15c8] ss:$16 sps:$4 sm:$0xff]  }
 0x881   : > { %13527 = vmatpush1.bf16.msra.mxu1 %v16764_v22  ;;  %v16832_v22 = vld [vmem:[#allocation14 + $0x15ec] ss:$16 sps:$4 sm:$0xff]  }
 0x882   : > { %13528 = vmatprep.subr.bf16.mxu1 %v16772_v39  ;;  %v16827_v39 = vld [vmem:[#allocation14 + $0x17c8] ss:$16 sps:$4 sm:$0xff]  }
 0x883   : > { %v11643_v47 = vpop.f32.mrb[32].mxu1  ;;  %13568 = vmatpush1.bf16.msra.mxu0 %v16767_v41  ;;  %v16835_v41 = vld [vmem:[#allocation14 + $0x17ec] ss:$16 sps:$4 sm:$0xff]  }
 0x884   : > { %v11644_v40 = vadd.f32 %v11643_v47, %v19115_v45  ;;  %v11645_v4 = vpop.f32.mrb[33].mxu1  ;;  %13569 = vmatprep.subr.bf16.mxu0 %v16775_v2  ;;  %v16830_v2 = vld [vmem:[#allocation14 + $0x15e8] ss:$16 sps:$4 sm:$0xff]  }
 0x885   : > { %v11646_v60 = vadd.f32 %v11645_v4, %v19117_v58  ;;  %v11647_v53 = vpop.f32.mrb[34].mxu1  ;;  %v11684_v9 = vpop.f32.mrb[36].mxu0  ;;  %13529 = vmatpush1.bf16.msra.mxu1 %v16770_v63  ;;  %v16833_v63 = vld [vmem:[#allocation14 + $0x17e8] ss:$16 sps:$4 sm:$0xff]  }
 0x886   : > { %v11685_v21 = vadd.f32 %v11684_v9, %v11644_v40  ;;  %v11648_v13 = vpop.f32.mrb[35].mxu1  ;;  %v11686_v57 = vpop.f32.mrb[37].mxu0  ;;  %13530 = vmatprep.subr.bf16.mxu1 %v16778_v28 }
 0x887   : > { %v11687_v20 = vadd.f32 %v11686_v57, %v11646_v60  ;;  %v11688_v27 = vpop.f32.mrb[38].mxu0  ;;  %13570 = vmatpush1.bf16.msra.mxu0 %v16773_v33 }
 0x888   : > { %v19126_v45 = vadd.f32 %v11685_v21, %v19046_v0  ;;  %v11689_v34 = vpop.f32.mrb[39].mxu0  ;;  %13571 = vmatprep.subr.bf16.mxu0 %v16781_v37  ;;  %v16791_v0 = vld [vmem:[#allocation14 + $0x1708] ss:$16 sps:$4 sm:$0xff]   ;;  %v17264_v21 = vmov 1983009808  }
 0x889   : > { %v19129_v58 = vadd.f32 %v11687_v20, %v19049_v1  ;;  %13531 = vmatpush1.bf16.msra.mxu1 %v16776_v59  ;;  %v16802_v1 = vld [vmem:[#allocation14 + $0x154c] ss:$16 sps:$4 sm:$0xff]   ;;  %v13638_v13 = vunpack.c.l.s4 %v17264_v21  ;;  %v13604_v20 = vld [vmem:[#allocation17] sm:$0xf] }
 0x88a   : > { %13532 = vmatprep.subr.bf16.mxu1 %v16784_v10 }
 0x88b   : > { %13572 = vmatpush1.bf16.msra.mxu0 %v16779_v35  ;;  %v13639_v57 = vunpack.c.0.s8 %v13638_v13  ;;  %v13634_v35 = vld [vmem:[#allocation18] sm:$0xff] }
 0x88c   : > { %13573 = vmatprep.subr.bf16.mxu0 %v16787_v42 }
 0x88d   : > { %13533 = vmatpush1.bf16.msra.mxu1 %v16782_v44  ;;  %v19134_v27 = vsub.s32 %v13639_v57, %v18590_v3 }
 0x88e   : > { %13534 = vmatprep.subr.bf16.mxu1 %v16790_v29 }
 0x88f   : > { %13574 = vmatpush1.bf16.msra.mxu0 %v16785_v23  ;;  %v13609_v23 = vrot.slane %v13604_v20, %v6206_v12 }
 0x890   : > { %13575 = vmatprep.subr.bf16.mxu0 %v16793_v62 }
 0x891   : > { %13535 = vmatpush1.bf16.msra.mxu1 %v16788_v19 }
 0x892   : > { %13536 = vmatprep.subr.bf16.mxu1 %v16796_v18  ;;  %v13643_v18 = vrot.slane %v13634_v35, %v19134_v27 }
 0x893   : > { %13576 = vmatpush1.bf16.msra.mxu0 %v16791_v0 }
 0x894   : > { %13577 = vmatprep.subr.bf16.mxu0 %v16799_v16  ;;  %v13613_v16 = vrot.slane %v13604_v20, %v6210_v25 }
 0x895   : > { %13537 = vmatpush1.bf16.msra.mxu1 %v16794_v26 }
 0x896   : > { %13538 = vmatprep.subr.bf16.mxu1 %v16802_v1 }
 0x897   : > { %13578 = vmatpush1.bf16.msra.mxu0 %v16797_v55 }
 0x898   : > { %13579 = vmatprep.subr.bf16.mxu0 %v16805_v56 }
 0x899   : > { %13539 = vmatpush1.bf16.msra.mxu1 %v16800_v7 }
 0x89a   : > { %13540 = vmatprep.subr.bf16.mxu1 %v16808_v8 }
 0x89b   : > { %13580 = vmatpush1.bf16.msra.mxu0 %v16803_v24  ;;  %v13651_v24 = vcombine.high %v13643_v18, %v13643_v18 }
 0x89c   : > { %13581 = vmatprep.subr.bf16.mxu0 %v16811_v32 }
 0x89d   : > { %13541 = vmatpush1.bf16.msra.mxu1 %v16806_v52 }
 0x89e   : > { %13542 = vmatprep.subr.bf16.mxu1 %v16814_v49 }
 0x89f   : > { %13582 = vmatpush1.bf16.msra.mxu0 %v16809_v61 }
 0x8a0   : > { %13583 = vmatprep.subr.bf16.mxu0 %v16817_v46 }
 0x8a1   : > { %13543 = vmatpush1.bf16.msra.mxu1 %v16812_v5 }
 0x8a2   : > { %13544 = vmatprep.subr.bf16.mxu1 %v16820_v48 }
 0x8a3   : > { %13584 = vmatpush1.bf16.msra.mxu0 %v16815_v54 }
 0x8a4   : > { %13585 = vmatprep.subr.bf16.mxu0 %v16823_v15 }
 0x8a5   : > { %13545 = vmatpush1.bf16.msra.mxu1 %v16818_v38 }
 0x8a6   : > { %13546 = vmatprep.subr.bf16.mxu1 %v16826_v36 }
 0x8a7   : > { %13586 = vmatpush1.bf16.msra.mxu0 %v16821_v51 }
 0x8a8   : > { %13587 = vmatprep.subr.bf16.mxu0 %v16829_v6 }
 0x8a9   : > { %13547 = vmatpush1.bf16.msra.mxu1 %v16824_v31 }
 0x8aa   : > { %13548 = vmatprep.subr.bf16.mxu1 %v16832_v22 }
 0x8ab   : > { %13588 = vmatpush1.bf16.msra.mxu0 %v16827_v39 }
 0x8ac   : > { %13589 = vmatprep.subr.bf16.mxu0 %v16835_v41 }
 0x8ad   : > { %13549 = vmatpush1.bf16.msra.mxu1 %v16830_v2 }
 0x8af   : > { %13590 = vmatpush1.bf16.msra.mxu0 %v16833_v63 }
 0x8b0   : > { %13551 = vmatmul.mubr.bf16.vlgmr.msra.gmra.mrb[48].mxu1 %v19107_v50 }
 0x8b2   : > { %13592 = vmatmul.mubr.bf16.vlgmr.msra.gmra.mrb[52].mxu0 %v19109_v43 }
 0x8c3   : > { %v13306_v28 = vpop.f32.mrb[36].mxu1 }
 0x8c4   : > { %v13308_v47 = vpop.f32.mrb[37].mxu1 }
 0x8c5   : > { %v13310_v33 = vpop.f32.mrb[38].mxu1  ;;  %v13347_v40 = vpop.f32.mrb[40].mxu0 }
 0x8c6   : > { %v13348_v4 = vadd.f32 %v13347_v40, %v13306_v28  ;;  %v13311_v37 = vpop.f32.mrb[39].mxu1  ;;  %v13349_v60 = vpop.f32.mrb[41].mxu0  ;;  %v13617_v28 = vrot.slane %v13604_v20, %v6214_v14 }
 0x8c7   : > { %v13350_v53 = vadd.f32 %v13349_v60, %v13308_v47  ;;  %v13351_v9 = vpop.f32.mrb[42].mxu0  ;;  %v13621_v37 = vrot.slane %v13604_v20, %v6218_v17 }
 0x8c8   : > { %v13352_v59 = vpop.f32.mrb[43].mxu0 }
 0x903   : > { %v13388_v10 = vpop.f32.mrb[40].mxu1 }
 0x904   : > { %v13389_v50 = vadd.f32 %v13388_v10, %v13348_v4  ;;  %v13390_v43 = vpop.f32.mrb[41].mxu1 }
 0x905   : > { %v13391_v34 = vadd.f32 %v13390_v43, %v13350_v53  ;;  %v13392_v42 = vpop.f32.mrb[42].mxu1  ;;  %v13429_v44 = vpop.f32.mrb[44].mxu0 }
 0x906   : > { %v13430_v29 = vadd.f32 %v13429_v44, %v13389_v50  ;;  %v13393_v62 = vpop.f32.mrb[43].mxu1  ;;  %v13431_v19 = vpop.f32.mrb[45].mxu0 }
 0x907   : > { %v13432_v0 = vadd.f32 %v13431_v19, %v13391_v34  ;;  %v13433_v26 = vpop.f32.mrb[46].mxu0 }
 0x908   : > { %v13600_v1 = vadd.f32 %v13430_v29, %v19096_v30  ;;  %v13434_v55 = vpop.f32.mrb[47].mxu0 }
 0x909   : > { %v13601_v56 = vadd.f32 %v13432_v0, %v19099_v11  ;;  %v13636_v11 = vcombine.high %v13634_v35, %v13634_v35 }
 0x90a   : > { %v13626_v7 = vadd.f32 %v13609_v23, %v13600_v1 }
 0x90b   : > { %v13627_v8 = vadd.f32 %v13613_v16, %v13601_v56  ;;  %v13650_v40 = vrot.slane %v13636_v11, %v19134_v27 }
 0x90c   : > { %v13630_v32 = vmax.f32 %v13626_v7, 0.0 }
 0x90d   : > { %v13631_v52 = vmax.f32 %v13627_v8, 0.0  ;;  %v13652_v57 = vcombine.high %v13650_v40, %v13650_v40 }
 0x90e   : > { %v13657_v12 = vadd.f32 %v13643_v18, %v13630_v32 }
 0x90f   : > { %v13658_v49 = vadd.f32 %v13651_v24, %v13631_v52 }
 0x911   : > { %v13665_v61 = vcombine.low %v13657_v12, %v13658_v49 }
 0x913   : > { %v13673_v34 = vrot.slane %v13665_v61, %v19134_v27 }
 0x943   : > { %v13470_v46 = vpop.f32.mrb[44].mxu1 }
 0x944   : > { %v13472_v5 = vpop.f32.mrb[45].mxu1 }
 0x945   : > { %v13474_v48 = vpop.f32.mrb[46].mxu1  ;;  %v13511_v54 = vpop.f32.mrb[48].mxu0 }
 0x946   : > { %v13512_v15 = vadd.f32 %v13511_v54, %v13470_v46  ;;  %v13475_v25 = vpop.f32.mrb[47].mxu1  ;;  %v13513_v38 = vpop.f32.mrb[49].mxu0 }
 0x947   : > { %v13514_v36 = vadd.f32 %v13513_v38, %v13472_v5  ;;  %v13515_v30 = vpop.f32.mrb[50].mxu0 }
 0x948   : > { %v13516_v51 = vpop.f32.mrb[51].mxu0 }
 0x983   : > { %v13552_v6 = vpop.f32.mrb[48].mxu1 }
 0x984   : > { %v13553_v31 = vadd.f32 %v13552_v6, %v13512_v15  ;;  %v13554_v22 = vpop.f32.mrb[49].mxu1 }
 0x985   : > { %v13555_v39 = vadd.f32 %v13554_v22, %v13514_v36  ;;  %v13556_v41 = vpop.f32.mrb[50].mxu1  ;;  %v13593_v2 = vpop.f32.mrb[52].mxu0 }
 0x986   : > { %v13594_v63 = vadd.f32 %v13593_v2, %v13553_v31  ;;  %v13557_v47 = vpop.f32.mrb[51].mxu1  ;;  %v13595_v33 = vpop.f32.mrb[53].mxu0 }
 0x987   : > { %v13596_v4 = vadd.f32 %v13595_v33, %v13555_v39  ;;  %v13597_v60 = vpop.f32.mrb[54].mxu0 }
 0x988   : > { %v13602_v53 = vadd.f32 %v13594_v63, %v19126_v45  ;;  %v13598_v9 = vpop.f32.mrb[55].mxu0 }
 0x989   : > { %v13603_v59 = vadd.f32 %v13596_v4, %v19129_v58 }
 0x98a   : > { %v13628_v21 = vadd.f32 %v13617_v28, %v13602_v53 }
 0x98b   : > { %v13629_v13 = vadd.f32 %v13621_v37, %v13603_v59 }
 0x98c   : > { %v13632_v10 = vmax.f32 %v13628_v21, 0.0 }
 0x98d   : > { %v13633_v50 = vmax.f32 %v13629_v13, 0.0 }
 0x98e   : > { %v13659_v14 = vadd.f32 %v13650_v40, %v13632_v10 }
 0x98f   : > { %v13660_v43 = vadd.f32 %v13652_v57, %v13633_v50 }
 0x991   : > { %v13666_v35 = vcombine.low %v13659_v14, %v13660_v43 }
 0x993   : > { %v13680_v42 = vrot.slane %v13666_v35, %v19134_v27 }
 0x995   : > { %v13681_v3 = vcombine.low %v13673_v34, %v13680_v42 }
 0x997   : > { %13683 = vst [vmem:[#allocation20] sm:$0xff] %v13681_v3 }
 0x998 PF: > { %p15567_p10 = scmp.eq.s32.totalorder %s17342_s19, 2  ;;  %s17265_s20 = smov [#allocation20]  }
 0x999   : > { %s13691_s22 = sshll.u32 %s17265_s20, 4  ;;  %s13692_s22 = int_to_ptr.vmem [resolvable:$true] %s13691_s22 }
 0x99a   : > { %s17153_s27 = scalar_lea.vmem %s13692_s22, 128  ;;  %p17160_p12 = scmp.lt.s32.totalorder %s13692_s22, %s13692_s22 }
 0x99b   : > { %p17154_p13 = scmp.ne.s32.totalorder %s13692_s22, %s17153_s27  ;;  %p17161_p0 = scmp.lt.s32.totalorder %s17153_s27, %s17153_s27 }
 0x99d   : > { %p17155_p6 = pnand %p17154_p13, %p15567_p10  ;;  %p17162_p5 = por %p17161_p0, %p17160_p12 }
 0x99f   : > { %p17156_p3 = pneg %p17155_p6 }
 0x9a1   : > { %p17163_p8 = pnand %p17162_p5, %p17156_p3 }
 0x9a3   : > { %17166 = shalt.err (!%p17163_p8)
}
 0x9a4   : > { %s17167_s17 = scalar_lea.hbm %s19198_s10, 128 }
 0x9a5   : > { %p17168_p11 = scmp.ne.s32.totalorder %s19198_s10, %s17167_s17  ;;  %p17173_p9 = scmp.lt.u32.totalorder %s17167_s17, %s19198_s10 }
 0x9a7   : > { %p17169_p7 = pnand %p17168_p11, %p15567_p10 }
 0x9a9   : > { %p17170_p2 = pneg %p17169_p7 }
 0x9ab   : > { %p17175_p1 = pnand %p17173_p9, %p17170_p2 }
 0x9ad   : > { %17178 = shalt.err (!%p17175_p1)
}
 0x9ae   : > { %15515 = dma.vmem_to_hbm [thread:$0]  (%p15567_p10), %s13692_s22, 128, %s19198_s10, [#allocation5]  }
 0x9af   : > { %17224 = dma.done.wait (%p15567_p10), [#allocation5], 128  }
 0x9b0   : > { %17226 = vsyncadd (%p15567_p10), [#allocation5], 4294967168 }
 0x9b1 PF: > { %p28_p4 = scmp.ge.s32.totalorder %s17533_s11, 5   ;;  %s19231_s13 = smov %s17233_s14 }
 0x9b2   : > { %s19232_s14 = smov %s17237_s15  ;;  %s19233_s15 = smov %s17545_s24 }
 0x9b3   : > { %s19234_s16 = smov %s17533_s11  ;;  %30 = sbr.rel (!%p28_p4) target bundleno = 15 (0xf), region = 152 }
 0x9ba   :  { %13704 = vsyncpa [#allocation4], 1 }
 0x9bb   :  { %13706 = vsyncpa [#allocation4 + $0x1], 1 }
 0x9bc   :  { %13707 = vsyncpa [#allocation7], 1 }
 0x9bd   :  { %13709 = vsyncpa [#allocation7 + $0x1], 1 }
 0x9be   :  { %13710 = vsyncpa [#allocation10], 1 }
 0x9bf   :  { %13711 = vsyncpa [#allocation13], 1 }
 0x9c0   :  { %13712 = vsyncpa [#allocation16], 1 }
 0x9c1   :  { %13713 = vsyncpa [#allocation19], 1 }
 0x9c2   :  { %13714 = vsyncpa [#allocation5], 1 }
 0x9c3   :  { %13716 = vsyncpa [#allocation5 + $0x1], 1 }

</bundles_post_ra>
